<compile_context>
chip_gen: v7x
topology: tpu7x:2x2x1
jax: 0.10.0
libtpu: 0.0.40
codegen_flags: <defaults>
</compile_context>

<pallas_src>
import functools
import math

import jax
import jax.numpy as jnp
from jax.experimental import pallas as pl
from jax.experimental.pallas import tpu as pltpu

_VMEM = pl.BlockSpec(memory_space=pltpu.MemorySpace.VMEM)


def _round_up(x, m):
    return ((x + m - 1) // m) * m


# ----------------------------------------------------------------------------
# Pallas kernels
# ----------------------------------------------------------------------------
def _mm_affine_kernel(relu, has_res, a_ref, b_ref, bias_ref, *rest):
    """Tiled matmul with fp32 accumulator.

    out = dot(A, B) + bias [+ residual] [relu]; BN scale is pre-folded into B.
    Grid = (M tiles, N tiles, K tiles); K is last and "arbitrary".
    """
    if has_res:
        res_ref, o_ref, acc_ref = rest
    else:
        o_ref, acc_ref = rest
        res_ref = None

    kk = pl.program_id(2)

    @pl.when(kk == 0)
    def _init():
        acc_ref[...] = jnp.zeros_like(acc_ref)

    acc_ref[...] += jnp.dot(a_ref[...], b_ref[...],
                            preferred_element_type=jnp.float32)

    @pl.when(kk == pl.num_programs(2) - 1)
    def _finalize():
        acc = acc_ref[...] + bias_ref[...]
        if has_res:
            acc = acc + res_ref[...].astype(jnp.float32)
        if relu:
            acc = jnp.maximum(acc, 0.0)
        o_ref[...] = acc.astype(o_ref.dtype)


def _bn_relu_kernel(x_ref, s_ref, b_ref, bn_ref, relu_ref):
    """Fused BN-affine + ReLU producing both intermediates in one pass."""
    xf = x_ref[...].astype(jnp.float32)
    y = xf * s_ref[...] + b_ref[...]
    bn_ref[...] = y.astype(bn_ref.dtype)
    relu_ref[...] = jnp.maximum(y, 0.0).astype(relu_ref.dtype)


def _maxpool_kernel(pee_ref, peo_ref, poe_ref, poo_ref, o_ref):
    """3x3 / stride-2 / pad-1 max pool from 4 parity-phase arrays.

    Each phase array is the (-inf)-padded sub-grid x[:, r::2, c::2, :]; the
    9 window taps become unit-stride slices of these phases.
    """
    ho, wo = o_ref.shape[1], o_ref.shape[2]
    ee, eo, oe, oo = pee_ref[...], peo_ref[...], poe_ref[...], poo_ref[...]

    def sl(a, r0, c0):
        return a[:, r0:r0 + ho, c0:c0 + wo, :]

    m = sl(oo, 0, 0)                       # (row -1, col -1)
    m = jnp.maximum(m, sl(oe, 0, 1))       # (row -1, col  0)
    m = jnp.maximum(m, sl(oo, 0, 1))       # (row -1, col +1)
    m = jnp.maximum(m, sl(eo, 1, 0))       # (row  0, col -1)
    m = jnp.maximum(m, sl(ee, 1, 1))       # (row  0, col  0)
    m = jnp.maximum(m, sl(eo, 1, 1))       # (row  0, col +1)
    m = jnp.maximum(m, sl(oo, 1, 0))       # (row +1, col -1)
    m = jnp.maximum(m, sl(oe, 1, 1))       # (row +1, col  0)
    m = jnp.maximum(m, sl(oo, 1, 1))       # (row +1, col +1)
    o_ref[...] = m.astype(o_ref.dtype)


def _avgpool_fc_kernel(x_ref, w_ref, b_ref, pool_ref, logit_ref):
    """Fused global average pool + flatten + fully-connected layer."""
    x = x_ref[...].astype(jnp.float32)            # [N, H*W, C]
    pooled = jnp.mean(x, axis=1)                  # [N, C]
    pool_ref[...] = pooled.astype(pool_ref.dtype)
    logits = jnp.dot(pooled, w_ref[...],
                     preferred_element_type=jnp.float32) + b_ref[...]
    logit_ref[...] = logits.astype(logit_ref.dtype)


# ----------------------------------------------------------------------------
# Pallas-call wrappers
# ----------------------------------------------------------------------------
def matmul_affine(a, b, bias, residual=None, relu=False, out_dtype=jnp.bfloat16):
    """Tiled bf16 matmul (fp32 accumulate) + bias (+ residual) (+ ReLU)."""
    m, k = a.shape
    _, n = b.shape

    # Tile sizes: M up to 256, N up to 128 (full Cout here), K up to 256.
    tm = 256 if m >= 256 else _round_up(m, 8)
    tk = _round_up(k, 8) if k <= 256 else 256
    tn = n if n <= 128 else 128

    m_pad = _round_up(m, tm)
    k_pad = _round_up(k, tk)
    n_pad = _round_up(n, tn)

    a = a.astype(jnp.bfloat16)
    b = b.astype(jnp.bfloat16)
    if (m_pad, k_pad) != (m, k):
        a = jnp.pad(a, ((0, m_pad - m), (0, k_pad - k)))
    if (k_pad, n_pad) != (k, n):
        b = jnp.pad(b, ((0, k_pad - k), (0, n_pad - n)))
    bias2 = jnp.pad(bias.astype(jnp.float32), (0, n_pad - n)).reshape(1, n_pad)

    args = [a, b, bias2]
    in_specs = [
        pl.BlockSpec((tm, tk), lambda i, j, kk: (i, kk)),
        pl.BlockSpec((tk, tn), lambda i, j, kk: (kk, j)),
        pl.BlockSpec((1, tn), lambda i, j, kk: (0, j)),
    ]
    if residual is not None:
        r = residual.astype(jnp.bfloat16)
        r = jnp.pad(r, ((0, m_pad - m), (0, n_pad - n)))
        args.append(r)
        in_specs.append(pl.BlockSpec((tm, tn), lambda i, j, kk: (i, j)))

    grid = (m_pad // tm, n_pad // tn, k_pad // tk)
    kernel = functools.partial(_mm_affine_kernel, relu, residual is not None)

    out = pl.pallas_call(
        kernel,
        out_shape=jax.ShapeDtypeStruct((m_pad, n_pad), out_dtype),
        grid_spec=pltpu.PrefetchScalarGridSpec(
            num_scalar_prefetch=0,
            grid=grid,
            in_specs=in_specs,
            out_specs=pl.BlockSpec((tm, tn), lambda i, j, kk: (i, j)),
            scratch_shapes=[pltpu.VMEM((tm, tn), jnp.float32)],
        ),
        compiler_params=pltpu.CompilerParams(
            dimension_semantics=("parallel", "parallel", "arbitrary"),
            vmem_limit_bytes=32 * 1024 * 1024,
        ),
    )(*args)

    if (m_pad, n_pad) != (m, n):
        out = out[:m, :n]
    return out


def _im2col_nhwc(x, kh, kw, stride, pad):
    """NHWC -> rows [N*Ho*Wo, kh*kw*C]; column order (i, j, c)."""
    n, h, w, c = x.shape
    ho = (h + 2 * pad - kh) // stride + 1
    wo = (w + 2 * pad - kw) // stride + 1
    xp = jnp.pad(x, ((0, 0), (pad, pad), (pad, pad), (0, 0))) if pad else x
    cols = []
    for i in range(kh):
        for j in range(kw):
            cols.append(xp[:, i:i + stride * ho:stride, j:j + stride * wo:stride, :])
    col = jnp.concatenate(cols, axis=-1)                  # [N, Ho, Wo, kh*kw*C]
    return col.reshape(n * ho * wo, kh * kw * c), ho, wo


def conv2d_bn(x, w_kc, scale, shift, kh, kw, stride, pad, relu=False, residual=None):
    """NHWC conv + folded eval-mode BN (+ residual, + ReLU) as a tiled matmul.

    w_kc: weight already in im2col layout [kh*kw*Cin, Cout] (float32).
    """
    n = x.shape[0]
    cout = w_kc.shape[1]
    a, ho, wo = _im2col_nhwc(x, kh, kw, stride, pad)
    b = (w_kc * scale[None, :]).astype(jnp.bfloat16)      # fold BN scale into weights
    res = None
    if residual is not None:
        res = residual.reshape(n * ho * wo, cout)
    out = matmul_affine(a, b, shift, residual=res, relu=relu,
                        out_dtype=jnp.bfloat16)
    return out.reshape(n, ho, wo, cout)


def bn_relu_stem(x, scale, shift):
    """Fused bn1 + relu on the stem; lane-dense [N*H, W*C] layout."""
    n, h, w, c = x.shape
    x2 = x.reshape(n * h, w * c)
    s2 = jnp.tile(scale.astype(jnp.float32), w).reshape(1, w * c)
    b2 = jnp.tile(shift.astype(jnp.float32), w).reshape(1, w * c)
    bn2, relu2 = pl.pallas_call(
        _bn_relu_kernel,
        out_shape=(jax.ShapeDtypeStruct(x2.shape, jnp.bfloat16),
                   jax.ShapeDtypeStruct(x2.shape, jnp.bfloat16)),
        in_specs=[_VMEM, _VMEM, _VMEM],
        out_specs=(_VMEM, _VMEM),
    )(x2, s2, b2)
    return bn2.reshape(n, h, w, c), relu2.reshape(n, h, w, c)


def maxpool_3x3_s2(x):
    """3x3 / stride 2 / pad 1 max pool on NHWC input with even H, W."""
    n, h, w, c = x.shape
    assert h % 2 == 0 and w % 2 == 0
    ho, wo = h // 2, w // 2
    neg = float(jnp.finfo(x.dtype).min)
    pee = x[:, 0::2, 0::2, :]
    peo = x[:, 0::2, 1::2, :]
    poe = x[:, 1::2, 0::2, :]
    poo = x[:, 1::2, 1::2, :]
    pad1 = lambda t: jnp.pad(t, ((0, 0), (1, 0), (1, 0), (0, 0)),
                             constant_values=neg)
    pee, peo, poe, poo = pad1(pee), pad1(peo), pad1(poe), pad1(poo)
    return pl.pallas_call(
        _maxpool_kernel,
        out_shape=jax.ShapeDtypeStruct((n, ho, wo, c), x.dtype),
        in_specs=[_VMEM] * 4,
        out_specs=_VMEM,
    )(pee, peo, poe, poo)


def avgpool_fc(x, fc_w, fc_b):
    """Fused global avgpool + flatten + fc.  x: NHWC, fc_w: [classes, C]."""
    n, h, w, c = x.shape
    ncls = fc_w.shape[0]
    x3 = x.reshape(n, h * w, c)
    wt = fc_w.T.astype(jnp.float32)
    b2 = fc_b.astype(jnp.float32).reshape(1, ncls)
    pooled, logits = pl.pallas_call(
        _avgpool_fc_kernel,
        out_shape=(jax.ShapeDtypeStruct((n, c), jnp.float32),
                   jax.ShapeDtypeStruct((n, ncls), jnp.float32)),
        in_specs=[_VMEM, _VMEM, _VMEM],
        out_specs=(_VMEM, _VMEM),
    )(x3, wt, b2)
    return pooled, logits


# ----------------------------------------------------------------------------
# Parameter initialization (deterministic, synthetic; eval-mode BN folded)
# ----------------------------------------------------------------------------
def _conv_init(key, cout, cin, k):
    w = jax.random.normal(key, (cout, cin, k, k), jnp.float32) / math.sqrt(cin * k * k)
    # reorder to im2col layout [kh*kw*cin, cout]; row index = (i*kw + j)*cin + c
    return w.transpose(2, 3, 1, 0).reshape(k * k * cin, cout)


def _bn_init(key, c, eps=1e-5):
    k1, k2, k3, k4 = jax.random.split(key, 4)
    gamma = 1.0 + 0.1 * jax.random.normal(k1, (c,), jnp.float32)
    beta = 0.1 * jax.random.normal(k2, (c,), jnp.float32)
    mean = 0.1 * jax.random.normal(k3, (c,), jnp.float32)
    var = jax.random.uniform(k4, (c,), jnp.float32, 0.5, 1.5)
    scale = gamma * jax.lax.rsqrt(var + eps)
    shift = beta - mean * scale
    return scale, shift


def make_resnet_params(key, in_ch=3, base=8, num_classes=10, layers=(2, 2, 2, 2)):
    keys = iter(jax.random.split(key, 256))
    nk = lambda: next(keys)
    params = {
        "conv1_w": _conv_init(nk(), base, in_ch, 7),
        "bn1": _bn_init(nk(), base),
        "layers": [],
    }
    widths = [base, base * 2, base * 4, base * 8]
    in_c = base
    for li, (width, nblk) in enumerate(zip(widths, layers)):
        blocks = []
        for bi in range(nblk):
            stride = 2 if (li > 0 and bi == 0) else 1
            blk = {
                "stride": stride,
                "conv1_w": _conv_init(nk(), width, in_c, 3),
                "bn1": _bn_init(nk(), width),
                "conv2_w": _conv_init(nk(), width, width, 3),
                "bn2": _bn_init(nk(), width),
            }
            if stride != 1 or in_c != width:
                blk["down_w"] = _conv_init(nk(), width, in_c, 1)
                blk["down_bn"] = _bn_init(nk(), width)
            blocks.append(blk)
            in_c = width
        params["layers"].append(blocks)
    params["fc_w"] = jax.random.normal(nk(), (num_classes, widths[-1]),
                                       jnp.float32) / math.sqrt(widths[-1])
    params["fc_b"] = 0.01 * jax.random.normal(nk(), (num_classes,), jnp.float32)
    return params


# ----------------------------------------------------------------------------
# Forward pass (mirrors BarlowResNet.forward — returns every intermediate)
# ----------------------------------------------------------------------------
def basic_block(x, p):
    out = conv2d_bn(x, p["conv1_w"], *p["bn1"], 3, 3,
                    stride=p["stride"], pad=1, relu=True)
    if "down_w" in p:
        identity = conv2d_bn(x, p["down_w"], *p["down_bn"], 1, 1,
                             stride=p["stride"], pad=0)
    else:
        identity = x
    # conv2 + bn2 + residual add + relu fused into the matmul epilogue
    out = conv2d_bn(out, p["conv2_w"], *p["bn2"], 3, 3, stride=1, pad=1,
                    relu=True, residual=identity)
    return out


def barlow_resnet_forward(x_nchw, params):
    # NCHW fp32 -> NHWC bf16 at the model boundary only.
    x = jnp.transpose(x_nchw, (0, 2, 3, 1)).astype(jnp.bfloat16)

    acts = []  # NHWC bf16 intermediates
    c1 = params["conv1_w"].shape[1]
    ones = jnp.ones((c1,), jnp.float32)
    zeros = jnp.zeros((c1,), jnp.float32)

    x = conv2d_bn(x, params["conv1_w"], ones, zeros, 7, 7, stride=2, pad=3)  # conv1
    acts.append(x)
    bn_out, x = bn_relu_stem(x, *params["bn1"])                              # bn1 + relu (fused)
    acts.append(bn_out)
    acts.append(x)
    x = maxpool_3x3_s2(x)                                                    # maxpool
    acts.append(x)

    for stage in params["layers"]:                                           # layer1..layer4
        for blk in stage:
            x = basic_block(x, blk)
            acts.append(x)

    pooled, logits = avgpool_fc(x, params["fc_w"], params["fc_b"])           # avgpool + fc (fused)

    # Model-boundary conversion back to PyTorch-style NCHW / fp32 outputs.
    all_out = [jnp.transpose(t, (0, 3, 1, 2)).astype(jnp.float32) for t in acts]
    all_out.append(pooled.reshape(pooled.shape[0], pooled.shape[1], 1, 1))   # avgpool
    all_out.append(logits)                                                   # fc
    return all_out


# ----------------------------------------------------------------------------
if __name__ == "__main__":
    key = jax.random.PRNGKey(0)
    kx, kp = jax.random.split(key)
    x = jax.random.normal(kx, (2, 3, 32, 32), jnp.float32)  # NCHW, like PyTorch
    params = make_resnet_params(kp)

    # params are closed over so python ints (strides) stay static under jit.
    fwd = jax.jit(lambda inp: barlow_resnet_forward(inp, params))
    outs = fwd(x)
    jax.block_until_ready(outs)
    print("KERNEL_OK")
</pallas_src>

<mosaic_0001>
module attributes {stable_mosaic.version = 11 : i64} {
  func.func @_bn_relu_kernel(%arg0: memref<32x128xbf16, #tpu.memory_space<vmem>>, %arg1: memref<1x128xf32, #tpu.memory_space<vmem>>, %arg2: memref<1x128xf32, #tpu.memory_space<vmem>>, %arg3: memref<32x128xbf16, #tpu.memory_space<vmem>>, %arg4: memref<32x128xbf16, #tpu.memory_space<vmem>>) attributes {dimension_semantics = [], scalar_prefetch = 0 : i64, scratch_operands = 0 : i64, tpu.core_type = #tpu.core_type<tc>} {
    %c0 = arith.constant 0 : index
    %c0_0 = arith.constant 0 : index
    %0 = vector.load %arg0[%c0, %c0_0] : memref<32x128xbf16, #tpu.memory_space<vmem>>, vector<32x128xbf16>
    %1 = arith.extf %0 : vector<32x128xbf16> to vector<32x128xf32>
    %c0_1 = arith.constant 0 : index
    %c0_2 = arith.constant 0 : index
    %2 = vector.load %arg1[%c0_1, %c0_2] : memref<1x128xf32, #tpu.memory_space<vmem>>, vector<1x128xf32>
    %3 = vector.broadcast %2 : vector<1x128xf32> to vector<32x128xf32>
    %4 = arith.mulf %1, %3 : vector<32x128xf32>
    %c0_3 = arith.constant 0 : index
    %c0_4 = arith.constant 0 : index
    %5 = vector.load %arg2[%c0_3, %c0_4] : memref<1x128xf32, #tpu.memory_space<vmem>>, vector<1x128xf32>
    %6 = vector.broadcast %5 : vector<1x128xf32> to vector<32x128xf32>
    %7 = arith.addf %4, %6 : vector<32x128xf32>
    %8 = arith.truncf %7 : vector<32x128xf32> to vector<32x128xbf16>
    %c0_5 = arith.constant 0 : index
    %c0_6 = arith.constant 0 : index
    %9 = vector.load %arg3[%c0_5, %c0_6] : memref<32x128xbf16, #tpu.memory_space<vmem>>, vector<32x128xbf16>
    tpu.vector_store %arg3[%c0_5, %c0_6], %8 {strides = array<i32>} : memref<32x128xbf16, #tpu.memory_space<vmem>>, vector<32x128xbf16>,
    %cst = arith.constant 0.000000e+00 : f32
    %10 = vector.broadcast %cst : f32 to vector<32x128xf32>
    %11 = arith.maximumf %7, %10 : vector<32x128xf32>
    %12 = arith.truncf %11 : vector<32x128xf32> to vector<32x128xbf16>
    %c0_7 = arith.constant 0 : index
    %c0_8 = arith.constant 0 : index
    %13 = vector.load %arg4[%c0_7, %c0_8] : memref<32x128xbf16, #tpu.memory_space<vmem>>, vector<32x128xbf16>
    tpu.vector_store %arg4[%c0_7, %c0_8], %12 {strides = array<i32>} : memref<32x128xbf16, #tpu.memory_space<vmem>>, vector<32x128xbf16>,
    return
  }
}

module attributes {stable_mosaic.version = 11 : i64} {
  func.func @_mm_affine_kernel(%arg0: i32, %arg1: i32, %arg2: i32, %arg3: memref<256x152xbf16, #tpu.memory_space<vmem>>, %arg4: memref<152x8xbf16, #tpu.memory_space<vmem>>, %arg5: memref<1x8xf32, #tpu.memory_space<vmem>>, %arg6: memref<256x8xbf16, #tpu.memory_space<vmem>>, %arg7: memref<256x8xf32, #tpu.memory_space<vmem>>) attributes {dimension_semantics = [#tpu.dimension_semantics<parallel>, #tpu.dimension_semantics<parallel>, #tpu.dimension_semantics<arbitrary>], iteration_bounds = array<i64: 2, 1, 1>, scalar_prefetch = 0 : i64, scratch_operands = 1 : i64, tpu.core_type = #tpu.core_type<tc>, window_params = [{transform_indices = @transform_0, window_bounds = array<i64: 256, 152>}, {transform_indices = @transform_1, window_bounds = array<i64: 152, 8>}, {transform_indices = @transform_2, window_bounds = array<i64: 1, 8>}, {transform_indices = @transform_3, window_bounds = array<i64: 256, 8>}]} {
    %c0_i32 = arith.constant 0 : i32
    %0 = arith.cmpi eq, %arg2, %c0_i32 : i32
    %1 = arith.extui %0 : i1 to i32
    %c0_i32_0 = arith.constant 0 : i32
    %2 = arith.cmpi ne, %1, %c0_i32_0 : i32
    scf.if %2 {
      %cst_10 = arith.constant 0.000000e+00 : f32
      %12 = vector.broadcast %cst_10 : f32 to vector<256x8xf32>
      %c0_11 = arith.constant 0 : index
      %c0_12 = arith.constant 0 : index
      %13 = vector.load %arg7[%c0_11, %c0_12] : memref<256x8xf32, #tpu.memory_space<vmem>>, vector<256x8xf32>
      tpu.vector_store %arg7[%c0_11, %c0_12], %12 {strides = array<i32>} : memref<256x8xf32, #tpu.memory_space<vmem>>, vector<256x8xf32>,
    } else {
    }
    %c0 = arith.constant 0 : index
    %c0_1 = arith.constant 0 : index
    %3 = vector.load %arg7[%c0, %c0_1] : memref<256x8xf32, #tpu.memory_space<vmem>>, vector<256x8xf32>
    %c0_2 = arith.constant 0 : index
    %c0_3 = arith.constant 0 : index
    %4 = vector.load %arg3[%c0_2, %c0_3] : memref<256x152xbf16, #tpu.memory_space<vmem>>, vector<256x152xbf16>
    %c0_4 = arith.constant 0 : index
    %c0_5 = arith.constant 0 : index
    %5 = vector.load %arg4[%c0_4, %c0_5] : memref<152x8xbf16, #tpu.memory_space<vmem>>, vector<152x8xbf16>
    %cst = arith.constant dense<0.000000e+00> : vector<256x8xf32>
    %6 = tpu.matmul %4, %5, %cst {dimension_numbers = #tpu.dot_dimension_numbers<[1], [0], [0], [1], [0, 0, 1, 1], [], []>} : vector<256x152xbf16>, vector<152x8xbf16>, vector<256x8xf32> -> vector<256x8xf32>
    %7 = arith.addf %3, %6 : vector<256x8xf32>
    %c0_6 = arith.constant 0 : index
    %c0_7 = arith.constant 0 : index
    %8 = vector.load %arg7[%c0_6, %c0_7] : memref<256x8xf32, #tpu.memory_space<vmem>>, vector<256x8xf32>
    tpu.vector_store %arg7[%c0_6, %c0_7], %7 {strides = array<i32>} : memref<256x8xf32, #tpu.memory_space<vmem>>, vector<256x8xf32>,
    %c0_i32_8 = arith.constant 0 : i32
    %9 = arith.cmpi eq, %arg2, %c0_i32_8 : i32
    %10 = arith.extui %9 : i1 to i32
    %c0_i32_9 = arith.constant 0 : i32
    %11 = arith.cmpi ne, %10, %c0_i32_9 : i32
    scf.if %11 {
      %c0_10 = arith.constant 0 : index
      %c0_11 = arith.constant 0 : index
      %12 = vector.load %arg7[%c0_10, %c0_11] : memref<256x8xf32, #tpu.memory_space<vmem>>, vector<256x8xf32>
      %c0_12 = arith.constant 0 : index
      %c0_13 = arith.constant 0 : index
      %13 = vector.load %arg5[%c0_12, %c0_13] : memref<1x8xf32, #tpu.memory_space<vmem>>, vector<1x8xf32>
      %14 = vector.broadcast %13 : vector<1x8xf32> to vector<256x8xf32>
      %15 = arith.addf %12, %14 : vector<256x8xf32>
      %16 = arith.truncf %15 : vector<256x8xf32> to vector<256x8xbf16>
      %c0_14 = arith.constant 0 : index
      %c0_15 = arith.constant 0 : index
      %17 = vector.load %arg6[%c0_14, %c0_15] : memref<256x8xbf16, #tpu.memory_space<vmem>>, vector<256x8xbf16>
      tpu.vector_store %arg6[%c0_14, %c0_15], %16 {strides = array<i32>} : memref<256x8xbf16, #tpu.memory_space<vmem>>, vector<256x8xbf16>,
    } else {
    }
    return
  }
  func.func @transform_0(%arg0: i32, %arg1: i32, %arg2: i32) -> (i32, i32) {
    %c0_i32 = arith.constant 0 : i32
    return %arg0, %arg2 : i32, i32
  }
  func.func @transform_1(%arg0: i32, %arg1: i32, %arg2: i32) -> (i32, i32) {
    %c0_i32 = arith.constant 0 : i32
    return %arg2, %arg1 : i32, i32
  }
  func.func @transform_2(%arg0: i32, %arg1: i32, %arg2: i32) -> (i32, i32) {
    %c0_i32 = arith.constant 0 : i32
    %c0_i32_0 = arith.constant 0 : i32
    return %c0_i32, %arg1 : i32, i32
  }
  func.func @transform_3(%arg0: i32, %arg1: i32, %arg2: i32) -> (i32, i32) {
    %c0_i32 = arith.constant 0 : i32
    return %arg0, %arg1 : i32, i32
  }
}

module attributes {stable_mosaic.version = 11 : i64} {
  func.func @_maxpool_kernel(%arg0: memref<2x9x9x8xbf16, #tpu.memory_space<vmem>>, %arg1: memref<2x9x9x8xbf16, #tpu.memory_space<vmem>>, %arg2: memref<2x9x9x8xbf16, #tpu.memory_space<vmem>>, %arg3: memref<2x9x9x8xbf16, #tpu.memory_space<vmem>>, %arg4: memref<2x8x8x8xbf16, #tpu.memory_space<vmem>>) attributes {dimension_semantics = [], scalar_prefetch = 0 : i64, scratch_operands = 0 : i64, tpu.core_type = #tpu.core_type<tc>} {
    %c0 = arith.constant 0 : index
    %c0_0 = arith.constant 0 : index
    %c0_1 = arith.constant 0 : index
    %c0_2 = arith.constant 0 : index
    %0 = vector.load %arg0[%c0, %c0_0, %c0_1, %c0_2] : memref<2x9x9x8xbf16, #tpu.memory_space<vmem>>, vector<2x9x9x8xbf16>
    %c0_3 = arith.constant 0 : index
    %c0_4 = arith.constant 0 : index
    %c0_5 = arith.constant 0 : index
    %c0_6 = arith.constant 0 : index
    %1 = vector.load %arg1[%c0_3, %c0_4, %c0_5, %c0_6] : memref<2x9x9x8xbf16, #tpu.memory_space<vmem>>, vector<2x9x9x8xbf16>
    %c0_7 = arith.constant 0 : index
    %c0_8 = arith.constant 0 : index
    %c0_9 = arith.constant 0 : index
    %c0_10 = arith.constant 0 : index
    %2 = vector.load %arg2[%c0_7, %c0_8, %c0_9, %c0_10] : memref<2x9x9x8xbf16, #tpu.memory_space<vmem>>, vector<2x9x9x8xbf16>
    %c0_11 = arith.constant 0 : index
    %c0_12 = arith.constant 0 : index
    %c0_13 = arith.constant 0 : index
    %c0_14 = arith.constant 0 : index
    %3 = vector.load %arg3[%c0_11, %c0_12, %c0_13, %c0_14] : memref<2x9x9x8xbf16, #tpu.memory_space<vmem>>, vector<2x9x9x8xbf16>
    %4 = vector.extract_strided_slice %3 {offsets = [0, 0, 0, 0], sizes = [2, 8, 8, 8], strides = [1, 1, 1, 1]} : vector<2x9x9x8xbf16> to vector<2x8x8x8xbf16>
    %5 = vector.extract_strided_slice %2 {offsets = [0, 0, 1, 0], sizes = [2, 8, 8, 8], strides = [1, 1, 1, 1]} : vector<2x9x9x8xbf16> to vector<2x8x8x8xbf16>
    %6 = arith.maximumf %4, %5 : vector<2x8x8x8xbf16>
    %7 = vector.extract_strided_slice %3 {offsets = [0, 0, 1, 0], sizes = [2, 8, 8, 8], strides = [1, 1, 1, 1]} : vector<2x9x9x8xbf16> to vector<2x8x8x8xbf16>
    %8 = arith.maximumf %6, %7 : vector<2x8x8x8xbf16>
    %9 = vector.extract_strided_slice %1 {offsets = [0, 1, 0, 0], sizes = [2, 8, 8, 8], strides = [1, 1, 1, 1]} : vector<2x9x9x8xbf16> to vector<2x8x8x8xbf16>
    %10 = arith.maximumf %8, %9 : vector<2x8x8x8xbf16>
    %11 = vector.extract_strided_slice %0 {offsets = [0, 1, 1, 0], sizes = [2, 8, 8, 8], strides = [1, 1, 1, 1]} : vector<2x9x9x8xbf16> to vector<2x8x8x8xbf16>
    %12 = arith.maximumf %10, %11 : vector<2x8x8x8xbf16>
    %13 = vector.extract_strided_slice %1 {offsets = [0, 1, 1, 0], sizes = [2, 8, 8, 8], strides = [1, 1, 1, 1]} : vector<2x9x9x8xbf16> to vector<2x8x8x8xbf16>
    %14 = arith.maximumf %12, %13 : vector<2x8x8x8xbf16>
    %15 = vector.extract_strided_slice %3 {offsets = [0, 1, 0, 0], sizes = [2, 8, 8, 8], strides = [1, 1, 1, 1]} : vector<2x9x9x8xbf16> to vector<2x8x8x8xbf16>
    %16 = arith.maximumf %14, %15 : vector<2x8x8x8xbf16>
    %17 = vector.extract_strided_slice %2 {offsets = [0, 1, 1, 0], sizes = [2, 8, 8, 8], strides = [1, 1, 1, 1]} : vector<2x9x9x8xbf16> to vector<2x8x8x8xbf16>
    %18 = arith.maximumf %16, %17 : vector<2x8x8x8xbf16>
    %19 = vector.extract_strided_slice %3 {offsets = [0, 1, 1, 0], sizes = [2, 8, 8, 8], strides = [1, 1, 1, 1]} : vector<2x9x9x8xbf16> to vector<2x8x8x8xbf16>
    %20 = arith.maximumf %18, %19 : vector<2x8x8x8xbf16>
    %c0_15 = arith.constant 0 : index
    %c0_16 = arith.constant 0 : index
    %c0_17 = arith.constant 0 : index
    %c0_18 = arith.constant 0 : index
    %21 = vector.load %arg4[%c0_15, %c0_16, %c0_17, %c0_18] : memref<2x8x8x8xbf16, #tpu.memory_space<vmem>>, vector<2x8x8x8xbf16>
    tpu.vector_store %arg4[%c0_15, %c0_16, %c0_17, %c0_18], %20 {strides = array<i32>} : memref<2x8x8x8xbf16, #tpu.memory_space<vmem>>, vector<2x8x8x8xbf16>,
    return
  }
}

module attributes {stable_mosaic.version = 11 : i64} {
  func.func @_mm_affine_kernel(%arg0: i32, %arg1: i32, %arg2: i32, %arg3: memref<128x72xbf16, #tpu.memory_space<vmem>>, %arg4: memref<72x8xbf16, #tpu.memory_space<vmem>>, %arg5: memref<1x8xf32, #tpu.memory_space<vmem>>, %arg6: memref<128x8xbf16, #tpu.memory_space<vmem>>, %arg7: memref<128x8xf32, #tpu.memory_space<vmem>>) attributes {dimension_semantics = [#tpu.dimension_semantics<parallel>, #tpu.dimension_semantics<parallel>, #tpu.dimension_semantics<arbitrary>], iteration_bounds = array<i64: 1, 1, 1>, scalar_prefetch = 0 : i64, scratch_operands = 1 : i64, tpu.core_type = #tpu.core_type<tc>, window_params = [{transform_indices = @transform_0, window_bounds = array<i64: 128, 72>}, {transform_indices = @transform_1, window_bounds = array<i64: 72, 8>}, {transform_indices = @transform_2, window_bounds = array<i64: 1, 8>}, {transform_indices = @transform_3, window_bounds = array<i64: 128, 8>}]} {
    %c0_i32 = arith.constant 0 : i32
    %0 = arith.cmpi eq, %arg2, %c0_i32 : i32
    %1 = arith.extui %0 : i1 to i32
    %c0_i32_0 = arith.constant 0 : i32
    %2 = arith.cmpi ne, %1, %c0_i32_0 : i32
    scf.if %2 {
      %cst_10 = arith.constant 0.000000e+00 : f32
      %12 = vector.broadcast %cst_10 : f32 to vector<128x8xf32>
      %c0_11 = arith.constant 0 : index
      %c0_12 = arith.constant 0 : index
      %13 = vector.load %arg7[%c0_11, %c0_12] : memref<128x8xf32, #tpu.memory_space<vmem>>, vector<128x8xf32>
      tpu.vector_store %arg7[%c0_11, %c0_12], %12 {strides = array<i32>} : memref<128x8xf32, #tpu.memory_space<vmem>>, vector<128x8xf32>,
    } else {
    }
    %c0 = arith.constant 0 : index
    %c0_1 = arith.constant 0 : index
    %3 = vector.load %arg7[%c0, %c0_1] : memref<128x8xf32, #tpu.memory_space<vmem>>, vector<128x8xf32>
    %c0_2 = arith.constant 0 : index
    %c0_3 = arith.constant 0 : index
    %4 = vector.load %arg3[%c0_2, %c0_3] : memref<128x72xbf16, #tpu.memory_space<vmem>>, vector<128x72xbf16>
    %c0_4 = arith.constant 0 : index
    %c0_5 = arith.constant 0 : index
    %5 = vector.load %arg4[%c0_4, %c0_5] : memref<72x8xbf16, #tpu.memory_space<vmem>>, vector<72x8xbf16>
    %cst = arith.constant dense<0.000000e+00> : vector<128x8xf32>
    %6 = tpu.matmul %4, %5, %cst {dimension_numbers = #tpu.dot_dimension_numbers<[1], [0], [0], [1], [0, 0, 1, 1], [], []>} : vector<128x72xbf16>, vector<72x8xbf16>, vector<128x8xf32> -> vector<128x8xf32>
    %7 = arith.addf %3, %6 : vector<128x8xf32>
    %c0_6 = arith.constant 0 : index
    %c0_7 = arith.constant 0 : index
    %8 = vector.load %arg7[%c0_6, %c0_7] : memref<128x8xf32, #tpu.memory_space<vmem>>, vector<128x8xf32>
    tpu.vector_store %arg7[%c0_6, %c0_7], %7 {strides = array<i32>} : memref<128x8xf32, #tpu.memory_space<vmem>>, vector<128x8xf32>,
    %c0_i32_8 = arith.constant 0 : i32
    %9 = arith.cmpi eq, %arg2, %c0_i32_8 : i32
    %10 = arith.extui %9 : i1 to i32
    %c0_i32_9 = arith.constant 0 : i32
    %11 = arith.cmpi ne, %10, %c0_i32_9 : i32
    scf.if %11 {
      %c0_10 = arith.constant 0 : index
      %c0_11 = arith.constant 0 : index
      %12 = vector.load %arg7[%c0_10, %c0_11] : memref<128x8xf32, #tpu.memory_space<vmem>>, vector<128x8xf32>
      %c0_12 = arith.constant 0 : index
      %c0_13 = arith.constant 0 : index
      %13 = vector.load %arg5[%c0_12, %c0_13] : memref<1x8xf32, #tpu.memory_space<vmem>>, vector<1x8xf32>
      %14 = vector.broadcast %13 : vector<1x8xf32> to vector<128x8xf32>
      %15 = arith.addf %12, %14 : vector<128x8xf32>
      %cst_14 = arith.constant 0.000000e+00 : f32
      %16 = vector.broadcast %cst_14 : f32 to vector<128x8xf32>
      %17 = arith.maximumf %15, %16 : vector<128x8xf32>
      %18 = arith.truncf %17 : vector<128x8xf32> to vector<128x8xbf16>
      %c0_15 = arith.constant 0 : index
      %c0_16 = arith.constant 0 : index
      %19 = vector.load %arg6[%c0_15, %c0_16] : memref<128x8xbf16, #tpu.memory_space<vmem>>, vector<128x8xbf16>
      tpu.vector_store %arg6[%c0_15, %c0_16], %18 {strides = array<i32>} : memref<128x8xbf16, #tpu.memory_space<vmem>>, vector<128x8xbf16>,
    } else {
    }
    return
  }
  func.func @transform_0(%arg0: i32, %arg1: i32, %arg2: i32) -> (i32, i32) {
    %c0_i32 = arith.constant 0 : i32
    return %arg0, %arg2 : i32, i32
  }
  func.func @transform_1(%arg0: i32, %arg1: i32, %arg2: i32) -> (i32, i32) {
    %c0_i32 = arith.constant 0 : i32
    return %arg2, %arg1 : i32, i32
  }
  func.func @transform_2(%arg0: i32, %arg1: i32, %arg2: i32) -> (i32, i32) {
    %c0_i32 = arith.constant 0 : i32
    %c0_i32_0 = arith.constant 0 : i32
    return %c0_i32, %arg1 : i32, i32
  }
  func.func @transform_3(%arg0: i32, %arg1: i32, %arg2: i32) -> (i32, i32) {
    %c0_i32 = arith.constant 0 : i32
    return %arg0, %arg1 : i32, i32
  }
}

module attributes {stable_mosaic.version = 11 : i64} {
  func.func @_mm_affine_kernel(%arg0: i32, %arg1: i32, %arg2: i32, %arg3: memref<128x72xbf16, #tpu.memory_space<vmem>>, %arg4: memref<72x8xbf16, #tpu.memory_space<vmem>>, %arg5: memref<1x8xf32, #tpu.memory_space<vmem>>, %arg6: memref<128x8xbf16, #tpu.memory_space<vmem>>, %arg7: memref<128x8xbf16, #tpu.memory_space<vmem>>, %arg8: memref<128x8xf32, #tpu.memory_space<vmem>>) attributes {dimension_semantics = [#tpu.dimension_semantics<parallel>, #tpu.dimension_semantics<parallel>, #tpu.dimension_semantics<arbitrary>], iteration_bounds = array<i64: 1, 1, 1>, scalar_prefetch = 0 : i64, scratch_operands = 1 : i64, tpu.core_type = #tpu.core_type<tc>, window_params = [{transform_indices = @transform_0, window_bounds = array<i64: 128, 72>}, {transform_indices = @transform_1, window_bounds = array<i64: 72, 8>}, {transform_indices = @transform_2, window_bounds = array<i64: 1, 8>}, {transform_indices = @transform_3, window_bounds = array<i64: 128, 8>}, {transform_indices = @transform_4, window_bounds = array<i64: 128, 8>}]} {
    %c0_i32 = arith.constant 0 : i32
    %0 = arith.cmpi eq, %arg2, %c0_i32 : i32
    %1 = arith.extui %0 : i1 to i32
    %c0_i32_0 = arith.constant 0 : i32
    %2 = arith.cmpi ne, %1, %c0_i32_0 : i32
    scf.if %2 {
      %cst_10 = arith.constant 0.000000e+00 : f32
      %12 = vector.broadcast %cst_10 : f32 to vector<128x8xf32>
      %c0_11 = arith.constant 0 : index
      %c0_12 = arith.constant 0 : index
      %13 = vector.load %arg8[%c0_11, %c0_12] : memref<128x8xf32, #tpu.memory_space<vmem>>, vector<128x8xf32>
      tpu.vector_store %arg8[%c0_11, %c0_12], %12 {strides = array<i32>} : memref<128x8xf32, #tpu.memory_space<vmem>>, vector<128x8xf32>,
    } else {
    }
    %c0 = arith.constant 0 : index
    %c0_1 = arith.constant 0 : index
    %3 = vector.load %arg8[%c0, %c0_1] : memref<128x8xf32, #tpu.memory_space<vmem>>, vector<128x8xf32>
    %c0_2 = arith.constant 0 : index
    %c0_3 = arith.constant 0 : index
    %4 = vector.load %arg3[%c0_2, %c0_3] : memref<128x72xbf16, #tpu.memory_space<vmem>>, vector<128x72xbf16>
    %c0_4 = arith.constant 0 : index
    %c0_5 = arith.constant 0 : index
    %5 = vector.load %arg4[%c0_4, %c0_5] : memref<72x8xbf16, #tpu.memory_space<vmem>>, vector<72x8xbf16>
    %cst = arith.constant dense<0.000000e+00> : vector<128x8xf32>
    %6 = tpu.matmul %4, %5, %cst {dimension_numbers = #tpu.dot_dimension_numbers<[1], [0], [0], [1], [0, 0, 1, 1], [], []>} : vector<128x72xbf16>, vector<72x8xbf16>, vector<128x8xf32> -> vector<128x8xf32>
    %7 = arith.addf %3, %6 : vector<128x8xf32>
    %c0_6 = arith.constant 0 : index
    %c0_7 = arith.constant 0 : index
    %8 = vector.load %arg8[%c0_6, %c0_7] : memref<128x8xf32, #tpu.memory_space<vmem>>, vector<128x8xf32>
    tpu.vector_store %arg8[%c0_6, %c0_7], %7 {strides = array<i32>} : memref<128x8xf32, #tpu.memory_space<vmem>>, vector<128x8xf32>,
    %c0_i32_8 = arith.constant 0 : i32
    %9 = arith.cmpi eq, %arg2, %c0_i32_8 : i32
    %10 = arith.extui %9 : i1 to i32
    %c0_i32_9 = arith.constant 0 : i32
    %11 = arith.cmpi ne, %10, %c0_i32_9 : i32
    scf.if %11 {
      %c0_10 = arith.constant 0 : index
      %c0_11 = arith.constant 0 : index
      %12 = vector.load %arg8[%c0_10, %c0_11] : memref<128x8xf32, #tpu.memory_space<vmem>>, vector<128x8xf32>
      %c0_12 = arith.constant 0 : index
      %c0_13 = arith.constant 0 : index
      %13 = vector.load %arg5[%c0_12, %c0_13] : memref<1x8xf32, #tpu.memory_space<vmem>>, vector<1x8xf32>
      %14 = vector.broadcast %13 : vector<1x8xf32> to vector<128x8xf32>
      %15 = arith.addf %12, %14 : vector<128x8xf32>
      %c0_14 = arith.constant 0 : index
      %c0_15 = arith.constant 0 : index
      %16 = vector.load %arg6[%c0_14, %c0_15] : memref<128x8xbf16, #tpu.memory_space<vmem>>, vector<128x8xbf16>
      %17 = arith.extf %16 : vector<128x8xbf16> to vector<128x8xf32>
      %18 = arith.addf %15, %17 : vector<128x8xf32>
      %cst_16 = arith.constant 0.000000e+00 : f32
      %19 = vector.broadcast %cst_16 : f32 to vector<128x8xf32>
      %20 = arith.maximumf %18, %19 : vector<128x8xf32>
      %21 = arith.truncf %20 : vector<128x8xf32> to vector<128x8xbf16>
      %c0_17 = arith.constant 0 : index
      %c0_18 = arith.constant 0 : index
      %22 = vector.load %arg7[%c0_17, %c0_18] : memref<128x8xbf16, #tpu.memory_space<vmem>>, vector<128x8xbf16>
      tpu.vector_store %arg7[%c0_17, %c0_18], %21 {strides = array<i32>} : memref<128x8xbf16, #tpu.memory_space<vmem>>, vector<128x8xbf16>,
    } else {
    }
    return
  }
  func.func @transform_0(%arg0: i32, %arg1: i32, %arg2: i32) -> (i32, i32) {
    %c0_i32 = arith.constant 0 : i32
    return %arg0, %arg2 : i32, i32
  }
  func.func @transform_1(%arg0: i32, %arg1: i32, %arg2: i32) -> (i32, i32) {
    %c0_i32 = arith.constant 0 : i32
    return %arg2, %arg1 : i32, i32
  }
  func.func @transform_2(%arg0: i32, %arg1: i32, %arg2: i32) -> (i32, i32) {
    %c0_i32 = arith.constant 0 : i32
    %c0_i32_0 = arith.constant 0 : i32
    return %c0_i32, %arg1 : i32, i32
  }
  func.func @transform_3(%arg0: i32, %arg1: i32, %arg2: i32) -> (i32, i32) {
    %c0_i32 = arith.constant 0 : i32
    return %arg0, %arg1 : i32, i32
  }
  func.func @transform_4(%arg0: i32, %arg1: i32, %arg2: i32) -> (i32, i32) {
    %c0_i32 = arith.constant 0 : i32
    return %arg0, %arg1 : i32, i32
  }
}

module attributes {stable_mosaic.version = 11 : i64} {
  func.func @_mm_affine_kernel(%arg0: i32, %arg1: i32, %arg2: i32, %arg3: memref<32x72xbf16, #tpu.memory_space<vmem>>, %arg4: memref<72x16xbf16, #tpu.memory_space<vmem>>, %arg5: memref<1x16xf32, #tpu.memory_space<vmem>>, %arg6: memref<32x16xbf16, #tpu.memory_space<vmem>>, %arg7: memref<32x16xf32, #tpu.memory_space<vmem>>) attributes {dimension_semantics = [#tpu.dimension_semantics<parallel>, #tpu.dimension_semantics<parallel>, #tpu.dimension_semantics<arbitrary>], iteration_bounds = array<i64: 1, 1, 1>, scalar_prefetch = 0 : i64, scratch_operands = 1 : i64, tpu.core_type = #tpu.core_type<tc>, window_params = [{transform_indices = @transform_0, window_bounds = array<i64: 32, 72>}, {transform_indices = @transform_1, window_bounds = array<i64: 72, 16>}, {transform_indices = @transform_2, window_bounds = array<i64: 1, 16>}, {transform_indices = @transform_3, window_bounds = array<i64: 32, 16>}]} {
    %c0_i32 = arith.constant 0 : i32
    %0 = arith.cmpi eq, %arg2, %c0_i32 : i32
    %1 = arith.extui %0 : i1 to i32
    %c0_i32_0 = arith.constant 0 : i32
    %2 = arith.cmpi ne, %1, %c0_i32_0 : i32
    scf.if %2 {
      %cst_10 = arith.constant 0.000000e+00 : f32
      %12 = vector.broadcast %cst_10 : f32 to vector<32x16xf32>
      %c0_11 = arith.constant 0 : index
      %c0_12 = arith.constant 0 : index
      %13 = vector.load %arg7[%c0_11, %c0_12] : memref<32x16xf32, #tpu.memory_space<vmem>>, vector<32x16xf32>
      tpu.vector_store %arg7[%c0_11, %c0_12], %12 {strides = array<i32>} : memref<32x16xf32, #tpu.memory_space<vmem>>, vector<32x16xf32>,
    } else {
    }
    %c0 = arith.constant 0 : index
    %c0_1 = arith.constant 0 : index
    %3 = vector.load %arg7[%c0, %c0_1] : memref<32x16xf32, #tpu.memory_space<vmem>>, vector<32x16xf32>
    %c0_2 = arith.constant 0 : index
    %c0_3 = arith.constant 0 : index
    %4 = vector.load %arg3[%c0_2, %c0_3] : memref<32x72xbf16, #tpu.memory_space<vmem>>, vector<32x72xbf16>
    %c0_4 = arith.constant 0 : index
    %c0_5 = arith.constant 0 : index
    %5 = vector.load %arg4[%c0_4, %c0_5] : memref<72x16xbf16, #tpu.memory_space<vmem>>, vector<72x16xbf16>
    %cst = arith.constant dense<0.000000e+00> : vector<32x16xf32>
    %6 = tpu.matmul %4, %5, %cst {dimension_numbers = #tpu.dot_dimension_numbers<[1], [0], [0], [1], [0, 0, 1, 1], [], []>} : vector<32x72xbf16>, vector<72x16xbf16>, vector<32x16xf32> -> vector<32x16xf32>
    %7 = arith.addf %3, %6 : vector<32x16xf32>
    %c0_6 = arith.constant 0 : index
    %c0_7 = arith.constant 0 : index
    %8 = vector.load %arg7[%c0_6, %c0_7] : memref<32x16xf32, #tpu.memory_space<vmem>>, vector<32x16xf32>
    tpu.vector_store %arg7[%c0_6, %c0_7], %7 {strides = array<i32>} : memref<32x16xf32, #tpu.memory_space<vmem>>, vector<32x16xf32>,
    %c0_i32_8 = arith.constant 0 : i32
    %9 = arith.cmpi eq, %arg2, %c0_i32_8 : i32
    %10 = arith.extui %9 : i1 to i32
    %c0_i32_9 = arith.constant 0 : i32
    %11 = arith.cmpi ne, %10, %c0_i32_9 : i32
    scf.if %11 {
      %c0_10 = arith.constant 0 : index
      %c0_11 = arith.constant 0 : index
      %12 = vector.load %arg7[%c0_10, %c0_11] : memref<32x16xf32, #tpu.memory_space<vmem>>, vector<32x16xf32>
      %c0_12 = arith.constant 0 : index
      %c0_13 = arith.constant 0 : index
      %13 = vector.load %arg5[%c0_12, %c0_13] : memref<1x16xf32, #tpu.memory_space<vmem>>, vector<1x16xf32>
      %14 = vector.broadcast %13 : vector<1x16xf32> to vector<32x16xf32>
      %15 = arith.addf %12, %14 : vector<32x16xf32>
      %cst_14 = arith.constant 0.000000e+00 : f32
      %16 = vector.broadcast %cst_14 : f32 to vector<32x16xf32>
      %17 = arith.maximumf %15, %16 : vector<32x16xf32>
      %18 = arith.truncf %17 : vector<32x16xf32> to vector<32x16xbf16>
      %c0_15 = arith.constant 0 : index
      %c0_16 = arith.constant 0 : index
      %19 = vector.load %arg6[%c0_15, %c0_16] : memref<32x16xbf16, #tpu.memory_space<vmem>>, vector<32x16xbf16>
      tpu.vector_store %arg6[%c0_15, %c0_16], %18 {strides = array<i32>} : memref<32x16xbf16, #tpu.memory_space<vmem>>, vector<32x16xbf16>,
    } else {
    }
    return
  }
  func.func @transform_0(%arg0: i32, %arg1: i32, %arg2: i32) -> (i32, i32) {
    %c0_i32 = arith.constant 0 : i32
    return %arg0, %arg2 : i32, i32
  }
  func.func @transform_1(%arg0: i32, %arg1: i32, %arg2: i32) -> (i32, i32) {
    %c0_i32 = arith.constant 0 : i32
    return %arg2, %arg1 : i32, i32
  }
  func.func @transform_2(%arg0: i32, %arg1: i32, %arg2: i32) -> (i32, i32) {
    %c0_i32 = arith.constant 0 : i32
    %c0_i32_0 = arith.constant 0 : i32
    return %c0_i32, %arg1 : i32, i32
  }
  func.func @transform_3(%arg0: i32, %arg1: i32, %arg2: i32) -> (i32, i32) {
    %c0_i32 = arith.constant 0 : i32
    return %arg0, %arg1 : i32, i32
  }
}

module attributes {stable_mosaic.version = 11 : i64} {
  func.func @_mm_affine_kernel(%arg0: i32, %arg1: i32, %arg2: i32, %arg3: memref<32x144xbf16, #tpu.memory_space<vmem>>, %arg4: memref<144x16xbf16, #tpu.memory_space<vmem>>, %arg5: memref<1x16xf32, #tpu.memory_space<vmem>>, %arg6: memref<32x16xbf16, #tpu.memory_space<vmem>>, %arg7: memref<32x16xbf16, #tpu.memory_space<vmem>>, %arg8: memref<32x16xf32, #tpu.memory_space<vmem>>) attributes {dimension_semantics = [#tpu.dimension_semantics<parallel>, #tpu.dimension_semantics<parallel>, #tpu.dimension_semantics<arbitrary>], iteration_bounds = array<i64: 1, 1, 1>, scalar_prefetch = 0 : i64, scratch_operands = 1 : i64, tpu.core_type = #tpu.core_type<tc>, window_params = [{transform_indices = @transform_0, window_bounds = array<i64: 32, 144>}, {transform_indices = @transform_1, window_bounds = array<i64: 144, 16>}, {transform_indices = @transform_2, window_bounds = array<i64: 1, 16>}, {transform_indices = @transform_3, window_bounds = array<i64: 32, 16>}, {transform_indices = @transform_4, window_bounds = array<i64: 32, 16>}]} {
    %c0_i32 = arith.constant 0 : i32
    %0 = arith.cmpi eq, %arg2, %c0_i32 : i32
    %1 = arith.extui %0 : i1 to i32
    %c0_i32_0 = arith.constant 0 : i32
    %2 = arith.cmpi ne, %1, %c0_i32_0 : i32
    scf.if %2 {
      %cst_10 = arith.constant 0.000000e+00 : f32
      %12 = vector.broadcast %cst_10 : f32 to vector<32x16xf32>
      %c0_11 = arith.constant 0 : index
      %c0_12 = arith.constant 0 : index
      %13 = vector.load %arg8[%c0_11, %c0_12] : memref<32x16xf32, #tpu.memory_space<vmem>>, vector<32x16xf32>
      tpu.vector_store %arg8[%c0_11, %c0_12], %12 {strides = array<i32>} : memref<32x16xf32, #tpu.memory_space<vmem>>, vector<32x16xf32>,
    } else {
    }
    %c0 = arith.constant 0 : index
    %c0_1 = arith.constant 0 : index
    %3 = vector.load %arg8[%c0, %c0_1] : memref<32x16xf32, #tpu.memory_space<vmem>>, vector<32x16xf32>
    %c0_2 = arith.constant 0 : index
    %c0_3 = arith.constant 0 : index
    %4 = vector.load %arg3[%c0_2, %c0_3] : memref<32x144xbf16, #tpu.memory_space<vmem>>, vector<32x144xbf16>
    %c0_4 = arith.constant 0 : index
    %c0_5 = arith.constant 0 : index
    %5 = vector.load %arg4[%c0_4, %c0_5] : memref<144x16xbf16, #tpu.memory_space<vmem>>, vector<144x16xbf16>
    %cst = arith.constant dense<0.000000e+00> : vector<32x16xf32>
    %6 = tpu.matmul %4, %5, %cst {dimension_numbers = #tpu.dot_dimension_numbers<[1], [0], [0], [1], [0, 0, 1, 1], [], []>} : vector<32x144xbf16>, vector<144x16xbf16>, vector<32x16xf32> -> vector<32x16xf32>
    %7 = arith.addf %3, %6 : vector<32x16xf32>
    %c0_6 = arith.constant 0 : index
    %c0_7 = arith.constant 0 : index
    %8 = vector.load %arg8[%c0_6, %c0_7] : memref<32x16xf32, #tpu.memory_space<vmem>>, vector<32x16xf32>
    tpu.vector_store %arg8[%c0_6, %c0_7], %7 {strides = array<i32>} : memref<32x16xf32, #tpu.memory_space<vmem>>, vector<32x16xf32>,
    %c0_i32_8 = arith.constant 0 : i32
    %9 = arith.cmpi eq, %arg2, %c0_i32_8 : i32
    %10 = arith.extui %9 : i1 to i32
    %c0_i32_9 = arith.constant 0 : i32
    %11 = arith.cmpi ne, %10, %c0_i32_9 : i32
    scf.if %11 {
      %c0_10 = arith.constant 0 : index
      %c0_11 = arith.constant 0 : index
      %12 = vector.load %arg8[%c0_10, %c0_11] : memref<32x16xf32, #tpu.memory_space<vmem>>, vector<32x16xf32>
      %c0_12 = arith.constant 0 : index
      %c0_13 = arith.constant 0 : index
      %13 = vector.load %arg5[%c0_12, %c0_13] : memref<1x16xf32, #tpu.memory_space<vmem>>, vector<1x16xf32>
      %14 = vector.broadcast %13 : vector<1x16xf32> to vector<32x16xf32>
      %15 = arith.addf %12, %14 : vector<32x16xf32>
      %c0_14 = arith.constant 0 : index
      %c0_15 = arith.constant 0 : index
      %16 = vector.load %arg6[%c0_14, %c0_15] : memref<32x16xbf16, #tpu.memory_space<vmem>>, vector<32x16xbf16>
      %17 = arith.extf %16 : vector<32x16xbf16> to vector<32x16xf32>
      %18 = arith.addf %15, %17 : vector<32x16xf32>
      %cst_16 = arith.constant 0.000000e+00 : f32
      %19 = vector.broadcast %cst_16 : f32 to vector<32x16xf32>
      %20 = arith.maximumf %18, %19 : vector<32x16xf32>
      %21 = arith.truncf %20 : vector<32x16xf32> to vector<32x16xbf16>
      %c0_17 = arith.constant 0 : index
      %c0_18 = arith.constant 0 : index
      %22 = vector.load %arg7[%c0_17, %c0_18] : memref<32x16xbf16, #tpu.memory_space<vmem>>, vector<32x16xbf16>
      tpu.vector_store %arg7[%c0_17, %c0_18], %21 {strides = array<i32>} : memref<32x16xbf16, #tpu.memory_space<vmem>>, vector<32x16xbf16>,
    } else {
    }
    return
  }
  func.func @transform_0(%arg0: i32, %arg1: i32, %arg2: i32) -> (i32, i32) {
    %c0_i32 = arith.constant 0 : i32
    return %arg0, %arg2 : i32, i32
  }
  func.func @transform_1(%arg0: i32, %arg1: i32, %arg2: i32) -> (i32, i32) {
    %c0_i32 = arith.constant 0 : i32
    return %arg2, %arg1 : i32, i32
  }
  func.func @transform_2(%arg0: i32, %arg1: i32, %arg2: i32) -> (i32, i32) {
    %c0_i32 = arith.constant 0 : i32
    %c0_i32_0 = arith.constant 0 : i32
    return %c0_i32, %arg1 : i32, i32
  }
  func.func @transform_3(%arg0: i32, %arg1: i32, %arg2: i32) -> (i32, i32) {
    %c0_i32 = arith.constant 0 : i32
    return %arg0, %arg1 : i32, i32
  }
  func.func @transform_4(%arg0: i32, %arg1: i32, %arg2: i32) -> (i32, i32) {
    %c0_i32 = arith.constant 0 : i32
    return %arg0, %arg1 : i32, i32
  }
}

module attributes {stable_mosaic.version = 11 : i64} {
  func.func @_mm_affine_kernel(%arg0: i32, %arg1: i32, %arg2: i32, %arg3: memref<32x8xbf16, #tpu.memory_space<vmem>>, %arg4: memref<8x16xbf16, #tpu.memory_space<vmem>>, %arg5: memref<1x16xf32, #tpu.memory_space<vmem>>, %arg6: memref<32x16xbf16, #tpu.memory_space<vmem>>, %arg7: memref<32x16xf32, #tpu.memory_space<vmem>>) attributes {dimension_semantics = [#tpu.dimension_semantics<parallel>, #tpu.dimension_semantics<parallel>, #tpu.dimension_semantics<arbitrary>], iteration_bounds = array<i64: 1, 1, 1>, scalar_prefetch = 0 : i64, scratch_operands = 1 : i64, tpu.core_type = #tpu.core_type<tc>, window_params = [{transform_indices = @transform_0, window_bounds = array<i64: 32, 8>}, {transform_indices = @transform_1, window_bounds = array<i64: 8, 16>}, {transform_indices = @transform_2, window_bounds = array<i64: 1, 16>}, {transform_indices = @transform_3, window_bounds = array<i64: 32, 16>}]} {
    %c0_i32 = arith.constant 0 : i32
    %0 = arith.cmpi eq, %arg2, %c0_i32 : i32
    %1 = arith.extui %0 : i1 to i32
    %c0_i32_0 = arith.constant 0 : i32
    %2 = arith.cmpi ne, %1, %c0_i32_0 : i32
    scf.if %2 {
      %cst_10 = arith.constant 0.000000e+00 : f32
      %12 = vector.broadcast %cst_10 : f32 to vector<32x16xf32>
      %c0_11 = arith.constant 0 : index
      %c0_12 = arith.constant 0 : index
      %13 = vector.load %arg7[%c0_11, %c0_12] : memref<32x16xf32, #tpu.memory_space<vmem>>, vector<32x16xf32>
      tpu.vector_store %arg7[%c0_11, %c0_12], %12 {strides = array<i32>} : memref<32x16xf32, #tpu.memory_space<vmem>>, vector<32x16xf32>,
    } else {
    }
    %c0 = arith.constant 0 : index
    %c0_1 = arith.constant 0 : index
    %3 = vector.load %arg7[%c0, %c0_1] : memref<32x16xf32, #tpu.memory_space<vmem>>, vector<32x16xf32>
    %c0_2 = arith.constant 0 : index
    %c0_3 = arith.constant 0 : index
    %4 = vector.load %arg3[%c0_2, %c0_3] : memref<32x8xbf16, #tpu.memory_space<vmem>>, vector<32x8xbf16>
    %c0_4 = arith.constant 0 : index
    %c0_5 = arith.constant 0 : index
    %5 = vector.load %arg4[%c0_4, %c0_5] : memref<8x16xbf16, #tpu.memory_space<vmem>>, vector<8x16xbf16>
    %cst = arith.constant dense<0.000000e+00> : vector<32x16xf32>
    %6 = tpu.matmul %4, %5, %cst {dimension_numbers = #tpu.dot_dimension_numbers<[1], [0], [0], [1], [0, 0, 1, 1], [], []>} : vector<32x8xbf16>, vector<8x16xbf16>, vector<32x16xf32> -> vector<32x16xf32>
    %7 = arith.addf %3, %6 : vector<32x16xf32>
    %c0_6 = arith.constant 0 : index
    %c0_7 = arith.constant 0 : index
    %8 = vector.load %arg7[%c0_6, %c0_7] : memref<32x16xf32, #tpu.memory_space<vmem>>, vector<32x16xf32>
    tpu.vector_store %arg7[%c0_6, %c0_7], %7 {strides = array<i32>} : memref<32x16xf32, #tpu.memory_space<vmem>>, vector<32x16xf32>,
    %c0_i32_8 = arith.constant 0 : i32
    %9 = arith.cmpi eq, %arg2, %c0_i32_8 : i32
    %10 = arith.extui %9 : i1 to i32
    %c0_i32_9 = arith.constant 0 : i32
    %11 = arith.cmpi ne, %10, %c0_i32_9 : i32
    scf.if %11 {
      %c0_10 = arith.constant 0 : index
      %c0_11 = arith.constant 0 : index
      %12 = vector.load %arg7[%c0_10, %c0_11] : memref<32x16xf32, #tpu.memory_space<vmem>>, vector<32x16xf32>
      %c0_12 = arith.constant 0 : index
      %c0_13 = arith.constant 0 : index
      %13 = vector.load %arg5[%c0_12, %c0_13] : memref<1x16xf32, #tpu.memory_space<vmem>>, vector<1x16xf32>
      %14 = vector.broadcast %13 : vector<1x16xf32> to vector<32x16xf32>
      %15 = arith.addf %12, %14 : vector<32x16xf32>
      %16 = arith.truncf %15 : vector<32x16xf32> to vector<32x16xbf16>
      %c0_14 = arith.constant 0 : index
      %c0_15 = arith.constant 0 : index
      %17 = vector.load %arg6[%c0_14, %c0_15] : memref<32x16xbf16, #tpu.memory_space<vmem>>, vector<32x16xbf16>
      tpu.vector_store %arg6[%c0_14, %c0_15], %16 {strides = array<i32>} : memref<32x16xbf16, #tpu.memory_space<vmem>>, vector<32x16xbf16>,
    } else {
    }
    return
  }
  func.func @transform_0(%arg0: i32, %arg1: i32, %arg2: i32) -> (i32, i32) {
    %c0_i32 = arith.constant 0 : i32
    return %arg0, %arg2 : i32, i32
  }
  func.func @transform_1(%arg0: i32, %arg1: i32, %arg2: i32) -> (i32, i32) {
    %c0_i32 = arith.constant 0 : i32
    return %arg2, %arg1 : i32, i32
  }
  func.func @transform_2(%arg0: i32, %arg1: i32, %arg2: i32) -> (i32, i32) {
    %c0_i32 = arith.constant 0 : i32
    %c0_i32_0 = arith.constant 0 : i32
    return %c0_i32, %arg1 : i32, i32
  }
  func.func @transform_3(%arg0: i32, %arg1: i32, %arg2: i32) -> (i32, i32) {
    %c0_i32 = arith.constant 0 : i32
    return %arg0, %arg1 : i32, i32
  }
}

module attributes {stable_mosaic.version = 11 : i64} {
  func.func @_mm_affine_kernel(%arg0: i32, %arg1: i32, %arg2: i32, %arg3: memref<32x144xbf16, #tpu.memory_space<vmem>>, %arg4: memref<144x16xbf16, #tpu.memory_space<vmem>>, %arg5: memref<1x16xf32, #tpu.memory_space<vmem>>, %arg6: memref<32x16xbf16, #tpu.memory_space<vmem>>, %arg7: memref<32x16xf32, #tpu.memory_space<vmem>>) attributes {dimension_semantics = [#tpu.dimension_semantics<parallel>, #tpu.dimension_semantics<parallel>, #tpu.dimension_semantics<arbitrary>], iteration_bounds = array<i64: 1, 1, 1>, scalar_prefetch = 0 : i64, scratch_operands = 1 : i64, tpu.core_type = #tpu.core_type<tc>, window_params = [{transform_indices = @transform_0, window_bounds = array<i64: 32, 144>}, {transform_indices = @transform_1, window_bounds = array<i64: 144, 16>}, {transform_indices = @transform_2, window_bounds = array<i64: 1, 16>}, {transform_indices = @transform_3, window_bounds = array<i64: 32, 16>}]} {
    %c0_i32 = arith.constant 0 : i32
    %0 = arith.cmpi eq, %arg2, %c0_i32 : i32
    %1 = arith.extui %0 : i1 to i32
    %c0_i32_0 = arith.constant 0 : i32
    %2 = arith.cmpi ne, %1, %c0_i32_0 : i32
    scf.if %2 {
      %cst_10 = arith.constant 0.000000e+00 : f32
      %12 = vector.broadcast %cst_10 : f32 to vector<32x16xf32>
      %c0_11 = arith.constant 0 : index
      %c0_12 = arith.constant 0 : index
      %13 = vector.load %arg7[%c0_11, %c0_12] : memref<32x16xf32, #tpu.memory_space<vmem>>, vector<32x16xf32>
      tpu.vector_store %arg7[%c0_11, %c0_12], %12 {strides = array<i32>} : memref<32x16xf32, #tpu.memory_space<vmem>>, vector<32x16xf32>,
    } else {
    }
    %c0 = arith.constant 0 : index
    %c0_1 = arith.constant 0 : index
    %3 = vector.load %arg7[%c0, %c0_1] : memref<32x16xf32, #tpu.memory_space<vmem>>, vector<32x16xf32>
    %c0_2 = arith.constant 0 : index
    %c0_3 = arith.constant 0 : index
    %4 = vector.load %arg3[%c0_2, %c0_3] : memref<32x144xbf16, #tpu.memory_space<vmem>>, vector<32x144xbf16>
    %c0_4 = arith.constant 0 : index
    %c0_5 = arith.constant 0 : index
    %5 = vector.load %arg4[%c0_4, %c0_5] : memref<144x16xbf16, #tpu.memory_space<vmem>>, vector<144x16xbf16>
    %cst = arith.constant dense<0.000000e+00> : vector<32x16xf32>
    %6 = tpu.matmul %4, %5, %cst {dimension_numbers = #tpu.dot_dimension_numbers<[1], [0], [0], [1], [0, 0, 1, 1], [], []>} : vector<32x144xbf16>, vector<144x16xbf16>, vector<32x16xf32> -> vector<32x16xf32>
    %7 = arith.addf %3, %6 : vector<32x16xf32>
    %c0_6 = arith.constant 0 : index
    %c0_7 = arith.constant 0 : index
    %8 = vector.load %arg7[%c0_6, %c0_7] : memref<32x16xf32, #tpu.memory_space<vmem>>, vector<32x16xf32>
    tpu.vector_store %arg7[%c0_6, %c0_7], %7 {strides = array<i32>} : memref<32x16xf32, #tpu.memory_space<vmem>>, vector<32x16xf32>,
    %c0_i32_8 = arith.constant 0 : i32
    %9 = arith.cmpi eq, %arg2, %c0_i32_8 : i32
    %10 = arith.extui %9 : i1 to i32
    %c0_i32_9 = arith.constant 0 : i32
    %11 = arith.cmpi ne, %10, %c0_i32_9 : i32
    scf.if %11 {
      %c0_10 = arith.constant 0 : index
      %c0_11 = arith.constant 0 : index
      %12 = vector.load %arg7[%c0_10, %c0_11] : memref<32x16xf32, #tpu.memory_space<vmem>>, vector<32x16xf32>
      %c0_12 = arith.constant 0 : index
      %c0_13 = arith.constant 0 : index
      %13 = vector.load %arg5[%c0_12, %c0_13] : memref<1x16xf32, #tpu.memory_space<vmem>>, vector<1x16xf32>
      %14 = vector.broadcast %13 : vector<1x16xf32> to vector<32x16xf32>
      %15 = arith.addf %12, %14 : vector<32x16xf32>
      %cst_14 = arith.constant 0.000000e+00 : f32
      %16 = vector.broadcast %cst_14 : f32 to vector<32x16xf32>
      %17 = arith.maximumf %15, %16 : vector<32x16xf32>
      %18 = arith.truncf %17 : vector<32x16xf32> to vector<32x16xbf16>
      %c0_15 = arith.constant 0 : index
      %c0_16 = arith.constant 0 : index
      %19 = vector.load %arg6[%c0_15, %c0_16] : memref<32x16xbf16, #tpu.memory_space<vmem>>, vector<32x16xbf16>
      tpu.vector_store %arg6[%c0_15, %c0_16], %18 {strides = array<i32>} : memref<32x16xbf16, #tpu.memory_space<vmem>>, vector<32x16xbf16>,
    } else {
    }
    return
  }
  func.func @transform_0(%arg0: i32, %arg1: i32, %arg2: i32) -> (i32, i32) {
    %c0_i32 = arith.constant 0 : i32
    return %arg0, %arg2 : i32, i32
  }
  func.func @transform_1(%arg0: i32, %arg1: i32, %arg2: i32) -> (i32, i32) {
    %c0_i32 = arith.constant 0 : i32
    return %arg2, %arg1 : i32, i32
  }
  func.func @transform_2(%arg0: i32, %arg1: i32, %arg2: i32) -> (i32, i32) {
    %c0_i32 = arith.constant 0 : i32
    %c0_i32_0 = arith.constant 0 : i32
    return %c0_i32, %arg1 : i32, i32
  }
  func.func @transform_3(%arg0: i32, %arg1: i32, %arg2: i32) -> (i32, i32) {
    %c0_i32 = arith.constant 0 : i32
    return %arg0, %arg1 : i32, i32
  }
}

module attributes {stable_mosaic.version = 11 : i64} {
  func.func @_mm_affine_kernel(%arg0: i32, %arg1: i32, %arg2: i32, %arg3: memref<8x16xbf16, #tpu.memory_space<vmem>>, %arg4: memref<16x32xbf16, #tpu.memory_space<vmem>>, %arg5: memref<1x32xf32, #tpu.memory_space<vmem>>, %arg6: memref<8x32xbf16, #tpu.memory_space<vmem>>, %arg7: memref<8x32xf32, #tpu.memory_space<vmem>>) attributes {dimension_semantics = [#tpu.dimension_semantics<parallel>, #tpu.dimension_semantics<parallel>, #tpu.dimension_semantics<arbitrary>], iteration_bounds = array<i64: 1, 1, 1>, scalar_prefetch = 0 : i64, scratch_operands = 1 : i64, tpu.core_type = #tpu.core_type<tc>, window_params = [{transform_indices = @transform_0, window_bounds = array<i64: 8, 16>}, {transform_indices = @transform_1, window_bounds = array<i64: 16, 32>}, {transform_indices = @transform_2, window_bounds = array<i64: 1, 32>}, {transform_indices = @transform_3, window_bounds = array<i64: 8, 32>}]} {
    %c0_i32 = arith.constant 0 : i32
    %0 = arith.cmpi eq, %arg2, %c0_i32 : i32
    %1 = arith.extui %0 : i1 to i32
    %c0_i32_0 = arith.constant 0 : i32
    %2 = arith.cmpi ne, %1, %c0_i32_0 : i32
    scf.if %2 {
      %cst_10 = arith.constant 0.000000e+00 : f32
      %12 = vector.broadcast %cst_10 : f32 to vector<8x32xf32>
      %c0_11 = arith.constant 0 : index
      %c0_12 = arith.constant 0 : index
      %13 = vector.load %arg7[%c0_11, %c0_12] : memref<8x32xf32, #tpu.memory_space<vmem>>, vector<8x32xf32>
      tpu.vector_store %arg7[%c0_11, %c0_12], %12 {strides = array<i32>} : memref<8x32xf32, #tpu.memory_space<vmem>>, vector<8x32xf32>,
    } else {
    }
    %c0 = arith.constant 0 : index
    %c0_1 = arith.constant 0 : index
    %3 = vector.load %arg7[%c0, %c0_1] : memref<8x32xf32, #tpu.memory_space<vmem>>, vector<8x32xf32>
    %c0_2 = arith.constant 0 : index
    %c0_3 = arith.constant 0 : index
    %4 = vector.load %arg3[%c0_2, %c0_3] : memref<8x16xbf16, #tpu.memory_space<vmem>>, vector<8x16xbf16>
    %c0_4 = arith.constant 0 : index
    %c0_5 = arith.constant 0 : index
    %5 = vector.load %arg4[%c0_4, %c0_5] : memref<16x32xbf16, #tpu.memory_space<vmem>>, vector<16x32xbf16>
    %cst = arith.constant dense<0.000000e+00> : vector<8x32xf32>
    %6 = tpu.matmul %4, %5, %cst {dimension_numbers = #tpu.dot_dimension_numbers<[1], [0], [0], [1], [0, 0, 1, 1], [], []>} : vector<8x16xbf16>, vector<16x32xbf16>, vector<8x32xf32> -> vector<8x32xf32>
    %7 = arith.addf %3, %6 : vector<8x32xf32>
    %c0_6 = arith.constant 0 : index
    %c0_7 = arith.constant 0 : index
    %8 = vector.load %arg7[%c0_6, %c0_7] : memref<8x32xf32, #tpu.memory_space<vmem>>, vector<8x32xf32>
    tpu.vector_store %arg7[%c0_6, %c0_7], %7 {strides = array<i32>} : memref<8x32xf32, #tpu.memory_space<vmem>>, vector<8x32xf32>,
    %c0_i32_8 = arith.constant 0 : i32
    %9 = arith.cmpi eq, %arg2, %c0_i32_8 : i32
    %10 = arith.extui %9 : i1 to i32
    %c0_i32_9 = arith.constant 0 : i32
    %11 = arith.cmpi ne, %10, %c0_i32_9 : i32
    scf.if %11 {
      %c0_10 = arith.constant 0 : index
      %c0_11 = arith.constant 0 : index
      %12 = vector.load %arg7[%c0_10, %c0_11] : memref<8x32xf32, #tpu.memory_space<vmem>>, vector<8x32xf32>
      %c0_12 = arith.constant 0 : index
      %c0_13 = arith.constant 0 : index
      %13 = vector.load %arg5[%c0_12, %c0_13] : memref<1x32xf32, #tpu.memory_space<vmem>>, vector<1x32xf32>
      %14 = vector.broadcast %13 : vector<1x32xf32> to vector<8x32xf32>
      %15 = arith.addf %12, %14 : vector<8x32xf32>
      %16 = arith.truncf %15 : vector<8x32xf32> to vector<8x32xbf16>
      %c0_14 = arith.constant 0 : index
      %c0_15 = arith.constant 0 : index
      %17 = vector.load %arg6[%c0_14, %c0_15] : memref<8x32xbf16, #tpu.memory_space<vmem>>, vector<8x32xbf16>
      tpu.vector_store %arg6[%c0_14, %c0_15], %16 {strides = array<i32>} : memref<8x32xbf16, #tpu.memory_space<vmem>>, vector<8x32xbf16>,
    } else {
    }
    return
  }
  func.func @transform_0(%arg0: i32, %arg1: i32, %arg2: i32) -> (i32, i32) {
    %c0_i32 = arith.constant 0 : i32
    return %arg0, %arg2 : i32, i32
  }
  func.func @transform_1(%arg0: i32, %arg1: i32, %arg2: i32) -> (i32, i32) {
    %c0_i32 = arith.constant 0 : i32
    return %arg2, %arg1 : i32, i32
  }
  func.func @transform_2(%arg0: i32, %arg1: i32, %arg2: i32) -> (i32, i32) {
    %c0_i32 = arith.constant 0 : i32
    %c0_i32_0 = arith.constant 0 : i32
    return %c0_i32, %arg1 : i32, i32
  }
  func.func @transform_3(%arg0: i32, %arg1: i32, %arg2: i32) -> (i32, i32) {
    %c0_i32 = arith.constant 0 : i32
    return %arg0, %arg1 : i32, i32
  }
}

module attributes {stable_mosaic.version = 11 : i64} {
  func.func @_mm_affine_kernel(%arg0: i32, %arg1: i32, %arg2: i32, %arg3: memref<8x144xbf16, #tpu.memory_space<vmem>>, %arg4: memref<144x32xbf16, #tpu.memory_space<vmem>>, %arg5: memref<1x32xf32, #tpu.memory_space<vmem>>, %arg6: memref<8x32xbf16, #tpu.memory_space<vmem>>, %arg7: memref<8x32xf32, #tpu.memory_space<vmem>>) attributes {dimension_semantics = [#tpu.dimension_semantics<parallel>, #tpu.dimension_semantics<parallel>, #tpu.dimension_semantics<arbitrary>], iteration_bounds = array<i64: 1, 1, 1>, scalar_prefetch = 0 : i64, scratch_operands = 1 : i64, tpu.core_type = #tpu.core_type<tc>, window_params = [{transform_indices = @transform_0, window_bounds = array<i64: 8, 144>}, {transform_indices = @transform_1, window_bounds = array<i64: 144, 32>}, {transform_indices = @transform_2, window_bounds = array<i64: 1, 32>}, {transform_indices = @transform_3, window_bounds = array<i64: 8, 32>}]} {
    %c0_i32 = arith.constant 0 : i32
    %0 = arith.cmpi eq, %arg2, %c0_i32 : i32
    %1 = arith.extui %0 : i1 to i32
    %c0_i32_0 = arith.constant 0 : i32
    %2 = arith.cmpi ne, %1, %c0_i32_0 : i32
    scf.if %2 {
      %cst_10 = arith.constant 0.000000e+00 : f32
      %12 = vector.broadcast %cst_10 : f32 to vector<8x32xf32>
      %c0_11 = arith.constant 0 : index
      %c0_12 = arith.constant 0 : index
      %13 = vector.load %arg7[%c0_11, %c0_12] : memref<8x32xf32, #tpu.memory_space<vmem>>, vector<8x32xf32>
      tpu.vector_store %arg7[%c0_11, %c0_12], %12 {strides = array<i32>} : memref<8x32xf32, #tpu.memory_space<vmem>>, vector<8x32xf32>,
    } else {
    }
    %c0 = arith.constant 0 : index
    %c0_1 = arith.constant 0 : index
    %3 = vector.load %arg7[%c0, %c0_1] : memref<8x32xf32, #tpu.memory_space<vmem>>, vector<8x32xf32>
    %c0_2 = arith.constant 0 : index
    %c0_3 = arith.constant 0 : index
    %4 = vector.load %arg3[%c0_2, %c0_3] : memref<8x144xbf16, #tpu.memory_space<vmem>>, vector<8x144xbf16>
    %c0_4 = arith.constant 0 : index
    %c0_5 = arith.constant 0 : index
    %5 = vector.load %arg4[%c0_4, %c0_5] : memref<144x32xbf16, #tpu.memory_space<vmem>>, vector<144x32xbf16>
    %cst = arith.constant dense<0.000000e+00> : vector<8x32xf32>
    %6 = tpu.matmul %4, %5, %cst {dimension_numbers = #tpu.dot_dimension_numbers<[1], [0], [0], [1], [0, 0, 1, 1], [], []>} : vector<8x144xbf16>, vector<144x32xbf16>, vector<8x32xf32> -> vector<8x32xf32>
    %7 = arith.addf %3, %6 : vector<8x32xf32>
    %c0_6 = arith.constant 0 : index
    %c0_7 = arith.constant 0 : index
    %8 = vector.load %arg7[%c0_6, %c0_7] : memref<8x32xf32, #tpu.memory_space<vmem>>, vector<8x32xf32>
    tpu.vector_store %arg7[%c0_6, %c0_7], %7 {strides = array<i32>} : memref<8x32xf32, #tpu.memory_space<vmem>>, vector<8x32xf32>,
    %c0_i32_8 = arith.constant 0 : i32
    %9 = arith.cmpi eq, %arg2, %c0_i32_8 : i32
    %10 = arith.extui %9 : i1 to i32
    %c0_i32_9 = arith.constant 0 : i32
    %11 = arith.cmpi ne, %10, %c0_i32_9 : i32
    scf.if %11 {
      %c0_10 = arith.constant 0 : index
      %c0_11 = arith.constant 0 : index
      %12 = vector.load %arg7[%c0_10, %c0_11] : memref<8x32xf32, #tpu.memory_space<vmem>>, vector<8x32xf32>
      %c0_12 = arith.constant 0 : index
      %c0_13 = arith.constant 0 : index
      %13 = vector.load %arg5[%c0_12, %c0_13] : memref<1x32xf32, #tpu.memory_space<vmem>>, vector<1x32xf32>
      %14 = vector.broadcast %13 : vector<1x32xf32> to vector<8x32xf32>
      %15 = arith.addf %12, %14 : vector<8x32xf32>
      %cst_14 = arith.constant 0.000000e+00 : f32
      %16 = vector.broadcast %cst_14 : f32 to vector<8x32xf32>
      %17 = arith.maximumf %15, %16 : vector<8x32xf32>
      %18 = arith.truncf %17 : vector<8x32xf32> to vector<8x32xbf16>
      %c0_15 = arith.constant 0 : index
      %c0_16 = arith.constant 0 : index
      %19 = vector.load %arg6[%c0_15, %c0_16] : memref<8x32xbf16, #tpu.memory_space<vmem>>, vector<8x32xbf16>
      tpu.vector_store %arg6[%c0_15, %c0_16], %18 {strides = array<i32>} : memref<8x32xbf16, #tpu.memory_space<vmem>>, vector<8x32xbf16>,
    } else {
    }
    return
  }
  func.func @transform_0(%arg0: i32, %arg1: i32, %arg2: i32) -> (i32, i32) {
    %c0_i32 = arith.constant 0 : i32
    return %arg0, %arg2 : i32, i32
  }
  func.func @transform_1(%arg0: i32, %arg1: i32, %arg2: i32) -> (i32, i32) {
    %c0_i32 = arith.constant 0 : i32
    return %arg2, %arg1 : i32, i32
  }
  func.func @transform_2(%arg0: i32, %arg1: i32, %arg2: i32) -> (i32, i32) {
    %c0_i32 = arith.constant 0 : i32
    %c0_i32_0 = arith.constant 0 : i32
    return %c0_i32, %arg1 : i32, i32
  }
  func.func @transform_3(%arg0: i32, %arg1: i32, %arg2: i32) -> (i32, i32) {
    %c0_i32 = arith.constant 0 : i32
    return %arg0, %arg1 : i32, i32
  }
}

module attributes {stable_mosaic.version = 11 : i64} {
  func.func @_mm_affine_kernel(%arg0: i32, %arg1: i32, %arg2: i32, %arg3: memref<8x256xbf16, #tpu.memory_space<vmem>>, %arg4: memref<256x32xbf16, #tpu.memory_space<vmem>>, %arg5: memref<1x32xf32, #tpu.memory_space<vmem>>, %arg6: memref<8x32xbf16, #tpu.memory_space<vmem>>, %arg7: memref<8x32xbf16, #tpu.memory_space<vmem>>, %arg8: memref<8x32xf32, #tpu.memory_space<vmem>>) attributes {dimension_semantics = [#tpu.dimension_semantics<parallel>, #tpu.dimension_semantics<parallel>, #tpu.dimension_semantics<arbitrary>], iteration_bounds = array<i64: 1, 1, 2>, scalar_prefetch = 0 : i64, scratch_operands = 1 : i64, tpu.core_type = #tpu.core_type<tc>, window_params = [{transform_indices = @transform_0, window_bounds = array<i64: 8, 256>}, {transform_indices = @transform_1, window_bounds = array<i64: 256, 32>}, {transform_indices = @transform_2, window_bounds = array<i64: 1, 32>}, {transform_indices = @transform_3, window_bounds = array<i64: 8, 32>}, {transform_indices = @transform_4, window_bounds = array<i64: 8, 32>}]} {
    %c0_i32 = arith.constant 0 : i32
    %0 = arith.cmpi eq, %arg2, %c0_i32 : i32
    %1 = arith.extui %0 : i1 to i32
    %c0_i32_0 = arith.constant 0 : i32
    %2 = arith.cmpi ne, %1, %c0_i32_0 : i32
    scf.if %2 {
      %cst_9 = arith.constant 0.000000e+00 : f32
      %12 = vector.broadcast %cst_9 : f32 to vector<8x32xf32>
      %c0_10 = arith.constant 0 : index
      %c0_11 = arith.constant 0 : index
      %13 = vector.load %arg8[%c0_10, %c0_11] : memref<8x32xf32, #tpu.memory_space<vmem>>, vector<8x32xf32>
      tpu.vector_store %arg8[%c0_10, %c0_11], %12 {strides = array<i32>} : memref<8x32xf32, #tpu.memory_space<vmem>>, vector<8x32xf32>,
    } else {
    }
    %c0 = arith.constant 0 : index
    %c0_1 = arith.constant 0 : index
    %3 = vector.load %arg8[%c0, %c0_1] : memref<8x32xf32, #tpu.memory_space<vmem>>, vector<8x32xf32>
    %c0_2 = arith.constant 0 : index
    %c0_3 = arith.constant 0 : index
    %4 = vector.load %arg3[%c0_2, %c0_3] : memref<8x256xbf16, #tpu.memory_space<vmem>>, vector<8x256xbf16>
    %c0_4 = arith.constant 0 : index
    %c0_5 = arith.constant 0 : index
    %5 = vector.load %arg4[%c0_4, %c0_5] : memref<256x32xbf16, #tpu.memory_space<vmem>>, vector<256x32xbf16>
    %cst = arith.constant dense<0.000000e+00> : vector<8x32xf32>
    %6 = tpu.matmul %4, %5, %cst {dimension_numbers = #tpu.dot_dimension_numbers<[1], [0], [0], [1], [0, 0, 1, 1], [], []>} : vector<8x256xbf16>, vector<256x32xbf16>, vector<8x32xf32> -> vector<8x32xf32>
    %7 = arith.addf %3, %6 : vector<8x32xf32>
    %c0_6 = arith.constant 0 : index
    %c0_7 = arith.constant 0 : index
    %8 = vector.load %arg8[%c0_6, %c0_7] : memref<8x32xf32, #tpu.memory_space<vmem>>, vector<8x32xf32>
    tpu.vector_store %arg8[%c0_6, %c0_7], %7 {strides = array<i32>} : memref<8x32xf32, #tpu.memory_space<vmem>>, vector<8x32xf32>,
    %c1_i32 = arith.constant 1 : i32
    %9 = arith.cmpi eq, %arg2, %c1_i32 : i32
    %10 = arith.extui %9 : i1 to i32
    %c0_i32_8 = arith.constant 0 : i32
    %11 = arith.cmpi ne, %10, %c0_i32_8 : i32
    scf.if %11 {
      %c0_9 = arith.constant 0 : index
      %c0_10 = arith.constant 0 : index
      %12 = vector.load %arg8[%c0_9, %c0_10] : memref<8x32xf32, #tpu.memory_space<vmem>>, vector<8x32xf32>
      %c0_11 = arith.constant 0 : index
      %c0_12 = arith.constant 0 : index
      %13 = vector.load %arg5[%c0_11, %c0_12] : memref<1x32xf32, #tpu.memory_space<vmem>>, vector<1x32xf32>
      %14 = vector.broadcast %13 : vector<1x32xf32> to vector<8x32xf32>
      %15 = arith.addf %12, %14 : vector<8x32xf32>
      %c0_13 = arith.constant 0 : index
      %c0_14 = arith.constant 0 : index
      %16 = vector.load %arg6[%c0_13, %c0_14] : memref<8x32xbf16, #tpu.memory_space<vmem>>, vector<8x32xbf16>
      %17 = arith.extf %16 : vector<8x32xbf16> to vector<8x32xf32>
      %18 = arith.addf %15, %17 : vector<8x32xf32>
      %cst_15 = arith.constant 0.000000e+00 : f32
      %19 = vector.broadcast %cst_15 : f32 to vector<8x32xf32>
      %20 = arith.maximumf %18, %19 : vector<8x32xf32>
      %21 = arith.truncf %20 : vector<8x32xf32> to vector<8x32xbf16>
      %c0_16 = arith.constant 0 : index
      %c0_17 = arith.constant 0 : index
      %22 = vector.load %arg7[%c0_16, %c0_17] : memref<8x32xbf16, #tpu.memory_space<vmem>>, vector<8x32xbf16>
      tpu.vector_store %arg7[%c0_16, %c0_17], %21 {strides = array<i32>} : memref<8x32xbf16, #tpu.memory_space<vmem>>, vector<8x32xbf16>,
    } else {
    }
    return
  }
  func.func @transform_0(%arg0: i32, %arg1: i32, %arg2: i32) -> (i32, i32) {
    %c0_i32 = arith.constant 0 : i32
    return %arg0, %arg2 : i32, i32
  }
  func.func @transform_1(%arg0: i32, %arg1: i32, %arg2: i32) -> (i32, i32) {
    %c0_i32 = arith.constant 0 : i32
    return %arg2, %arg1 : i32, i32
  }
  func.func @transform_2(%arg0: i32, %arg1: i32, %arg2: i32) -> (i32, i32) {
    %c0_i32 = arith.constant 0 : i32
    %c0_i32_0 = arith.constant 0 : i32
    return %c0_i32, %arg1 : i32, i32
  }
  func.func @transform_3(%arg0: i32, %arg1: i32, %arg2: i32) -> (i32, i32) {
    %c0_i32 = arith.constant 0 : i32
    return %arg0, %arg1 : i32, i32
  }
  func.func @transform_4(%arg0: i32, %arg1: i32, %arg2: i32) -> (i32, i32) {
    %c0_i32 = arith.constant 0 : i32
    return %arg0, %arg1 : i32, i32
  }
}

module attributes {stable_mosaic.version = 11 : i64} {
  func.func @_mm_affine_kernel(%arg0: i32, %arg1: i32, %arg2: i32, %arg3: memref<8x256xbf16, #tpu.memory_space<vmem>>, %arg4: memref<256x32xbf16, #tpu.memory_space<vmem>>, %arg5: memref<1x32xf32, #tpu.memory_space<vmem>>, %arg6: memref<8x32xbf16, #tpu.memory_space<vmem>>, %arg7: memref<8x32xf32, #tpu.memory_space<vmem>>) attributes {dimension_semantics = [#tpu.dimension_semantics<parallel>, #tpu.dimension_semantics<parallel>, #tpu.dimension_semantics<arbitrary>], iteration_bounds = array<i64: 1, 1, 2>, scalar_prefetch = 0 : i64, scratch_operands = 1 : i64, tpu.core_type = #tpu.core_type<tc>, window_params = [{transform_indices = @transform_0, window_bounds = array<i64: 8, 256>}, {transform_indices = @transform_1, window_bounds = array<i64: 256, 32>}, {transform_indices = @transform_2, window_bounds = array<i64: 1, 32>}, {transform_indices = @transform_3, window_bounds = array<i64: 8, 32>}]} {
    %c0_i32 = arith.constant 0 : i32
    %0 = arith.cmpi eq, %arg2, %c0_i32 : i32
    %1 = arith.extui %0 : i1 to i32
    %c0_i32_0 = arith.constant 0 : i32
    %2 = arith.cmpi ne, %1, %c0_i32_0 : i32
    scf.if %2 {
      %cst_9 = arith.constant 0.000000e+00 : f32
      %12 = vector.broadcast %cst_9 : f32 to vector<8x32xf32>
      %c0_10 = arith.constant 0 : index
      %c0_11 = arith.constant 0 : index
      %13 = vector.load %arg7[%c0_10, %c0_11] : memref<8x32xf32, #tpu.memory_space<vmem>>, vector<8x32xf32>
      tpu.vector_store %arg7[%c0_10, %c0_11], %12 {strides = array<i32>} : memref<8x32xf32, #tpu.memory_space<vmem>>, vector<8x32xf32>,
    } else {
    }
    %c0 = arith.constant 0 : index
    %c0_1 = arith.constant 0 : index
    %3 = vector.load %arg7[%c0, %c0_1] : memref<8x32xf32, #tpu.memory_space<vmem>>, vector<8x32xf32>
    %c0_2 = arith.constant 0 : index
    %c0_3 = arith.constant 0 : index
    %4 = vector.load %arg3[%c0_2, %c0_3] : memref<8x256xbf16, #tpu.memory_space<vmem>>, vector<8x256xbf16>
    %c0_4 = arith.constant 0 : index
    %c0_5 = arith.constant 0 : index
    %5 = vector.load %arg4[%c0_4, %c0_5] : memref<256x32xbf16, #tpu.memory_space<vmem>>, vector<256x32xbf16>
    %cst = arith.constant dense<0.000000e+00> : vector<8x32xf32>
    %6 = tpu.matmul %4, %5, %cst {dimension_numbers = #tpu.dot_dimension_numbers<[1], [0], [0], [1], [0, 0, 1, 1], [], []>} : vector<8x256xbf16>, vector<256x32xbf16>, vector<8x32xf32> -> vector<8x32xf32>
    %7 = arith.addf %3, %6 : vector<8x32xf32>
    %c0_6 = arith.constant 0 : index
    %c0_7 = arith.constant 0 : index
    %8 = vector.load %arg7[%c0_6, %c0_7] : memref<8x32xf32, #tpu.memory_space<vmem>>, vector<8x32xf32>
    tpu.vector_store %arg7[%c0_6, %c0_7], %7 {strides = array<i32>} : memref<8x32xf32, #tpu.memory_space<vmem>>, vector<8x32xf32>,
    %c1_i32 = arith.constant 1 : i32
    %9 = arith.cmpi eq, %arg2, %c1_i32 : i32
    %10 = arith.extui %9 : i1 to i32
    %c0_i32_8 = arith.constant 0 : i32
    %11 = arith.cmpi ne, %10, %c0_i32_8 : i32
    scf.if %11 {
      %c0_9 = arith.constant 0 : index
      %c0_10 = arith.constant 0 : index
      %12 = vector.load %arg7[%c0_9, %c0_10] : memref<8x32xf32, #tpu.memory_space<vmem>>, vector<8x32xf32>
      %c0_11 = arith.constant 0 : index
      %c0_12 = arith.constant 0 : index
      %13 = vector.load %arg5[%c0_11, %c0_12] : memref<1x32xf32, #tpu.memory_space<vmem>>, vector<1x32xf32>
      %14 = vector.broadcast %13 : vector<1x32xf32> to vector<8x32xf32>
      %15 = arith.addf %12, %14 : vector<8x32xf32>
      %cst_13 = arith.constant 0.000000e+00 : f32
      %16 = vector.broadcast %cst_13 : f32 to vector<8x32xf32>
      %17 = arith.maximumf %15, %16 : vector<8x32xf32>
      %18 = arith.truncf %17 : vector<8x32xf32> to vector<8x32xbf16>
      %c0_14 = arith.constant 0 : index
      %c0_15 = arith.constant 0 : index
      %19 = vector.load %arg6[%c0_14, %c0_15] : memref<8x32xbf16, #tpu.memory_space<vmem>>, vector<8x32xbf16>
      tpu.vector_store %arg6[%c0_14, %c0_15], %18 {strides = array<i32>} : memref<8x32xbf16, #tpu.memory_space<vmem>>, vector<8x32xbf16>,
    } else {
    }
    return
  }
  func.func @transform_0(%arg0: i32, %arg1: i32, %arg2: i32) -> (i32, i32) {
    %c0_i32 = arith.constant 0 : i32
    return %arg0, %arg2 : i32, i32
  }
  func.func @transform_1(%arg0: i32, %arg1: i32, %arg2: i32) -> (i32, i32) {
    %c0_i32 = arith.constant 0 : i32
    return %arg2, %arg1 : i32, i32
  }
  func.func @transform_2(%arg0: i32, %arg1: i32, %arg2: i32) -> (i32, i32) {
    %c0_i32 = arith.constant 0 : i32
    %c0_i32_0 = arith.constant 0 : i32
    return %c0_i32, %arg1 : i32, i32
  }
  func.func @transform_3(%arg0: i32, %arg1: i32, %arg2: i32) -> (i32, i32) {
    %c0_i32 = arith.constant 0 : i32
    return %arg0, %arg1 : i32, i32
  }
}

module attributes {stable_mosaic.version = 11 : i64} {
  func.func @_mm_affine_kernel(%arg0: i32, %arg1: i32, %arg2: i32, %arg3: memref<8x256xbf16, #tpu.memory_space<vmem>>, %arg4: memref<256x64xbf16, #tpu.memory_space<vmem>>, %arg5: memref<1x64xf32, #tpu.memory_space<vmem>>, %arg6: memref<8x64xbf16, #tpu.memory_space<vmem>>, %arg7: memref<8x64xf32, #tpu.memory_space<vmem>>) attributes {dimension_semantics = [#tpu.dimension_semantics<parallel>, #tpu.dimension_semantics<parallel>, #tpu.dimension_semantics<arbitrary>], iteration_bounds = array<i64: 1, 1, 2>, scalar_prefetch = 0 : i64, scratch_operands = 1 : i64, tpu.core_type = #tpu.core_type<tc>, window_params = [{transform_indices = @transform_0, window_bounds = array<i64: 8, 256>}, {transform_indices = @transform_1, window_bounds = array<i64: 256, 64>}, {transform_indices = @transform_2, window_bounds = array<i64: 1, 64>}, {transform_indices = @transform_3, window_bounds = array<i64: 8, 64>}]} {
    %c0_i32 = arith.constant 0 : i32
    %0 = arith.cmpi eq, %arg2, %c0_i32 : i32
    %1 = arith.extui %0 : i1 to i32
    %c0_i32_0 = arith.constant 0 : i32
    %2 = arith.cmpi ne, %1, %c0_i32_0 : i32
    scf.if %2 {
      %cst_9 = arith.constant 0.000000e+00 : f32
      %12 = vector.broadcast %cst_9 : f32 to vector<8x64xf32>
      %c0_10 = arith.constant 0 : index
      %c0_11 = arith.constant 0 : index
      %13 = vector.load %arg7[%c0_10, %c0_11] : memref<8x64xf32, #tpu.memory_space<vmem>>, vector<8x64xf32>
      tpu.vector_store %arg7[%c0_10, %c0_11], %12 {strides = array<i32>} : memref<8x64xf32, #tpu.memory_space<vmem>>, vector<8x64xf32>,
    } else {
    }
    %c0 = arith.constant 0 : index
    %c0_1 = arith.constant 0 : index
    %3 = vector.load %arg7[%c0, %c0_1] : memref<8x64xf32, #tpu.memory_space<vmem>>, vector<8x64xf32>
    %c0_2 = arith.constant 0 : index
    %c0_3 = arith.constant 0 : index
    %4 = vector.load %arg3[%c0_2, %c0_3] : memref<8x256xbf16, #tpu.memory_space<vmem>>, vector<8x256xbf16>
    %c0_4 = arith.constant 0 : index
    %c0_5 = arith.constant 0 : index
    %5 = vector.load %arg4[%c0_4, %c0_5] : memref<256x64xbf16, #tpu.memory_space<vmem>>, vector<256x64xbf16>
    %cst = arith.constant dense<0.000000e+00> : vector<8x64xf32>
    %6 = tpu.matmul %4, %5, %cst {dimension_numbers = #tpu.dot_dimension_numbers<[1], [0], [0], [1], [0, 0, 1, 1], [], []>} : vector<8x256xbf16>, vector<256x64xbf16>, vector<8x64xf32> -> vector<8x64xf32>
    %7 = arith.addf %3, %6 : vector<8x64xf32>
    %c0_6 = arith.constant 0 : index
    %c0_7 = arith.constant 0 : index
    %8 = vector.load %arg7[%c0_6, %c0_7] : memref<8x64xf32, #tpu.memory_space<vmem>>, vector<8x64xf32>
    tpu.vector_store %arg7[%c0_6, %c0_7], %7 {strides = array<i32>} : memref<8x64xf32, #tpu.memory_space<vmem>>, vector<8x64xf32>,
    %c1_i32 = arith.constant 1 : i32
    %9 = arith.cmpi eq, %arg2, %c1_i32 : i32
    %10 = arith.extui %9 : i1 to i32
    %c0_i32_8 = arith.constant 0 : i32
    %11 = arith.cmpi ne, %10, %c0_i32_8 : i32
    scf.if %11 {
      %c0_9 = arith.constant 0 : index
      %c0_10 = arith.constant 0 : index
      %12 = vector.load %arg7[%c0_9, %c0_10] : memref<8x64xf32, #tpu.memory_space<vmem>>, vector<8x64xf32>
      %c0_11 = arith.constant 0 : index
      %c0_12 = arith.constant 0 : index
      %13 = vector.load %arg5[%c0_11, %c0_12] : memref<1x64xf32, #tpu.memory_space<vmem>>, vector<1x64xf32>
      %14 = vector.broadcast %13 : vector<1x64xf32> to vector<8x64xf32>
      %15 = arith.addf %12, %14 : vector<8x64xf32>
      %cst_13 = arith.constant 0.000000e+00 : f32
      %16 = vector.broadcast %cst_13 : f32 to vector<8x64xf32>
      %17 = arith.maximumf %15, %16 : vector<8x64xf32>
      %18 = arith.truncf %17 : vector<8x64xf32> to vector<8x64xbf16>
      %c0_14 = arith.constant 0 : index
      %c0_15 = arith.constant 0 : index
      %19 = vector.load %arg6[%c0_14, %c0_15] : memref<8x64xbf16, #tpu.memory_space<vmem>>, vector<8x64xbf16>
      tpu.vector_store %arg6[%c0_14, %c0_15], %18 {strides = array<i32>} : memref<8x64xbf16, #tpu.memory_space<vmem>>, vector<8x64xbf16>,
    } else {
    }
    return
  }
  func.func @transform_0(%arg0: i32, %arg1: i32, %arg2: i32) -> (i32, i32) {
    %c0_i32 = arith.constant 0 : i32
    return %arg0, %arg2 : i32, i32
  }
  func.func @transform_1(%arg0: i32, %arg1: i32, %arg2: i32) -> (i32, i32) {
    %c0_i32 = arith.constant 0 : i32
    return %arg2, %arg1 : i32, i32
  }
  func.func @transform_2(%arg0: i32, %arg1: i32, %arg2: i32) -> (i32, i32) {
    %c0_i32 = arith.constant 0 : i32
    %c0_i32_0 = arith.constant 0 : i32
    return %c0_i32, %arg1 : i32, i32
  }
  func.func @transform_3(%arg0: i32, %arg1: i32, %arg2: i32) -> (i32, i32) {
    %c0_i32 = arith.constant 0 : i32
    return %arg0, %arg1 : i32, i32
  }
}

module attributes {stable_mosaic.version = 11 : i64} {
  func.func @_mm_affine_kernel(%arg0: i32, %arg1: i32, %arg2: i32, %arg3: memref<8x32xbf16, #tpu.memory_space<vmem>>, %arg4: memref<32x64xbf16, #tpu.memory_space<vmem>>, %arg5: memref<1x64xf32, #tpu.memory_space<vmem>>, %arg6: memref<8x64xbf16, #tpu.memory_space<vmem>>, %arg7: memref<8x64xf32, #tpu.memory_space<vmem>>) attributes {dimension_semantics = [#tpu.dimension_semantics<parallel>, #tpu.dimension_semantics<parallel>, #tpu.dimension_semantics<arbitrary>], iteration_bounds = array<i64: 1, 1, 1>, scalar_prefetch = 0 : i64, scratch_operands = 1 : i64, tpu.core_type = #tpu.core_type<tc>, window_params = [{transform_indices = @transform_0, window_bounds = array<i64: 8, 32>}, {transform_indices = @transform_1, window_bounds = array<i64: 32, 64>}, {transform_indices = @transform_2, window_bounds = array<i64: 1, 64>}, {transform_indices = @transform_3, window_bounds = array<i64: 8, 64>}]} {
    %c0_i32 = arith.constant 0 : i32
    %0 = arith.cmpi eq, %arg2, %c0_i32 : i32
    %1 = arith.extui %0 : i1 to i32
    %c0_i32_0 = arith.constant 0 : i32
    %2 = arith.cmpi ne, %1, %c0_i32_0 : i32
    scf.if %2 {
      %cst_10 = arith.constant 0.000000e+00 : f32
      %12 = vector.broadcast %cst_10 : f32 to vector<8x64xf32>
      %c0_11 = arith.constant 0 : index
      %c0_12 = arith.constant 0 : index
      %13 = vector.load %arg7[%c0_11, %c0_12] : memref<8x64xf32, #tpu.memory_space<vmem>>, vector<8x64xf32>
      tpu.vector_store %arg7[%c0_11, %c0_12], %12 {strides = array<i32>} : memref<8x64xf32, #tpu.memory_space<vmem>>, vector<8x64xf32>,
    } else {
    }
    %c0 = arith.constant 0 : index
    %c0_1 = arith.constant 0 : index
    %3 = vector.load %arg7[%c0, %c0_1] : memref<8x64xf32, #tpu.memory_space<vmem>>, vector<8x64xf32>
    %c0_2 = arith.constant 0 : index
    %c0_3 = arith.constant 0 : index
    %4 = vector.load %arg3[%c0_2, %c0_3] : memref<8x32xbf16, #tpu.memory_space<vmem>>, vector<8x32xbf16>
    %c0_4 = arith.constant 0 : index
    %c0_5 = arith.constant 0 : index
    %5 = vector.load %arg4[%c0_4, %c0_5] : memref<32x64xbf16, #tpu.memory_space<vmem>>, vector<32x64xbf16>
    %cst = arith.constant dense<0.000000e+00> : vector<8x64xf32>
    %6 = tpu.matmul %4, %5, %cst {dimension_numbers = #tpu.dot_dimension_numbers<[1], [0], [0], [1], [0, 0, 1, 1], [], []>} : vector<8x32xbf16>, vector<32x64xbf16>, vector<8x64xf32> -> vector<8x64xf32>
    %7 = arith.addf %3, %6 : vector<8x64xf32>
    %c0_6 = arith.constant 0 : index
    %c0_7 = arith.constant 0 : index
    %8 = vector.load %arg7[%c0_6, %c0_7] : memref<8x64xf32, #tpu.memory_space<vmem>>, vector<8x64xf32>
    tpu.vector_store %arg7[%c0_6, %c0_7], %7 {strides = array<i32>} : memref<8x64xf32, #tpu.memory_space<vmem>>, vector<8x64xf32>,
    %c0_i32_8 = arith.constant 0 : i32
    %9 = arith.cmpi eq, %arg2, %c0_i32_8 : i32
    %10 = arith.extui %9 : i1 to i32
    %c0_i32_9 = arith.constant 0 : i32
    %11 = arith.cmpi ne, %10, %c0_i32_9 : i32
    scf.if %11 {
      %c0_10 = arith.constant 0 : index
      %c0_11 = arith.constant 0 : index
      %12 = vector.load %arg7[%c0_10, %c0_11] : memref<8x64xf32, #tpu.memory_space<vmem>>, vector<8x64xf32>
      %c0_12 = arith.constant 0 : index
      %c0_13 = arith.constant 0 : index
      %13 = vector.load %arg5[%c0_12, %c0_13] : memref<1x64xf32, #tpu.memory_space<vmem>>, vector<1x64xf32>
      %14 = vector.broadcast %13 : vector<1x64xf32> to vector<8x64xf32>
      %15 = arith.addf %12, %14 : vector<8x64xf32>
      %16 = arith.truncf %15 : vector<8x64xf32> to vector<8x64xbf16>
      %c0_14 = arith.constant 0 : index
      %c0_15 = arith.constant 0 : index
      %17 = vector.load %arg6[%c0_14, %c0_15] : memref<8x64xbf16, #tpu.memory_space<vmem>>, vector<8x64xbf16>
      tpu.vector_store %arg6[%c0_14, %c0_15], %16 {strides = array<i32>} : memref<8x64xbf16, #tpu.memory_space<vmem>>, vector<8x64xbf16>,
    } else {
    }
    return
  }
  func.func @transform_0(%arg0: i32, %arg1: i32, %arg2: i32) -> (i32, i32) {
    %c0_i32 = arith.constant 0 : i32
    return %arg0, %arg2 : i32, i32
  }
  func.func @transform_1(%arg0: i32, %arg1: i32, %arg2: i32) -> (i32, i32) {
    %c0_i32 = arith.constant 0 : i32
    return %arg2, %arg1 : i32, i32
  }
  func.func @transform_2(%arg0: i32, %arg1: i32, %arg2: i32) -> (i32, i32) {
    %c0_i32 = arith.constant 0 : i32
    %c0_i32_0 = arith.constant 0 : i32
    return %c0_i32, %arg1 : i32, i32
  }
  func.func @transform_3(%arg0: i32, %arg1: i32, %arg2: i32) -> (i32, i32) {
    %c0_i32 = arith.constant 0 : i32
    return %arg0, %arg1 : i32, i32
  }
}

module attributes {stable_mosaic.version = 11 : i64} {
  func.func @_mm_affine_kernel(%arg0: i32, %arg1: i32, %arg2: i32, %arg3: memref<8x256xbf16, #tpu.memory_space<vmem>>, %arg4: memref<256x64xbf16, #tpu.memory_space<vmem>>, %arg5: memref<1x64xf32, #tpu.memory_space<vmem>>, %arg6: memref<8x64xbf16, #tpu.memory_space<vmem>>, %arg7: memref<8x64xbf16, #tpu.memory_space<vmem>>, %arg8: memref<8x64xf32, #tpu.memory_space<vmem>>) attributes {dimension_semantics = [#tpu.dimension_semantics<parallel>, #tpu.dimension_semantics<parallel>, #tpu.dimension_semantics<arbitrary>], iteration_bounds = array<i64: 1, 1, 3>, scalar_prefetch = 0 : i64, scratch_operands = 1 : i64, tpu.core_type = #tpu.core_type<tc>, window_params = [{transform_indices = @transform_0, window_bounds = array<i64: 8, 256>}, {transform_indices = @transform_1, window_bounds = array<i64: 256, 64>}, {transform_indices = @transform_2, window_bounds = array<i64: 1, 64>}, {transform_indices = @transform_3, window_bounds = array<i64: 8, 64>}, {transform_indices = @transform_4, window_bounds = array<i64: 8, 64>}]} {
    %c0_i32 = arith.constant 0 : i32
    %0 = arith.cmpi eq, %arg2, %c0_i32 : i32
    %1 = arith.extui %0 : i1 to i32
    %c0_i32_0 = arith.constant 0 : i32
    %2 = arith.cmpi ne, %1, %c0_i32_0 : i32
    scf.if %2 {
      %cst_9 = arith.constant 0.000000e+00 : f32
      %12 = vector.broadcast %cst_9 : f32 to vector<8x64xf32>
      %c0_10 = arith.constant 0 : index
      %c0_11 = arith.constant 0 : index
      %13 = vector.load %arg8[%c0_10, %c0_11] : memref<8x64xf32, #tpu.memory_space<vmem>>, vector<8x64xf32>
      tpu.vector_store %arg8[%c0_10, %c0_11], %12 {strides = array<i32>} : memref<8x64xf32, #tpu.memory_space<vmem>>, vector<8x64xf32>,
    } else {
    }
    %c0 = arith.constant 0 : index
    %c0_1 = arith.constant 0 : index
    %3 = vector.load %arg8[%c0, %c0_1] : memref<8x64xf32, #tpu.memory_space<vmem>>, vector<8x64xf32>
    %c0_2 = arith.constant 0 : index
    %c0_3 = arith.constant 0 : index
    %4 = vector.load %arg3[%c0_2, %c0_3] : memref<8x256xbf16, #tpu.memory_space<vmem>>, vector<8x256xbf16>
    %c0_4 = arith.constant 0 : index
    %c0_5 = arith.constant 0 : index
    %5 = vector.load %arg4[%c0_4, %c0_5] : memref<256x64xbf16, #tpu.memory_space<vmem>>, vector<256x64xbf16>
    %cst = arith.constant dense<0.000000e+00> : vector<8x64xf32>
    %6 = tpu.matmul %4, %5, %cst {dimension_numbers = #tpu.dot_dimension_numbers<[1], [0], [0], [1], [0, 0, 1, 1], [], []>} : vector<8x256xbf16>, vector<256x64xbf16>, vector<8x64xf32> -> vector<8x64xf32>
    %7 = arith.addf %3, %6 : vector<8x64xf32>
    %c0_6 = arith.constant 0 : index
    %c0_7 = arith.constant 0 : index
    %8 = vector.load %arg8[%c0_6, %c0_7] : memref<8x64xf32, #tpu.memory_space<vmem>>, vector<8x64xf32>
    tpu.vector_store %arg8[%c0_6, %c0_7], %7 {strides = array<i32>} : memref<8x64xf32, #tpu.memory_space<vmem>>, vector<8x64xf32>,
    %c2_i32 = arith.constant 2 : i32
    %9 = arith.cmpi eq, %arg2, %c2_i32 : i32
    %10 = arith.extui %9 : i1 to i32
    %c0_i32_8 = arith.constant 0 : i32
    %11 = arith.cmpi ne, %10, %c0_i32_8 : i32
    scf.if %11 {
      %c0_9 = arith.constant 0 : index
      %c0_10 = arith.constant 0 : index
      %12 = vector.load %arg8[%c0_9, %c0_10] : memref<8x64xf32, #tpu.memory_space<vmem>>, vector<8x64xf32>
      %c0_11 = arith.constant 0 : index
      %c0_12 = arith.constant 0 : index
      %13 = vector.load %arg5[%c0_11, %c0_12] : memref<1x64xf32, #tpu.memory_space<vmem>>, vector<1x64xf32>
      %14 = vector.broadcast %13 : vector<1x64xf32> to vector<8x64xf32>
      %15 = arith.addf %12, %14 : vector<8x64xf32>
      %c0_13 = arith.constant 0 : index
      %c0_14 = arith.constant 0 : index
      %16 = vector.load %arg6[%c0_13, %c0_14] : memref<8x64xbf16, #tpu.memory_space<vmem>>, vector<8x64xbf16>
      %17 = arith.extf %16 : vector<8x64xbf16> to vector<8x64xf32>
      %18 = arith.addf %15, %17 : vector<8x64xf32>
      %cst_15 = arith.constant 0.000000e+00 : f32
      %19 = vector.broadcast %cst_15 : f32 to vector<8x64xf32>
      %20 = arith.maximumf %18, %19 : vector<8x64xf32>
      %21 = arith.truncf %20 : vector<8x64xf32> to vector<8x64xbf16>
      %c0_16 = arith.constant 0 : index
      %c0_17 = arith.constant 0 : index
      %22 = vector.load %arg7[%c0_16, %c0_17] : memref<8x64xbf16, #tpu.memory_space<vmem>>, vector<8x64xbf16>
      tpu.vector_store %arg7[%c0_16, %c0_17], %21 {strides = array<i32>} : memref<8x64xbf16, #tpu.memory_space<vmem>>, vector<8x64xbf16>,
    } else {
    }
    return
  }
  func.func @transform_0(%arg0: i32, %arg1: i32, %arg2: i32) -> (i32, i32) {
    %c0_i32 = arith.constant 0 : i32
    return %arg0, %arg2 : i32, i32
  }
  func.func @transform_1(%arg0: i32, %arg1: i32, %arg2: i32) -> (i32, i32) {
    %c0_i32 = arith.constant 0 : i32
    return %arg2, %arg1 : i32, i32
  }
  func.func @transform_2(%arg0: i32, %arg1: i32, %arg2: i32) -> (i32, i32) {
    %c0_i32 = arith.constant 0 : i32
    %c0_i32_0 = arith.constant 0 : i32
    return %c0_i32, %arg1 : i32, i32
  }
  func.func @transform_3(%arg0: i32, %arg1: i32, %arg2: i32) -> (i32, i32) {
    %c0_i32 = arith.constant 0 : i32
    return %arg0, %arg1 : i32, i32
  }
  func.func @transform_4(%arg0: i32, %arg1: i32, %arg2: i32) -> (i32, i32) {
    %c0_i32 = arith.constant 0 : i32
    return %arg0, %arg1 : i32, i32
  }
}

module attributes {stable_mosaic.version = 11 : i64} {
  func.func @_mm_affine_kernel(%arg0: i32, %arg1: i32, %arg2: i32, %arg3: memref<8x256xbf16, #tpu.memory_space<vmem>>, %arg4: memref<256x64xbf16, #tpu.memory_space<vmem>>, %arg5: memref<1x64xf32, #tpu.memory_space<vmem>>, %arg6: memref<8x64xbf16, #tpu.memory_space<vmem>>, %arg7: memref<8x64xf32, #tpu.memory_space<vmem>>) attributes {dimension_semantics = [#tpu.dimension_semantics<parallel>, #tpu.dimension_semantics<parallel>, #tpu.dimension_semantics<arbitrary>], iteration_bounds = array<i64: 1, 1, 3>, scalar_prefetch = 0 : i64, scratch_operands = 1 : i64, tpu.core_type = #tpu.core_type<tc>, window_params = [{transform_indices = @transform_0, window_bounds = array<i64: 8, 256>}, {transform_indices = @transform_1, window_bounds = array<i64: 256, 64>}, {transform_indices = @transform_2, window_bounds = array<i64: 1, 64>}, {transform_indices = @transform_3, window_bounds = array<i64: 8, 64>}]} {
    %c0_i32 = arith.constant 0 : i32
    %0 = arith.cmpi eq, %arg2, %c0_i32 : i32
    %1 = arith.extui %0 : i1 to i32
    %c0_i32_0 = arith.constant 0 : i32
    %2 = arith.cmpi ne, %1, %c0_i32_0 : i32
    scf.if %2 {
      %cst_9 = arith.constant 0.000000e+00 : f32
      %12 = vector.broadcast %cst_9 : f32 to vector<8x64xf32>
      %c0_10 = arith.constant 0 : index
      %c0_11 = arith.constant 0 : index
      %13 = vector.load %arg7[%c0_10, %c0_11] : memref<8x64xf32, #tpu.memory_space<vmem>>, vector<8x64xf32>
      tpu.vector_store %arg7[%c0_10, %c0_11], %12 {strides = array<i32>} : memref<8x64xf32, #tpu.memory_space<vmem>>, vector<8x64xf32>,
    } else {
    }
    %c0 = arith.constant 0 : index
    %c0_1 = arith.constant 0 : index
    %3 = vector.load %arg7[%c0, %c0_1] : memref<8x64xf32, #tpu.memory_space<vmem>>, vector<8x64xf32>
    %c0_2 = arith.constant 0 : index
    %c0_3 = arith.constant 0 : index
    %4 = vector.load %arg3[%c0_2, %c0_3] : memref<8x256xbf16, #tpu.memory_space<vmem>>, vector<8x256xbf16>
    %c0_4 = arith.constant 0 : index
    %c0_5 = arith.constant 0 : index
    %5 = vector.load %arg4[%c0_4, %c0_5] : memref<256x64xbf16, #tpu.memory_space<vmem>>, vector<256x64xbf16>
    %cst = arith.constant dense<0.000000e+00> : vector<8x64xf32>
    %6 = tpu.matmul %4, %5, %cst {dimension_numbers = #tpu.dot_dimension_numbers<[1], [0], [0], [1], [0, 0, 1, 1], [], []>} : vector<8x256xbf16>, vector<256x64xbf16>, vector<8x64xf32> -> vector<8x64xf32>
    %7 = arith.addf %3, %6 : vector<8x64xf32>
    %c0_6 = arith.constant 0 : index
    %c0_7 = arith.constant 0 : index
    %8 = vector.load %arg7[%c0_6, %c0_7] : memref<8x64xf32, #tpu.memory_space<vmem>>, vector<8x64xf32>
    tpu.vector_store %arg7[%c0_6, %c0_7], %7 {strides = array<i32>} : memref<8x64xf32, #tpu.memory_space<vmem>>, vector<8x64xf32>,
    %c2_i32 = arith.constant 2 : i32
    %9 = arith.cmpi eq, %arg2, %c2_i32 : i32
    %10 = arith.extui %9 : i1 to i32
    %c0_i32_8 = arith.constant 0 : i32
    %11 = arith.cmpi ne, %10, %c0_i32_8 : i32
    scf.if %11 {
      %c0_9 = arith.constant 0 : index
      %c0_10 = arith.constant 0 : index
      %12 = vector.load %arg7[%c0_9, %c0_10] : memref<8x64xf32, #tpu.memory_space<vmem>>, vector<8x64xf32>
      %c0_11 = arith.constant 0 : index
      %c0_12 = arith.constant 0 : index
      %13 = vector.load %arg5[%c0_11, %c0_12] : memref<1x64xf32, #tpu.memory_space<vmem>>, vector<1x64xf32>
      %14 = vector.broadcast %13 : vector<1x64xf32> to vector<8x64xf32>
      %15 = arith.addf %12, %14 : vector<8x64xf32>
      %cst_13 = arith.constant 0.000000e+00 : f32
      %16 = vector.broadcast %cst_13 : f32 to vector<8x64xf32>
      %17 = arith.maximumf %15, %16 : vector<8x64xf32>
      %18 = arith.truncf %17 : vector<8x64xf32> to vector<8x64xbf16>
      %c0_14 = arith.constant 0 : index
      %c0_15 = arith.constant 0 : index
      %19 = vector.load %arg6[%c0_14, %c0_15] : memref<8x64xbf16, #tpu.memory_space<vmem>>, vector<8x64xbf16>
      tpu.vector_store %arg6[%c0_14, %c0_15], %18 {strides = array<i32>} : memref<8x64xbf16, #tpu.memory_space<vmem>>, vector<8x64xbf16>,
    } else {
    }
    return
  }
  func.func @transform_0(%arg0: i32, %arg1: i32, %arg2: i32) -> (i32, i32) {
    %c0_i32 = arith.constant 0 : i32
    return %arg0, %arg2 : i32, i32
  }
  func.func @transform_1(%arg0: i32, %arg1: i32, %arg2: i32) -> (i32, i32) {
    %c0_i32 = arith.constant 0 : i32
    return %arg2, %arg1 : i32, i32
  }
  func.func @transform_2(%arg0: i32, %arg1: i32, %arg2: i32) -> (i32, i32) {
    %c0_i32 = arith.constant 0 : i32
    %c0_i32_0 = arith.constant 0 : i32
    return %c0_i32, %arg1 : i32, i32
  }
  func.func @transform_3(%arg0: i32, %arg1: i32, %arg2: i32) -> (i32, i32) {
    %c0_i32 = arith.constant 0 : i32
    return %arg0, %arg1 : i32, i32
  }
}

module attributes {stable_mosaic.version = 11 : i64} {
  func.func @_avgpool_fc_kernel(%arg0: memref<2x1x64xbf16, #tpu.memory_space<vmem>>, %arg1: memref<64x10xf32, #tpu.memory_space<vmem>>, %arg2: memref<1x10xf32, #tpu.memory_space<vmem>>, %arg3: memref<2x64xf32, #tpu.memory_space<vmem>>, %arg4: memref<2x10xf32, #tpu.memory_space<vmem>>) attributes {dimension_semantics = [], scalar_prefetch = 0 : i64, scratch_operands = 0 : i64, tpu.core_type = #tpu.core_type<tc>} {
    %c0 = arith.constant 0 : index
    %c0_0 = arith.constant 0 : index
    %c0_1 = arith.constant 0 : index
    %0 = vector.load %arg0[%c0, %c0_0, %c0_1] : memref<2x1x64xbf16, #tpu.memory_space<vmem>>, vector<2x1x64xbf16>
    %1 = arith.extf %0 : vector<2x1x64xbf16> to vector<2x1x64xf32>
    %cst = arith.constant dense<0.000000e+00> : vector<2x64xf32>
    %2 = vector.multi_reduction <add>, %1, %cst [1] : vector<2x1x64xf32> to vector<2x64xf32>
    %cst_2 = arith.constant 1.000000e+00 : f32
    %3 = vector.broadcast %cst_2 : f32 to vector<2x64xf32>
    %4 = arith.divf %2, %3 : vector<2x64xf32>
    %c0_3 = arith.constant 0 : index
    %c0_4 = arith.constant 0 : index
    %5 = vector.load %arg3[%c0_3, %c0_4] : memref<2x64xf32, #tpu.memory_space<vmem>>, vector<2x64xf32>
    tpu.vector_store %arg3[%c0_3, %c0_4], %4 {strides = array<i32>} : memref<2x64xf32, #tpu.memory_space<vmem>>, vector<2x64xf32>,
    %c0_5 = arith.constant 0 : index
    %c0_6 = arith.constant 0 : index
    %6 = vector.load %arg1[%c0_5, %c0_6] : memref<64x10xf32, #tpu.memory_space<vmem>>, vector<64x10xf32>
    %cst_7 = arith.constant dense<0.000000e+00> : vector<2x10xf32>
    %7 = tpu.matmul %4, %6, %cst_7 {dimension_numbers = #tpu.dot_dimension_numbers<[1], [0], [0], [1], [0, 0, 1, 1], [], []>} : vector<2x64xf32>, vector<64x10xf32>, vector<2x10xf32> -> vector<2x10xf32>
    %c0_8 = arith.constant 0 : index
    %c0_9 = arith.constant 0 : index
    %8 = vector.load %arg2[%c0_8, %c0_9] : memref<1x10xf32, #tpu.memory_space<vmem>>, vector<1x10xf32>
    %9 = vector.broadcast %8 : vector<1x10xf32> to vector<2x10xf32>
    %10 = arith.addf %7, %9 : vector<2x10xf32>
    %c0_10 = arith.constant 0 : index
    %c0_11 = arith.constant 0 : index
    %11 = vector.load %arg4[%c0_10, %c0_11] : memref<2x10xf32, #tpu.memory_space<vmem>>, vector<2x10xf32>
    tpu.vector_store %arg4[%c0_10, %c0_11], %10 {strides = array<i32>} : memref<2x10xf32, #tpu.memory_space<vmem>>, vector<2x10xf32>,
    return
  }
}

</mosaic_0001>

<bundles_post_ra>
// kernel: tile.10
= control target key start
LH: loop header
LB: loop body
LE: loop exit
PB: predicated region body
PF: predicated region fallthrough
CT: control target
= control target key end

     0   :  { %s28_s0 = inlined_call_operand.vmem [shape: f32[8], index: 0, kind: input, shape index: {}]   ;;  %s29_s1 = inlined_call_operand.vmem [shape: f32[16,8], index: 1, kind: output, shape index: {}]  }
   0x1   :  { %v4_v0 = vld [vmem:[%s28_s0] ss:$0 sm:$0xff] }
   0x2   :  { %5 = vst [vmem:[%s29_s1] sm:$0xff] %v4_v0  ;;  %8 = vst [vmem:[%s29_s1 + $0x8] sm:$0xff] %v4_v0 }

// kernel: tile.11
= control target key start
LH: loop header
LB: loop body
LE: loop exit
PB: predicated region body
PF: predicated region fallthrough
CT: control target
= control target key end

     0   :  { %s131_s10 = smov 120   ;;  %s132_s11 = smov 104   ;;  %vm3_vm0 = vcmask 64512   ;;  %vm9_vm1 = vcmask 1048512   ;;  %vm15_vm2 = vcmask 982912   ;;  %vm21_vm3 = vcmask 917312   ;;  %s207_s0 = inlined_call_operand.vmem [shape: f32[16,8], index: 0, kind: input, shape index: {}]   ;;  %s208_s1 = inlined_call_operand.vmem [shape: f32[1,128], index: 1, kind: output, shape index: {}]  }
   0x1   :  { %v101_v0 = vld [vmem:[%s207_s0 + $0xf] sm:$0x1]   ;;  %v103_v1 = vld [vmem:[%s207_s0 + $0xd] sm:$0x1]   ;;  %v102_v2 = vld [vmem:[%s207_s0 + $0xe] sm:$0x1]  }
   0x2   :  { %7 = vrot.lane.b32.xlu0 %v101_v0, %s131_s10  ;;  %19 = vrot.lane.b32.xlu1 %v103_v1, %s132_s11  ;;  %v104_v3 = vld [vmem:[%s207_s0 + $0xc] sm:$0x1]   ;;  %s133_s16 = smov 112   ;;  %s134_s17 = smov 96   ;;  %v105_v4 = vld [vmem:[%s207_s0 + $0xb] sm:$0x1]  }
   0x3   :  { %v106_v5 = vld [vmem:[%s207_s0 + $0xa] sm:$0x1]   ;;  %v2_v6 = vld [vmem:[%s207_s0] sm:$0x1]   ;;  %s135_s24 = smov 88   ;;  %s136_s25 = smov 80  }
   0x4   :  { %4 = vst.msk [vmem:[#allocation0] sm:$0x1] %vm3_vm0, %v2_v6   ;;  %v107_v7 = vld [vmem:[%s207_s0 + $0x9] sm:$0x1]   ;;  %v108_v8 = vld [vmem:[%s207_s0 + $0x8] sm:$0x1]  }
   0x5   :  { %s137_s30 = smov 72   ;;  %s138_s2 = smov 64   ;;  %v109_v9 = vld [vmem:[%s207_s0 + $0x7] sm:$0x1]   ;;  %v110_v10 = vld [vmem:[%s207_s0 + $0x6] sm:$0x1]  }
   0x6   :  { %13 = vrot.lane.b32.xlu0 %v102_v2, %s133_s16  ;;  %25 = vrot.lane.b32.xlu1 %v104_v3, %s134_s17  ;;  %s139_s7 = smov 56   ;;  %s140_s8 = smov 48   ;;  %v111_v11 = vld [vmem:[%s207_s0 + $0x5] sm:$0x1]   ;;  %v112_v12 = vld [vmem:[%s207_s0 + $0x4] sm:$0x1]  }
   0x7   :  { %s141_s13 = smov 40   ;;  %s142_s14 = smov 32   ;;  %v113_v13 = vld [vmem:[%s207_s0 + $0x3] sm:$0x1]   ;;  %v114_v14 = vld [vmem:[%s207_s0 + $0x2] sm:$0x1]  }
   0x8   :  { %s143_s19 = smov 24   ;;  %s144_s20 = smov 16   ;;  %v115_v15 = vld [vmem:[%s207_s0 + $0x1] sm:$0x1]   ;;  %vm27_vm4 = vcmask 851712   ;;  %vm33_vm5 = vcmask 786112  }
   0x9   :  { %s145_s0 = smov 8   ;;  %vm39_vm6 = vcmask 720512   ;;  %vm45_vm7 = vcmask 654912   ;;  %vm51_vm8 = vcmask 589312   ;;  %vm57_vm9 = vcmask 523712  }
   0xa   :  { %31 = vrot.lane.b32.xlu0 %v105_v4, %s135_s24  ;;  %37 = vrot.lane.b32.xlu1 %v106_v5, %s136_s25  ;;  %vm63_vm10 = vcmask 458112   ;;  %vm69_vm11 = vcmask 392512   ;;  %vm75_vm12 = vcmask 326912   ;;  %vm81_vm13 = vcmask 261312  }
   0xb   :  { %vm87_vm14 = vcmask 195712   ;;  %vm93_vm15 = vcmask 130112  }
   0xe   :  { %43 = vrot.lane.b32.xlu0 %v107_v7, %s137_s30  ;;  %49 = vrot.lane.b32.xlu1 %v108_v8, %s138_s2 }
  0x12   :  { %55 = vrot.lane.b32.xlu0 %v109_v9, %s139_s7  ;;  %61 = vrot.lane.b32.xlu1 %v110_v10, %s140_s8 }
  0x16   :  { %67 = vrot.lane.b32.xlu0 %v111_v11, %s141_s13  ;;  %73 = vrot.lane.b32.xlu1 %v112_v12, %s142_s14 }
  0x1a   :  { %79 = vrot.lane.b32.xlu0 %v113_v13, %s143_s19  ;;  %85 = vrot.lane.b32.xlu1 %v114_v14, %s144_s20 }
  0x1e   :  { %91 = vrot.lane.b32.xlu0 %v115_v15, %s145_s0 }
  0x74   :  { %v8_v16 = vpop.permute.xlu0 %7   ;;  %v20_v17 = vpop.permute.xlu1 %19  }
  0x75   :  { %10 = vst.msk [vmem:[#allocation0] sm:$0x1] %vm9_vm1, %v8_v16  }
  0x78   :  { %v14_v18 = vpop.permute.xlu0 %13   ;;  %v26_v19 = vpop.permute.xlu1 %25  }
  0x79   :  { %16 = vst.msk [vmem:[#allocation0] sm:$0x1] %vm15_vm2, %v14_v18  }
  0x7a   :  { %22 = vst.msk [vmem:[#allocation0] sm:$0x1] %vm21_vm3, %v20_v17  }
  0x7b   :  { %28 = vst.msk [vmem:[#allocation0] sm:$0x1] %vm27_vm4, %v26_v19  }
  0x7c   :  { %v32_v20 = vpop.permute.xlu0 %31   ;;  %v38_v21 = vpop.permute.xlu1 %37  }
  0x7d   :  { %34 = vst.msk [vmem:[#allocation0] sm:$0x1] %vm33_vm5, %v32_v20  }
  0x7e   :  { %40 = vst.msk [vmem:[#allocation0] sm:$0x1] %vm39_vm6, %v38_v21  }
  0x80   :  { %v44_v22 = vpop.permute.xlu0 %43   ;;  %v50_v23 = vpop.permute.xlu1 %49  }
  0x81   :  { %46 = vst.msk [vmem:[#allocation0] sm:$0x1] %vm45_vm7, %v44_v22  }
  0x82   :  { %52 = vst.msk [vmem:[#allocation0] sm:$0x1] %vm51_vm8, %v50_v23  }
  0x84   :  { %v56_v24 = vpop.permute.xlu0 %55   ;;  %v62_v25 = vpop.permute.xlu1 %61  }
  0x85   :  { %58 = vst.msk [vmem:[#allocation0] sm:$0x1] %vm57_vm9, %v56_v24  }
  0x86   :  { %64 = vst.msk [vmem:[#allocation0] sm:$0x1] %vm63_vm10, %v62_v25  }
  0x88   :  { %v68_v26 = vpop.permute.xlu0 %67   ;;  %v74_v27 = vpop.permute.xlu1 %73  }
  0x89   :  { %70 = vst.msk [vmem:[#allocation0] sm:$0x1] %vm69_vm11, %v68_v26  }
  0x8a   :  { %76 = vst.msk [vmem:[#allocation0] sm:$0x1] %vm75_vm12, %v74_v27  }
  0x8c   :  { %v80_v28 = vpop.permute.xlu0 %79   ;;  %v86_v29 = vpop.permute.xlu1 %85  }
  0x8d   :  { %82 = vst.msk [vmem:[#allocation0] sm:$0x1] %vm81_vm13, %v80_v28  }
  0x8e   :  { %88 = vst.msk [vmem:[#allocation0] sm:$0x1] %vm87_vm14, %v86_v29  }
  0x90   :  { %v92_v30 = vpop.permute.xlu0 %91  }
  0x91   :  { %94 = vst.msk [vmem:[#allocation0] sm:$0x1] %vm93_vm15, %v92_v30  }
  0x98   :  { %v98_v31 = vld [vmem:[#allocation0] sm:$0x1] }
  0x99   :  { %100 = vst [vmem:[%s208_s1] sm:$0x1] %v98_v31 }

// kernel: _lambda_.24
= control target key start
LH: loop header
LB: loop body
LE: loop exit
PB: predicated region body
PF: predicated region fallthrough
CT: control target
= control target key end

     0   :  { %s196_s0 = inlined_call_operand.vmem [shape: bf16[32,128], index: 0, kind: input, shape index: {}]   ;;  %s197_s1 = inlined_call_operand.vmem [shape: f32[1,128], index: 1, kind: input, shape index: {}]   ;;  %s198_s2 = inlined_call_operand.vmem [shape: f32[1,128], index: 2, kind: input, shape index: {}]   ;;  %s199_s3 = inlined_call_operand.vmem [shape: bf16[32,128], index: 3, kind: output, shape index: {0}]   ;;  %s200_s4 = inlined_call_operand.vmem [shape: bf16[32,128], index: 4, kind: output, shape index: {1}]  }
   0x1   :  { %v117_v0 = vld [vmem:[%s196_s0] sm:$0xff]   ;;  %v144_v4 = vld [vmem:[%s196_s0 + $0x8] sm:$0xff]  }
   0x2   :  { %v98_v1 = vld [vmem:[%s197_s1] ss:$0 sm:$0xff]  ;;  %v118_v2 = vunpack.c.l.bf16 %v117_v0  ;;  %v119_v3 = vunpack.c.h.bf16 %v117_v0  ;;  %v122_v6 = vunpack.c.l.bf16 %v144_v4  ;;  %v123_v7 = vunpack.c.h.bf16 %v144_v4 }
   0x3   :  { %v99_v5 = vld [vmem:[%s198_s2] ss:$0 sm:$0xff] }
   0x4   :  { %v31_v8 = vmul.f32 %v118_v2, %v98_v1  ;;  %v32_v9 = vmul.f32 %v119_v3, %v98_v1  ;;  %v33_v10 = vmul.f32 %v122_v6, %v98_v1  ;;  %v34_v11 = vmul.f32 %v123_v7, %v98_v1 }
   0x6   :  { %v42_v12 = vadd.f32 %v99_v5, %v31_v8  ;;  %v43_v13 = vadd.f32 %v99_v5, %v32_v9  ;;  %v44_v14 = vadd.f32 %v99_v5, %v33_v10  ;;  %v45_v15 = vadd.f32 %v99_v5, %v34_v11 }
   0x8   :  { %v127_v16 = vpack.c.bf16 %v43_v13, %v42_v12  ;;  %v66_v17 = vmax.f32 %v42_v12, 0.0  ;;  %v67_v18 = vmax.f32 %v43_v13, 0.0  ;;  %v132_v19 = vpack.c.bf16 %v45_v15, %v44_v14 }
   0x9   :  { %v68_v20 = vmax.f32 %v44_v14, 0.0  ;;  %v69_v21 = vmax.f32 %v45_v15, 0.0 }
   0xa   :  { %128 = vst [vmem:[%s199_s3] sm:$0xff] %v127_v16   ;;  %v137_v22 = vpack.c.bf16 %v67_v18, %v66_v17  ;;  %145 = vst [vmem:[%s199_s3 + $0x8] sm:$0xff] %v132_v19  }
   0xb   :  { %v142_v23 = vpack.c.bf16 %v69_v21, %v68_v20 }
   0xc   :  { %138 = vst [vmem:[%s200_s4] sm:$0xff] %v137_v22  }
   0xd   :  { %146 = vst [vmem:[%s200_s4 + $0x8] sm:$0xff] %v142_v23  }

// kernel: _lambda_.23
= control target key start
LH: loop header
LB: loop body
LE: loop exit
PB: predicated region body
PF: predicated region fallthrough
CT: control target
= control target key end

     0   :  { %s1505_s12 = smov 0   ;;  %s1507_s13 = smov 0   ;;  %s1809_s0 = inlined_call_operand.vmem [shape: bf16[512,152], index: 0, kind: input, shape index: {}]   ;;  %s1810_s1 = inlined_call_operand.vmem [shape: bf16[152,8], index: 1, kind: input, shape index: {}]   ;;  %s1811_s2 = inlined_call_operand.vmem [shape: f32[1,8], index: 2, kind: input, shape index: {}]   ;;  %s1812_s3 = inlined_call_operand.vmem [shape: bf16[512,8], index: 3, kind: output, shape index: {}]  }
   0x1   :  { %s1509_s14 = smov 0  }
   0x2 LB: > { %s32_s15 = sadd.s32 1, %s1477_s13  ;;  %p1223_p0 = scmp.ge.s32.totalorder %s1481_s14, 1  ;;  %s1481_s14 = sphi %s1509_s14, %s13_s14   ;;  %s1477_s13 = sphi %s1507_s13, %s1814_s13   ;;  %s1473_s12 = sphi %s1505_s12, %s1813_s12  }
   0x3   : > { %p34_p1 = scmp.ge.s32.totalorder %s32_s15, 2  ;;  %p191_p2 = scmp.lt.s32.totalorder %s1481_s14, 3 }
   0x5   : > { %s1816_s15 = smov (%p34_p1, %s32_s15), 0  ;;  %p192_p3 = pnand %p1223_p0, %p191_p2 }
   0x6   : > { %v1401_v0 = vld [vmem:[%s1810_s1] sm:$0xff] (!%p192_p3)   ;;  %v1483_v1 = vmov (!%p192_p3), 0   ;;  %v1402_v2 = vld [vmem:[%s1810_s1 + $0x8] sm:$0xff] (!%p192_p3)   ;;  %s1224_s20 = sshll.u32 (!%p192_p3), %s1473_s12, 5  ;;  %v1403_v3 = vld [vmem:[%s1810_s1 + $0x10] sm:$0xff] (!%p192_p3)   ;;  %vm272_vm0 = vcmask (!%p192_p3), 64512  }
   0x7   : > { %195 = sbr.rel (%p192_p3) target bundleno = 333 (0x14d), region = 32  ;;  %642 = vmatprep.subr.bf16.mxu0 (!%p192_p3), %v1483_v1  ;;  %1355 = vmatprep.subr.bf16.mxu1 (!%p192_p3), %v1483_v1  ;;  %p236_p4 = scmp.lt.s32.totalorder (!%p192_p3), %s1224_s20, 63  ;;  %vm589_vm1 = vcmask (!%p192_p3), 195584   ;;  %v1404_v4 = vld [vmem:[%s1810_s1 + $0x18] sm:$0xff] (!%p192_p3)   ;;  %v1484_v6 = vmov (!%p192_p3), 0.0   ;;  %v1405_v8 = vld [vmem:[%s1810_s1 + $0x20] sm:$0xff] (!%p192_p3)  }
   0x8   : > { %643 = vmatpush1.bf16.msra.mxu0 (!%p192_p3), %v1401_v0  ;;  %1365 = vmatpush1.bf16.msra.mxu1 (!%p192_p3), %v1401_v0  ;;  %273 = vst.msk [vmem:[#allocation2] sm:$0xff] (!%p192_p3), %vm272_vm0, %v1484_v6  ;;  %274 = vst.msk [vmem:[#allocation2 + $0x8] sm:$0xff] (!%p192_p3), %vm272_vm0, %v1484_v6  ;;  %v1406_v9 = vld [vmem:[%s1810_s1 + $0x28] sm:$0xff] (!%p192_p3)   ;;  %v1407_v10 = vld [vmem:[%s1810_s1 + $0x30] sm:$0xff] (!%p192_p3)   ;;  %vm638_vm2 = vcmask (!%p192_p3), 1043456   ;;  %vm1070_vm3 = vcmask (!%p192_p3), 60416  }
   0x9   : > { %644 = vmatprep.subr.bf16.mxu0 (!%p192_p3), %v1483_v1  ;;  %1356 = vmatprep.subr.bf16.mxu1 (!%p192_p3), %v1483_v1  ;;  %275 = vst.msk [vmem:[#allocation2 + $0x10] sm:$0xff] (!%p192_p3), %vm272_vm0, %v1484_v6  ;;  %276 = vst.msk [vmem:[#allocation2 + $0x18] sm:$0xff] (!%p192_p3), %vm272_vm0, %v1484_v6  ;;  %v1408_v11 = vld [vmem:[%s1810_s1 + $0x38] sm:$0xff] (!%p192_p3)   ;;  %v1409_v12 = vld [vmem:[%s1810_s1 + $0x40] sm:$0xff] (!%p192_p3)  }
   0xa   : > { %277 = vst.msk [vmem:[#allocation2 + $0x20] sm:$0xff] (!%p192_p3), %vm272_vm0, %v1484_v6  ;;  %278 = vst.msk [vmem:[#allocation2 + $0x28] sm:$0xff] (!%p192_p3), %vm272_vm0, %v1484_v6  ;;  %v1410_v13 = vld [vmem:[%s1810_s1 + $0x48] ss:$0 sps:$4 sm:$0xff] (!%p192_p3)   ;;  %v1668_v63 = vld [vmem:[%s1811_s2] ss:$0 sm:$0xff] (!%p192_p3) }
   0xb   : > { %279 = vst.msk [vmem:[#allocation2 + $0x30] sm:$0xff] (!%p192_p3), %vm272_vm0, %v1484_v6  ;;  %280 = vst.msk [vmem:[#allocation2 + $0x38] sm:$0xff] (!%p192_p3), %vm272_vm0, %v1484_v6  ;;  %v640_v14 = vsel (!%p192_p3), %vm638_vm2, %v1410_v13, 0 }
   0xc   : > { %645 = vmatpush1.bf16.msra.mxu0 (!%p192_p3), %v1402_v2  ;;  %1366 = vmatpush1.bf16.msra.mxu1 (!%p192_p3), %v1402_v2  ;;  %281 = vst.msk [vmem:[#allocation2 + $0x40] sm:$0xff] (!%p192_p3), %vm272_vm0, %v1484_v6  ;;  %282 = vst.msk [vmem:[#allocation2 + $0x48] sm:$0xff] (!%p192_p3), %vm272_vm0, %v1484_v6 }
   0xd   : > { %646 = vmatprep.subr.bf16.mxu0 (!%p192_p3), %v1483_v1  ;;  %1357 = vmatprep.subr.bf16.mxu1 (!%p192_p3), %v1483_v1  ;;  %283 = vst.msk [vmem:[#allocation2 + $0x50] sm:$0xff] (!%p192_p3), %vm272_vm0, %v1484_v6  ;;  %284 = vst.msk [vmem:[#allocation2 + $0x58] sm:$0xff] (!%p192_p3), %vm272_vm0, %v1484_v6 }
   0xe   : > { %s1818_s20 = smov (!%p236_p4, %s1224_s20), 63  ;;  %285 = vst.msk [vmem:[#allocation2 + $0x60] sm:$0xff] %vm272_vm0, %v1484_v6  ;;  %286 = vst.msk [vmem:[#allocation2 + $0x68] sm:$0xff] %vm272_vm0, %v1484_v6 }
   0xf   : > { %s1322_s23 = sshll.u32 %s1818_s20, 3  ;;  %287 = vst.msk [vmem:[#allocation2 + $0x70] sm:$0xff] %vm272_vm0, %v1484_v6  ;;  %288 = vst.msk [vmem:[#allocation2 + $0x78] sm:$0xff] %vm272_vm0, %v1484_v6  ;;  %v305_v45 = vld [vmem:[#allocation2] sm:$0xff]  ;;  %v306_v49 = vld [vmem:[#allocation2 + $0x8] sm:$0xff]  ;;  %s1228_s19 = sshll.u32 %s1818_s20, 2 }
  0x10   : > { %s1544_s26 = scalar_lea.vmem %s1809_s0, %s1322_s23  ;;  %647 = vmatpush1.bf16.msra.mxu0 %v1403_v3  ;;  %1367 = vmatpush1.bf16.msra.mxu1 %v1403_v3  ;;  %289 = vst.msk [vmem:[#allocation2 + $0x80] sm:$0xff] %vm272_vm0, %v1484_v6  ;;  %290 = vst.msk [vmem:[#allocation2 + $0x88] sm:$0xff] %vm272_vm0, %v1484_v6  ;;  %v307_v61 = vld [vmem:[#allocation2 + $0x10] sm:$0xff]  ;;  %v308_v2 = vld [vmem:[#allocation2 + $0x18] sm:$0xff]  ;;  %s1678_s22 = scalar_lea.vmem %s1812_s3, %s1228_s19 }
  0x11   : > { %v1413_v5 = vld [vmem:[%s1544_s26 + $0x4] ss:$8 sps:$4 sm:$0xff]   ;;  %291 = vst.msk [vmem:[#allocation2 + $0x90] sm:$0xff] %vm272_vm0, %v1484_v6  ;;  %292 = vst.msk [vmem:[#allocation2 + $0x98] sm:$0xff] %vm272_vm0, %v1484_v6  ;;  %648 = vmatprep.subr.bf16.mxu0 %v1483_v1  ;;  %1358 = vmatprep.subr.bf16.mxu1 %v1483_v1  ;;  %v1411_v15 = vld [vmem:[%s1544_s26] ss:$8 sps:$4 sm:$0xff]  }
  0x12   : > { %293 = vst.msk [vmem:[#allocation2 + $0xa0] sm:$0xff] %vm272_vm0, %v1484_v6  ;;  %294 = vst.msk [vmem:[#allocation2 + $0xa8] sm:$0xff] %vm272_vm0, %v1484_v6  ;;  %1271 = vmatprep.mubr.msk.bf16.mxu0 %vm589_vm1, %v1413_v5  ;;  %v1416_v7 = vld [vmem:[%s1544_s26 + $0x84] ss:$8 sps:$4 sm:$0xff]   ;;  %v1414_v16 = vld [vmem:[%s1544_s26 + $0x80] ss:$8 sps:$4 sm:$0xff]  }
  0x13   : > { %295 = vst.msk [vmem:[#allocation2 + $0xb0] sm:$0xff] %vm272_vm0, %v1484_v6  ;;  %296 = vst.msk [vmem:[#allocation2 + $0xb8] sm:$0xff] %vm272_vm0, %v1484_v6  ;;  %1279 = vmatprep.mubr.msk.bf16.mxu1 %vm589_vm1, %v1416_v7  ;;  %v1417_v17 = vld [vmem:[%s1544_s26 + $0x14] ss:$8 sps:$4 sm:$0xff]   ;;  %v1421_v19 = vld [vmem:[%s1544_s26 + $0x10] ss:$8 sps:$4 sm:$0xff]  }
  0x14   : > { %297 = vst.msk [vmem:[#allocation2 + $0xc0] sm:$0xff] %vm272_vm0, %v1484_v6  ;;  %298 = vst.msk [vmem:[#allocation2 + $0xc8] sm:$0xff] %vm272_vm0, %v1484_v6  ;;  %649 = vmatpush1.bf16.msra.mxu0 %v1404_v4  ;;  %1368 = vmatpush1.bf16.msra.mxu1 %v1404_v4  ;;  %v1419_v18 = vld [vmem:[%s1544_s26 + $0x94] ss:$8 sps:$4 sm:$0xff]   ;;  %v1422_v20 = vld [vmem:[%s1544_s26 + $0x90] ss:$8 sps:$4 sm:$0xff]  }
  0x15   : > { %299 = vst.msk [vmem:[#allocation2 + $0xd0] sm:$0xff] %vm272_vm0, %v1484_v6  ;;  %300 = vst.msk [vmem:[#allocation2 + $0xd8] sm:$0xff] %vm272_vm0, %v1484_v6  ;;  %650 = vmatprep.subr.bf16.mxu0 %v1483_v1  ;;  %1359 = vmatprep.subr.bf16.mxu1 %v1483_v1  ;;  %v1423_v21 = vld [vmem:[%s1544_s26 + $0x24] ss:$8 sps:$4 sm:$0xff]   ;;  %v1427_v23 = vld [vmem:[%s1544_s26 + $0x20] ss:$8 sps:$4 sm:$0xff]  }
  0x16   : > { %301 = vst.msk [vmem:[#allocation2 + $0xe0] sm:$0xff] %vm272_vm0, %v1484_v6  ;;  %302 = vst.msk [vmem:[#allocation2 + $0xe8] sm:$0xff] %vm272_vm0, %v1484_v6  ;;  %v1425_v22 = vld [vmem:[%s1544_s26 + $0xa4] ss:$8 sps:$4 sm:$0xff]   ;;  %v1428_v24 = vld [vmem:[%s1544_s26 + $0xa0] ss:$8 sps:$4 sm:$0xff]  }
  0x17   : > { %303 = vst.msk [vmem:[#allocation2 + $0xf0] sm:$0xff] %vm272_vm0, %v1484_v6  ;;  %304 = vst.msk [vmem:[#allocation2 + $0xf8] sm:$0xff] %vm272_vm0, %v1484_v6  ;;  %v1429_v25 = vld [vmem:[%s1544_s26 + $0x34] ss:$8 sps:$4 sm:$0xff]   ;;  %v1433_v27 = vld [vmem:[%s1544_s26 + $0x30] ss:$8 sps:$4 sm:$0xff]  }
  0x18   : > { %651 = vmatpush1.bf16.msra.mxu0 %v1405_v8  ;;  %1369 = vmatpush1.bf16.msra.mxu1 %v1405_v8  ;;  %v1431_v26 = vld [vmem:[%s1544_s26 + $0xb4] ss:$8 sps:$4 sm:$0xff]   ;;  %v1434_v28 = vld [vmem:[%s1544_s26 + $0xb0] ss:$8 sps:$4 sm:$0xff]   ;;  %v1435_v29 = vld [vmem:[%s1544_s26 + $0x44] ss:$8 sps:$4 sm:$0xff]  }
  0x19   : > { %652 = vmatprep.subr.bf16.mxu0 %v1483_v1  ;;  %1360 = vmatprep.subr.bf16.mxu1 %v1483_v1  ;;  %v1437_v30 = vld [vmem:[%s1544_s26 + $0xc4] ss:$8 sps:$4 sm:$0xff]   ;;  %v1439_v31 = vld [vmem:[%s1544_s26 + $0x40] ss:$8 sps:$4 sm:$0xff]   ;;  %v1441_v33 = vld [vmem:[%s1544_s26 + $0x54] ss:$8 sps:$4 sm:$0xff]  }
  0x1a   : > { %v1440_v32 = vld [vmem:[%s1544_s26 + $0xc0] ss:$8 sps:$4 sm:$0xff]   ;;  %v1443_v34 = vld [vmem:[%s1544_s26 + $0xd4] ss:$8 sps:$4 sm:$0xff]   ;;  %v1445_v35 = vld [vmem:[%s1544_s26 + $0x50] ss:$8 sps:$4 sm:$0xff]  }
  0x1b   : > { %v1446_v36 = vld [vmem:[%s1544_s26 + $0xd0] ss:$8 sps:$4 sm:$0xff]   ;;  %v1447_v37 = vld [vmem:[%s1544_s26 + $0x64] ss:$8 sps:$4 sm:$0xff]   ;;  %v1451_v39 = vld [vmem:[%s1544_s26 + $0x60] ss:$8 sps:$4 sm:$0xff]  }
  0x1c   : > { %653 = vmatpush1.bf16.msra.mxu0 %v1406_v9  ;;  %1370 = vmatpush1.bf16.msra.mxu1 %v1406_v9  ;;  %v1449_v38 = vld [vmem:[%s1544_s26 + $0xe4] ss:$8 sps:$4 sm:$0xff]   ;;  %v1452_v40 = vld [vmem:[%s1544_s26 + $0xe0] ss:$8 sps:$4 sm:$0xff]   ;;  %v1453_v41 = vld [vmem:[%s1544_s26 + $0x74] ss:$8 sps:$4 sm:$0xff]  }
  0x1d   : > { %654 = vmatprep.subr.bf16.mxu0 %v1483_v1  ;;  %1361 = vmatprep.subr.bf16.mxu1 %v1483_v1  ;;  %v1455_v42 = vld [vmem:[%s1544_s26 + $0xf4] ss:$8 sps:$4 sm:$0xff]   ;;  %v1457_v43 = vld [vmem:[%s1544_s26 + $0x70] ss:$8 sps:$4 sm:$0xff]   ;;  %v321_v46 = vld [vmem:[#allocation2 + $0x80] sm:$0xff] }
  0x1e   : > { %v1458_v44 = vld [vmem:[%s1544_s26 + $0xf0] ss:$8 sps:$4 sm:$0xff]   ;;  %v322_v50 = vld [vmem:[#allocation2 + $0x88] sm:$0xff] }
  0x1f   : > { %v323_v62 = vld [vmem:[#allocation2 + $0x90] sm:$0xff]  ;;  %v324_v3 = vld [vmem:[#allocation2 + $0x98] sm:$0xff] }
  0x20   : > { %655 = vmatpush1.bf16.msra.mxu0 %v1407_v10  ;;  %1371 = vmatpush1.bf16.msra.mxu1 %v1407_v10 }
  0x21   : > { %656 = vmatprep.subr.bf16.mxu0 %v1483_v1  ;;  %1362 = vmatprep.subr.bf16.mxu1 %v1483_v1 }
  0x24   : > { %657 = vmatpush1.bf16.msra.mxu0 %v1408_v11  ;;  %1372 = vmatpush1.bf16.msra.mxu1 %v1408_v11 }
  0x25   : > { %658 = vmatprep.subr.bf16.mxu0 %v1483_v1  ;;  %1363 = vmatprep.subr.bf16.mxu1 %v1483_v1 }
  0x28   : > { %659 = vmatpush1.bf16.msra.mxu0 %v1409_v12  ;;  %1373 = vmatpush1.bf16.msra.mxu1 %v1409_v12 }
  0x29   : > { %660 = vmatprep.subr.bf16.mxu0 %v1483_v1  ;;  %1364 = vmatprep.subr.bf16.mxu1 %v1483_v1 }
  0x2c   : > { %661 = vmatpush1.bf16.msra.mxu0 %v640_v14  ;;  %1374 = vmatpush1.bf16.msra.mxu1 %v640_v14 }
  0x2f   : > { %675 = vmatmul.mubr.bf16.vlgmr.msra.gmra.mrb[0].mxu0 %v1411_v15  ;;  %739 = vmatmul.mubr.bf16.vlgmr.msra.gmra.mrb[0].mxu1 %v1414_v16 }
  0x30   : > { %1272 = vmatprep.mubr.msk.bf16.mxu0 %vm589_vm1, %v1417_v17  ;;  %1280 = vmatprep.mubr.msk.bf16.mxu1 %vm589_vm1, %v1419_v18 }
  0x37   : > { %683 = vmatmul.mubr.bf16.gmra.mrb[4].mxu0 %v1421_v19  ;;  %747 = vmatmul.mubr.bf16.gmra.mrb[4].mxu1 %v1422_v20 }
  0x38   : > { %1273 = vmatprep.mubr.msk.bf16.mxu0 %vm589_vm1, %v1423_v21  ;;  %1281 = vmatprep.mubr.msk.bf16.mxu1 %vm589_vm1, %v1425_v22 }
  0x3f   : > { %691 = vmatmul.mubr.bf16.gmra.mrb[8].mxu0 %v1427_v23  ;;  %755 = vmatmul.mubr.bf16.gmra.mrb[8].mxu1 %v1428_v24  ;;  %v309_v24 = vld [vmem:[#allocation2 + $0x20] sm:$0xff] }
  0x40   : > { %1274 = vmatprep.mubr.msk.bf16.mxu0 %vm589_vm1, %v1429_v25  ;;  %1282 = vmatprep.mubr.msk.bf16.mxu1 %vm589_vm1, %v1431_v26  ;;  %v325_v25 = vld [vmem:[#allocation2 + $0xa0] sm:$0xff] }
  0x47   : > { %699 = vmatmul.mubr.bf16.gmra.mrb[12].mxu0 %v1433_v27  ;;  %763 = vmatmul.mubr.bf16.gmra.mrb[12].mxu1 %v1434_v28 }
  0x48   : > { %1275 = vmatprep.mubr.msk.bf16.mxu0 %vm589_vm1, %v1435_v29  ;;  %1283 = vmatprep.mubr.msk.bf16.mxu1 %vm589_vm1, %v1437_v30  ;;  %v310_v30 = vld [vmem:[#allocation2 + $0x28] sm:$0xff] }
  0x4f   : > { %707 = vmatmul.mubr.bf16.gmra.mrb[16].mxu0 %v1439_v31  ;;  %771 = vmatmul.mubr.bf16.gmra.mrb[16].mxu1 %v1440_v32  ;;  %v326_v31 = vld [vmem:[#allocation2 + $0xa8] sm:$0xff] }
  0x50   : > { %1276 = vmatprep.mubr.msk.bf16.mxu0 %vm589_vm1, %v1441_v33  ;;  %1284 = vmatprep.mubr.msk.bf16.mxu1 %vm589_vm1, %v1443_v34 }
  0x57   : > { %715 = vmatmul.mubr.bf16.gmra.mrb[20].mxu0 %v1445_v35  ;;  %779 = vmatmul.mubr.bf16.gmra.mrb[20].mxu1 %v1446_v36 }
  0x58   : > { %1277 = vmatprep.mubr.msk.bf16.mxu0 %vm589_vm1, %v1447_v37  ;;  %1285 = vmatprep.mubr.msk.bf16.mxu1 %vm589_vm1, %v1449_v38 }
  0x5f   : > { %723 = vmatmul.mubr.bf16.gmra.mrb[24].mxu0 %v1451_v39  ;;  %787 = vmatmul.mubr.bf16.gmra.mrb[24].mxu1 %v1452_v40 }
  0x60   : > { %1278 = vmatprep.mubr.msk.bf16.mxu0 %vm589_vm1, %v1453_v41  ;;  %1286 = vmatprep.mubr.msk.bf16.mxu1 %vm589_vm1, %v1455_v42 }
  0x67   : > { %731 = vmatmul.mubr.bf16.gmra.mrb[28].mxu0 %v1457_v43  ;;  %795 = vmatmul.mubr.bf16.gmra.mrb[28].mxu1 %v1458_v44 }
 0x102   : > { %v676_v47 = vpop.f32.mrb[0].mxu0  ;;  %v740_v48 = vpop.f32.mrb[0].mxu1 }
 0x103   : > { %v803_v51 = vadd.f32 %v676_v47, %v305_v45  ;;  %v819_v52 = vadd.f32 %v740_v48, %v321_v46  ;;  %v678_v53 = vpop.f32.mrb[1].mxu0  ;;  %v742_v54 = vpop.f32.mrb[1].mxu1 }
 0x104   : > { %v679_v55 = vpop.f32.mrb[2].mxu0  ;;  %v743_v56 = vpop.f32.mrb[2].mxu1  ;;  %v327_v53 = vld [vmem:[#allocation2 + $0xb0] sm:$0xff] }
 0x105   : > { %836 = vst.msk [vmem:[#allocation2] sm:$0xff] %vm272_vm0, %v803_v51  ;;  %852 = vst.msk [vmem:[#allocation2 + $0x80] sm:$0xff] %vm272_vm0, %v819_v52  ;;  %v804_v57 = vadd.f32 %v679_v55, %v306_v49  ;;  %v820_v58 = vadd.f32 %v743_v56, %v322_v50  ;;  %v681_v59 = vpop.f32.mrb[3].mxu0  ;;  %v745_v60 = vpop.f32.mrb[3].mxu1  ;;  %v311_v52 = vld [vmem:[#allocation2 + $0x30] sm:$0xff] }
 0x106   : > { %v328_v59 = vld [vmem:[#allocation2 + $0xb8] sm:$0xff] }
 0x107   : > { %837 = vst.msk [vmem:[#allocation2 + $0x8] sm:$0xff] %vm272_vm0, %v804_v57  ;;  %853 = vst.msk [vmem:[#allocation2 + $0x88] sm:$0xff] %vm272_vm0, %v820_v58  ;;  %v312_v58 = vld [vmem:[#allocation2 + $0x38] sm:$0xff] }
 0x10a   : > { %v684_v0 = vpop.f32.mrb[4].mxu0  ;;  %v748_v1 = vpop.f32.mrb[4].mxu1 }
 0x10b   : > { %v805_v4 = vadd.f32 %v684_v0, %v307_v61  ;;  %v821_v5 = vadd.f32 %v748_v1, %v323_v62  ;;  %v686_v6 = vpop.f32.mrb[5].mxu0  ;;  %v750_v7 = vpop.f32.mrb[5].mxu1 }
 0x10c   : > { %v871_v8 = vld [vmem:[#allocation2] sm:$0xff]  ;;  %v687_v10 = vpop.f32.mrb[6].mxu0  ;;  %v751_v11 = vpop.f32.mrb[6].mxu1 }
 0x10d   : > { %v887_v9 = vld [vmem:[#allocation2 + $0x80] sm:$0xff]  ;;  %v910_v12 = vadd.f32 %v1668_v63, %v871_v8  ;;  %838 = vst.msk [vmem:[#allocation2 + $0x10] sm:$0xff] %vm272_vm0, %v805_v4  ;;  %854 = vst.msk [vmem:[#allocation2 + $0x90] sm:$0xff] %vm272_vm0, %v821_v5  ;;  %v806_v14 = vadd.f32 %v687_v10, %v308_v2  ;;  %v822_v15 = vadd.f32 %v751_v11, %v324_v3  ;;  %v689_v16 = vpop.f32.mrb[7].mxu0  ;;  %v753_v17 = vpop.f32.mrb[7].mxu1 }
 0x10e   : > { %v926_v13 = vadd.f32 %v1668_v63, %v887_v9  ;;  %v872_v18 = vld [vmem:[#allocation2 + $0x8] sm:$0xff]  ;;  %v313_v17 = vld [vmem:[#allocation2 + $0x40] sm:$0xff] }
 0x10f   : > { %v888_v19 = vld [vmem:[#allocation2 + $0x88] sm:$0xff]  ;;  %v1323_v20 = vpack.c.bf16 %v910_v12, %v910_v12  ;;  %v911_v22 = vadd.f32 %v1668_v63, %v872_v18  ;;  %839 = vst.msk [vmem:[#allocation2 + $0x18] sm:$0xff] %vm272_vm0, %v806_v14  ;;  %855 = vst.msk [vmem:[#allocation2 + $0x98] sm:$0xff] %vm272_vm0, %v822_v15  ;;  %v329_v18 = vld [vmem:[#allocation2 + $0xc0] sm:$0xff] }
 0x110   : > { %v1339_v21 = vpack.c.bf16 %v926_v13, %v926_v13  ;;  %v927_v23 = vadd.f32 %v1668_v63, %v888_v19 }
 0x111   : > { %1071 = vst.msk [vmem:[%s1678_s22] sm:$0xf] %vm1070_vm3, %v1323_v20  ;;  %v1324_v26 = vpack.c.bf16 %v911_v22, %v911_v22 }
 0x112   : > { %1087 = vst.msk [vmem:[%s1678_s22 + $0x40] sm:$0xf] %vm1070_vm3, %v1339_v21  ;;  %v1340_v27 = vpack.c.bf16 %v927_v23, %v927_v23  ;;  %v692_v28 = vpop.f32.mrb[8].mxu0  ;;  %v756_v29 = vpop.f32.mrb[8].mxu1  ;;  %v314_v23 = vld [vmem:[#allocation2 + $0x48] sm:$0xff] }
 0x113   : > { %1072 = vst.msk [vmem:[%s1678_s22 + $0x4] sm:$0xf] %vm1070_vm3, %v1324_v26  ;;  %v807_v32 = vadd.f32 %v692_v28, %v309_v24  ;;  %v823_v33 = vadd.f32 %v756_v29, %v325_v25  ;;  %v694_v34 = vpop.f32.mrb[9].mxu0  ;;  %v758_v35 = vpop.f32.mrb[9].mxu1  ;;  %v330_v24 = vld [vmem:[#allocation2 + $0xc8] sm:$0xff] }
 0x114   : > { %1088 = vst.msk [vmem:[%s1678_s22 + $0x44] sm:$0xf] %vm1070_vm3, %v1340_v27  ;;  %v873_v36 = vld [vmem:[#allocation2 + $0x10] sm:$0xff]  ;;  %v695_v38 = vpop.f32.mrb[10].mxu0  ;;  %v759_v39 = vpop.f32.mrb[10].mxu1 }
 0x115   : > { %v889_v37 = vld [vmem:[#allocation2 + $0x90] sm:$0xff]  ;;  %v912_v40 = vadd.f32 %v1668_v63, %v873_v36  ;;  %840 = vst.msk [vmem:[#allocation2 + $0x20] sm:$0xff] %vm272_vm0, %v807_v32  ;;  %856 = vst.msk [vmem:[#allocation2 + $0xa0] sm:$0xff] %vm272_vm0, %v823_v33  ;;  %v808_v42 = vadd.f32 %v695_v38, %v310_v30  ;;  %v824_v43 = vadd.f32 %v759_v39, %v326_v31  ;;  %v697_v44 = vpop.f32.mrb[11].mxu0  ;;  %v761_v45 = vpop.f32.mrb[11].mxu1 }
 0x116   : > { %v928_v41 = vadd.f32 %v1668_v63, %v889_v37  ;;  %v874_v46 = vld [vmem:[#allocation2 + $0x18] sm:$0xff]  ;;  %v315_v45 = vld [vmem:[#allocation2 + $0x50] sm:$0xff] }
 0x117   : > { %v890_v47 = vld [vmem:[#allocation2 + $0x98] sm:$0xff]  ;;  %v1325_v48 = vpack.c.bf16 %v912_v40, %v912_v40  ;;  %v913_v50 = vadd.f32 %v1668_v63, %v874_v46  ;;  %841 = vst.msk [vmem:[#allocation2 + $0x28] sm:$0xff] %vm272_vm0, %v808_v42  ;;  %857 = vst.msk [vmem:[#allocation2 + $0xa8] sm:$0xff] %vm272_vm0, %v824_v43  ;;  %v331_v46 = vld [vmem:[#allocation2 + $0xd0] sm:$0xff] }
 0x118   : > { %v1341_v49 = vpack.c.bf16 %v928_v41, %v928_v41  ;;  %v929_v51 = vadd.f32 %v1668_v63, %v890_v47 }
 0x119   : > { %1073 = vst.msk [vmem:[%s1678_s22 + $0x8] sm:$0xf] %vm1070_vm3, %v1325_v48  ;;  %v1326_v54 = vpack.c.bf16 %v913_v50, %v913_v50 }
 0x11a   : > { %1089 = vst.msk [vmem:[%s1678_s22 + $0x48] sm:$0xf] %vm1070_vm3, %v1341_v49  ;;  %v1342_v55 = vpack.c.bf16 %v929_v51, %v929_v51  ;;  %v700_v56 = vpop.f32.mrb[12].mxu0  ;;  %v764_v57 = vpop.f32.mrb[12].mxu1  ;;  %v316_v51 = vld [vmem:[#allocation2 + $0x58] sm:$0xff] }
 0x11b   : > { %1074 = vst.msk [vmem:[%s1678_s22 + $0xc] sm:$0xf] %vm1070_vm3, %v1326_v54  ;;  %v809_v60 = vadd.f32 %v700_v56, %v311_v52  ;;  %v825_v61 = vadd.f32 %v764_v57, %v327_v53  ;;  %v702_v62 = vpop.f32.mrb[13].mxu0  ;;  %v766_v0 = vpop.f32.mrb[13].mxu1  ;;  %v332_v52 = vld [vmem:[#allocation2 + $0xd8] sm:$0xff] }
 0x11c   : > { %1090 = vst.msk [vmem:[%s1678_s22 + $0x4c] sm:$0xf] %vm1070_vm3, %v1342_v55  ;;  %v875_v1 = vld [vmem:[#allocation2 + $0x20] sm:$0xff]  ;;  %v703_v3 = vpop.f32.mrb[14].mxu0  ;;  %v767_v4 = vpop.f32.mrb[14].mxu1 }
 0x11d   : > { %v891_v2 = vld [vmem:[#allocation2 + $0xa0] sm:$0xff]  ;;  %v914_v5 = vadd.f32 %v1668_v63, %v875_v1  ;;  %842 = vst.msk [vmem:[#allocation2 + $0x30] sm:$0xff] %vm272_vm0, %v809_v60  ;;  %858 = vst.msk [vmem:[#allocation2 + $0xb0] sm:$0xff] %vm272_vm0, %v825_v61  ;;  %v810_v7 = vadd.f32 %v703_v3, %v312_v58  ;;  %v826_v8 = vadd.f32 %v767_v4, %v328_v59  ;;  %v705_v9 = vpop.f32.mrb[15].mxu0  ;;  %v769_v10 = vpop.f32.mrb[15].mxu1 }
 0x11e   : > { %v930_v6 = vadd.f32 %v1668_v63, %v891_v2  ;;  %v876_v11 = vld [vmem:[#allocation2 + $0x28] sm:$0xff]  ;;  %v317_v10 = vld [vmem:[#allocation2 + $0x60] sm:$0xff] }
 0x11f   : > { %v892_v12 = vld [vmem:[#allocation2 + $0xa8] sm:$0xff]  ;;  %v1327_v13 = vpack.c.bf16 %v914_v5, %v914_v5  ;;  %v915_v15 = vadd.f32 %v1668_v63, %v876_v11  ;;  %843 = vst.msk [vmem:[#allocation2 + $0x38] sm:$0xff] %vm272_vm0, %v810_v7  ;;  %859 = vst.msk [vmem:[#allocation2 + $0xb8] sm:$0xff] %vm272_vm0, %v826_v8  ;;  %v333_v11 = vld [vmem:[#allocation2 + $0xe0] sm:$0xff] }
 0x120   : > { %v1343_v14 = vpack.c.bf16 %v930_v6, %v930_v6  ;;  %v931_v16 = vadd.f32 %v1668_v63, %v892_v12 }
 0x121   : > { %1075 = vst.msk [vmem:[%s1678_s22 + $0x10] sm:$0xf] %vm1070_vm3, %v1327_v13  ;;  %v1328_v19 = vpack.c.bf16 %v915_v15, %v915_v15 }
 0x122   : > { %1091 = vst.msk [vmem:[%s1678_s22 + $0x50] sm:$0xf] %vm1070_vm3, %v1343_v14  ;;  %v1344_v20 = vpack.c.bf16 %v931_v16, %v931_v16  ;;  %v708_v21 = vpop.f32.mrb[16].mxu0  ;;  %v772_v22 = vpop.f32.mrb[16].mxu1  ;;  %v318_v16 = vld [vmem:[#allocation2 + $0x68] sm:$0xff] }
 0x123   : > { %1076 = vst.msk [vmem:[%s1678_s22 + $0x14] sm:$0xf] %vm1070_vm3, %v1328_v19  ;;  %v811_v25 = vadd.f32 %v708_v21, %v313_v17  ;;  %v827_v26 = vadd.f32 %v772_v22, %v329_v18  ;;  %v710_v27 = vpop.f32.mrb[17].mxu0  ;;  %v774_v28 = vpop.f32.mrb[17].mxu1  ;;  %v334_v17 = vld [vmem:[#allocation2 + $0xe8] sm:$0xff] }
 0x124   : > { %1092 = vst.msk [vmem:[%s1678_s22 + $0x54] sm:$0xf] %vm1070_vm3, %v1344_v20  ;;  %v877_v29 = vld [vmem:[#allocation2 + $0x30] sm:$0xff]  ;;  %v711_v31 = vpop.f32.mrb[18].mxu0  ;;  %v775_v32 = vpop.f32.mrb[18].mxu1 }
 0x125   : > { %v893_v30 = vld [vmem:[#allocation2 + $0xb0] sm:$0xff]  ;;  %v916_v33 = vadd.f32 %v1668_v63, %v877_v29  ;;  %844 = vst.msk [vmem:[#allocation2 + $0x40] sm:$0xff] %vm272_vm0, %v811_v25  ;;  %860 = vst.msk [vmem:[#allocation2 + $0xc0] sm:$0xff] %vm272_vm0, %v827_v26  ;;  %v812_v35 = vadd.f32 %v711_v31, %v314_v23  ;;  %v828_v36 = vadd.f32 %v775_v32, %v330_v24  ;;  %v713_v37 = vpop.f32.mrb[19].mxu0  ;;  %v777_v38 = vpop.f32.mrb[19].mxu1 }
 0x126   : > { %v932_v34 = vadd.f32 %v1668_v63, %v893_v30  ;;  %v878_v39 = vld [vmem:[#allocation2 + $0x38] sm:$0xff]  ;;  %v319_v38 = vld [vmem:[#allocation2 + $0x70] sm:$0xff] }
 0x127   : > { %v894_v40 = vld [vmem:[#allocation2 + $0xb8] sm:$0xff]  ;;  %v1329_v41 = vpack.c.bf16 %v916_v33, %v916_v33  ;;  %v917_v43 = vadd.f32 %v1668_v63, %v878_v39  ;;  %845 = vst.msk [vmem:[#allocation2 + $0x48] sm:$0xff] %vm272_vm0, %v812_v35  ;;  %861 = vst.msk [vmem:[#allocation2 + $0xc8] sm:$0xff] %vm272_vm0, %v828_v36  ;;  %v335_v39 = vld [vmem:[#allocation2 + $0xf0] sm:$0xff] }
 0x128   : > { %v1345_v42 = vpack.c.bf16 %v932_v34, %v932_v34  ;;  %v933_v44 = vadd.f32 %v1668_v63, %v894_v40 }
 0x129   : > { %1077 = vst.msk [vmem:[%s1678_s22 + $0x18] sm:$0xf] %vm1070_vm3, %v1329_v41  ;;  %v1330_v47 = vpack.c.bf16 %v917_v43, %v917_v43 }
 0x12a   : > { %1093 = vst.msk [vmem:[%s1678_s22 + $0x58] sm:$0xf] %vm1070_vm3, %v1345_v42  ;;  %v1346_v48 = vpack.c.bf16 %v933_v44, %v933_v44  ;;  %v716_v49 = vpop.f32.mrb[20].mxu0  ;;  %v780_v50 = vpop.f32.mrb[20].mxu1  ;;  %v320_v44 = vld [vmem:[#allocation2 + $0x78] sm:$0xff] }
 0x12b   : > { %1078 = vst.msk [vmem:[%s1678_s22 + $0x1c] sm:$0xf] %vm1070_vm3, %v1330_v47  ;;  %v813_v53 = vadd.f32 %v716_v49, %v315_v45  ;;  %v829_v54 = vadd.f32 %v780_v50, %v331_v46  ;;  %v718_v55 = vpop.f32.mrb[21].mxu0  ;;  %v782_v56 = vpop.f32.mrb[21].mxu1  ;;  %v336_v45 = vld [vmem:[#allocation2 + $0xf8] sm:$0xff] }
 0x12c   : > { %1094 = vst.msk [vmem:[%s1678_s22 + $0x5c] sm:$0xf] %vm1070_vm3, %v1346_v48  ;;  %v879_v57 = vld [vmem:[#allocation2 + $0x40] sm:$0xff]  ;;  %v719_v59 = vpop.f32.mrb[22].mxu0  ;;  %v783_v60 = vpop.f32.mrb[22].mxu1 }
 0x12d   : > { %v895_v58 = vld [vmem:[#allocation2 + $0xc0] sm:$0xff]  ;;  %v918_v61 = vadd.f32 %v1668_v63, %v879_v57  ;;  %846 = vst.msk [vmem:[#allocation2 + $0x50] sm:$0xff] %vm272_vm0, %v813_v53  ;;  %862 = vst.msk [vmem:[#allocation2 + $0xd0] sm:$0xff] %vm272_vm0, %v829_v54  ;;  %v814_v0 = vadd.f32 %v719_v59, %v316_v51  ;;  %v830_v1 = vadd.f32 %v783_v60, %v332_v52  ;;  %v721_v2 = vpop.f32.mrb[23].mxu0  ;;  %v785_v3 = vpop.f32.mrb[23].mxu1 }
 0x12e   : > { %v934_v62 = vadd.f32 %v1668_v63, %v895_v58  ;;  %v880_v4 = vld [vmem:[#allocation2 + $0x48] sm:$0xff] }
 0x12f   : > { %v896_v5 = vld [vmem:[#allocation2 + $0xc8] sm:$0xff]  ;;  %v1331_v6 = vpack.c.bf16 %v918_v61, %v918_v61  ;;  %v919_v8 = vadd.f32 %v1668_v63, %v880_v4  ;;  %847 = vst.msk [vmem:[#allocation2 + $0x58] sm:$0xff] %vm272_vm0, %v814_v0  ;;  %863 = vst.msk [vmem:[#allocation2 + $0xd8] sm:$0xff] %vm272_vm0, %v830_v1 }
 0x130   : > { %v1347_v7 = vpack.c.bf16 %v934_v62, %v934_v62  ;;  %v935_v9 = vadd.f32 %v1668_v63, %v896_v5 }
 0x131   : > { %1079 = vst.msk [vmem:[%s1678_s22 + $0x20] sm:$0xf] %vm1070_vm3, %v1331_v6  ;;  %v1332_v12 = vpack.c.bf16 %v919_v8, %v919_v8 }
 0x132   : > { %1095 = vst.msk [vmem:[%s1678_s22 + $0x60] sm:$0xf] %vm1070_vm3, %v1347_v7  ;;  %v1348_v13 = vpack.c.bf16 %v935_v9, %v935_v9  ;;  %v724_v14 = vpop.f32.mrb[24].mxu0  ;;  %v788_v15 = vpop.f32.mrb[24].mxu1 }
 0x133   : > { %1080 = vst.msk [vmem:[%s1678_s22 + $0x24] sm:$0xf] %vm1070_vm3, %v1332_v12  ;;  %v815_v18 = vadd.f32 %v724_v14, %v317_v10  ;;  %v831_v19 = vadd.f32 %v788_v15, %v333_v11  ;;  %v726_v20 = vpop.f32.mrb[25].mxu0  ;;  %v790_v21 = vpop.f32.mrb[25].mxu1 }
 0x134   : > { %1096 = vst.msk [vmem:[%s1678_s22 + $0x64] sm:$0xf] %vm1070_vm3, %v1348_v13  ;;  %v881_v22 = vld [vmem:[#allocation2 + $0x50] sm:$0xff]  ;;  %v727_v24 = vpop.f32.mrb[26].mxu0  ;;  %v791_v25 = vpop.f32.mrb[26].mxu1 }
 0x135   : > { %v897_v23 = vld [vmem:[#allocation2 + $0xd0] sm:$0xff]  ;;  %v920_v26 = vadd.f32 %v1668_v63, %v881_v22  ;;  %848 = vst.msk [vmem:[#allocation2 + $0x60] sm:$0xff] %vm272_vm0, %v815_v18  ;;  %864 = vst.msk [vmem:[#allocation2 + $0xe0] sm:$0xff] %vm272_vm0, %v831_v19  ;;  %v816_v28 = vadd.f32 %v727_v24, %v318_v16  ;;  %v832_v29 = vadd.f32 %v791_v25, %v334_v17  ;;  %v729_v30 = vpop.f32.mrb[27].mxu0  ;;  %v793_v31 = vpop.f32.mrb[27].mxu1 }
 0x136   : > { %v936_v27 = vadd.f32 %v1668_v63, %v897_v23  ;;  %v882_v32 = vld [vmem:[#allocation2 + $0x58] sm:$0xff] }
 0x137   : > { %v898_v33 = vld [vmem:[#allocation2 + $0xd8] sm:$0xff]  ;;  %v1333_v34 = vpack.c.bf16 %v920_v26, %v920_v26  ;;  %v921_v36 = vadd.f32 %v1668_v63, %v882_v32  ;;  %849 = vst.msk [vmem:[#allocation2 + $0x68] sm:$0xff] %vm272_vm0, %v816_v28  ;;  %865 = vst.msk [vmem:[#allocation2 + $0xe8] sm:$0xff] %vm272_vm0, %v832_v29 }
 0x138   : > { %v1349_v35 = vpack.c.bf16 %v936_v27, %v936_v27  ;;  %v937_v37 = vadd.f32 %v1668_v63, %v898_v33 }
 0x139   : > { %1081 = vst.msk [vmem:[%s1678_s22 + $0x28] sm:$0xf] %vm1070_vm3, %v1333_v34  ;;  %v1334_v40 = vpack.c.bf16 %v921_v36, %v921_v36 }
 0x13a   : > { %1097 = vst.msk [vmem:[%s1678_s22 + $0x68] sm:$0xf] %vm1070_vm3, %v1349_v35  ;;  %v1350_v41 = vpack.c.bf16 %v937_v37, %v937_v37  ;;  %v732_v42 = vpop.f32.mrb[28].mxu0  ;;  %v796_v43 = vpop.f32.mrb[28].mxu1 }
 0x13b   : > { %1082 = vst.msk [vmem:[%s1678_s22 + $0x2c] sm:$0xf] %vm1070_vm3, %v1334_v40  ;;  %v817_v46 = vadd.f32 %v732_v42, %v319_v38  ;;  %v833_v47 = vadd.f32 %v796_v43, %v335_v39  ;;  %v734_v48 = vpop.f32.mrb[29].mxu0  ;;  %v798_v49 = vpop.f32.mrb[29].mxu1 }
 0x13c   : > { %1098 = vst.msk [vmem:[%s1678_s22 + $0x6c] sm:$0xf] %vm1070_vm3, %v1350_v41  ;;  %v883_v50 = vld [vmem:[#allocation2 + $0x60] sm:$0xff]  ;;  %v735_v52 = vpop.f32.mrb[30].mxu0  ;;  %v799_v53 = vpop.f32.mrb[30].mxu1 }
 0x13d   : > { %v899_v51 = vld [vmem:[#allocation2 + $0xe0] sm:$0xff]  ;;  %v922_v54 = vadd.f32 %v1668_v63, %v883_v50  ;;  %850 = vst.msk [vmem:[#allocation2 + $0x70] sm:$0xff] %vm272_vm0, %v817_v46  ;;  %866 = vst.msk [vmem:[#allocation2 + $0xf0] sm:$0xff] %vm272_vm0, %v833_v47  ;;  %v818_v56 = vadd.f32 %v735_v52, %v320_v44  ;;  %v834_v57 = vadd.f32 %v799_v53, %v336_v45  ;;  %v737_v58 = vpop.f32.mrb[31].mxu0  ;;  %v801_v59 = vpop.f32.mrb[31].mxu1 }
 0x13e   : > { %v938_v55 = vadd.f32 %v1668_v63, %v899_v51  ;;  %v884_v60 = vld [vmem:[#allocation2 + $0x68] sm:$0xff] }
 0x13f   : > { %v900_v61 = vld [vmem:[#allocation2 + $0xe8] sm:$0xff]  ;;  %v1335_v62 = vpack.c.bf16 %v922_v54, %v922_v54  ;;  %v923_v1 = vadd.f32 %v1668_v63, %v884_v60  ;;  %851 = vst.msk [vmem:[#allocation2 + $0x78] sm:$0xff] %vm272_vm0, %v818_v56  ;;  %867 = vst.msk [vmem:[#allocation2 + $0xf8] sm:$0xff] %vm272_vm0, %v834_v57 }
 0x140   : > { %v1351_v0 = vpack.c.bf16 %v938_v55, %v938_v55  ;;  %v939_v2 = vadd.f32 %v1668_v63, %v900_v61 }
 0x141   : > { %1083 = vst.msk [vmem:[%s1678_s22 + $0x30] sm:$0xf] %vm1070_vm3, %v1335_v62  ;;  %v1336_v3 = vpack.c.bf16 %v923_v1, %v923_v1 }
 0x142   : > { %1099 = vst.msk [vmem:[%s1678_s22 + $0x70] sm:$0xf] %vm1070_vm3, %v1351_v0  ;;  %v1352_v4 = vpack.c.bf16 %v939_v2, %v939_v2 }
 0x143   : > { %1084 = vst.msk [vmem:[%s1678_s22 + $0x34] sm:$0xf] %vm1070_vm3, %v1336_v3 }
 0x144   : > { %1100 = vst.msk [vmem:[%s1678_s22 + $0x74] sm:$0xf] %vm1070_vm3, %v1352_v4  ;;  %v885_v5 = vld [vmem:[#allocation2 + $0x70] sm:$0xff] }
 0x145   : > { %v901_v6 = vld [vmem:[#allocation2 + $0xf0] sm:$0xff]  ;;  %v924_v7 = vadd.f32 %v1668_v63, %v885_v5 }
 0x146   : > { %v940_v8 = vadd.f32 %v1668_v63, %v901_v6  ;;  %v886_v9 = vld [vmem:[#allocation2 + $0x78] sm:$0xff] }
 0x147   : > { %v902_v10 = vld [vmem:[#allocation2 + $0xf8] sm:$0xff]  ;;  %v1337_v11 = vpack.c.bf16 %v924_v7, %v924_v7  ;;  %v925_v13 = vadd.f32 %v1668_v63, %v886_v9 }
 0x148   : > { %v1353_v12 = vpack.c.bf16 %v940_v8, %v940_v8  ;;  %v941_v14 = vadd.f32 %v1668_v63, %v902_v10 }
 0x149   : > { %1085 = vst.msk [vmem:[%s1678_s22 + $0x38] sm:$0xf] %vm1070_vm3, %v1337_v11  ;;  %v1338_v15 = vpack.c.bf16 %v925_v13, %v925_v13 }
 0x14a   : > { %1101 = vst.msk [vmem:[%s1678_s22 + $0x78] sm:$0xf] %vm1070_vm3, %v1353_v12  ;;  %v1354_v16 = vpack.c.bf16 %v941_v14, %v941_v14 }
 0x14b   : > { %1086 = vst.msk [vmem:[%s1678_s22 + $0x3c] sm:$0xf] %vm1070_vm3, %v1338_v15 }
 0x14c   : > { %1102 = vst.msk [vmem:[%s1678_s22 + $0x7c] sm:$0xf] %vm1070_vm3, %v1354_v16 }
 0x14d PF: > { %s13_s14 = sadd.s32 1, %s1481_s14   ;;  %s1813_s12 = smov %s1477_s13 }
 0x14e   : > { %p10_p5 = scmp.ge.s32.totalorder %s13_s14, 4   ;;  %s1814_s13 = smov %s1816_s15 }
 0x150   :  { %12 = sbr.rel (!%p10_p5) target bundleno = 2 (0x2), region = 76 }

// kernel: _lambda_.26
= control target key start
LH: loop header
LB: loop body
LE: loop exit
PB: predicated region body
PF: predicated region fallthrough
CT: control target
= control target key end

     0   :  { %vm19_vm0 = vcmask 64512   ;;  %v565_v1 = vmov 0.0   ;;  %vm144_vm1 = vcmask 588800   ;;  %vm169_vm2 = vcmask 1043456   ;;  %s750_s1 = inlined_call_operand.vmem [shape: bf16[72,8], index: 1, kind: input, shape index: {}]   ;;  %s751_s0 = inlined_call_operand.vmem [shape: bf16[128,72], index: 0, kind: input, shape index: {}]   ;;  %s752_s2 = inlined_call_operand.vmem [shape: f32[1,8], index: 2, kind: input, shape index: {}]   ;;  %s753_s3 = inlined_call_operand.vmem [shape: bf16[128,8], index: 3, kind: output, shape index: {}]  }
   0x1   :  { %v552_v0 = vld [vmem:[%s750_s1] sm:$0xff]   ;;  %22 = vst.msk [vmem:[#allocation2 + $0x10] sm:$0xff] %vm19_vm0, %v565_v1  ;;  %20 = vst.msk [vmem:[#allocation2] sm:$0xff] %vm19_vm0, %v565_v1  ;;  %v553_v2 = vld [vmem:[%s750_s1 + $0x8] sm:$0xff]   ;;  %vm425_vm3 = vcmask 60416  }
   0x2   :  { %21 = vst.msk [vmem:[#allocation2 + $0x8] sm:$0xff] %vm19_vm0, %v565_v1  ;;  %23 = vst.msk [vmem:[#allocation2 + $0x18] sm:$0xff] %vm19_vm0, %v565_v1  ;;  %513 = vmatprep.subr.bf16.mxu0 %v552_v0  ;;  %539 = vmatprep.subr.bf16.mxu1 %v552_v0  ;;  %v554_v3 = vld [vmem:[%s750_s1 + $0x10] sm:$0xff]   ;;  %v557_v4 = vld [vmem:[%s751_s0] sm:$0xff]  }
   0x3   :  { %24 = vst.msk [vmem:[#allocation2 + $0x20] sm:$0xff] %vm19_vm0, %v565_v1  ;;  %25 = vst.msk [vmem:[#allocation2 + $0x28] sm:$0xff] %vm19_vm0, %v565_v1  ;;  %514 = vmatpush3.bf16.msra.mxu0 %v552_v0  ;;  %544 = vmatpush3.bf16.msra.mxu1 %v552_v0  ;;  %v558_v5 = vld [vmem:[%s751_s0 + $0x20] sm:$0xff]   ;;  %v555_v6 = vld [vmem:[%s750_s1 + $0x18] sm:$0xff]  }
   0x4   :  { %26 = vst.msk [vmem:[#allocation2 + $0x30] sm:$0xff] %vm19_vm0, %v565_v1  ;;  %27 = vst.msk [vmem:[#allocation2 + $0x38] sm:$0xff] %vm19_vm0, %v565_v1  ;;  %515 = vmatprep.subr.bf16.mxu0 %v553_v2  ;;  %540 = vmatprep.subr.bf16.mxu1 %v553_v2  ;;  %v556_v7 = vld [vmem:[%s750_s1 + $0x20] ss:$0 sps:$4 sm:$0xff]   ;;  %v559_v9 = vld [vmem:[%s751_s0 + $0x8] sm:$0xff]  }
   0x5   :  { %28 = vst.msk [vmem:[#allocation2 + $0x40] sm:$0xff] %vm19_vm0, %v565_v1  ;;  %29 = vst.msk [vmem:[#allocation2 + $0x48] sm:$0xff] %vm19_vm0, %v565_v1  ;;  %523 = vmatprep.mubr.msk.bf16.mxu0 %vm144_vm1, %v557_v4  ;;  %531 = vmatprep.mubr.msk.bf16.mxu1 %vm144_vm1, %v558_v5  ;;  %v171_v8 = vsel %vm169_vm2, %v556_v7, 0  ;;  %v560_v10 = vld [vmem:[%s751_s0 + $0x28] sm:$0xff]   ;;  %v561_v11 = vld [vmem:[%s751_s0 + $0x10] sm:$0xff]  }
   0x6   :  { %30 = vst.msk [vmem:[#allocation2 + $0x50] sm:$0xff] %vm19_vm0, %v565_v1  ;;  %31 = vst.msk [vmem:[#allocation2 + $0x58] sm:$0xff] %vm19_vm0, %v565_v1  ;;  %v562_v12 = vld [vmem:[%s751_s0 + $0x30] sm:$0xff]   ;;  %v563_v13 = vld [vmem:[%s751_s0 + $0x18] sm:$0xff]  }
   0x7   :  { %32 = vst.msk [vmem:[#allocation2 + $0x60] sm:$0xff] %vm19_vm0, %v565_v1  ;;  %33 = vst.msk [vmem:[#allocation2 + $0x68] sm:$0xff] %vm19_vm0, %v565_v1  ;;  %516 = vmatpush3.bf16.msra.mxu0 %v553_v2  ;;  %545 = vmatpush3.bf16.msra.mxu1 %v553_v2  ;;  %v564_v14 = vld [vmem:[%s751_s0 + $0x38] sm:$0xff]   ;;  %v660_v43 = vld [vmem:[%s752_s2] ss:$0 sm:$0xff] }
   0x8   :  { %34 = vst.msk [vmem:[#allocation2 + $0x70] sm:$0xff] %vm19_vm0, %v565_v1  ;;  %35 = vst.msk [vmem:[#allocation2 + $0x78] sm:$0xff] %vm19_vm0, %v565_v1  ;;  %517 = vmatprep.subr.bf16.mxu0 %v554_v3  ;;  %541 = vmatprep.subr.bf16.mxu1 %v554_v3  ;;  %v38_v15 = vld [vmem:[#allocation2 + $0x10] sm:$0xff]  ;;  %v36_v17 = vld [vmem:[#allocation2] sm:$0xff] }
   0x9   :  { %v39_v21 = vld [vmem:[#allocation2 + $0x18] sm:$0xff]  ;;  %v37_v27 = vld [vmem:[#allocation2 + $0x8] sm:$0xff] }
   0xa   :  { %v40_v41 = vld [vmem:[#allocation2 + $0x20] sm:$0xff]  ;;  %v41_v52 = vld [vmem:[#allocation2 + $0x28] sm:$0xff] }
   0xb   :  { %518 = vmatpush3.bf16.msra.mxu0 %v554_v3  ;;  %546 = vmatpush3.bf16.msra.mxu1 %v554_v3  ;;  %v42_v39 = vld [vmem:[#allocation2 + $0x30] sm:$0xff]  ;;  %v43_v46 = vld [vmem:[#allocation2 + $0x38] sm:$0xff] }
   0xc   :  { %519 = vmatprep.subr.bf16.mxu0 %v555_v6  ;;  %542 = vmatprep.subr.bf16.mxu1 %v555_v6  ;;  %v44_v18 = vld [vmem:[#allocation2 + $0x40] sm:$0xff]  ;;  %v45_v28 = vld [vmem:[#allocation2 + $0x48] sm:$0xff] }
   0xd   :  { %v46_v16 = vld [vmem:[#allocation2 + $0x50] sm:$0xff]  ;;  %v47_v22 = vld [vmem:[#allocation2 + $0x58] sm:$0xff] }
   0xe   :  { %v48_v42 = vld [vmem:[#allocation2 + $0x60] sm:$0xff]  ;;  %v49_v53 = vld [vmem:[#allocation2 + $0x68] sm:$0xff] }
   0xf   :  { %520 = vmatpush3.bf16.msra.mxu0 %v555_v6  ;;  %547 = vmatpush3.bf16.msra.mxu1 %v555_v6  ;;  %v50_v40 = vld [vmem:[#allocation2 + $0x70] sm:$0xff]  ;;  %v51_v47 = vld [vmem:[#allocation2 + $0x78] sm:$0xff] }
  0x10   :  { %549 = vmatprep.subr.msk.bf16.mxu0 %vm169_vm2, %v556_v7  ;;  %550 = vmatprep.subr.msk.bf16.mxu1 %vm169_vm2, %v556_v7 }
  0x13   :  { %522 = vmatpush3.bf16.msra.mxu0 %v171_v8  ;;  %548 = vmatpush3.bf16.msra.mxu1 %v171_v8 }
  0x16   :  { %524 = vmatmul.mubr.msk.bf16.vlgmr.msra.gmra.mrb[0].mxu0 %vm144_vm1, %v559_v9  ;;  %532 = vmatmul.mubr.msk.bf16.vlgmr.msra.gmra.mrb[0].mxu1 %vm144_vm1, %v560_v10 }
  0x17   :  { %527 = vmatprep.mubr.msk.bf16.mxu0 %vm144_vm1, %v561_v11  ;;  %535 = vmatprep.mubr.msk.bf16.mxu1 %vm144_vm1, %v562_v12 }
  0x1e   :  { %528 = vmatmul.mubr.msk.bf16.gmra.mrb[4].mxu0 %vm144_vm1, %v563_v13  ;;  %536 = vmatmul.mubr.msk.bf16.gmra.mrb[4].mxu1 %vm144_vm1, %v564_v14 }
  0xe9   :  { %v525_v19 = vpop.f32.mrb[0].mxu0  ;;  %v533_v20 = vpop.f32.mrb[0].mxu1 }
  0xea   :  { %v272_v23 = vadd.f32 %v525_v19, %v38_v15  ;;  %v280_v24 = vadd.f32 %v533_v20, %v46_v16  ;;  %v207_v25 = vpop.f32.mrb[1].mxu0  ;;  %v239_v26 = vpop.f32.mrb[1].mxu1 }
  0xeb   :  { %v270_v29 = vadd.f32 %v207_v25, %v36_v17  ;;  %v278_v30 = vadd.f32 %v239_v26, %v44_v18  ;;  %v526_v31 = vpop.f32.mrb[2].mxu0  ;;  %v534_v32 = vpop.f32.mrb[2].mxu1 }
  0xec   :  { %289 = vst.msk [vmem:[#allocation2 + $0x10] sm:$0xff] %vm19_vm0, %v272_v23  ;;  %297 = vst.msk [vmem:[#allocation2 + $0x50] sm:$0xff] %vm19_vm0, %v280_v24  ;;  %v273_v33 = vadd.f32 %v526_v31, %v39_v21  ;;  %v281_v34 = vadd.f32 %v534_v32, %v47_v22  ;;  %v210_v35 = vpop.f32.mrb[3].mxu0  ;;  %v242_v36 = vpop.f32.mrb[3].mxu1 }
  0xed   :  { %287 = vst.msk [vmem:[#allocation2] sm:$0xff] %vm19_vm0, %v270_v29  ;;  %295 = vst.msk [vmem:[#allocation2 + $0x40] sm:$0xff] %vm19_vm0, %v278_v30  ;;  %v271_v37 = vadd.f32 %v210_v35, %v37_v27  ;;  %v279_v38 = vadd.f32 %v242_v36, %v45_v28 }
  0xee   :  { %290 = vst.msk [vmem:[#allocation2 + $0x18] sm:$0xff] %vm19_vm0, %v273_v33  ;;  %298 = vst.msk [vmem:[#allocation2 + $0x58] sm:$0xff] %vm19_vm0, %v281_v34 }
  0xef   :  { %288 = vst.msk [vmem:[#allocation2 + $0x8] sm:$0xff] %vm19_vm0, %v271_v37  ;;  %296 = vst.msk [vmem:[#allocation2 + $0x48] sm:$0xff] %vm19_vm0, %v279_v38 }
  0xf1   :  { %v529_v44 = vpop.f32.mrb[4].mxu0  ;;  %v537_v45 = vpop.f32.mrb[4].mxu1 }
  0xf2   :  { %v276_v48 = vadd.f32 %v529_v44, %v42_v39  ;;  %v284_v49 = vadd.f32 %v537_v45, %v50_v40  ;;  %v223_v50 = vpop.f32.mrb[5].mxu0  ;;  %v255_v51 = vpop.f32.mrb[5].mxu1 }
  0xf3   :  { %v308_v54 = vld [vmem:[#allocation2 + $0x10] sm:$0xff]  ;;  %v274_v56 = vadd.f32 %v223_v50, %v40_v41  ;;  %v282_v57 = vadd.f32 %v255_v51, %v48_v42  ;;  %v530_v58 = vpop.f32.mrb[6].mxu0  ;;  %v538_v59 = vpop.f32.mrb[6].mxu1 }
  0xf4   :  { %v316_v55 = vld [vmem:[#allocation2 + $0x50] sm:$0xff]  ;;  %v331_v60 = vadd.f32 %v660_v43, %v308_v54  ;;  %v306_v62 = vld [vmem:[#allocation2] sm:$0xff]  ;;  %293 = vst.msk [vmem:[#allocation2 + $0x30] sm:$0xff] %vm19_vm0, %v276_v48  ;;  %301 = vst.msk [vmem:[#allocation2 + $0x70] sm:$0xff] %vm19_vm0, %v284_v49  ;;  %v277_v0 = vadd.f32 %v530_v58, %v43_v46  ;;  %v285_v1 = vadd.f32 %v538_v59, %v51_v47  ;;  %v226_v2 = vpop.f32.mrb[7].mxu0  ;;  %v258_v3 = vpop.f32.mrb[7].mxu1 }
  0xf5   :  { %v339_v61 = vadd.f32 %v660_v43, %v316_v55  ;;  %v314_v63 = vld [vmem:[#allocation2 + $0x40] sm:$0xff]  ;;  %v329_v4 = vadd.f32 %v660_v43, %v306_v62  ;;  %v309_v6 = vld [vmem:[#allocation2 + $0x18] sm:$0xff]  ;;  %291 = vst.msk [vmem:[#allocation2 + $0x20] sm:$0xff] %vm19_vm0, %v274_v56  ;;  %299 = vst.msk [vmem:[#allocation2 + $0x60] sm:$0xff] %vm19_vm0, %v282_v57  ;;  %v275_v8 = vadd.f32 %v226_v2, %v41_v52 }
  0xf6   :  { %v337_v5 = vadd.f32 %v660_v43, %v314_v63  ;;  %v317_v7 = vld [vmem:[#allocation2 + $0x58] sm:$0xff]  ;;  %v283_v9 = vadd.f32 %v258_v3, %v49_v53  ;;  %v347_v10 = vmax.f32 %v331_v60, 0.0  ;;  %v332_v12 = vadd.f32 %v660_v43, %v309_v6  ;;  %v307_v14 = vld [vmem:[#allocation2 + $0x8] sm:$0xff]  ;;  %294 = vst.msk [vmem:[#allocation2 + $0x38] sm:$0xff] %vm19_vm0, %v277_v0  ;;  %302 = vst.msk [vmem:[#allocation2 + $0x78] sm:$0xff] %vm19_vm0, %v285_v1 }
  0xf7   :  { %v355_v11 = vmax.f32 %v339_v61, 0.0  ;;  %v340_v13 = vadd.f32 %v660_v43, %v317_v7  ;;  %v315_v15 = vld [vmem:[#allocation2 + $0x48] sm:$0xff]  ;;  %v345_v16 = vmax.f32 %v329_v4, 0.0  ;;  %v330_v18 = vadd.f32 %v660_v43, %v307_v14  ;;  %292 = vst.msk [vmem:[#allocation2 + $0x28] sm:$0xff] %vm19_vm0, %v275_v8 }
  0xf8   :  { %v353_v17 = vmax.f32 %v337_v5, 0.0  ;;  %v338_v19 = vadd.f32 %v660_v43, %v315_v15  ;;  %300 = vst.msk [vmem:[#allocation2 + $0x68] sm:$0xff] %vm19_vm0, %v283_v9  ;;  %v486_v20 = vpack.c.bf16 %v347_v10, %v347_v10  ;;  %v348_v22 = vmax.f32 %v332_v12, 0.0 }
  0xf9   :  { %v494_v21 = vpack.c.bf16 %v355_v11, %v355_v11  ;;  %v356_v23 = vmax.f32 %v340_v13, 0.0  ;;  %v484_v24 = vpack.c.bf16 %v345_v16, %v345_v16  ;;  %v346_v26 = vmax.f32 %v330_v18, 0.0 }
  0xfa   :  { %v492_v25 = vpack.c.bf16 %v353_v17, %v353_v17  ;;  %v354_v27 = vmax.f32 %v338_v19, 0.0  ;;  %428 = vst.msk [vmem:[%s753_s3 + $0x8] sm:$0xf] %vm425_vm3, %v486_v20  ;;  %v487_v28 = vpack.c.bf16 %v348_v22, %v348_v22 }
  0xfb   :  { %436 = vst.msk [vmem:[%s753_s3 + $0x28] sm:$0xf] %vm425_vm3, %v494_v21  ;;  %v495_v29 = vpack.c.bf16 %v356_v23, %v356_v23  ;;  %426 = vst.msk [vmem:[%s753_s3] sm:$0xf] %vm425_vm3, %v484_v24  ;;  %v485_v30 = vpack.c.bf16 %v346_v26, %v346_v26  ;;  %v312_v32 = vld [vmem:[#allocation2 + $0x30] sm:$0xff] }
  0xfc   :  { %434 = vst.msk [vmem:[%s753_s3 + $0x20] sm:$0xf] %vm425_vm3, %v492_v25  ;;  %v493_v31 = vpack.c.bf16 %v354_v27, %v354_v27  ;;  %v320_v33 = vld [vmem:[#allocation2 + $0x70] sm:$0xff]  ;;  %429 = vst.msk [vmem:[%s753_s3 + $0xc] sm:$0xf] %vm425_vm3, %v487_v28  ;;  %v335_v34 = vadd.f32 %v660_v43, %v312_v32  ;;  %v310_v36 = vld [vmem:[#allocation2 + $0x20] sm:$0xff] }
  0xfd   :  { %437 = vst.msk [vmem:[%s753_s3 + $0x2c] sm:$0xf] %vm425_vm3, %v495_v29  ;;  %v343_v35 = vadd.f32 %v660_v43, %v320_v33  ;;  %v318_v37 = vld [vmem:[#allocation2 + $0x60] sm:$0xff]  ;;  %427 = vst.msk [vmem:[%s753_s3 + $0x4] sm:$0xf] %vm425_vm3, %v485_v30  ;;  %v333_v38 = vadd.f32 %v660_v43, %v310_v36  ;;  %v313_v40 = vld [vmem:[#allocation2 + $0x38] sm:$0xff] }
  0xfe   :  { %435 = vst.msk [vmem:[%s753_s3 + $0x24] sm:$0xf] %vm425_vm3, %v493_v31  ;;  %v341_v39 = vadd.f32 %v660_v43, %v318_v37  ;;  %v321_v41 = vld [vmem:[#allocation2 + $0x78] sm:$0xff]  ;;  %v351_v42 = vmax.f32 %v335_v34, 0.0  ;;  %v336_v45 = vadd.f32 %v660_v43, %v313_v40  ;;  %v311_v47 = vld [vmem:[#allocation2 + $0x28] sm:$0xff] }
  0xff   :  { %v359_v44 = vmax.f32 %v343_v35, 0.0  ;;  %v344_v46 = vadd.f32 %v660_v43, %v321_v41  ;;  %v319_v48 = vld [vmem:[#allocation2 + $0x68] sm:$0xff]  ;;  %v349_v49 = vmax.f32 %v333_v38, 0.0  ;;  %v334_v51 = vadd.f32 %v660_v43, %v311_v47 }
 0x100   :  { %v357_v50 = vmax.f32 %v341_v39, 0.0  ;;  %v342_v52 = vadd.f32 %v660_v43, %v319_v48  ;;  %v490_v53 = vpack.c.bf16 %v351_v42, %v351_v42  ;;  %v352_v55 = vmax.f32 %v336_v45, 0.0 }
 0x101   :  { %v498_v54 = vpack.c.bf16 %v359_v44, %v359_v44  ;;  %v360_v56 = vmax.f32 %v344_v46, 0.0  ;;  %v488_v57 = vpack.c.bf16 %v349_v49, %v349_v49  ;;  %v350_v59 = vmax.f32 %v334_v51, 0.0 }
 0x102   :  { %v496_v58 = vpack.c.bf16 %v357_v50, %v357_v50  ;;  %v358_v60 = vmax.f32 %v342_v52, 0.0  ;;  %432 = vst.msk [vmem:[%s753_s3 + $0x18] sm:$0xf] %vm425_vm3, %v490_v53  ;;  %v491_v61 = vpack.c.bf16 %v352_v55, %v352_v55 }
 0x103   :  { %440 = vst.msk [vmem:[%s753_s3 + $0x38] sm:$0xf] %vm425_vm3, %v498_v54  ;;  %v499_v43 = vpack.c.bf16 %v360_v56, %v360_v56  ;;  %430 = vst.msk [vmem:[%s753_s3 + $0x10] sm:$0xf] %vm425_vm3, %v488_v57  ;;  %v489_v62 = vpack.c.bf16 %v350_v59, %v350_v59 }
 0x104   :  { %438 = vst.msk [vmem:[%s753_s3 + $0x30] sm:$0xf] %vm425_vm3, %v496_v58  ;;  %v497_v63 = vpack.c.bf16 %v358_v60, %v358_v60  ;;  %433 = vst.msk [vmem:[%s753_s3 + $0x1c] sm:$0xf] %vm425_vm3, %v491_v61 }
 0x105   :  { %441 = vst.msk [vmem:[%s753_s3 + $0x3c] sm:$0xf] %vm425_vm3, %v499_v43  ;;  %431 = vst.msk [vmem:[%s753_s3 + $0x14] sm:$0xf] %vm425_vm3, %v489_v62 }
 0x106   :  { %439 = vst.msk [vmem:[%s753_s3 + $0x34] sm:$0xf] %vm425_vm3, %v497_v63 }

// kernel: _lambda_.25
= control target key start
LH: loop header
LB: loop body
LE: loop exit
PB: predicated region body
PF: predicated region fallthrough
CT: control target
= control target key end

     0   :  { %vm153_vm0 = vsmask.f32 3328  ;;  %vm154_vm1 = vsmask.f32 7440  ;;  %vm1304_vm3 = vcmask 60416   ;;  %s2064_s2 = inlined_call_operand.vmem [shape: bf16[2,9,9,8], index: 2, kind: input, shape index: {}]   ;;  %s2065_s3 = inlined_call_operand.vmem [shape: bf16[2,9,9,8], index: 3, kind: input, shape index: {}]   ;;  %s2066_s0 = inlined_call_operand.vmem [shape: bf16[2,9,9,8], index: 0, kind: input, shape index: {}]   ;;  %s2067_s1 = inlined_call_operand.vmem [shape: bf16[2,9,9,8], index: 1, kind: input, shape index: {}]   ;;  %s2068_s4 = inlined_call_operand.vmem [shape: bf16[2,8,8,8], index: 4, kind: output, shape index: {}]  }
   0x1   :  { %v81_v0 = vld [vmem:[%s2064_s2] sm:$0xf]  ;;  %v82_v1 = vld [vmem:[%s2064_s2 + $0x4] sm:$0x1]  ;;  %v83_v2 = vld [vmem:[%s2064_s2 + $0x8] sm:$0xf] }
   0x2   :  { %v84_v3 = vld [vmem:[%s2064_s2 + $0xc] sm:$0x1]  ;;  %v117_v4 = vld [vmem:[%s2065_s3] sm:$0xf]  ;;  %v17_v5 = vld [vmem:[%s2066_s0 + $0x8] sm:$0xf] }
   0x3   :  { %v118_v6 = vld [vmem:[%s2065_s3 + $0x4] sm:$0x1]  ;;  %v157_v7 = vshrl.u32 %v81_v0, 16  ;;  %v160_v8 = vshll.u32 %v81_v0, 16  ;;  %v166_v9 = vshll.u32 %v82_v1, 16  ;;  %v171_v10 = vshrl.u32 %v83_v2, 16  ;;  %vm1386_vm2 = vmor %vm153_vm0, %vm154_vm1 }
   0x4   :  { %v1374_v11 = vld [vmem:[%s2065_s3 + $0x8] sm:$0xf]  ;;  %v174_v12 = vshll.u32 %v83_v2, 16  ;;  %v180_v13 = vshll.u32 %v84_v3, 16  ;;  %v413_v14 = vshrl.u32 %v117_v4, 16  ;;  %v416_v15 = vshll.u32 %v117_v4, 16 }
   0x5   :  { %v120_v16 = vld [vmem:[%s2065_s3 + $0xc] sm:$0x1]  ;;  %v159_v17 = vrot.slane %v157_v7, 4  ;;  %v162_v18 = vrot.slane %v160_v8, 5  ;;  %v168_v19 = vrot.slane %v166_v9, 5  ;;  %v173_v20 = vrot.slane %v171_v10, 4 }
   0x6   :  { %v176_v21 = vrot.slane %v174_v12, 5  ;;  %v182_v22 = vrot.slane %v180_v13, 5  ;;  %v415_v23 = vrot.slane %v413_v14, 4  ;;  %v418_v24 = vrot.slane %v416_v15, 5  ;;  %v18_v29 = vld [vmem:[%s2066_s0 + $0xc] sm:$0x1] }
   0x7   :  { %v163_v25 = vor.u32 %v162_v18, %v159_v17  ;;  %v422_v26 = vshll.u32 %v118_v6, 16  ;;  %v427_v27 = vshrl.u32 %v1374_v11, 16  ;;  %v430_v28 = vshll.u32 %v1374_v11, 16  ;;  %v19_v35 = vld [vmem:[%s2066_s0 + $0x10] sm:$0xf] }
   0x8   :  { %v177_v31 = vor.u32 %v176_v21, %v173_v20  ;;  %v419_v32 = vor.u32 %v418_v24, %v415_v23  ;;  %v436_v33 = vshll.u32 %v120_v16, 16  ;;  %v685_v34 = vshrl.u32 %v17_v5, 16  ;;  %v20_v44 = vld [vmem:[%s2066_s0 + $0x14] sm:$0x1]  ;;  %v49_v49 = vld [vmem:[%s2067_s1 + $0x8] sm:$0xf] }
   0x9   :  { %v164_v36 = vrot.slane %v163_v25, 4  ;;  %v424_v37 = vrot.slane %v422_v26, 5  ;;  %v429_v38 = vrot.slane %v427_v27, 4  ;;  %v432_v39 = vrot.slane %v430_v28, 5  ;;  %v50_v58 = vld [vmem:[%s2067_s1 + $0xc] sm:$0x1] }
   0xa   :  { %v178_v40 = vrot.slane %v177_v31, 4  ;;  %v420_v41 = vrot.slane %v419_v32, 4  ;;  %v438_v42 = vrot.slane %v436_v33, 5  ;;  %v687_v43 = vrot.slane %v685_v34, 4  ;;  %v51_v63 = vld [vmem:[%s2067_s1 + $0x10] sm:$0xf] }
   0xb   :  { %v169_v45 = vsel %vm1386_vm2, %v164_v36, %v168_v19  ;;  %v433_v46 = vor.u32 %v432_v39, %v429_v38  ;;  %v688_v47 = vshll.u32 %v17_v5, 16  ;;  %v694_v48 = vshll.u32 %v18_v29, 16  ;;  %v85_v8 = vld [vmem:[%s2064_s2 + $0x10] sm:$0xf]  ;;  %v86_v18 = vld [vmem:[%s2064_s2 + $0x14] sm:$0x1] }
   0xc   :  { %v1403_v50 = vsel %vm1386_vm2, %v178_v40, %v182_v22  ;;  %v396_v51 = vmax.bf16 %v169_v45, %v117_v4  ;;  %v425_v52 = vsel %vm1386_vm2, %v420_v41, %v424_v37  ;;  %v699_v53 = vshrl.u32 %v19_v35, 16  ;;  %v1431_v22 = vld [vmem:[%s2065_s3 + $0x10] sm:$0xf]  ;;  %v122_v29 = vld [vmem:[%s2065_s3 + $0x14] sm:$0x1] }
   0xd   :  { %v397_v54 = vmax.bf16 %v1403_v50, %v1374_v11  ;;  %v434_v55 = vrot.slane %v433_v46, 4  ;;  %v690_v56 = vrot.slane %v688_v47, 5  ;;  %v696_v57 = vrot.slane %v694_v48, 5  ;;  %v21_v36 = vld [vmem:[%s2066_s0 + $0x18] sm:$0xf] }
   0xe   :  { %v652_v59 = vmax.bf16 %v425_v52, %v396_v51  ;;  %v701_v60 = vrot.slane %v699_v53, 4  ;;  %v702_v61 = vshll.u32 %v19_v35, 16  ;;  %v708_v62 = vshll.u32 %v20_v44, 16  ;;  %v22_v37 = vld [vmem:[%s2066_s0 + $0x1c] sm:$0x1] }
   0xf   :  { %v1417_v0 = vsel %vm1386_vm2, %v434_v55, %v438_v42  ;;  %v691_v1 = vor.u32 %v690_v56, %v687_v43  ;;  %v941_v2 = vshrl.u32 %v49_v49, 16  ;;  %v944_v3 = vshll.u32 %v49_v49, 16  ;;  %v52_v45 = vld [vmem:[%s2067_s1 + $0x14] sm:$0x1] }
  0x10   :  { %v653_v4 = vmax.bf16 %v1417_v0, %v397_v54  ;;  %v668_v5 = vmax.bf16 %v652_v59, %v49_v49  ;;  %v704_v6 = vrot.slane %v702_v61, 5  ;;  %v710_v7 = vrot.slane %v708_v62, 5  ;;  %v53_v49 = vld [vmem:[%s2067_s1 + $0x18] sm:$0xf] }
  0x11   :  { %v692_v9 = vrot.slane %v691_v1, 4  ;;  %v943_v10 = vrot.slane %v941_v2, 4  ;;  %v946_v12 = vrot.slane %v944_v3, 5  ;;  %v950_v13 = vshll.u32 %v50_v58, 16  ;;  %v87_v59 = vld [vmem:[%s2064_s2 + $0x18] sm:$0xf] }
  0x12   :  { %v669_v14 = vmax.bf16 %v653_v4, %v51_v63  ;;  %v705_v15 = vor.u32 %v704_v6, %v701_v60  ;;  %v955_v16 = vshrl.u32 %v51_v63, 16  ;;  %v958_v17 = vshll.u32 %v51_v63, 16 }
  0x13   :  { %v697_v19 = vsel %vm1386_vm2, %v692_v9, %v696_v57  ;;  %v947_v20 = vor.u32 %v946_v12, %v943_v10  ;;  %v952_v21 = vrot.slane %v950_v13, 5  ;;  %v185_v23 = vshrl.u32 %v85_v8, 16  ;;  %v1471_v13 = vld [vmem:[%s2065_s3 + $0x18] sm:$0xf] }
  0x14   :  { %v706_v24 = vrot.slane %v705_v15, 4  ;;  %v924_v25 = vmax.bf16 %v697_v19, %v668_v5  ;;  %v957_v26 = vrot.slane %v955_v16, 4  ;;  %v960_v27 = vrot.slane %v958_v17, 5  ;;  %v23_v19 = vld [vmem:[%s2066_s0 + $0x20] sm:$0xf] }
  0x15   :  { %v948_v28 = vrot.slane %v947_v20, 4  ;;  %v187_v31 = vrot.slane %v185_v23, 4  ;;  %v188_v32 = vshll.u32 %v85_v8, 16  ;;  %v194_v33 = vshll.u32 %v86_v18, 16  ;;  %v124_v20 = vld [vmem:[%s2065_s3 + $0x1c] sm:$0x1] }
  0x16   :  { %v711_v34 = vsel %vm1386_vm2, %v706_v24, %v710_v7  ;;  %v961_v35 = vor.u32 %v960_v27, %v957_v26  ;;  %v441_v38 = vshrl.u32 %v1431_v22, 16  ;;  %v444_v39 = vshll.u32 %v1431_v22, 16  ;;  %v88_v7 = vld [vmem:[%s2064_s2 + $0x1c] sm:$0x1] }
  0x17   :  { %v925_v40 = vmax.bf16 %v711_v34, %v669_v14  ;;  %v953_v41 = vsel %vm1386_vm2, %v948_v28, %v952_v21  ;;  %v190_v42 = vrot.slane %v188_v32, 5  ;;  %v196_v43 = vrot.slane %v194_v33, 5 }
  0x18   :  { %v1180_v44 = vmax.bf16 %v953_v41, %v924_v25  ;;  %v443_v46 = vrot.slane %v441_v38, 4  ;;  %v446_v47 = vrot.slane %v444_v39, 5  ;;  %v450_v48 = vshll.u32 %v122_v29, 16  ;;  %v24_v29 = vld [vmem:[%s2066_s0 + $0x24] sm:$0x1] }
  0x19   :  { %v191_v51 = vor.u32 %v190_v42, %v187_v31  ;;  %v713_v52 = vshrl.u32 %v21_v36, 16  ;;  %v716_v53 = vshll.u32 %v21_v36, 16  ;;  %v722_v54 = vshll.u32 %v22_v37, 16  ;;  %v54_v39 = vld [vmem:[%s2067_s1 + $0x1c] sm:$0x1] }
  0x1a   :  { %v1196_v55 = vmax.bf16 %v1180_v44, %v1374_v11  ;;  %v447_v56 = vor.u32 %v446_v47, %v443_v46  ;;  %v452_v57 = vrot.slane %v450_v48, 5  ;;  %v962_v58 = vrot.slane %v961_v35, 4 }
  0x1b   :  { %v192_v60 = vrot.slane %v191_v51, 4  ;;  %v715_v61 = vrot.slane %v713_v52, 4  ;;  %v718_v62 = vrot.slane %v716_v53, 5  ;;  %v724_v63 = vrot.slane %v722_v54, 5  ;;  %v89_v52 = vld [vmem:[%s2064_s2 + $0x20] sm:$0xf] }
  0x1c   :  { %v1242_v1 = vmax.bf16 %v1196_v55, %v1403_v50  ;;  %v448_v2 = vrot.slane %v447_v56, 4  ;;  %v964_v3 = vshll.u32 %v52_v45, 16  ;;  %v969_v4 = vshrl.u32 %v53_v49, 16 }
  0x1d   :  { %v197_v5 = vsel %vm1386_vm2, %v192_v60, %v196_v43  ;;  %v719_v11 = vor.u32 %v718_v62, %v715_v61  ;;  %v972_v6 = vshll.u32 %v53_v49, 16  ;;  %v199_v8 = vshrl.u32 %v87_v59, 16  ;;  %v90_v61 = vld [vmem:[%s2064_s2 + $0x24] sm:$0x1] }
  0x1e   :  { %v1288_v9 = vmax.bf16 %v1242_v1, %v1417_v0  ;;  %v398_v10 = vmax.bf16 %v197_v5, %v1431_v22  ;;  %v453_v50 = vsel %vm1386_vm2, %v448_v2, %v452_v57  ;;  %v966_v12 = vrot.slane %v964_v3, 5 }
  0x1f   :  { %v720_v14 = vrot.slane %v719_v11, 4  ;;  %v971_v15 = vrot.slane %v969_v4, 4  ;;  %v974_v16 = vrot.slane %v972_v6, 5  ;;  %v201_v17 = vrot.slane %v199_v8, 4  ;;  %v1517_v11 = vld [vmem:[%s2065_s3 + $0x20] sm:$0xf] }
  0x20   :  { %1305 = vst.msk [vmem:[%s2068_s4] sm:$0xf] %vm1304_vm3, %v1288_v9  ;;  %v654_v0 = vmax.bf16 %v453_v50, %v398_v10  ;;  %v967_v18 = vsel %vm1386_vm2, %v962_v58, %v966_v12  ;;  %v202_v21 = vshll.u32 %v87_v59, 16  ;;  %v208_v23 = vshll.u32 %v88_v7, 16  ;;  %v25_v9 = vld [vmem:[%s2066_s0 + $0x28] sm:$0xf] }
  0x21   :  { %v725_v24 = vsel %vm1386_vm2, %v720_v14, %v724_v63  ;;  %v975_v25 = vor.u32 %v974_v16, %v971_v15  ;;  %v1181_v26 = vmax.bf16 %v967_v18, %v925_v40  ;;  %v455_v27 = vshrl.u32 %v1471_v13, 16  ;;  %v55_v40 = vld [vmem:[%s2067_s1 + $0x20] sm:$0xf]  ;;  %v126_v10 = vld [vmem:[%s2065_s3 + $0x24] sm:$0x1] }
  0x22   :  { %v670_v28 = vmax.bf16 %v654_v0, %v53_v49  ;;  %v204_v31 = vrot.slane %v202_v21, 5  ;;  %v210_v32 = vrot.slane %v208_v23, 5  ;;  %v458_v33 = vshll.u32 %v1471_v13, 16  ;;  %v26_v23 = vld [vmem:[%s2066_s0 + $0x2c] sm:$0x1] }
  0x23   :  { %v1197_v34 = vmax.bf16 %v1181_v26, %v1431_v22  ;;  %v457_v35 = vrot.slane %v455_v27, 4  ;;  %v464_v36 = vshll.u32 %v124_v20, 16  ;;  %v727_v37 = vshrl.u32 %v23_v19, 16 }
  0x24   :  { %v926_v38 = vmax.bf16 %v725_v24, %v670_v28  ;;  %v205_v41 = vor.u32 %v204_v31, %v201_v17  ;;  %v460_v42 = vrot.slane %v458_v33, 5  ;;  %v730_v43 = vshll.u32 %v23_v19, 16  ;;  %v56_v24 = vld [vmem:[%s2067_s1 + $0x24] sm:$0x1] }
  0x25   :  { %v1243_v44 = vmax.bf16 %v1197_v34, %v197_v5  ;;  %v466_v45 = vrot.slane %v464_v36, 5  ;;  %v729_v46 = vrot.slane %v727_v37, 4  ;;  %v736_v47 = vshll.u32 %v24_v29, 16  ;;  %v57_v29 = vld [vmem:[%s2067_s1 + $0x28] sm:$0xf] }
  0x26   :  { %v206_v22 = vrot.slane %v205_v41, 4  ;;  %v461_v48 = vor.u32 %v460_v42, %v457_v35  ;;  %v732_v49 = vrot.slane %v730_v43, 5  ;;  %v976_v51 = vrot.slane %v975_v25, 4  ;;  %v91_v41 = vld [vmem:[%s2064_s2 + $0x28] sm:$0xf] }
  0x27   :  { %v1289_v53 = vmax.bf16 %v1243_v44, %v453_v50  ;;  %v738_v54 = vrot.slane %v736_v47, 5  ;;  %v978_v55 = vshll.u32 %v54_v39, 16  ;;  %v983_v56 = vshrl.u32 %v55_v40, 16 }
  0x28   :  { %v211_v57 = vsel %vm1386_vm2, %v206_v22, %v210_v32  ;;  %v462_v58 = vrot.slane %v461_v48, 4  ;;  %v733_v59 = vor.u32 %v732_v49, %v729_v46  ;;  %v986_v60 = vshll.u32 %v55_v40, 16  ;;  %v92_v46 = vld [vmem:[%s2064_s2 + $0x2c] sm:$0x1] }
  0x29   :  { %1306 = vst.msk [vmem:[%s2068_s4 + $0x4] sm:$0xf] %vm1304_vm3, %v1289_v53  ;;  %v399_v62 = vmax.bf16 %v211_v57, %v1471_v13  ;;  %v980_v63 = vrot.slane %v978_v55, 5  ;;  %v985_v1 = vrot.slane %v983_v56, 4  ;;  %v213_v2 = vshrl.u32 %v89_v52, 16 }
  0x2a   :  { %v467_v3 = vsel %vm1386_vm2, %v462_v58, %v466_v45  ;;  %v734_v4 = vrot.slane %v733_v59, 4  ;;  %v988_v5 = vrot.slane %v986_v60, 5  ;;  %v216_v6 = vshll.u32 %v89_v52, 16 }
  0x2b   :  { %v655_v7 = vmax.bf16 %v467_v3, %v399_v62  ;;  %v981_v8 = vsel %vm1386_vm2, %v976_v51, %v980_v63  ;;  %v215_v50 = vrot.slane %v213_v2, 4  ;;  %v222_v12 = vshll.u32 %v90_v61, 16  ;;  %v27_v63 = vld [vmem:[%s2066_s0 + $0x30] sm:$0xf] }
  0x2c   :  { %v739_v14 = vsel %vm1386_vm2, %v734_v4, %v738_v54  ;;  %v989_v15 = vor.u32 %v988_v5, %v985_v1  ;;  %v1182_v16 = vmax.bf16 %v981_v8, %v926_v38  ;;  %v218_v17 = vrot.slane %v216_v6, 5  ;;  %v128_v1 = vld [vmem:[%s2065_s3 + $0x2c] sm:$0x1] }
  0x2d   :  { %v671_v0 = vmax.bf16 %v655_v7, %v55_v40  ;;  %v224_v18 = vrot.slane %v222_v12, 5  ;;  %v469_v19 = vshrl.u32 %v1517_v11, 16  ;;  %v472_v20 = vshll.u32 %v1517_v11, 16  ;;  %v28_v12 = vld [vmem:[%s2066_s0 + $0x34] sm:$0x1] }
  0x2e   :  { %v1198_v21 = vmax.bf16 %v1182_v16, %v1471_v13  ;;  %v219_v25 = vor.u32 %v218_v17, %v215_v50  ;;  %v478_v26 = vshll.u32 %v126_v10, 16  ;;  %v741_v27 = vshrl.u32 %v25_v9, 16 }
  0x2f   :  { %v927_v28 = vmax.bf16 %v739_v14, %v671_v0  ;;  %v471_v31 = vrot.slane %v469_v19, 4  ;;  %v474_v32 = vrot.slane %v472_v20, 5  ;;  %v744_v33 = vshll.u32 %v25_v9, 16  ;;  %v58_v14 = vld [vmem:[%s2067_s1 + $0x2c] sm:$0x1] }
  0x30   :  { %v1244_v13 = vmax.bf16 %v1198_v21, %v211_v57  ;;  %v220_v34 = vrot.slane %v219_v25, 4  ;;  %v480_v35 = vrot.slane %v478_v26, 5  ;;  %v743_v36 = vrot.slane %v741_v27, 4  ;;  %v1559_v57 = vld [vmem:[%s2065_s3 + $0x28] sm:$0xf] }
  0x31   :  { %v475_v37 = vor.u32 %v474_v32, %v471_v31  ;;  %v746_v38 = vrot.slane %v744_v33, 5  ;;  %v750_v39 = vshll.u32 %v26_v23, 16  ;;  %v990_v40 = vrot.slane %v989_v15, 4  ;;  %v93_v31 = vld [vmem:[%s2064_s2 + $0x30] sm:$0xf] }
  0x32   :  { %v1290_v42 = vmax.bf16 %v1244_v13, %v467_v3  ;;  %v225_v43 = vsel %vm1386_vm2, %v220_v34, %v224_v18  ;;  %v992_v44 = vshll.u32 %v56_v24, 16  ;;  %v997_v45 = vshrl.u32 %v57_v29, 16  ;;  %v59_v18 = vld [vmem:[%s2067_s1 + $0x30] sm:$0xf] }
  0x33   :  { %v400_v47 = vmax.bf16 %v225_v43, %v1517_v11  ;;  %v476_v22 = vrot.slane %v475_v37, 4  ;;  %v747_v48 = vor.u32 %v746_v38, %v743_v36  ;;  %v752_v49 = vrot.slane %v750_v39, 5 }
  0x34   :  { %1307 = vst.msk [vmem:[%s2068_s4 + $0x8] sm:$0xf] %vm1304_vm3, %v1290_v42  ;;  %v994_v51 = vrot.slane %v992_v44, 5  ;;  %v999_v52 = vrot.slane %v997_v45, 4  ;;  %v1000_v53 = vshll.u32 %v57_v29, 16  ;;  %v227_v54 = vshrl.u32 %v91_v41, 16 }
  0x35   :  { %v481_v55 = vsel %vm1386_vm2, %v476_v22, %v480_v35  ;;  %v748_v56 = vrot.slane %v747_v48, 4  ;;  %v230_v58 = vshll.u32 %v91_v41, 16  ;;  %v236_v59 = vshll.u32 %v92_v46, 16  ;;  %v94_v35 = vld [vmem:[%s2064_s2 + $0x34] sm:$0x1] }
  0x36   :  { %v656_v60 = vmax.bf16 %v481_v55, %v400_v47  ;;  %v995_v61 = vsel %vm1386_vm2, %v990_v40, %v994_v51  ;;  %v1002_v62 = vrot.slane %v1000_v53, 5  ;;  %v229_v2 = vrot.slane %v227_v54, 4  ;;  %v1601_v46 = vld [vmem:[%s2065_s3 + $0x30] sm:$0xf]  ;;  %v130_v53 = vld [vmem:[%s2065_s3 + $0x34] sm:$0x1] }
  0x37   :  { %v753_v3 = vsel %vm1386_vm2, %v748_v56, %v752_v49  ;;  %v1183_v4 = vmax.bf16 %v995_v61, %v927_v28  ;;  %v232_v5 = vrot.slane %v230_v58, 5  ;;  %v238_v6 = vrot.slane %v236_v59, 5 }
  0x38   :  { %v672_v7 = vmax.bf16 %v656_v60, %v57_v29  ;;  %v1003_v8 = vor.u32 %v1002_v62, %v999_v52  ;;  %v483_v9 = vshrl.u32 %v1559_v57, 16  ;;  %v486_v10 = vshll.u32 %v1559_v57, 16  ;;  %v29_v52 = vld [vmem:[%s2066_s0 + $0x38] sm:$0xf] }
  0x39   :  { %v1199_v50 = vmax.bf16 %v1183_v4, %v1517_v11  ;;  %v233_v15 = vor.u32 %v232_v5, %v229_v2  ;;  %v492_v16 = vshll.u32 %v128_v1, 16  ;;  %v755_v17 = vshrl.u32 %v27_v63, 16  ;;  %v30_v2 = vld [vmem:[%s2066_s0 + $0x3c] sm:$0x1] }
  0x3a   :  { %v928_v0 = vmax.bf16 %v753_v3, %v672_v7  ;;  %v485_v19 = vrot.slane %v483_v9, 4  ;;  %v488_v20 = vrot.slane %v486_v10, 5  ;;  %v758_v21 = vshll.u32 %v27_v63, 16  ;;  %v60_v3 = vld [vmem:[%s2067_s1 + $0x34] sm:$0x1] }
  0x3b   :  { %v1245_v11 = vmax.bf16 %v1199_v50, %v225_v43  ;;  %v234_v23 = vrot.slane %v233_v15, 4  ;;  %v494_v24 = vrot.slane %v492_v16, 5  ;;  %v757_v25 = vrot.slane %v755_v17, 4 }
  0x3c   :  { %v489_v26 = vor.u32 %v488_v20, %v485_v19  ;;  %v760_v27 = vrot.slane %v758_v21, 5  ;;  %v764_v28 = vshll.u32 %v28_v12, 16  ;;  %v1004_v29 = vrot.slane %v1003_v8, 4  ;;  %v61_v8 = vld [vmem:[%s2067_s1 + $0x38] sm:$0xf] }
  0x3d   :  { %v1291_v32 = vmax.bf16 %v1245_v11, %v481_v55  ;;  %v239_v33 = vsel %vm1386_vm2, %v234_v23, %v238_v6  ;;  %v1006_v13 = vshll.u32 %v58_v14, 16  ;;  %v1011_v34 = vshrl.u32 %v59_v18, 16  ;;  %v95_v19 = vld [vmem:[%s2064_s2 + $0x38] sm:$0xf] }
  0x3e   :  { %v401_v36 = vmax.bf16 %v239_v33, %v1559_v57  ;;  %v490_v37 = vrot.slane %v489_v26, 4  ;;  %v761_v38 = vor.u32 %v760_v27, %v757_v25  ;;  %v766_v39 = vrot.slane %v764_v28, 5 }
  0x3f   :  { %1308 = vst.msk [vmem:[%s2068_s4 + $0xc] sm:$0xf] %vm1304_vm3, %v1291_v32  ;;  %v1008_v40 = vrot.slane %v1006_v13, 5  ;;  %v1013_v41 = vrot.slane %v1011_v34, 4  ;;  %v1014_v42 = vshll.u32 %v59_v18, 16  ;;  %v241_v43 = vshrl.u32 %v93_v31, 16 }
  0x40   :  { %v495_v44 = vsel %vm1386_vm2, %v490_v37, %v494_v24  ;;  %v762_v45 = vrot.slane %v761_v38, 4  ;;  %v244_v47 = vshll.u32 %v93_v31, 16  ;;  %v250_v22 = vshll.u32 %v94_v35, 16  ;;  %v96_v24 = vld [vmem:[%s2064_s2 + $0x3c] sm:$0x1] }
  0x41   :  { %v657_v48 = vmax.bf16 %v495_v44, %v401_v36  ;;  %v1009_v49 = vsel %vm1386_vm2, %v1004_v29, %v1008_v40  ;;  %v1016_v51 = vrot.slane %v1014_v42, 5  ;;  %v243_v54 = vrot.slane %v241_v43, 4  ;;  %v1643_v35 = vld [vmem:[%s2065_s3 + $0x38] sm:$0xf]  ;;  %v132_v42 = vld [vmem:[%s2065_s3 + $0x3c] sm:$0x1] }
  0x42   :  { %v767_v55 = vsel %vm1386_vm2, %v762_v45, %v766_v39  ;;  %v1184_v56 = vmax.bf16 %v1009_v49, %v928_v0  ;;  %v246_v58 = vrot.slane %v244_v47, 5  ;;  %v252_v59 = vrot.slane %v250_v22, 5 }
  0x43   :  { %v673_v60 = vmax.bf16 %v657_v48, %v59_v18  ;;  %v1017_v61 = vor.u32 %v1016_v51, %v1013_v41  ;;  %v497_v62 = vshrl.u32 %v1601_v46, 16  ;;  %v500_v63 = vshll.u32 %v1601_v46, 16  ;;  %v31_v41 = vld [vmem:[%s2066_s0 + $0x40] sm:$0xf] }
  0x44   :  { %v1200_v1 = vmax.bf16 %v1184_v56, %v1559_v57  ;;  %v247_v4 = vor.u32 %v246_v58, %v243_v54  ;;  %v506_v5 = vshll.u32 %v130_v53, 16  ;;  %v769_v6 = vshrl.u32 %v29_v52, 16  ;;  %v32_v54 = vld [vmem:[%s2066_s0 + $0x44] sm:$0x1] }
  0x45   :  { %v929_v7 = vmax.bf16 %v767_v55, %v673_v60  ;;  %v499_v9 = vrot.slane %v497_v62, 4  ;;  %v502_v10 = vrot.slane %v500_v63, 5  ;;  %v772_v50 = vshll.u32 %v29_v52, 16  ;;  %v62_v55 = vld [vmem:[%s2067_s1 + $0x3c] sm:$0x1] }
  0x46   :  { %v1246_v57 = vmax.bf16 %v1200_v1, %v239_v33  ;;  %v248_v12 = vrot.slane %v247_v4, 4  ;;  %v508_v14 = vrot.slane %v506_v5, 5  ;;  %v771_v15 = vrot.slane %v769_v6, 4 }
  0x47   :  { %v503_v16 = vor.u32 %v502_v10, %v499_v9  ;;  %v774_v17 = vrot.slane %v772_v50, 5  ;;  %v778_v0 = vshll.u32 %v30_v2, 16  ;;  %v1018_v18 = vrot.slane %v1017_v61, 4  ;;  %v63_v61 = vld [vmem:[%s2067_s1 + $0x40] sm:$0xf] }
  0x48   :  { %v1292_v20 = vmax.bf16 %v1246_v57, %v495_v44  ;;  %v253_v21 = vsel %vm1386_vm2, %v248_v12, %v252_v59  ;;  %v1020_v11 = vshll.u32 %v60_v3, 16  ;;  %v1025_v23 = vshrl.u32 %v61_v8, 16  ;;  %v64_v9 = vld [vmem:[%s2067_s1 + $0x44] sm:$0x1] }
  0x49   :  { %v402_v25 = vmax.bf16 %v253_v21, %v1601_v46  ;;  %v504_v26 = vrot.slane %v503_v16, 4  ;;  %v775_v27 = vor.u32 %v774_v17, %v771_v15  ;;  %v780_v28 = vrot.slane %v778_v0, 5 }
  0x4a   :  { %1309 = vst.msk [vmem:[%s2068_s4 + $0x10] sm:$0xf] %vm1304_vm3, %v1292_v20  ;;  %v1022_v29 = vrot.slane %v1020_v11, 5  ;;  %v1027_v31 = vrot.slane %v1025_v23, 4  ;;  %v1028_v32 = vshll.u32 %v61_v8, 16  ;;  %v255_v33 = vshrl.u32 %v95_v19, 16 }
  0x4b   :  { %v509_v13 = vsel %vm1386_vm2, %v504_v26, %v508_v14  ;;  %v776_v34 = vrot.slane %v775_v27, 4  ;;  %v258_v36 = vshll.u32 %v95_v19, 16  ;;  %v264_v37 = vshll.u32 %v96_v24, 16  ;;  %v97_v14 = vld [vmem:[%s2064_s2 + $0x40] sm:$0xf] }
  0x4c   :  { %v658_v38 = vmax.bf16 %v509_v13, %v402_v25  ;;  %v1023_v39 = vsel %vm1386_vm2, %v1018_v18, %v1022_v29  ;;  %v1030_v40 = vrot.slane %v1028_v32, 5  ;;  %v257_v43 = vrot.slane %v255_v33, 4  ;;  %v133_v25 = vld [vmem:[%s2065_s3 + $0x40] sm:$0xf]  ;;  %v134_v32 = vld [vmem:[%s2065_s3 + $0x44] sm:$0x1] }
  0x4d   :  { %v781_v44 = vsel %vm1386_vm2, %v776_v34, %v780_v28  ;;  %v1185_v45 = vmax.bf16 %v1023_v39, %v929_v7  ;;  %v260_v47 = vrot.slane %v258_v36, 5  ;;  %v266_v22 = vrot.slane %v264_v37, 5 }
  0x4e   :  { %v674_v48 = vmax.bf16 %v658_v38, %v61_v8  ;;  %v1031_v49 = vor.u32 %v1030_v40, %v1027_v31  ;;  %v511_v51 = vshrl.u32 %v1643_v35, 16  ;;  %v514_v52 = vshll.u32 %v1643_v35, 16 }
  0x4f   :  { %v1201_v53 = vmax.bf16 %v1185_v45, %v1601_v46  ;;  %v261_v56 = vor.u32 %v260_v47, %v257_v43  ;;  %v520_v58 = vshll.u32 %v132_v42, 16  ;;  %v783_v59 = vshrl.u32 %v31_v41, 16  ;;  %v99_v47 = vld [vmem:[%s2064_s2 + $0x48] sm:$0xf] }
  0x50   :  { %v930_v60 = vmax.bf16 %v781_v44, %v674_v48  ;;  %v513_v62 = vrot.slane %v511_v51, 4  ;;  %v516_v63 = vrot.slane %v514_v52, 5  ;;  %v786_v1 = vshll.u32 %v31_v41, 16 }
  0x51   :  { %v1247_v46 = vmax.bf16 %v1201_v53, %v253_v21  ;;  %v262_v2 = vrot.slane %v261_v56, 4  ;;  %v522_v3 = vrot.slane %v520_v58, 5  ;;  %v785_v4 = vrot.slane %v783_v59, 4  ;;  %v98_v21 = vld [vmem:[%s2064_s2 + $0x44] sm:$0x1] }
  0x52   :  { %v517_v5 = vor.u32 %v516_v63, %v513_v62  ;;  %v788_v6 = vrot.slane %v786_v1, 5  ;;  %v792_v7 = vshll.u32 %v32_v54, 16  ;;  %v1032_v8 = vrot.slane %v1031_v49, 4  ;;  %v102_v59 = vld [vmem:[%s2064_s2 + $0x54] sm:$0x1] }
  0x53   :  { %v1293_v10 = vmax.bf16 %v1247_v46, %v509_v13  ;;  %v267_v50 = vsel %vm1386_vm2, %v262_v2, %v266_v22  ;;  %v1034_v57 = vshll.u32 %v62_v55, 16  ;;  %v1039_v12 = vshrl.u32 %v63_v61, 16  ;;  %v100_v22 = vld [vmem:[%s2064_s2 + $0x4c] sm:$0x1] }
  0x54   :  { %v403_v15 = vmax.bf16 %v267_v50, %v1643_v35  ;;  %v518_v16 = vrot.slane %v517_v5, 4  ;;  %v789_v17 = vor.u32 %v788_v6, %v785_v4  ;;  %v794_v0 = vrot.slane %v792_v7, 5 }
  0x55   :  { %1310 = vst.msk [vmem:[%s2068_s4 + $0x14] sm:$0xf] %vm1304_vm3, %v1293_v10  ;;  %v1036_v18 = vrot.slane %v1034_v57, 5  ;;  %v1041_v19 = vrot.slane %v1039_v12, 4  ;;  %v1042_v20 = vshll.u32 %v63_v61, 16  ;;  %v1048_v11 = vshll.u32 %v64_v9, 16 }
  0x56   :  { %v523_v23 = vsel %vm1386_vm2, %v518_v16, %v522_v3  ;;  %v790_v24 = vrot.slane %v789_v17, 4  ;;  %v1213_v26 = vshrl.u32 %v97_v14, 16  ;;  %v1216_v27 = vshll.u32 %v97_v14, 16  ;;  %v135_v3 = vld [vmem:[%s2065_s3 + $0x48] sm:$0xf] }
  0x57   :  { %v659_v28 = vmax.bf16 %v523_v23, %v403_v15  ;;  %v1037_v29 = vsel %vm1386_vm2, %v1032_v8, %v1036_v18  ;;  %v1044_v31 = vrot.slane %v1042_v20, 5  ;;  %v1050_v33 = vrot.slane %v1048_v11, 5  ;;  %v136_v10 = vld [vmem:[%s2065_s3 + $0x4c] sm:$0x1]  ;;  %v1725_v12 = vld [vmem:[%s2065_s3 + $0x50] sm:$0xf] }
  0x58   :  { %v795_v13 = vsel %vm1386_vm2, %v790_v24, %v794_v0  ;;  %v1186_v34 = vmax.bf16 %v1037_v29, %v930_v60  ;;  %v1215_v36 = vrot.slane %v1213_v26, 4  ;;  %v1218_v37 = vrot.slane %v1216_v27, 5  ;;  %v33_v27 = vld [vmem:[%s2066_s0 + $0x50] sm:$0xf] }
  0x59   :  { %v675_v38 = vmax.bf16 %v659_v28, %v63_v61  ;;  %v1045_v39 = vor.u32 %v1044_v31, %v1041_v19  ;;  %v1222_v40 = vshll.u32 %v98_v21, 16  ;;  %v1259_v41 = vshrl.u32 %v133_v25, 16  ;;  %v138_v19 = vld [vmem:[%s2065_s3 + $0x54] sm:$0x1] }
  0x5a   :  { %v1202_v42 = vmax.bf16 %v1186_v34, %v1643_v35  ;;  %v1219_v43 = vor.u32 %v1218_v37, %v1215_v36  ;;  %v1262_v44 = vshll.u32 %v133_v25, 16  ;;  %v1268_v45 = vshll.u32 %v134_v32, 16  ;;  %v101_v35 = vld [vmem:[%s2064_s2 + $0x50] sm:$0xf]  ;;  %v34_v32 = vld [vmem:[%s2066_s0 + $0x54] sm:$0x1] }
  0x5b   :  { %v931_v48 = vmax.bf16 %v795_v13, %v675_v38  ;;  %v1046_v49 = vrot.slane %v1045_v39, 4  ;;  %v1224_v51 = vrot.slane %v1222_v40, 5  ;;  %v1261_v52 = vrot.slane %v1259_v41, 4 }
  0x5c   :  { %v1248_v53 = vmax.bf16 %v1202_v42, %v267_v50  ;;  %v1220_v54 = vrot.slane %v1219_v43, 4  ;;  %v1264_v55 = vrot.slane %v1262_v44, 5  ;;  %v1270_v56 = vrot.slane %v1268_v45, 5 }
  0x5d   :  { %v1051_v58 = vsel %vm1386_vm2, %v1046_v49, %v1050_v33  ;;  %v269_v60 = vshrl.u32 %v99_v47, 16  ;;  %v272_v61 = vshll.u32 %v99_v47, 16  ;;  %v278_v62 = vshll.u32 %v100_v22, 16  ;;  %v35_v33 = vld [vmem:[%s2066_s0 + $0x58] sm:$0xf] }
  0x5e   :  { %v1294_v63 = vmax.bf16 %v1248_v53, %v523_v23  ;;  %v1187_v1 = vmax.bf16 %v1051_v58, %v931_v48  ;;  %v1225_v46 = vsel %vm1386_vm2, %v1220_v54, %v1224_v51  ;;  %v1265_v2 = vor.u32 %v1264_v55, %v1261_v52  ;;  %v36_v47 = vld [vmem:[%s2066_s0 + $0x5c] sm:$0x1]  ;;  %v65_v22 = vld [vmem:[%s2067_s1 + $0x50] sm:$0xf]  ;;  %v66_v53 = vld [vmem:[%s2067_s1 + $0x54] sm:$0x1] }
  0x5f   :  { %v271_v4 = vrot.slane %v269_v60, 4  ;;  %v274_v5 = vrot.slane %v272_v61, 5  ;;  %v280_v6 = vrot.slane %v278_v62, 5  ;;  %v283_v7 = vshrl.u32 %v101_v35, 16  ;;  %v67_v62 = vld [vmem:[%s2067_s1 + $0x58] sm:$0xf] }
  0x60   :  { %1311 = vst.msk [vmem:[%s2068_s4 + $0x18] sm:$0xf] %vm1304_vm3, %v1294_v63  ;;  %v1203_v8 = vmax.bf16 %v1187_v1, %v133_v25  ;;  %v1266_v9 = vrot.slane %v1265_v2, 4  ;;  %v286_v50 = vshll.u32 %v101_v35, 16  ;;  %v292_v57 = vshll.u32 %v102_v59, 16 }
  0x61   :  { %v275_v14 = vor.u32 %v274_v5, %v271_v4  ;;  %v285_v15 = vrot.slane %v283_v7, 4  ;;  %v525_v16 = vshrl.u32 %v135_v3, 16  ;;  %v528_v17 = vshll.u32 %v135_v3, 16 }
  0x62   :  { %v1249_v0 = vmax.bf16 %v1225_v46, %v1203_v8  ;;  %v1271_v18 = vsel %vm1386_vm2, %v1266_v9, %v1270_v56  ;;  %v288_v20 = vrot.slane %v286_v50, 5  ;;  %v294_v21 = vrot.slane %v292_v57, 5  ;;  %v103_v50 = vld [vmem:[%s2064_s2 + $0x58] sm:$0xf] }
  0x63   :  { %v276_v11 = vrot.slane %v275_v14, 4  ;;  %v527_v23 = vrot.slane %v525_v16, 4  ;;  %v530_v24 = vrot.slane %v528_v17, 5  ;;  %v534_v25 = vshll.u32 %v136_v10, 16  ;;  %v104_v17 = vld [vmem:[%s2064_s2 + $0x5c] sm:$0x1] }
  0x64   :  { %v1295_v26 = vmax.bf16 %v1271_v18, %v1249_v0  ;;  %v289_v28 = vor.u32 %v288_v20, %v285_v15  ;;  %v539_v29 = vshrl.u32 %v1725_v12, 16  ;;  %v542_v31 = vshll.u32 %v1725_v12, 16 }
  0x65   :  { %v281_v13 = vsel %vm1386_vm2, %v276_v11, %v280_v6  ;;  %v531_v34 = vor.u32 %v530_v24, %v527_v23  ;;  %v536_v36 = vrot.slane %v534_v25, 5  ;;  %v548_v37 = vshll.u32 %v138_v19, 16 }
  0x66   :  { %1312 = vst.msk [vmem:[%s2068_s4 + $0x1c] sm:$0xf] %vm1304_vm3, %v1295_v26  ;;  %v290_v38 = vrot.slane %v289_v28, 4  ;;  %v404_v39 = vmax.bf16 %v281_v13, %v135_v3  ;;  %v541_v40 = vrot.slane %v539_v29, 4  ;;  %v544_v41 = vrot.slane %v542_v31, 5 }
  0x67   :  { %v532_v42 = vrot.slane %v531_v34, 4  ;;  %v550_v43 = vrot.slane %v548_v37, 5  ;;  %v797_v44 = vshrl.u32 %v33_v27, 16  ;;  %v800_v45 = vshll.u32 %v33_v27, 16  ;;  %v37_v28 = vld [vmem:[%s2066_s0 + $0x60] sm:$0xf] }
  0x68   :  { %v1757_v48 = vsel %vm1386_vm2, %v290_v38, %v294_v21  ;;  %v545_v49 = vor.u32 %v544_v41, %v541_v40  ;;  %v806_v51 = vshll.u32 %v34_v32, 16  ;;  %v811_v52 = vshrl.u32 %v35_v33, 16  ;;  %v1785_v21 = vld [vmem:[%s2065_s3 + $0x58] sm:$0xf] }
  0x69   :  { %v405_v54 = vmax.bf16 %v1757_v48, %v1725_v12  ;;  %v537_v55 = vsel %vm1386_vm2, %v532_v42, %v536_v36  ;;  %v799_v56 = vrot.slane %v797_v44, 4  ;;  %v802_v35 = vrot.slane %v800_v45, 5 }
  0x6a   :  { %v546_v58 = vrot.slane %v545_v49, 4  ;;  %v660_v59 = vmax.bf16 %v537_v55, %v404_v39  ;;  %v808_v60 = vrot.slane %v806_v51, 5  ;;  %v813_v61 = vrot.slane %v811_v52, 4  ;;  %v38_v39 = vld [vmem:[%s2066_s0 + $0x64] sm:$0x1] }
  0x6b   :  { %v803_v63 = vor.u32 %v802_v35, %v799_v56  ;;  %v814_v1 = vshll.u32 %v35_v33, 16  ;;  %v820_v46 = vshll.u32 %v36_v47, 16  ;;  %v1053_v2 = vshrl.u32 %v65_v22, 16  ;;  %v140_v33 = vld [vmem:[%s2065_s3 + $0x5c] sm:$0x1] }
  0x6c   :  { %v1771_v3 = vsel %vm1386_vm2, %v546_v58, %v550_v43  ;;  %v676_v4 = vmax.bf16 %v660_v59, %v65_v22  ;;  %v1056_v5 = vshll.u32 %v65_v22, 16  ;;  %v1062_v6 = vshll.u32 %v66_v53, 16  ;;  %v68_v22 = vld [vmem:[%s2067_s1 + $0x5c] sm:$0x1]  ;;  %v69_v53 = vld [vmem:[%s2067_s1 + $0x60] sm:$0xf] }
  0x6d   :  { %v661_v7 = vmax.bf16 %v1771_v3, %v405_v54  ;;  %v804_v8 = vrot.slane %v803_v63, 4  ;;  %v816_v9 = vrot.slane %v814_v1, 5  ;;  %v822_v10 = vrot.slane %v820_v46, 5 }
  0x6e   :  { %v1055_v57 = vrot.slane %v1053_v2, 4  ;;  %v1058_v14 = vrot.slane %v1056_v5, 5  ;;  %v1064_v15 = vrot.slane %v1062_v6, 5  ;;  %v1067_v16 = vshrl.u32 %v67_v62, 16  ;;  %v105_v2 = vld [vmem:[%s2064_s2 + $0x60] sm:$0xf] }
  0x6f   :  { %v677_v0 = vmax.bf16 %v661_v7, %v67_v62  ;;  %v809_v18 = vsel %vm1386_vm2, %v804_v8, %v808_v60  ;;  %v817_v19 = vor.u32 %v816_v9, %v813_v61  ;;  %v1070_v20 = vshll.u32 %v67_v62, 16 }
  0x70   :  { %v932_v11 = vmax.bf16 %v809_v18, %v676_v4  ;;  %v1059_v23 = vor.u32 %v1058_v14, %v1055_v57  ;;  %v1069_v24 = vrot.slane %v1067_v16, 4  ;;  %v297_v25 = vshrl.u32 %v103_v50, 16 }
  0x71   :  { %v818_v26 = vrot.slane %v817_v19, 4  ;;  %v1072_v27 = vrot.slane %v1070_v20, 5  ;;  %v300_v29 = vshll.u32 %v103_v50, 16  ;;  %v306_v31 = vshll.u32 %v104_v17, 16  ;;  %v106_v50 = vld [vmem:[%s2064_s2 + $0x64] sm:$0x1] }
  0x72   :  { %v1060_v32 = vrot.slane %v1059_v23, 4  ;;  %v299_v13 = vrot.slane %v297_v25, 4  ;;  %v553_v34 = vshrl.u32 %v1785_v21, 16  ;;  %v556_v36 = vshll.u32 %v1785_v21, 16  ;;  %v142_v19 = vld [vmem:[%s2065_s3 + $0x64] sm:$0x1] }
  0x73   :  { %v823_v37 = vsel %vm1386_vm2, %v818_v26, %v822_v10  ;;  %v1073_v38 = vor.u32 %v1072_v27, %v1069_v24  ;;  %v302_v40 = vrot.slane %v300_v29, 5  ;;  %v308_v41 = vrot.slane %v306_v31, 5  ;;  %v39_v23 = vld [vmem:[%s2066_s0 + $0x68] sm:$0xf] }
  0x74   :  { %v933_v42 = vmax.bf16 %v823_v37, %v677_v0  ;;  %v1065_v43 = vsel %vm1386_vm2, %v1060_v32, %v1064_v15  ;;  %v555_v44 = vrot.slane %v553_v34, 4  ;;  %v558_v45 = vrot.slane %v556_v36, 5  ;;  %v1825_v15 = vld [vmem:[%s2065_s3 + $0x60] sm:$0xf]  ;;  %v40_v32 = vld [vmem:[%s2066_s0 + $0x6c] sm:$0x1] }
  0x75   :  { %v1188_v47 = vmax.bf16 %v1065_v43, %v932_v11  ;;  %v303_v49 = vor.u32 %v302_v40, %v299_v13  ;;  %v562_v51 = vshll.u32 %v140_v33, 16  ;;  %v825_v52 = vshrl.u32 %v37_v28, 16  ;;  %v70_v37 = vld [vmem:[%s2067_s1 + $0x64] sm:$0x1] }
  0x76   :  { %v559_v54 = vor.u32 %v558_v45, %v555_v44  ;;  %v828_v55 = vshll.u32 %v37_v28, 16  ;;  %v834_v56 = vshll.u32 %v38_v39, 16  ;;  %v1074_v35 = vrot.slane %v1073_v38, 4 }
  0x77   :  { %v1204_v58 = vmax.bf16 %v1188_v47, %v1725_v12  ;;  %v304_v59 = vrot.slane %v303_v49, 4  ;;  %v564_v60 = vrot.slane %v562_v51, 5  ;;  %v827_v61 = vrot.slane %v825_v52, 4 }
  0x78   :  { %v560_v62 = vrot.slane %v559_v54, 4  ;;  %v830_v63 = vrot.slane %v828_v55, 5  ;;  %v836_v1 = vrot.slane %v834_v56, 5  ;;  %v1076_v46 = vshll.u32 %v68_v22, 16  ;;  %v107_v55 = vld [vmem:[%s2064_s2 + $0x68] sm:$0xf] }
  0x79   :  { %v1250_v4 = vmax.bf16 %v1204_v58, %v1757_v48  ;;  %v309_v5 = vsel %vm1386_vm2, %v304_v59, %v308_v41  ;;  %v1081_v6 = vshrl.u32 %v69_v53, 16  ;;  %v1084_v7 = vshll.u32 %v69_v53, 16 }
  0x7a   :  { %v406_v12 = vmax.bf16 %v309_v5, %v1785_v21  ;;  %v565_v8 = vsel %vm1386_vm2, %v560_v62, %v564_v60  ;;  %v831_v9 = vor.u32 %v830_v63, %v827_v61  ;;  %v1078_v10 = vrot.slane %v1076_v46, 5  ;;  %v108_v60 = vld [vmem:[%s2064_s2 + $0x6c] sm:$0x1] }
  0x7b   :  { %v1296_v57 = vmax.bf16 %v1250_v4, %v1771_v3  ;;  %v1083_v14 = vrot.slane %v1081_v6, 4  ;;  %v1086_v48 = vrot.slane %v1084_v7, 5  ;;  %v311_v16 = vshrl.u32 %v105_v2, 16  ;;  %v1869_v4 = vld [vmem:[%s2065_s3 + $0x68] sm:$0xf] }
  0x7c   :  { %v662_v17 = vmax.bf16 %v565_v8, %v406_v12  ;;  %v832_v0 = vrot.slane %v831_v9, 4  ;;  %v1079_v18 = vsel %vm1386_vm2, %v1074_v35, %v1078_v10  ;;  %v314_v20 = vshll.u32 %v105_v2, 16  ;;  %v144_v9 = vld [vmem:[%s2065_s3 + $0x6c] sm:$0x1] }
  0x7d   :  { %1313 = vst.msk [vmem:[%s2068_s4 + $0x20] sm:$0xf] %vm1304_vm3, %v1296_v57  ;;  %v1087_v3 = vor.u32 %v1086_v48, %v1083_v14  ;;  %v1189_v11 = vmax.bf16 %v1079_v18, %v933_v42  ;;  %v313_v24 = vrot.slane %v311_v16, 4  ;;  %v320_v25 = vshll.u32 %v106_v50, 16  ;;  %v41_v48 = vld [vmem:[%s2066_s0 + $0x70] sm:$0xf] }
  0x7e   :  { %v678_v26 = vmax.bf16 %v662_v17, %v69_v53  ;;  %v837_v27 = vsel %vm1386_vm2, %v832_v0, %v836_v1  ;;  %v316_v28 = vrot.slane %v314_v20, 5  ;;  %v567_v29 = vshrl.u32 %v1825_v15, 16 }
  0x7f   :  { %v1205_v31 = vmax.bf16 %v1189_v11, %v1785_v21  ;;  %v322_v33 = vrot.slane %v320_v25, 5  ;;  %v570_v13 = vshll.u32 %v1825_v15, 16  ;;  %v576_v34 = vshll.u32 %v142_v19, 16  ;;  %v71_v21 = vld [vmem:[%s2067_s1 + $0x68] sm:$0xf] }
  0x80   :  { %v934_v36 = vmax.bf16 %v837_v27, %v678_v26  ;;  %v317_v38 = vor.u32 %v316_v28, %v313_v24  ;;  %v569_v39 = vrot.slane %v567_v29, 4  ;;  %v839_v40 = vshrl.u32 %v39_v23, 16  ;;  %v42_v11 = vld [vmem:[%s2066_s0 + $0x74] sm:$0x1]  ;;  %v72_v25 = vld [vmem:[%s2067_s1 + $0x6c] sm:$0x1] }
  0x81   :  { %v1251_v41 = vmax.bf16 %v1205_v31, %v309_v5  ;;  %v572_v42 = vrot.slane %v570_v13, 5  ;;  %v578_v43 = vrot.slane %v576_v34, 5  ;;  %v842_v44 = vshll.u32 %v39_v23, 16 }
  0x82   :  { %v318_v45 = vrot.slane %v317_v38, 4  ;;  %v841_v47 = vrot.slane %v839_v40, 4  ;;  %v848_v22 = vshll.u32 %v40_v32, 16  ;;  %v1088_v49 = vrot.slane %v1087_v3, 4 }
  0x83   :  { %v1297_v51 = vmax.bf16 %v1251_v41, %v565_v8  ;;  %v573_v52 = vor.u32 %v572_v42, %v569_v39  ;;  %v844_v53 = vrot.slane %v842_v44, 5  ;;  %v1090_v54 = vshll.u32 %v70_v37, 16  ;;  %v109_v42 = vld [vmem:[%s2064_s2 + $0x70] sm:$0xf] }
  0x84   :  { %v323_v56 = vsel %vm1386_vm2, %v318_v45, %v322_v33  ;;  %v850_v35 = vrot.slane %v848_v22, 5  ;;  %v1095_v58 = vshrl.u32 %v71_v21, 16  ;;  %v1098_v59 = vshll.u32 %v71_v21, 16  ;;  %v110_v22 = vld [vmem:[%s2064_s2 + $0x74] sm:$0x1] }
  0x85   :  { %1314 = vst.msk [vmem:[%s2068_s4 + $0x24] sm:$0xf] %vm1304_vm3, %v1297_v51  ;;  %v407_v61 = vmax.bf16 %v323_v56, %v1825_v15  ;;  %v574_v62 = vrot.slane %v573_v52, 4  ;;  %v845_v63 = vor.u32 %v844_v53, %v841_v47  ;;  %v1092_v1 = vrot.slane %v1090_v54, 5 }
  0x86   :  { %v1097_v46 = vrot.slane %v1095_v58, 4  ;;  %v1100_v2 = vrot.slane %v1098_v59, 5  ;;  %v325_v5 = vshrl.u32 %v107_v55, 16  ;;  %v328_v6 = vshll.u32 %v107_v55, 16 }
  0x87   :  { %v579_v7 = vsel %vm1386_vm2, %v574_v62, %v578_v43  ;;  %v846_v12 = vrot.slane %v845_v63, 4  ;;  %v1093_v8 = vsel %vm1386_vm2, %v1088_v49, %v1092_v1  ;;  %v334_v10 = vshll.u32 %v108_v60, 16  ;;  %v146_v62 = vld [vmem:[%s2065_s3 + $0x74] sm:$0x1] }
  0x88   :  { %v663_v50 = vmax.bf16 %v579_v7, %v407_v61  ;;  %v1101_v57 = vor.u32 %v1100_v2, %v1097_v46  ;;  %v1190_v14 = vmax.bf16 %v1093_v8, %v934_v36  ;;  %v327_v16 = vrot.slane %v325_v5, 4  ;;  %v43_v5 = vld [vmem:[%s2066_s0 + $0x78] sm:$0xf] }
  0x89   :  { %v851_v17 = vsel %vm1386_vm2, %v846_v12, %v850_v35  ;;  %v330_v0 = vrot.slane %v328_v6, 5  ;;  %v336_v18 = vrot.slane %v334_v10, 5  ;;  %v581_v19 = vshrl.u32 %v1869_v4, 16 }
  0x8a   :  { %v679_v20 = vmax.bf16 %v663_v50, %v71_v21  ;;  %v1206_v3 = vmax.bf16 %v1190_v14, %v1825_v15  ;;  %v584_v23 = vshll.u32 %v1869_v4, 16  ;;  %v590_v24 = vshll.u32 %v144_v9, 16  ;;  %v73_v15 = vld [vmem:[%s2067_s1 + $0x70] sm:$0xf] }
  0x8b   :  { %v331_v26 = vor.u32 %v330_v0, %v327_v16  ;;  %v583_v27 = vrot.slane %v581_v19, 4  ;;  %v853_v28 = vshrl.u32 %v41_v48, 16  ;;  %v856_v29 = vshll.u32 %v41_v48, 16  ;;  %v74_v16 = vld [vmem:[%s2067_s1 + $0x74] sm:$0x1] }
  0x8c   :  { %v935_v31 = vmax.bf16 %v851_v17, %v679_v20  ;;  %v1252_v32 = vmax.bf16 %v1206_v3, %v323_v56  ;;  %v586_v33 = vrot.slane %v584_v23, 5  ;;  %v592_v13 = vrot.slane %v590_v24, 5  ;;  %v1911_v56 = vld [vmem:[%s2065_s3 + $0x70] sm:$0xf] }
  0x8d   :  { %v332_v34 = vrot.slane %v331_v26, 4  ;;  %v855_v36 = vrot.slane %v853_v28, 4  ;;  %v858_v37 = vrot.slane %v856_v29, 5  ;;  %v862_v38 = vshll.u32 %v42_v11, 16 }
  0x8e   :  { %v1298_v39 = vmax.bf16 %v1252_v32, %v579_v7  ;;  %v587_v40 = vor.u32 %v586_v33, %v583_v27  ;;  %v1102_v41 = vrot.slane %v1101_v57, 4  ;;  %v1104_v21 = vshll.u32 %v72_v25, 16  ;;  %v44_v57 = vld [vmem:[%s2066_s0 + $0x7c] sm:$0x1] }
  0x8f   :  { %v337_v43 = vsel %vm1386_vm2, %v332_v34, %v336_v18  ;;  %v859_v44 = vor.u32 %v858_v37, %v855_v36  ;;  %v864_v45 = vrot.slane %v862_v38, 5  ;;  %v1109_v47 = vshrl.u32 %v73_v15, 16  ;;  %v112_v37 = vld [vmem:[%s2064_s2 + $0x7c] sm:$0x1] }
  0x90   :  { %1315 = vst.msk [vmem:[%s2068_s4 + $0x28] sm:$0xf] %vm1304_vm3, %v1298_v39  ;;  %v408_v49 = vmax.bf16 %v337_v43, %v1869_v4  ;;  %v588_v51 = vrot.slane %v587_v40, 4  ;;  %v1106_v52 = vrot.slane %v1104_v21, 5  ;;  %v1112_v53 = vshll.u32 %v73_v15, 16 }
  0x91   :  { %v860_v54 = vrot.slane %v859_v44, 4  ;;  %v1111_v55 = vrot.slane %v1109_v47, 4  ;;  %v339_v35 = vshrl.u32 %v109_v42, 16  ;;  %v342_v58 = vshll.u32 %v109_v42, 16 }
  0x92   :  { %v593_v59 = vsel %vm1386_vm2, %v588_v51, %v592_v13  ;;  %v1107_v60 = vsel %vm1386_vm2, %v1102_v41, %v1106_v52  ;;  %v1114_v61 = vrot.slane %v1112_v53, 5  ;;  %v348_v63 = vshll.u32 %v110_v22, 16  ;;  %v148_v51 = vld [vmem:[%s2065_s3 + $0x7c] sm:$0x1] }
  0x93   :  { %v664_v1 = vmax.bf16 %v593_v59, %v408_v49  ;;  %v865_v46 = vsel %vm1386_vm2, %v860_v54, %v864_v45  ;;  %v1191_v2 = vmax.bf16 %v1107_v60, %v935_v31  ;;  %v341_v6 = vrot.slane %v339_v35, 4  ;;  %v45_v35 = vld [vmem:[%s2066_s0 + $0x80] sm:$0xf] }
  0x94   :  { %v1115_v7 = vor.u32 %v1114_v61, %v1111_v55  ;;  %v344_v12 = vrot.slane %v342_v58, 5  ;;  %v350_v8 = vrot.slane %v348_v63, 5  ;;  %v595_v9 = vshrl.u32 %v1911_v56, 16 }
  0x95   :  { %v680_v10 = vmax.bf16 %v664_v1, %v73_v15  ;;  %v1207_v50 = vmax.bf16 %v1191_v2, %v1869_v4  ;;  %v598_v14 = vshll.u32 %v1911_v56, 16  ;;  %v604_v48 = vshll.u32 %v146_v62, 16  ;;  %v75_v4 = vld [vmem:[%s2067_s1 + $0x78] sm:$0xf] }
  0x96   :  { %v345_v17 = vor.u32 %v344_v12, %v341_v6  ;;  %v597_v0 = vrot.slane %v595_v9, 4  ;;  %v867_v18 = vshrl.u32 %v43_v5, 16  ;;  %v870_v19 = vshll.u32 %v43_v5, 16  ;;  %v111_v15 = vld [vmem:[%s2064_s2 + $0x78] sm:$0xf] }
  0x97   :  { %v936_v20 = vmax.bf16 %v865_v46, %v680_v10  ;;  %v1253_v3 = vmax.bf16 %v1207_v50, %v337_v43  ;;  %v600_v11 = vrot.slane %v598_v14, 5  ;;  %v606_v23 = vrot.slane %v604_v48, 5  ;;  %v1953_v43 = vld [vmem:[%s2065_s3 + $0x78] sm:$0xf]  ;;  %v46_v46 = vld [vmem:[%s2066_s0 + $0x84] sm:$0x1] }
  0x98   :  { %v346_v24 = vrot.slane %v345_v17, 4  ;;  %v869_v25 = vrot.slane %v867_v18, 4  ;;  %v872_v26 = vrot.slane %v870_v19, 5  ;;  %v876_v27 = vshll.u32 %v44_v57, 16  ;;  %v76_v6 = vld [vmem:[%s2067_s1 + $0x7c] sm:$0x1] }
  0x99   :  { %v1299_v28 = vmax.bf16 %v1253_v3, %v593_v59  ;;  %v601_v29 = vor.u32 %v600_v11, %v597_v0  ;;  %v1116_v31 = vrot.slane %v1115_v7, 4  ;;  %v1118_v32 = vshll.u32 %v74_v16, 16 }
  0x9a   :  { %v351_v33 = vsel %vm1386_vm2, %v346_v24, %v350_v8  ;;  %v873_v13 = vor.u32 %v872_v26, %v869_v25  ;;  %v878_v34 = vrot.slane %v876_v27, 5  ;;  %v1123_v36 = vshrl.u32 %v75_v4, 16  ;;  %v114_v26 = vld [vmem:[%s2064_s2 + $0x84] sm:$0x1] }
  0x9b   :  { %1316 = vst.msk [vmem:[%s2068_s4 + $0x2c] sm:$0xf] %vm1304_vm3, %v1299_v28  ;;  %v409_v38 = vmax.bf16 %v351_v33, %v1911_v56  ;;  %v602_v39 = vrot.slane %v601_v29, 4  ;;  %v1120_v40 = vrot.slane %v1118_v32, 5  ;;  %v1126_v41 = vshll.u32 %v75_v4, 16 }
  0x9c   :  { %v874_v21 = vrot.slane %v873_v13, 4  ;;  %v1125_v42 = vrot.slane %v1123_v36, 4  ;;  %v353_v44 = vshrl.u32 %v111_v15, 16  ;;  %v356_v45 = vshll.u32 %v111_v15, 16 }
  0x9d   :  { %v607_v47 = vsel %vm1386_vm2, %v602_v39, %v606_v23  ;;  %v1121_v22 = vsel %vm1386_vm2, %v1116_v31, %v1120_v40  ;;  %v1128_v49 = vrot.slane %v1126_v41, 5  ;;  %v362_v52 = vshll.u32 %v112_v37, 16  ;;  %v150_v39 = vld [vmem:[%s2065_s3 + $0x84] sm:$0x1] }
  0x9e   :  { %v665_v53 = vmax.bf16 %v607_v47, %v409_v38  ;;  %v879_v54 = vsel %vm1386_vm2, %v874_v21, %v878_v34  ;;  %v1192_v55 = vmax.bf16 %v1121_v22, %v936_v20  ;;  %v355_v58 = vrot.slane %v353_v44, 4  ;;  %v47_v44 = vld [vmem:[%s2066_s0 + $0x88] sm:$0xf] }
  0x9f   :  { %v1129_v59 = vor.u32 %v1128_v49, %v1125_v42  ;;  %v358_v60 = vrot.slane %v356_v45, 5  ;;  %v364_v61 = vrot.slane %v362_v52, 5  ;;  %v609_v62 = vshrl.u32 %v1953_v43, 16 }
  0xa0   :  { %v681_v63 = vmax.bf16 %v665_v53, %v75_v4  ;;  %v1208_v1 = vmax.bf16 %v1192_v55, %v1911_v56  ;;  %v612_v2 = vshll.u32 %v1953_v43, 16  ;;  %v618_v5 = vshll.u32 %v148_v51, 16  ;;  %v77_v56 = vld [vmem:[%s2067_s1 + $0x80] sm:$0xf] }
  0xa1   :  { %v359_v7 = vor.u32 %v358_v60, %v355_v58  ;;  %v611_v12 = vrot.slane %v609_v62, 4  ;;  %v881_v8 = vshrl.u32 %v45_v35, 16  ;;  %v884_v9 = vshll.u32 %v45_v35, 16  ;;  %v113_v4 = vld [vmem:[%s2064_s2 + $0x80] sm:$0xf] }
  0xa2   :  { %v937_v10 = vmax.bf16 %v879_v54, %v681_v63  ;;  %v1254_v50 = vmax.bf16 %v1208_v1, %v351_v33  ;;  %v614_v57 = vrot.slane %v612_v2, 5  ;;  %v620_v14 = vrot.slane %v618_v5, 5  ;;  %v1995_v33 = vld [vmem:[%s2065_s3 + $0x80] sm:$0xf]  ;;  %v48_v54 = vld [vmem:[%s2066_s0 + $0x8c] sm:$0x1] }
  0xa3   :  { %v360_v48 = vrot.slane %v359_v7, 4  ;;  %v883_v16 = vrot.slane %v881_v8, 4  ;;  %v886_v17 = vrot.slane %v884_v9, 5  ;;  %v890_v0 = vshll.u32 %v46_v46, 16  ;;  %v78_v58 = vld [vmem:[%s2067_s1 + $0x84] sm:$0x1] }
  0xa4   :  { %v1300_v18 = vmax.bf16 %v1254_v50, %v607_v47  ;;  %v615_v19 = vor.u32 %v614_v57, %v611_v12  ;;  %v1130_v20 = vrot.slane %v1129_v59, 4  ;;  %v1132_v3 = vshll.u32 %v76_v6, 16  ;;  %v115_v57 = vld [vmem:[%s2064_s2 + $0x88] sm:$0xf] }
  0xa5   :  { %v365_v11 = vsel %vm1386_vm2, %v360_v48, %v364_v61  ;;  %v887_v23 = vor.u32 %v886_v17, %v883_v16  ;;  %v892_v24 = vrot.slane %v890_v0, 5  ;;  %v1137_v25 = vshrl.u32 %v77_v56, 16 }
  0xa6   :  { %1317 = vst.msk [vmem:[%s2068_s4 + $0x30] sm:$0xf] %vm1304_vm3, %v1300_v18  ;;  %v410_v27 = vmax.bf16 %v365_v11, %v1953_v43  ;;  %v616_v28 = vrot.slane %v615_v19, 4  ;;  %v1134_v29 = vrot.slane %v1132_v3, 5  ;;  %v1140_v31 = vshll.u32 %v77_v56, 16 }
  0xa7   :  { %v888_v32 = vrot.slane %v887_v23, 4  ;;  %v1139_v15 = vrot.slane %v1137_v25, 4  ;;  %v367_v13 = vshrl.u32 %v113_v4, 16  ;;  %v370_v34 = vshll.u32 %v113_v4, 16 }
  0xa8   :  { %v621_v36 = vsel %vm1386_vm2, %v616_v28, %v620_v14  ;;  %v1135_v37 = vsel %vm1386_vm2, %v1130_v20, %v1134_v29  ;;  %v1142_v38 = vrot.slane %v1140_v31, 5  ;;  %v376_v40 = vshll.u32 %v114_v26, 16  ;;  %v151_v28 = vld [vmem:[%s2065_s3 + $0x88] sm:$0xf] }
  0xa9   :  { %v666_v41 = vmax.bf16 %v621_v36, %v410_v27  ;;  %v893_v21 = vsel %vm1386_vm2, %v888_v32, %v892_v24  ;;  %v1193_v42 = vmax.bf16 %v1135_v37, %v937_v10  ;;  %v369_v45 = vrot.slane %v367_v13, 4  ;;  %v152_v13 = vld [vmem:[%s2065_s3 + $0x8c] sm:$0x1] }
  0xaa   :  { %v1143_v47 = vor.u32 %v1142_v38, %v1139_v15  ;;  %v372_v22 = vrot.slane %v370_v34, 5  ;;  %v378_v49 = vrot.slane %v376_v40, 5  ;;  %v623_v51 = vshrl.u32 %v1995_v33, 16 }
  0xab   :  { %v682_v52 = vmax.bf16 %v666_v41, %v77_v56  ;;  %v1209_v53 = vmax.bf16 %v1193_v42, %v1953_v43  ;;  %v626_v55 = vshll.u32 %v1995_v33, 16  ;;  %v632_v35 = vshll.u32 %v150_v39, 16  ;;  %v79_v43 = vld [vmem:[%s2067_s1 + $0x88] sm:$0xf]  ;;  %v80_v56 = vld [vmem:[%s2067_s1 + $0x8c] sm:$0x1] }
  0xac   :  { %v373_v59 = vor.u32 %v372_v22, %v369_v45  ;;  %v625_v60 = vrot.slane %v623_v51, 4  ;;  %v895_v61 = vshrl.u32 %v47_v44, 16  ;;  %v898_v62 = vshll.u32 %v47_v44, 16 }
  0xad   :  { %v938_v63 = vmax.bf16 %v893_v21, %v682_v52  ;;  %v1255_v1 = vmax.bf16 %v1209_v53, %v365_v11  ;;  %v628_v46 = vrot.slane %v626_v55, 5  ;;  %v634_v2 = vrot.slane %v632_v35, 5  ;;  %v116_v11 = vld [vmem:[%s2064_s2 + $0x8c] sm:$0x1] }
  0xae   :  { %v374_v5 = vrot.slane %v373_v59, 4  ;;  %v897_v6 = vrot.slane %v895_v61, 4  ;;  %v900_v7 = vrot.slane %v898_v62, 5  ;;  %v904_v12 = vshll.u32 %v48_v54, 16 }
  0xaf   :  { %v1301_v8 = vmax.bf16 %v1255_v1, %v621_v36  ;;  %v629_v9 = vor.u32 %v628_v46, %v625_v60  ;;  %v1144_v10 = vrot.slane %v1143_v47, 4  ;;  %v1146_v50 = vshll.u32 %v78_v58, 16 }
  0xb0   :  { %v379_v14 = vsel %vm1386_vm2, %v374_v5, %v378_v49  ;;  %v901_v48 = vor.u32 %v900_v7, %v897_v6  ;;  %v906_v16 = vrot.slane %v904_v12, 5  ;;  %v1151_v17 = vshrl.u32 %v79_v43, 16 }
  0xb1   :  { %1318 = vst.msk [vmem:[%s2068_s4 + $0x34] sm:$0xf] %vm1304_vm3, %v1301_v8  ;;  %v411_v0 = vmax.bf16 %v379_v14, %v1995_v33  ;;  %v630_v18 = vrot.slane %v629_v9, 4  ;;  %v1148_v19 = vrot.slane %v1146_v50, 5  ;;  %v1154_v20 = vshll.u32 %v79_v43, 16 }
  0xb2   :  { %v902_v3 = vrot.slane %v901_v48, 4  ;;  %v1153_v4 = vrot.slane %v1151_v17, 4  ;;  %v1160_v23 = vshll.u32 %v80_v56, 16  ;;  %v1227_v24 = vshrl.u32 %v115_v57, 16 }
  0xb3   :  { %v635_v25 = vsel %vm1386_vm2, %v630_v18, %v634_v2  ;;  %v1149_v26 = vsel %vm1386_vm2, %v1144_v10, %v1148_v19  ;;  %v1156_v27 = vrot.slane %v1154_v20, 5  ;;  %v1230_v29 = vshll.u32 %v115_v57, 16 }
  0xb4   :  { %v667_v31 = vmax.bf16 %v635_v25, %v411_v0  ;;  %v907_v32 = vsel %vm1386_vm2, %v902_v3, %v906_v16  ;;  %v1194_v15 = vmax.bf16 %v1149_v26, %v938_v63  ;;  %v1162_v34 = vrot.slane %v1160_v23, 5 }
  0xb5   :  { %v1157_v36 = vor.u32 %v1156_v27, %v1153_v4  ;;  %v1229_v37 = vrot.slane %v1227_v24, 4  ;;  %v1232_v38 = vrot.slane %v1230_v29, 5  ;;  %v1236_v39 = vshll.u32 %v116_v11, 16 }
  0xb6   :  { %v683_v40 = vmax.bf16 %v667_v31, %v79_v43  ;;  %v1210_v41 = vmax.bf16 %v1194_v15, %v1995_v33  ;;  %v1273_v21 = vshrl.u32 %v151_v28, 16  ;;  %v1276_v42 = vshll.u32 %v151_v28, 16 }
  0xb7   :  { %v1158_v44 = vrot.slane %v1157_v36, 4  ;;  %v1233_v45 = vor.u32 %v1232_v38, %v1229_v37  ;;  %v1238_v47 = vrot.slane %v1236_v39, 5  ;;  %v1282_v22 = vshll.u32 %v152_v13, 16 }
  0xb8   :  { %v939_v49 = vmax.bf16 %v907_v32, %v683_v40  ;;  %v1256_v51 = vmax.bf16 %v1210_v41, %v379_v14  ;;  %v1275_v52 = vrot.slane %v1273_v21, 4  ;;  %v1278_v53 = vrot.slane %v1276_v42, 5 }
  0xb9   :  { %v1163_v54 = vsel %vm1386_vm2, %v1158_v44, %v1162_v34  ;;  %v1234_v55 = vrot.slane %v1233_v45, 4  ;;  %v1284_v60 = vrot.slane %v1282_v22, 5 }
  0xba   :  { %v1302_v35 = vmax.bf16 %v1256_v51, %v635_v25  ;;  %v1195_v58 = vmax.bf16 %v1163_v54, %v939_v49  ;;  %v1279_v59 = vor.u32 %v1278_v53, %v1275_v52 }
  0xbb   :  { %v1239_v33 = vsel %vm1386_vm2, %v1234_v55, %v1238_v47 }
  0xbc   :  { %1319 = vst.msk [vmem:[%s2068_s4 + $0x38] sm:$0xf] %vm1304_vm3, %v1302_v35  ;;  %v1211_v61 = vmax.bf16 %v1195_v58, %v151_v28  ;;  %v1280_v62 = vrot.slane %v1279_v59, 4 }
  0xbe   :  { %v1257_v63 = vmax.bf16 %v1239_v33, %v1211_v61  ;;  %v1285_v1 = vsel %vm1386_vm2, %v1280_v62, %v1284_v60 }
  0xc0   :  { %v1303_v43 = vmax.bf16 %v1285_v1, %v1257_v63 }
  0xc2   :  { %1320 = vst.msk [vmem:[%s2068_s4 + $0x3c] sm:$0xf] %vm1304_vm3, %v1303_v43 }

// kernel: _lambda_.27
= control target key start
LH: loop header
LB: loop body
LE: loop exit
PB: predicated region body
PF: predicated region fallthrough
CT: control target
= control target key end

     0   :  { %vm22_vm0 = vcmask 64512   ;;  %v655_v1 = vmov 0.0   ;;  %vm147_vm1 = vcmask 588800   ;;  %vm172_vm2 = vcmask 1043456   ;;  %s929_s1 = inlined_call_operand.vmem [shape: bf16[72,8], index: 1, kind: input, shape index: {}]   ;;  %s930_s0 = inlined_call_operand.vmem [shape: bf16[128,72], index: 0, kind: input, shape index: {}]   ;;  %s931_s3 = inlined_call_operand.vmem [shape: bf16[128,8], index: 3, kind: input, shape index: {}]   ;;  %s932_s2 = inlined_call_operand.vmem [shape: f32[1,8], index: 2, kind: input, shape index: {}]   ;;  %s933_s4 = inlined_call_operand.vmem [shape: bf16[128,8], index: 4, kind: output, shape index: {}]  }
   0x1   :  { %v642_v0 = vld [vmem:[%s929_s1] sm:$0xff]   ;;  %25 = vst.msk [vmem:[#allocation2 + $0x10] sm:$0xff] %vm22_vm0, %v655_v1  ;;  %23 = vst.msk [vmem:[#allocation2] sm:$0xff] %vm22_vm0, %v655_v1  ;;  %v643_v2 = vld [vmem:[%s929_s1 + $0x8] sm:$0xff]   ;;  %vm476_vm3 = vcmask 60416  }
   0x2   :  { %24 = vst.msk [vmem:[#allocation2 + $0x8] sm:$0xff] %vm22_vm0, %v655_v1  ;;  %26 = vst.msk [vmem:[#allocation2 + $0x18] sm:$0xff] %vm22_vm0, %v655_v1  ;;  %603 = vmatprep.subr.bf16.mxu0 %v642_v0  ;;  %629 = vmatprep.subr.bf16.mxu1 %v642_v0  ;;  %v644_v3 = vld [vmem:[%s929_s1 + $0x10] sm:$0xff]   ;;  %v647_v4 = vld [vmem:[%s930_s0] sm:$0xff]  }
   0x3   :  { %27 = vst.msk [vmem:[#allocation2 + $0x20] sm:$0xff] %vm22_vm0, %v655_v1  ;;  %28 = vst.msk [vmem:[#allocation2 + $0x28] sm:$0xff] %vm22_vm0, %v655_v1  ;;  %604 = vmatpush3.bf16.msra.mxu0 %v642_v0  ;;  %634 = vmatpush3.bf16.msra.mxu1 %v642_v0  ;;  %v648_v5 = vld [vmem:[%s930_s0 + $0x20] sm:$0xff]   ;;  %v645_v6 = vld [vmem:[%s929_s1 + $0x18] sm:$0xff]  }
   0x4   :  { %29 = vst.msk [vmem:[#allocation2 + $0x30] sm:$0xff] %vm22_vm0, %v655_v1  ;;  %30 = vst.msk [vmem:[#allocation2 + $0x38] sm:$0xff] %vm22_vm0, %v655_v1  ;;  %605 = vmatprep.subr.bf16.mxu0 %v643_v2  ;;  %630 = vmatprep.subr.bf16.mxu1 %v643_v2  ;;  %v646_v7 = vld [vmem:[%s929_s1 + $0x20] ss:$0 sps:$4 sm:$0xff]   ;;  %v649_v9 = vld [vmem:[%s930_s0 + $0x8] sm:$0xff]  }
   0x5   :  { %31 = vst.msk [vmem:[#allocation2 + $0x40] sm:$0xff] %vm22_vm0, %v655_v1  ;;  %32 = vst.msk [vmem:[#allocation2 + $0x48] sm:$0xff] %vm22_vm0, %v655_v1  ;;  %613 = vmatprep.mubr.msk.bf16.mxu0 %vm147_vm1, %v647_v4  ;;  %621 = vmatprep.mubr.msk.bf16.mxu1 %vm147_vm1, %v648_v5  ;;  %v174_v8 = vsel %vm172_vm2, %v646_v7, 0  ;;  %v650_v10 = vld [vmem:[%s930_s0 + $0x28] sm:$0xff]   ;;  %v651_v11 = vld [vmem:[%s930_s0 + $0x10] sm:$0xff]  }
   0x6   :  { %33 = vst.msk [vmem:[#allocation2 + $0x50] sm:$0xff] %vm22_vm0, %v655_v1  ;;  %34 = vst.msk [vmem:[#allocation2 + $0x58] sm:$0xff] %vm22_vm0, %v655_v1  ;;  %v652_v12 = vld [vmem:[%s930_s0 + $0x30] sm:$0xff]   ;;  %v653_v13 = vld [vmem:[%s930_s0 + $0x18] sm:$0xff]  }
   0x7   :  { %35 = vst.msk [vmem:[#allocation2 + $0x60] sm:$0xff] %vm22_vm0, %v655_v1  ;;  %36 = vst.msk [vmem:[#allocation2 + $0x68] sm:$0xff] %vm22_vm0, %v655_v1  ;;  %606 = vmatpush3.bf16.msra.mxu0 %v643_v2  ;;  %635 = vmatpush3.bf16.msra.mxu1 %v643_v2  ;;  %v654_v14 = vld [vmem:[%s930_s0 + $0x38] sm:$0xff]   ;;  %v747_v29 = vld [vmem:[%s931_s3 + $0x8] sm:$0xff]  }
   0x8   :  { %37 = vst.msk [vmem:[#allocation2 + $0x70] sm:$0xff] %vm22_vm0, %v655_v1  ;;  %38 = vst.msk [vmem:[#allocation2 + $0x78] sm:$0xff] %vm22_vm0, %v655_v1  ;;  %607 = vmatprep.subr.bf16.mxu0 %v644_v3  ;;  %631 = vmatprep.subr.bf16.mxu1 %v644_v3  ;;  %v41_v15 = vld [vmem:[#allocation2 + $0x10] sm:$0xff]  ;;  %v39_v17 = vld [vmem:[#allocation2] sm:$0xff]  ;;  %v557_v47 = vunpack.c.l.bf16 %v747_v29  ;;  %v558_v53 = vunpack.c.h.bf16 %v747_v29 }
   0x9   :  { %v42_v21 = vld [vmem:[#allocation2 + $0x18] sm:$0xff]  ;;  %v40_v27 = vld [vmem:[#allocation2 + $0x8] sm:$0xff]  ;;  %v759_v35 = vld [vmem:[%s931_s3] sm:$0xff]  }
   0xa   :  { %v754_v34 = vld [vmem:[%s931_s3 + $0x28] sm:$0xff]   ;;  %v764_v36 = vld [vmem:[%s931_s3 + $0x20] sm:$0xff]   ;;  %v771_v43 = vld [vmem:[%s931_s3 + $0x18] sm:$0xff]   ;;  %v553_v49 = vunpack.c.l.bf16 %v759_v35  ;;  %v554_v55 = vunpack.c.h.bf16 %v759_v35 }
   0xb   :  { %608 = vmatpush3.bf16.msra.mxu0 %v644_v3  ;;  %636 = vmatpush3.bf16.msra.mxu1 %v644_v3  ;;  %v778_v44 = vld [vmem:[%s931_s3 + $0x38] sm:$0xff]   ;;  %v783_v45 = vld [vmem:[%s931_s3 + $0x10] sm:$0xff]   ;;  %v573_v48 = vunpack.c.l.bf16 %v754_v34  ;;  %v569_v50 = vunpack.c.l.bf16 %v764_v36  ;;  %v574_v54 = vunpack.c.h.bf16 %v754_v34  ;;  %v570_v56 = vunpack.c.h.bf16 %v764_v36  ;;  %v43_v57 = vld [vmem:[#allocation2 + $0x20] sm:$0xff] }
   0xc   :  { %609 = vmatprep.subr.bf16.mxu0 %v645_v6  ;;  %632 = vmatprep.subr.bf16.mxu1 %v645_v6  ;;  %v47_v18 = vld [vmem:[#allocation2 + $0x40] sm:$0xff]  ;;  %v48_v28 = vld [vmem:[#allocation2 + $0x48] sm:$0xff]  ;;  %v788_v46 = vld [vmem:[%s931_s3 + $0x30] sm:$0xff]   ;;  %v565_v61 = vunpack.c.l.bf16 %v771_v43  ;;  %v581_v63 = vunpack.c.l.bf16 %v778_v44  ;;  %v561_v0 = vunpack.c.l.bf16 %v783_v45 }
   0xd   :  { %v49_v16 = vld [vmem:[#allocation2 + $0x50] sm:$0xff]  ;;  %v50_v22 = vld [vmem:[#allocation2 + $0x58] sm:$0xff]  ;;  %v803_v59 = vld [vmem:[%s932_s2] ss:$0 sm:$0xff]  ;;  %v577_v1 = vunpack.c.l.bf16 %v788_v46 }
   0xe   :  { %v45_v51 = vld [vmem:[#allocation2 + $0x30] sm:$0xff]  ;;  %v51_v58 = vld [vmem:[#allocation2 + $0x60] sm:$0xff]  ;;  %v46_v2 = vld [vmem:[#allocation2 + $0x38] sm:$0xff] }
   0xf   :  { %610 = vmatpush3.bf16.msra.mxu0 %v645_v6  ;;  %637 = vmatpush3.bf16.msra.mxu1 %v645_v6  ;;  %v53_v52 = vld [vmem:[#allocation2 + $0x70] sm:$0xff]  ;;  %v54_v3 = vld [vmem:[#allocation2 + $0x78] sm:$0xff] }
  0x10   :  { %639 = vmatprep.subr.msk.bf16.mxu0 %vm172_vm2, %v646_v7  ;;  %640 = vmatprep.subr.msk.bf16.mxu1 %vm172_vm2, %v646_v7 }
  0x13   :  { %612 = vmatpush3.bf16.msra.mxu0 %v174_v8  ;;  %638 = vmatpush3.bf16.msra.mxu1 %v174_v8  ;;  %v566_v8 = vunpack.c.h.bf16 %v771_v43 }
  0x16   :  { %614 = vmatmul.mubr.msk.bf16.vlgmr.msra.gmra.mrb[0].mxu0 %vm147_vm1, %v649_v9  ;;  %622 = vmatmul.mubr.msk.bf16.vlgmr.msra.gmra.mrb[0].mxu1 %vm147_vm1, %v650_v10  ;;  %v582_v9 = vunpack.c.h.bf16 %v778_v44  ;;  %v44_v10 = vld [vmem:[#allocation2 + $0x28] sm:$0xff] }
  0x17   :  { %617 = vmatprep.mubr.msk.bf16.mxu0 %vm147_vm1, %v651_v11  ;;  %625 = vmatprep.mubr.msk.bf16.mxu1 %vm147_vm1, %v652_v12  ;;  %v52_v11 = vld [vmem:[#allocation2 + $0x68] sm:$0xff] }
  0x1e   :  { %618 = vmatmul.mubr.msk.bf16.gmra.mrb[4].mxu0 %vm147_vm1, %v653_v13  ;;  %626 = vmatmul.mubr.msk.bf16.gmra.mrb[4].mxu1 %vm147_vm1, %v654_v14 }
  0xe9   :  { %v615_v19 = vpop.f32.mrb[0].mxu0  ;;  %v623_v20 = vpop.f32.mrb[0].mxu1 }
  0xea   :  { %v275_v23 = vadd.f32 %v615_v19, %v41_v15  ;;  %v283_v24 = vadd.f32 %v623_v20, %v49_v16  ;;  %v210_v25 = vpop.f32.mrb[1].mxu0  ;;  %v242_v26 = vpop.f32.mrb[1].mxu1  ;;  %v578_v19 = vunpack.c.h.bf16 %v788_v46 }
  0xeb   :  { %v273_v30 = vadd.f32 %v210_v25, %v39_v17  ;;  %v281_v31 = vadd.f32 %v242_v26, %v47_v18  ;;  %v616_v32 = vpop.f32.mrb[2].mxu0  ;;  %v624_v33 = vpop.f32.mrb[2].mxu1  ;;  %v562_v18 = vunpack.c.h.bf16 %v783_v45 }
  0xec   :  { %292 = vst.msk [vmem:[#allocation2 + $0x10] sm:$0xff] %vm22_vm0, %v275_v23  ;;  %300 = vst.msk [vmem:[#allocation2 + $0x50] sm:$0xff] %vm22_vm0, %v283_v24  ;;  %v276_v37 = vadd.f32 %v616_v32, %v42_v21  ;;  %v284_v38 = vadd.f32 %v624_v33, %v50_v22  ;;  %v213_v39 = vpop.f32.mrb[3].mxu0  ;;  %v245_v40 = vpop.f32.mrb[3].mxu1 }
  0xed   :  { %290 = vst.msk [vmem:[#allocation2] sm:$0xff] %vm22_vm0, %v273_v30  ;;  %298 = vst.msk [vmem:[#allocation2 + $0x40] sm:$0xff] %vm22_vm0, %v281_v31  ;;  %v274_v41 = vadd.f32 %v213_v39, %v40_v27  ;;  %v282_v42 = vadd.f32 %v245_v40, %v48_v28 }
  0xee   :  { %293 = vst.msk [vmem:[#allocation2 + $0x18] sm:$0xff] %vm22_vm0, %v276_v37  ;;  %301 = vst.msk [vmem:[#allocation2 + $0x58] sm:$0xff] %vm22_vm0, %v284_v38 }
  0xef   :  { %291 = vst.msk [vmem:[#allocation2 + $0x8] sm:$0xff] %vm22_vm0, %v274_v41  ;;  %299 = vst.msk [vmem:[#allocation2 + $0x48] sm:$0xff] %vm22_vm0, %v282_v42 }
  0xf1   :  { %v619_v60 = vpop.f32.mrb[4].mxu0  ;;  %v627_v62 = vpop.f32.mrb[4].mxu1 }
  0xf2   :  { %v279_v4 = vadd.f32 %v619_v60, %v45_v51  ;;  %v287_v5 = vadd.f32 %v627_v62, %v53_v52  ;;  %v226_v6 = vpop.f32.mrb[5].mxu0  ;;  %v258_v7 = vpop.f32.mrb[5].mxu1 }
  0xf3   :  { %v311_v12 = vld [vmem:[#allocation2 + $0x10] sm:$0xff]  ;;  %v277_v14 = vadd.f32 %v226_v6, %v43_v57  ;;  %v285_v15 = vadd.f32 %v258_v7, %v51_v58  ;;  %v620_v16 = vpop.f32.mrb[6].mxu0  ;;  %v628_v17 = vpop.f32.mrb[6].mxu1 }
  0xf4   :  { %v319_v13 = vld [vmem:[#allocation2 + $0x50] sm:$0xff]  ;;  %v334_v20 = vadd.f32 %v803_v59, %v311_v12  ;;  %v309_v22 = vld [vmem:[#allocation2] sm:$0xff]  ;;  %296 = vst.msk [vmem:[#allocation2 + $0x30] sm:$0xff] %vm22_vm0, %v279_v4  ;;  %304 = vst.msk [vmem:[#allocation2 + $0x70] sm:$0xff] %vm22_vm0, %v287_v5  ;;  %v280_v24 = vadd.f32 %v620_v16, %v46_v2  ;;  %v288_v25 = vadd.f32 %v628_v17, %v54_v3  ;;  %v229_v26 = vpop.f32.mrb[7].mxu0  ;;  %v261_v27 = vpop.f32.mrb[7].mxu1 }
  0xf5   :  { %v342_v21 = vadd.f32 %v803_v59, %v319_v13  ;;  %v317_v23 = vld [vmem:[#allocation2 + $0x40] sm:$0xff]  ;;  %v332_v28 = vadd.f32 %v803_v59, %v309_v22  ;;  %v312_v31 = vld [vmem:[#allocation2 + $0x18] sm:$0xff]  ;;  %294 = vst.msk [vmem:[#allocation2 + $0x20] sm:$0xff] %vm22_vm0, %v277_v14  ;;  %302 = vst.msk [vmem:[#allocation2 + $0x60] sm:$0xff] %vm22_vm0, %v285_v15  ;;  %v278_v33 = vadd.f32 %v229_v26, %v44_v10 }
  0xf6   :  { %v340_v30 = vadd.f32 %v803_v59, %v317_v23  ;;  %v320_v32 = vld [vmem:[#allocation2 + $0x58] sm:$0xff]  ;;  %v286_v37 = vadd.f32 %v261_v27, %v52_v11  ;;  %v382_v38 = vadd.f32 %v557_v47, %v334_v20  ;;  %v335_v40 = vadd.f32 %v803_v59, %v312_v31  ;;  %v310_v42 = vld [vmem:[#allocation2 + $0x8] sm:$0xff]  ;;  %297 = vst.msk [vmem:[#allocation2 + $0x38] sm:$0xff] %vm22_vm0, %v280_v24 }
  0xf7   :  { %v390_v39 = vadd.f32 %v573_v48, %v342_v21  ;;  %v343_v41 = vadd.f32 %v803_v59, %v320_v32  ;;  %v318_v51 = vld [vmem:[#allocation2 + $0x48] sm:$0xff]  ;;  %305 = vst.msk [vmem:[#allocation2 + $0x78] sm:$0xff] %vm22_vm0, %v288_v25  ;;  %v380_v52 = vadd.f32 %v553_v49, %v332_v28  ;;  %v333_v58 = vadd.f32 %v803_v59, %v310_v42 }
  0xf8   :  { %v388_v57 = vadd.f32 %v569_v50, %v340_v30  ;;  %v341_v47 = vadd.f32 %v803_v59, %v318_v51  ;;  %295 = vst.msk [vmem:[#allocation2 + $0x28] sm:$0xff] %vm22_vm0, %v278_v33  ;;  %303 = vst.msk [vmem:[#allocation2 + $0x68] sm:$0xff] %vm22_vm0, %v286_v37  ;;  %v398_v48 = vmax.f32 %v382_v38, 0.0  ;;  %v383_v62 = vadd.f32 %v558_v53, %v335_v40 }
  0xf9   :  { %v406_v60 = vmax.f32 %v390_v39, 0.0  ;;  %v391_v2 = vadd.f32 %v574_v54, %v343_v41  ;;  %v396_v49 = vmax.f32 %v380_v52, 0.0  ;;  %v381_v50 = vadd.f32 %v554_v55, %v333_v58 }
  0xfa   :  { %v404_v3 = vmax.f32 %v388_v57, 0.0  ;;  %v389_v4 = vadd.f32 %v570_v56, %v341_v47  ;;  %v537_v5 = vpack.c.bf16 %v398_v48, %v398_v48  ;;  %v399_v7 = vmax.f32 %v383_v62, 0.0 }
  0xfb   :  { %v545_v6 = vpack.c.bf16 %v406_v60, %v406_v60  ;;  %v407_v10 = vmax.f32 %v391_v2, 0.0  ;;  %v535_v11 = vpack.c.bf16 %v396_v49, %v396_v49  ;;  %v397_v13 = vmax.f32 %v381_v50, 0.0  ;;  %v315_v53 = vld [vmem:[#allocation2 + $0x30] sm:$0xff] }
  0xfc   :  { %v543_v12 = vpack.c.bf16 %v404_v3, %v404_v3  ;;  %v405_v29 = vmax.f32 %v389_v4, 0.0  ;;  %v323_v14 = vld [vmem:[#allocation2 + $0x70] sm:$0xff]  ;;  %479 = vst.msk [vmem:[%s933_s4 + $0x8] sm:$0xf] %vm476_vm3, %v537_v5  ;;  %v538_v34 = vpack.c.bf16 %v399_v7, %v399_v7  ;;  %v338_v36 = vadd.f32 %v803_v59, %v315_v53  ;;  %v313_v55 = vld [vmem:[#allocation2 + $0x20] sm:$0xff] }
  0xfd   :  { %487 = vst.msk [vmem:[%s933_s4 + $0x28] sm:$0xf] %vm476_vm3, %v545_v6  ;;  %v546_v35 = vpack.c.bf16 %v407_v10, %v407_v10  ;;  %v346_v54 = vadd.f32 %v803_v59, %v323_v14  ;;  %v321_v56 = vld [vmem:[#allocation2 + $0x60] sm:$0xff]  ;;  %477 = vst.msk [vmem:[%s933_s4] sm:$0xf] %vm476_vm3, %v535_v11  ;;  %v536_v15 = vpack.c.bf16 %v397_v13, %v397_v13  ;;  %v316_v21 = vld [vmem:[#allocation2 + $0x38] sm:$0xff] }
  0xfe   :  { %485 = vst.msk [vmem:[%s933_s4 + $0x20] sm:$0xf] %vm476_vm3, %v543_v12  ;;  %v544_v16 = vpack.c.bf16 %v405_v29, %v405_v29  ;;  %v336_v17 = vadd.f32 %v803_v59, %v313_v55  ;;  %v344_v20 = vadd.f32 %v803_v59, %v321_v56  ;;  %v324_v22 = vld [vmem:[#allocation2 + $0x78] sm:$0xff]  ;;  %480 = vst.msk [vmem:[%s933_s4 + $0xc] sm:$0xf] %vm476_vm3, %v538_v34 }
  0xff   :  { %488 = vst.msk [vmem:[%s933_s4 + $0x2c] sm:$0xf] %vm476_vm3, %v546_v35  ;;  %v386_v23 = vadd.f32 %v565_v61, %v338_v36  ;;  %v394_v24 = vadd.f32 %v581_v63, %v346_v54  ;;  %v339_v25 = vadd.f32 %v803_v59, %v316_v21  ;;  %v347_v26 = vadd.f32 %v803_v59, %v324_v22  ;;  %v314_v27 = vld [vmem:[#allocation2 + $0x28] sm:$0xff] }
 0x100   :  { %v322_v28 = vld [vmem:[#allocation2 + $0x68] sm:$0xff]  ;;  %478 = vst.msk [vmem:[%s933_s4 + $0x4] sm:$0xf] %vm476_vm3, %v536_v15  ;;  %486 = vst.msk [vmem:[%s933_s4 + $0x24] sm:$0xf] %vm476_vm3, %v544_v16  ;;  %v384_v61 = vadd.f32 %v561_v0, %v336_v17  ;;  %v392_v63 = vadd.f32 %v577_v1, %v344_v20  ;;  %v337_v30 = vadd.f32 %v803_v59, %v314_v27 }
 0x101   :  { %v345_v31 = vadd.f32 %v803_v59, %v322_v28  ;;  %v402_v32 = vmax.f32 %v386_v23, 0.0  ;;  %v410_v33 = vmax.f32 %v394_v24, 0.0  ;;  %v387_v37 = vadd.f32 %v566_v8, %v339_v25 }
 0x102   :  { %v395_v38 = vadd.f32 %v582_v9, %v347_v26  ;;  %v400_v39 = vmax.f32 %v384_v61, 0.0  ;;  %v408_v40 = vmax.f32 %v392_v63, 0.0  ;;  %v385_v0 = vadd.f32 %v562_v18, %v337_v30 }
 0x103   :  { %v393_v1 = vadd.f32 %v578_v19, %v345_v31  ;;  %v541_v41 = vpack.c.bf16 %v402_v32, %v402_v32  ;;  %v549_v42 = vpack.c.bf16 %v410_v33, %v410_v33  ;;  %v403_v51 = vmax.f32 %v387_v37, 0.0 }
 0x104   :  { %v411_v59 = vmax.f32 %v395_v38, 0.0  ;;  %v539_v52 = vpack.c.bf16 %v400_v39, %v400_v39  ;;  %v547_v57 = vpack.c.bf16 %v408_v40, %v408_v40  ;;  %v401_v58 = vmax.f32 %v385_v0, 0.0 }
 0x105   :  { %v409_v43 = vmax.f32 %v393_v1, 0.0  ;;  %483 = vst.msk [vmem:[%s933_s4 + $0x18] sm:$0xf] %vm476_vm3, %v541_v41  ;;  %491 = vst.msk [vmem:[%s933_s4 + $0x38] sm:$0xf] %vm476_vm3, %v549_v42  ;;  %v542_v44 = vpack.c.bf16 %v403_v51, %v403_v51 }
 0x106   :  { %v550_v45 = vpack.c.bf16 %v411_v59, %v411_v59  ;;  %481 = vst.msk [vmem:[%s933_s4 + $0x10] sm:$0xf] %vm476_vm3, %v539_v52  ;;  %489 = vst.msk [vmem:[%s933_s4 + $0x30] sm:$0xf] %vm476_vm3, %v547_v57  ;;  %v540_v46 = vpack.c.bf16 %v401_v58, %v401_v58 }
 0x107   :  { %v548_v8 = vpack.c.bf16 %v409_v43, %v409_v43  ;;  %484 = vst.msk [vmem:[%s933_s4 + $0x1c] sm:$0xf] %vm476_vm3, %v542_v44 }
 0x108   :  { %492 = vst.msk [vmem:[%s933_s4 + $0x3c] sm:$0xf] %vm476_vm3, %v550_v45  ;;  %482 = vst.msk [vmem:[%s933_s4 + $0x14] sm:$0xf] %vm476_vm3, %v540_v46 }
 0x109   :  { %490 = vst.msk [vmem:[%s933_s4 + $0x34] sm:$0xf] %vm476_vm3, %v548_v8 }

// kernel: _lambda_.30
= control target key start
LH: loop header
LB: loop body
LE: loop exit
PB: predicated region body
PF: predicated region fallthrough
CT: control target
= control target key end

     0   :  { %vm19_vm0 = vcmask 130048   ;;  %v242_v1 = vmov 0.0   ;;  %vm78_vm1 = vcmask 588800   ;;  %vm85_vm2 = vcmask 1043456   ;;  %s307_s1 = inlined_call_operand.vmem [shape: bf16[72,16], index: 1, kind: input, shape index: {}]   ;;  %s308_s0 = inlined_call_operand.vmem [shape: bf16[32,72], index: 0, kind: input, shape index: {}]   ;;  %s309_s2 = inlined_call_operand.vmem [shape: f32[1,16], index: 2, kind: input, shape index: {}]   ;;  %s310_s3 = inlined_call_operand.vmem [shape: bf16[32,16], index: 3, kind: output, shape index: {}]  }
   0x1   :  { %v235_v0 = vld [vmem:[%s307_s1] sm:$0xff]   ;;  %22 = vst.msk [vmem:[#allocation2 + $0x10] sm:$0xff] %vm19_vm0, %v242_v1  ;;  %20 = vst.msk [vmem:[#allocation2] sm:$0xff] %vm19_vm0, %v242_v1  ;;  %v236_v2 = vld [vmem:[%s307_s1 + $0x8] sm:$0xff]   ;;  %vm185_vm3 = vcmask 125952  }
   0x2   :  { %21 = vst.msk [vmem:[#allocation2 + $0x8] sm:$0xff] %vm19_vm0, %v242_v1  ;;  %23 = vst.msk [vmem:[#allocation2 + $0x18] sm:$0xff] %vm19_vm0, %v242_v1  ;;  %219 = vmatprep.subr.bf16.mxu0 %v235_v0  ;;  %v237_v3 = vld [vmem:[%s307_s1 + $0x10] sm:$0xff]   ;;  %v240_v4 = vld [vmem:[%s308_s0] sm:$0xff]  }
   0x3   :  { %220 = vmatpush3.bf16.msra.mxu0 %v235_v0  ;;  %229 = vmatprep.mubr.msk.bf16.mxu0 %vm78_vm1, %v240_v4  ;;  %v238_v5 = vld [vmem:[%s307_s1 + $0x18] sm:$0xff]   ;;  %v239_v6 = vld [vmem:[%s307_s1 + $0x20] ss:$0 sps:$4 sm:$0xff]   ;;  %v241_v8 = vld [vmem:[%s308_s0 + $0x8] sm:$0xff]  }
   0x4   :  { %221 = vmatprep.subr.bf16.mxu0 %v236_v2  ;;  %v87_v7 = vsel %vm85_vm2, %v239_v6, 0  ;;  %v203_v21 = vld [vmem:[%s309_s2] ss:$0 sm:$0xff] }
   0x7   :  { %222 = vmatpush3.bf16.msra.mxu0 %v236_v2 }
   0x8   :  { %223 = vmatprep.subr.bf16.mxu0 %v237_v3  ;;  %v26_v9 = vld [vmem:[#allocation2 + $0x10] sm:$0xff]  ;;  %v24_v10 = vld [vmem:[#allocation2] sm:$0xff] }
   0x9   :  { %v27_v12 = vld [vmem:[#allocation2 + $0x18] sm:$0xff]  ;;  %v25_v15 = vld [vmem:[#allocation2 + $0x8] sm:$0xff] }
   0xb   :  { %224 = vmatpush3.bf16.msra.mxu0 %v237_v3 }
   0xc   :  { %225 = vmatprep.subr.bf16.mxu0 %v238_v5 }
   0xf   :  { %226 = vmatpush3.bf16.msra.mxu0 %v238_v5 }
  0x10   :  { %233 = vmatprep.subr.msk.bf16.mxu0 %vm85_vm2, %v239_v6 }
  0x13   :  { %228 = vmatpush3.bf16.msra.mxu0 %v87_v7 }
  0x16   :  { %230 = vmatmul.mubr.msk.bf16.vlgmr.msra.gmra.mrb[0].mxu0 %vm78_vm1, %v241_v8 }
  0xe9   :  { %v231_v11 = vpop.f32.mrb[0].mxu0 }
  0xea   :  { %v140_v13 = vadd.f32 %v231_v11, %v26_v9  ;;  %v123_v14 = vpop.f32.mrb[1].mxu0 }
  0xeb   :  { %v138_v16 = vadd.f32 %v123_v14, %v24_v10  ;;  %v232_v17 = vpop.f32.mrb[2].mxu0 }
  0xec   :  { %145 = vst.msk [vmem:[#allocation2 + $0x10] sm:$0xff] %vm19_vm0, %v140_v13  ;;  %v141_v18 = vadd.f32 %v232_v17, %v27_v12  ;;  %v126_v19 = vpop.f32.mrb[3].mxu0 }
  0xed   :  { %143 = vst.msk [vmem:[#allocation2] sm:$0xff] %vm19_vm0, %v138_v16  ;;  %v139_v20 = vadd.f32 %v126_v19, %v25_v15 }
  0xee   :  { %146 = vst.msk [vmem:[#allocation2 + $0x18] sm:$0xff] %vm19_vm0, %v141_v18 }
  0xef   :  { %144 = vst.msk [vmem:[#allocation2 + $0x8] sm:$0xff] %vm19_vm0, %v139_v20 }
  0xf3   :  { %v152_v22 = vld [vmem:[#allocation2 + $0x10] sm:$0xff] }
  0xf4   :  { %v163_v23 = vadd.f32 %v203_v21, %v152_v22  ;;  %v150_v24 = vld [vmem:[#allocation2] sm:$0xff] }
  0xf5   :  { %v161_v25 = vadd.f32 %v203_v21, %v150_v24  ;;  %v153_v26 = vld [vmem:[#allocation2 + $0x18] sm:$0xff] }
  0xf6   :  { %v167_v27 = vmax.f32 %v163_v23, 0.0  ;;  %v164_v28 = vadd.f32 %v203_v21, %v153_v26  ;;  %v151_v29 = vld [vmem:[#allocation2 + $0x8] sm:$0xff] }
  0xf7   :  { %v165_v30 = vmax.f32 %v161_v25, 0.0  ;;  %v162_v31 = vadd.f32 %v203_v21, %v151_v29 }
  0xf8   :  { %v210_v32 = vpack.c.bf16 %v167_v27, %v167_v27  ;;  %v168_v33 = vmax.f32 %v164_v28, 0.0 }
  0xf9   :  { %v208_v34 = vpack.c.bf16 %v165_v30, %v165_v30  ;;  %v166_v35 = vmax.f32 %v162_v31, 0.0 }
  0xfa   :  { %188 = vst.msk [vmem:[%s310_s3 + $0x8] sm:$0xf] %vm185_vm3, %v210_v32  ;;  %v211_v36 = vpack.c.bf16 %v168_v33, %v168_v33 }
  0xfb   :  { %186 = vst.msk [vmem:[%s310_s3] sm:$0xf] %vm185_vm3, %v208_v34  ;;  %v209_v37 = vpack.c.bf16 %v166_v35, %v166_v35 }
  0xfc   :  { %189 = vst.msk [vmem:[%s310_s3 + $0xc] sm:$0xf] %vm185_vm3, %v211_v36 }
  0xfd   :  { %187 = vst.msk [vmem:[%s310_s3 + $0x4] sm:$0xf] %vm185_vm3, %v209_v37 }

// kernel: _lambda_.32
= control target key start
LH: loop header
LB: loop body
LE: loop exit
PB: predicated region body
PF: predicated region fallthrough
CT: control target
= control target key end

     0   :  { %vm22_vm0 = vcmask 130048   ;;  %v316_v0 = vmov 0   ;;  %v317_v2 = vmov 0.0   ;;  %vm239_vm1 = vcmask 125952   ;;  %s413_s1 = inlined_call_operand.vmem [shape: bf16[144,16], index: 1, kind: input, shape index: {}]   ;;  %s414_s0 = inlined_call_operand.vmem [shape: bf16[32,144], index: 0, kind: input, shape index: {}]   ;;  %s415_s3 = inlined_call_operand.vmem [shape: bf16[32,16], index: 3, kind: input, shape index: {}]   ;;  %s416_s2 = inlined_call_operand.vmem [shape: f32[1,16], index: 2, kind: input, shape index: {}]   ;;  %s417_s4 = inlined_call_operand.vmem [shape: bf16[32,16], index: 4, kind: output, shape index: {}]  }
   0x1   :  { %132 = vmatprep.subr.bf16.mxu0 %v316_v0  ;;  %281 = vmatprep.subr.bf16.mxu1 %v316_v0  ;;  %v301_v1 = vld [vmem:[%s413_s1] sm:$0xff]   ;;  %23 = vst.msk [vmem:[#allocation2] sm:$0xff] %vm22_vm0, %v317_v2  ;;  %24 = vst.msk [vmem:[#allocation2 + $0x8] sm:$0xff] %vm22_vm0, %v317_v2  ;;  %v302_v3 = vld [vmem:[%s413_s1 + $0x8] sm:$0xff]  }
   0x2   :  { %25 = vst.msk [vmem:[#allocation2 + $0x10] sm:$0xff] %vm22_vm0, %v317_v2  ;;  %26 = vst.msk [vmem:[#allocation2 + $0x18] sm:$0xff] %vm22_vm0, %v317_v2  ;;  %133 = vmatpush1.bf16.msra.mxu0 %v301_v1  ;;  %290 = vmatpush1.bf16.msra.mxu1 %v301_v1  ;;  %v303_v4 = vld [vmem:[%s413_s1 + $0x10] sm:$0xff]   ;;  %v304_v5 = vld [vmem:[%s413_s1 + $0x18] sm:$0xff]  }
   0x3   :  { %134 = vmatprep.subr.bf16.mxu0 %v316_v0  ;;  %282 = vmatprep.subr.bf16.mxu1 %v316_v0  ;;  %v312_v6 = vld [vmem:[%s414_s0 + $0x4] ss:$8 sps:$4 sm:$0xff]   ;;  %v315_v7 = vld [vmem:[%s414_s0 + $0x14] ss:$8 sps:$4 sm:$0xff]   ;;  %v310_v13 = vld [vmem:[%s414_s0] ss:$8 sps:$4 sm:$0xff]  }
   0x4   :  { %261 = vmatprep.mubr.msk.bf16.mxu0 %vm22_vm0, %v312_v6  ;;  %262 = vmatprep.mubr.msk.bf16.mxu1 %vm22_vm0, %v315_v7  ;;  %v305_v8 = vld [vmem:[%s413_s1 + $0x20] sm:$0xff]   ;;  %v306_v9 = vld [vmem:[%s413_s1 + $0x28] sm:$0xff]   ;;  %v307_v10 = vld [vmem:[%s413_s1 + $0x30] sm:$0xff]  }
   0x5   :  { %v308_v11 = vld [vmem:[%s413_s1 + $0x38] sm:$0xff]   ;;  %v309_v12 = vld [vmem:[%s413_s1 + $0x40] sm:$0xff]   ;;  %v280_v32 = vld [vmem:[%s415_s3 + $0x8] sm:$0xff]  }
   0x6   :  { %135 = vmatpush1.bf16.msra.mxu0 %v302_v3  ;;  %291 = vmatpush1.bf16.msra.mxu1 %v302_v3  ;;  %v313_v14 = vld [vmem:[%s414_s0 + $0x10] ss:$8 sps:$4 sm:$0xff]   ;;  %v273_v31 = vld [vmem:[%s415_s3] sm:$0xff]   ;;  %v278_v35 = vunpack.c.l.bf16 %v280_v32  ;;  %v279_v41 = vunpack.c.h.bf16 %v280_v32 }
   0x7   :  { %136 = vmatprep.subr.bf16.mxu0 %v316_v0  ;;  %283 = vmatprep.subr.bf16.mxu1 %v316_v0  ;;  %v263_v33 = vld [vmem:[%s416_s2] ss:$0 sm:$0xff]  ;;  %v274_v34 = vunpack.c.l.bf16 %v273_v31  ;;  %v275_v40 = vunpack.c.h.bf16 %v273_v31 }
   0x8   :  { %v27_v15 = vld [vmem:[#allocation2] sm:$0xff]  ;;  %v28_v19 = vld [vmem:[#allocation2 + $0x8] sm:$0xff] }
   0x9   :  { %v29_v16 = vld [vmem:[#allocation2 + $0x10] sm:$0xff]  ;;  %v30_v20 = vld [vmem:[#allocation2 + $0x18] sm:$0xff] }
   0xa   :  { %137 = vmatpush1.bf16.msra.mxu0 %v303_v4  ;;  %292 = vmatpush1.bf16.msra.mxu1 %v303_v4 }
   0xb   :  { %138 = vmatprep.subr.bf16.mxu0 %v316_v0  ;;  %284 = vmatprep.subr.bf16.mxu1 %v316_v0 }
   0xe   :  { %139 = vmatpush1.bf16.msra.mxu0 %v304_v5  ;;  %293 = vmatpush1.bf16.msra.mxu1 %v304_v5 }
   0xf   :  { %140 = vmatprep.subr.bf16.mxu0 %v316_v0  ;;  %285 = vmatprep.subr.bf16.mxu1 %v316_v0 }
  0x12   :  { %141 = vmatpush1.bf16.msra.mxu0 %v305_v8  ;;  %294 = vmatpush1.bf16.msra.mxu1 %v305_v8 }
  0x13   :  { %142 = vmatprep.subr.bf16.mxu0 %v316_v0  ;;  %286 = vmatprep.subr.bf16.mxu1 %v316_v0 }
  0x16   :  { %143 = vmatpush1.bf16.msra.mxu0 %v306_v9  ;;  %295 = vmatpush1.bf16.msra.mxu1 %v306_v9 }
  0x17   :  { %144 = vmatprep.subr.bf16.mxu0 %v316_v0  ;;  %287 = vmatprep.subr.bf16.mxu1 %v316_v0 }
  0x1a   :  { %145 = vmatpush1.bf16.msra.mxu0 %v307_v10  ;;  %296 = vmatpush1.bf16.msra.mxu1 %v307_v10 }
  0x1b   :  { %146 = vmatprep.subr.bf16.mxu0 %v316_v0  ;;  %288 = vmatprep.subr.bf16.mxu1 %v316_v0 }
  0x1e   :  { %147 = vmatpush1.bf16.msra.mxu0 %v308_v11  ;;  %297 = vmatpush1.bf16.msra.mxu1 %v308_v11 }
  0x1f   :  { %148 = vmatprep.subr.bf16.mxu0 %v316_v0  ;;  %289 = vmatprep.subr.bf16.mxu1 %v316_v0 }
  0x22   :  { %149 = vmatpush1.bf16.msra.mxu0 %v309_v12  ;;  %298 = vmatpush1.bf16.msra.mxu1 %v309_v12 }
  0x25   :  { %165 = vmatmul.mubr.bf16.vlgmr.msra.gmra.mrb[0].mxu0 %v310_v13  ;;  %173 = vmatmul.mubr.bf16.vlgmr.msra.gmra.mrb[0].mxu1 %v313_v14 }
  0xf8   :  { %v166_v17 = vpop.f32.mrb[0].mxu0  ;;  %v174_v18 = vpop.f32.mrb[0].mxu1 }
  0xf9   :  { %v181_v21 = vadd.f32 %v166_v17, %v27_v15  ;;  %v183_v22 = vadd.f32 %v174_v18, %v29_v16  ;;  %v168_v23 = vpop.f32.mrb[1].mxu0  ;;  %v176_v24 = vpop.f32.mrb[1].mxu1 }
  0xfa   :  { %v169_v25 = vpop.f32.mrb[2].mxu0  ;;  %v177_v26 = vpop.f32.mrb[2].mxu1 }
  0xfb   :  { %185 = vst.msk [vmem:[#allocation2] sm:$0xff] %vm22_vm0, %v181_v21  ;;  %187 = vst.msk [vmem:[#allocation2 + $0x10] sm:$0xff] %vm22_vm0, %v183_v22  ;;  %v182_v27 = vadd.f32 %v169_v25, %v28_v19  ;;  %v184_v28 = vadd.f32 %v177_v26, %v30_v20  ;;  %v171_v29 = vpop.f32.mrb[3].mxu0  ;;  %v179_v30 = vpop.f32.mrb[3].mxu1 }
  0xfd   :  { %186 = vst.msk [vmem:[#allocation2 + $0x8] sm:$0xff] %vm22_vm0, %v182_v27  ;;  %188 = vst.msk [vmem:[#allocation2 + $0x18] sm:$0xff] %vm22_vm0, %v184_v28 }
 0x102   :  { %v192_v36 = vld [vmem:[#allocation2] sm:$0xff]  ;;  %v194_v37 = vld [vmem:[#allocation2 + $0x10] sm:$0xff] }
 0x103   :  { %v203_v38 = vadd.f32 %v263_v33, %v192_v36  ;;  %v205_v39 = vadd.f32 %v263_v33, %v194_v37 }
 0x104   :  { %v193_v42 = vld [vmem:[#allocation2 + $0x8] sm:$0xff]  ;;  %v195_v43 = vld [vmem:[#allocation2 + $0x18] sm:$0xff] }
 0x105   :  { %v215_v44 = vadd.f32 %v274_v34, %v203_v38  ;;  %v217_v45 = vadd.f32 %v278_v35, %v205_v39  ;;  %v204_v46 = vadd.f32 %v263_v33, %v193_v42  ;;  %v206_v47 = vadd.f32 %v263_v33, %v195_v43 }
 0x107   :  { %v219_v48 = vmax.f32 %v215_v44, 0.0  ;;  %v221_v49 = vmax.f32 %v217_v45, 0.0  ;;  %v216_v50 = vadd.f32 %v275_v40, %v204_v46  ;;  %v218_v51 = vadd.f32 %v279_v41, %v206_v47 }
 0x109   :  { %v268_v52 = vpack.c.bf16 %v219_v48, %v219_v48  ;;  %v270_v53 = vpack.c.bf16 %v221_v49, %v221_v49  ;;  %v220_v54 = vmax.f32 %v216_v50, 0.0  ;;  %v222_v55 = vmax.f32 %v218_v51, 0.0 }
 0x10b   :  { %240 = vst.msk [vmem:[%s417_s4] sm:$0xf] %vm239_vm1, %v268_v52  ;;  %242 = vst.msk [vmem:[%s417_s4 + $0x8] sm:$0xf] %vm239_vm1, %v270_v53  ;;  %v269_v56 = vpack.c.bf16 %v220_v54, %v220_v54  ;;  %v271_v57 = vpack.c.bf16 %v222_v55, %v222_v55 }
 0x10d   :  { %241 = vst.msk [vmem:[%s417_s4 + $0x4] sm:$0xf] %vm239_vm1, %v269_v56  ;;  %243 = vst.msk [vmem:[%s417_s4 + $0xc] sm:$0xf] %vm239_vm1, %v271_v57 }

// kernel: _lambda_.31
= control target key start
LH: loop header
LB: loop body
LE: loop exit
PB: predicated region body
PF: predicated region fallthrough
CT: control target
= control target key end

     0   :  { %vm50_vm0 = vcmask 1043456   ;;  %vm43_vm1 = vcmask 64512   ;;  %vm19_vm2 = vcmask 130048   ;;  %v181_v1 = vmov 0.0   ;;  %s234_s1 = inlined_call_operand.vmem [shape: bf16[8,16], index: 1, kind: input, shape index: {}]   ;;  %s235_s0 = inlined_call_operand.vmem [shape: bf16[32,8], index: 0, kind: input, shape index: {}]   ;;  %s236_s2 = inlined_call_operand.vmem [shape: f32[1,16], index: 2, kind: input, shape index: {}]   ;;  %s237_s3 = inlined_call_operand.vmem [shape: bf16[32,16], index: 3, kind: output, shape index: {}]  }
   0x1   :  { %v32_v0 = vld [vmem:[%s234_s1] sm:$0xf]  ;;  %22 = vst.msk [vmem:[#allocation2 + $0x10] sm:$0xff] %vm19_vm2, %v181_v1  ;;  %20 = vst.msk [vmem:[#allocation2] sm:$0xff] %vm19_vm2, %v181_v1  ;;  %v180_v4 = vld [vmem:[%s235_s0 + $0x8] sm:$0xff]   ;;  %vm146_vm3 = vcmask 125952  }
   0x2   :  { %21 = vst.msk [vmem:[#allocation2 + $0x8] sm:$0xff] %vm19_vm2, %v181_v1  ;;  %23 = vst.msk [vmem:[#allocation2 + $0x18] sm:$0xff] %vm19_vm2, %v181_v1  ;;  %177 = vmatprep.subr.msk.bf16.mxu0 %vm50_vm0, %v32_v0  ;;  %v52_v2 = vsel %vm50_vm0, %v32_v0, 0  ;;  %v179_v3 = vld [vmem:[%s235_s0] sm:$0xff]  }
   0x3   :  { %172 = vmatpush3.bf16.msra.mxu0 %v52_v2  ;;  %173 = vmatprep.mubr.msk.bf16.mxu0 %vm43_vm1, %v179_v3  ;;  %v159_v17 = vld [vmem:[%s236_s2] ss:$0 sm:$0xff] }
   0x6   :  { %174 = vmatmul.mubr.msk.bf16.vlgmr.msra.gmra.mrb[0].mxu0 %vm43_vm1, %v180_v4 }
   0x8   :  { %v26_v5 = vld [vmem:[#allocation2 + $0x10] sm:$0xff]  ;;  %v24_v6 = vld [vmem:[#allocation2] sm:$0xff] }
   0x9   :  { %v27_v8 = vld [vmem:[#allocation2 + $0x18] sm:$0xff]  ;;  %v25_v11 = vld [vmem:[#allocation2 + $0x8] sm:$0xff] }
  0xd9   :  { %v175_v7 = vpop.f32.mrb[0].mxu0 }
  0xda   :  { %v105_v9 = vadd.f32 %v175_v7, %v26_v5  ;;  %v88_v10 = vpop.f32.mrb[1].mxu0 }
  0xdb   :  { %v103_v12 = vadd.f32 %v88_v10, %v24_v6  ;;  %v176_v13 = vpop.f32.mrb[2].mxu0 }
  0xdc   :  { %110 = vst.msk [vmem:[#allocation2 + $0x10] sm:$0xff] %vm19_vm2, %v105_v9  ;;  %v106_v14 = vadd.f32 %v176_v13, %v27_v8  ;;  %v91_v15 = vpop.f32.mrb[3].mxu0 }
  0xdd   :  { %108 = vst.msk [vmem:[#allocation2] sm:$0xff] %vm19_vm2, %v103_v12  ;;  %v104_v16 = vadd.f32 %v91_v15, %v25_v11 }
  0xde   :  { %111 = vst.msk [vmem:[#allocation2 + $0x18] sm:$0xff] %vm19_vm2, %v106_v14 }
  0xdf   :  { %109 = vst.msk [vmem:[#allocation2 + $0x8] sm:$0xff] %vm19_vm2, %v104_v16 }
  0xe3   :  { %v117_v18 = vld [vmem:[#allocation2 + $0x10] sm:$0xff] }
  0xe4   :  { %v128_v19 = vadd.f32 %v159_v17, %v117_v18  ;;  %v115_v20 = vld [vmem:[#allocation2] sm:$0xff] }
  0xe5   :  { %v126_v21 = vadd.f32 %v159_v17, %v115_v20  ;;  %v118_v22 = vld [vmem:[#allocation2 + $0x18] sm:$0xff] }
  0xe6   :  { %v166_v23 = vpack.c.bf16 %v128_v19, %v128_v19  ;;  %v129_v24 = vadd.f32 %v159_v17, %v118_v22  ;;  %v116_v25 = vld [vmem:[#allocation2 + $0x8] sm:$0xff] }
  0xe7   :  { %v164_v26 = vpack.c.bf16 %v126_v21, %v126_v21  ;;  %v127_v27 = vadd.f32 %v159_v17, %v116_v25 }
  0xe8   :  { %149 = vst.msk [vmem:[%s237_s3 + $0x8] sm:$0xf] %vm146_vm3, %v166_v23  ;;  %v167_v28 = vpack.c.bf16 %v129_v24, %v129_v24 }
  0xe9   :  { %147 = vst.msk [vmem:[%s237_s3] sm:$0xf] %vm146_vm3, %v164_v26  ;;  %v165_v29 = vpack.c.bf16 %v127_v27, %v127_v27 }
  0xea   :  { %150 = vst.msk [vmem:[%s237_s3 + $0xc] sm:$0xf] %vm146_vm3, %v167_v28 }
  0xeb   :  { %148 = vst.msk [vmem:[%s237_s3 + $0x4] sm:$0xf] %vm146_vm3, %v165_v29 }

// kernel: _lambda_.33
= control target key start
LH: loop header
LB: loop body
LE: loop exit
PB: predicated region body
PF: predicated region fallthrough
CT: control target
= control target key end

     0   :  { %vm19_vm0 = vcmask 130048   ;;  %v292_v0 = vmov 0   ;;  %v293_v2 = vmov 0.0   ;;  %vm224_vm1 = vcmask 125952   ;;  %s378_s1 = inlined_call_operand.vmem [shape: bf16[144,16], index: 1, kind: input, shape index: {}]   ;;  %s379_s0 = inlined_call_operand.vmem [shape: bf16[32,144], index: 0, kind: input, shape index: {}]   ;;  %s380_s2 = inlined_call_operand.vmem [shape: f32[1,16], index: 2, kind: input, shape index: {}]   ;;  %s381_s3 = inlined_call_operand.vmem [shape: bf16[32,16], index: 3, kind: output, shape index: {}]  }
   0x1   :  { %129 = vmatprep.subr.bf16.mxu0 %v292_v0  ;;  %257 = vmatprep.subr.bf16.mxu1 %v292_v0  ;;  %v277_v1 = vld [vmem:[%s378_s1] sm:$0xff]   ;;  %20 = vst.msk [vmem:[#allocation2] sm:$0xff] %vm19_vm0, %v293_v2  ;;  %21 = vst.msk [vmem:[#allocation2 + $0x8] sm:$0xff] %vm19_vm0, %v293_v2  ;;  %v278_v3 = vld [vmem:[%s378_s1 + $0x8] sm:$0xff]  }
   0x2   :  { %22 = vst.msk [vmem:[#allocation2 + $0x10] sm:$0xff] %vm19_vm0, %v293_v2  ;;  %23 = vst.msk [vmem:[#allocation2 + $0x18] sm:$0xff] %vm19_vm0, %v293_v2  ;;  %130 = vmatpush1.bf16.msra.mxu0 %v277_v1  ;;  %266 = vmatpush1.bf16.msra.mxu1 %v277_v1  ;;  %v279_v4 = vld [vmem:[%s378_s1 + $0x10] sm:$0xff]   ;;  %v280_v5 = vld [vmem:[%s378_s1 + $0x18] sm:$0xff]  }
   0x3   :  { %131 = vmatprep.subr.bf16.mxu0 %v292_v0  ;;  %258 = vmatprep.subr.bf16.mxu1 %v292_v0  ;;  %v288_v6 = vld [vmem:[%s379_s0 + $0x4] ss:$8 sps:$4 sm:$0xff]   ;;  %v291_v7 = vld [vmem:[%s379_s0 + $0x14] ss:$8 sps:$4 sm:$0xff]   ;;  %v286_v13 = vld [vmem:[%s379_s0] ss:$8 sps:$4 sm:$0xff]  }
   0x4   :  { %246 = vmatprep.mubr.msk.bf16.mxu0 %vm19_vm0, %v288_v6  ;;  %247 = vmatprep.mubr.msk.bf16.mxu1 %vm19_vm0, %v291_v7  ;;  %v281_v8 = vld [vmem:[%s378_s1 + $0x20] sm:$0xff]   ;;  %v282_v9 = vld [vmem:[%s378_s1 + $0x28] sm:$0xff]   ;;  %v283_v10 = vld [vmem:[%s378_s1 + $0x30] sm:$0xff]  }
   0x5   :  { %v284_v11 = vld [vmem:[%s378_s1 + $0x38] sm:$0xff]   ;;  %v285_v12 = vld [vmem:[%s378_s1 + $0x40] sm:$0xff]  }
   0x6   :  { %132 = vmatpush1.bf16.msra.mxu0 %v278_v3  ;;  %267 = vmatpush1.bf16.msra.mxu1 %v278_v3  ;;  %v289_v14 = vld [vmem:[%s379_s0 + $0x10] ss:$8 sps:$4 sm:$0xff]   ;;  %v248_v31 = vld [vmem:[%s380_s2] ss:$0 sm:$0xff] }
   0x7   :  { %133 = vmatprep.subr.bf16.mxu0 %v292_v0  ;;  %259 = vmatprep.subr.bf16.mxu1 %v292_v0 }
   0x8   :  { %v24_v15 = vld [vmem:[#allocation2] sm:$0xff]  ;;  %v25_v19 = vld [vmem:[#allocation2 + $0x8] sm:$0xff] }
   0x9   :  { %v26_v16 = vld [vmem:[#allocation2 + $0x10] sm:$0xff]  ;;  %v27_v20 = vld [vmem:[#allocation2 + $0x18] sm:$0xff] }
   0xa   :  { %134 = vmatpush1.bf16.msra.mxu0 %v279_v4  ;;  %268 = vmatpush1.bf16.msra.mxu1 %v279_v4 }
   0xb   :  { %135 = vmatprep.subr.bf16.mxu0 %v292_v0  ;;  %260 = vmatprep.subr.bf16.mxu1 %v292_v0 }
   0xe   :  { %136 = vmatpush1.bf16.msra.mxu0 %v280_v5  ;;  %269 = vmatpush1.bf16.msra.mxu1 %v280_v5 }
   0xf   :  { %137 = vmatprep.subr.bf16.mxu0 %v292_v0  ;;  %261 = vmatprep.subr.bf16.mxu1 %v292_v0 }
  0x12   :  { %138 = vmatpush1.bf16.msra.mxu0 %v281_v8  ;;  %270 = vmatpush1.bf16.msra.mxu1 %v281_v8 }
  0x13   :  { %139 = vmatprep.subr.bf16.mxu0 %v292_v0  ;;  %262 = vmatprep.subr.bf16.mxu1 %v292_v0 }
  0x16   :  { %140 = vmatpush1.bf16.msra.mxu0 %v282_v9  ;;  %271 = vmatpush1.bf16.msra.mxu1 %v282_v9 }
  0x17   :  { %141 = vmatprep.subr.bf16.mxu0 %v292_v0  ;;  %263 = vmatprep.subr.bf16.mxu1 %v292_v0 }
  0x1a   :  { %142 = vmatpush1.bf16.msra.mxu0 %v283_v10  ;;  %272 = vmatpush1.bf16.msra.mxu1 %v283_v10 }
  0x1b   :  { %143 = vmatprep.subr.bf16.mxu0 %v292_v0  ;;  %264 = vmatprep.subr.bf16.mxu1 %v292_v0 }
  0x1e   :  { %144 = vmatpush1.bf16.msra.mxu0 %v284_v11  ;;  %273 = vmatpush1.bf16.msra.mxu1 %v284_v11 }
  0x1f   :  { %145 = vmatprep.subr.bf16.mxu0 %v292_v0  ;;  %265 = vmatprep.subr.bf16.mxu1 %v292_v0 }
  0x22   :  { %146 = vmatpush1.bf16.msra.mxu0 %v285_v12  ;;  %274 = vmatpush1.bf16.msra.mxu1 %v285_v12 }
  0x25   :  { %162 = vmatmul.mubr.bf16.vlgmr.msra.gmra.mrb[0].mxu0 %v286_v13  ;;  %170 = vmatmul.mubr.bf16.vlgmr.msra.gmra.mrb[0].mxu1 %v289_v14 }
  0xf8   :  { %v163_v17 = vpop.f32.mrb[0].mxu0  ;;  %v171_v18 = vpop.f32.mrb[0].mxu1 }
  0xf9   :  { %v178_v21 = vadd.f32 %v163_v17, %v24_v15  ;;  %v180_v22 = vadd.f32 %v171_v18, %v26_v16  ;;  %v165_v23 = vpop.f32.mrb[1].mxu0  ;;  %v173_v24 = vpop.f32.mrb[1].mxu1 }
  0xfa   :  { %v166_v25 = vpop.f32.mrb[2].mxu0  ;;  %v174_v26 = vpop.f32.mrb[2].mxu1 }
  0xfb   :  { %182 = vst.msk [vmem:[#allocation2] sm:$0xff] %vm19_vm0, %v178_v21  ;;  %184 = vst.msk [vmem:[#allocation2 + $0x10] sm:$0xff] %vm19_vm0, %v180_v22  ;;  %v179_v27 = vadd.f32 %v166_v25, %v25_v19  ;;  %v181_v28 = vadd.f32 %v174_v26, %v27_v20  ;;  %v168_v29 = vpop.f32.mrb[3].mxu0  ;;  %v176_v30 = vpop.f32.mrb[3].mxu1 }
  0xfd   :  { %183 = vst.msk [vmem:[#allocation2 + $0x8] sm:$0xff] %vm19_vm0, %v179_v27  ;;  %185 = vst.msk [vmem:[#allocation2 + $0x18] sm:$0xff] %vm19_vm0, %v181_v28 }
 0x102   :  { %v189_v32 = vld [vmem:[#allocation2] sm:$0xff]  ;;  %v191_v33 = vld [vmem:[#allocation2 + $0x10] sm:$0xff] }
 0x103   :  { %v200_v34 = vadd.f32 %v248_v31, %v189_v32  ;;  %v202_v35 = vadd.f32 %v248_v31, %v191_v33 }
 0x104   :  { %v190_v36 = vld [vmem:[#allocation2 + $0x8] sm:$0xff]  ;;  %v192_v37 = vld [vmem:[#allocation2 + $0x18] sm:$0xff] }
 0x105   :  { %v204_v38 = vmax.f32 %v200_v34, 0.0  ;;  %v206_v39 = vmax.f32 %v202_v35, 0.0  ;;  %v201_v40 = vadd.f32 %v248_v31, %v190_v36  ;;  %v203_v41 = vadd.f32 %v248_v31, %v192_v37 }
 0x107   :  { %v253_v42 = vpack.c.bf16 %v204_v38, %v204_v38  ;;  %v255_v43 = vpack.c.bf16 %v206_v39, %v206_v39  ;;  %v205_v44 = vmax.f32 %v201_v40, 0.0  ;;  %v207_v45 = vmax.f32 %v203_v41, 0.0 }
 0x109   :  { %225 = vst.msk [vmem:[%s381_s3] sm:$0xf] %vm224_vm1, %v253_v42  ;;  %227 = vst.msk [vmem:[%s381_s3 + $0x8] sm:$0xf] %vm224_vm1, %v255_v43  ;;  %v254_v46 = vpack.c.bf16 %v205_v44, %v205_v44  ;;  %v256_v47 = vpack.c.bf16 %v207_v45, %v207_v45 }
 0x10b   :  { %226 = vst.msk [vmem:[%s381_s3 + $0x4] sm:$0xf] %vm224_vm1, %v254_v46  ;;  %228 = vst.msk [vmem:[%s381_s3 + $0xc] sm:$0xf] %vm224_vm1, %v256_v47 }

// kernel: _lambda_.36
= control target key start
LH: loop header
LB: loop body
LE: loop exit
PB: predicated region body
PF: predicated region fallthrough
CT: control target
= control target key end

     0   :  { %vm19_vm0 = vcmask 261120   ;;  %v111_v0 = vmov 0.0   ;;  %vm112_vm1 = vmmov 0   ;;  %vm31_vm2 = vcmask 130048   ;;  %s147_s1 = inlined_call_operand.vmem [shape: bf16[16,32], index: 1, kind: input, shape index: {}]   ;;  %s148_s0 = inlined_call_operand.vmem [shape: bf16[8,16], index: 0, kind: input, shape index: {}]   ;;  %s149_s2 = inlined_call_operand.vmem [shape: f32[1,32], index: 2, kind: input, shape index: {}]   ;;  %s150_s3 = inlined_call_operand.vmem [shape: bf16[8,32], index: 3, kind: output, shape index: {}]  }
   0x1   :  { %20 = vst.msk [vmem:[#allocation2] sm:$0xff] %vm19_vm0, %v111_v0  ;;  %102 = vmatprep.subr.bf16.mxu0 %v111_v0  ;;  %v110_v1 = vld [vmem:[%s147_s1] sm:$0xff]   ;;  %104 = vmatprep.mubr.msk.bf16.mxu0 %vm112_vm1, %v111_v0  ;;  %vm91_vm3 = vcmask 257024  }
   0x2   :  { %103 = vmatpush3.bf16.msra.mxu0 %v110_v1  ;;  %v22_v2 = vld [vmem:[%s148_s0] sm:$0xf] }
   0x3   :  { %v99_v9 = vld [vmem:[%s149_s2] ss:$0 sm:$0xff] }
   0x5   :  { %105 = vmatmul.mubr.msk.bf16.vlgmr.msra.gmra.mrb[0].mxu0 %vm31_vm2, %v22_v2 }
   0x8   :  { %v21_v3 = vld [vmem:[#allocation2] sm:$0xff] }
  0xd8   :  { %v69_v4 = vpop.f32.mrb[0].mxu0 }
  0xd9   :  { %v75_v5 = vadd.f32 %v69_v4, %v21_v3  ;;  %v106_v6 = vpop.f32.mrb[1].mxu0 }
  0xda   :  { %v72_v7 = vpop.f32.mrb[2].mxu0 }
  0xdb   :  { %77 = vst.msk [vmem:[#allocation2] sm:$0xff] %vm19_vm0, %v75_v5  ;;  %v107_v8 = vpop.f32.mrb[3].mxu0 }
  0xe2   :  { %v81_v10 = vld [vmem:[#allocation2] sm:$0xff] }
  0xe3   :  { %v89_v11 = vadd.f32 %v99_v9, %v81_v10 }
  0xe5   :  { %v90_v12 = vpack.c.bf16 %v89_v11, %v89_v11 }
  0xe7   :  { %92 = vst.msk [vmem:[%s150_s3] sm:$0xf] %vm91_vm3, %v90_v12 }

// kernel: _lambda_.35
= control target key start
LH: loop header
LB: loop body
LE: loop exit
PB: predicated region body
PF: predicated region fallthrough
CT: control target
= control target key end

     0   :  { %vm19_vm0 = vcmask 261120   ;;  %v194_v0 = vmov 0   ;;  %v195_v2 = vmov 0.0   ;;  %vm101_vm1 = vcmask 130048   ;;  %s254_s1 = inlined_call_operand.vmem [shape: bf16[144,32], index: 1, kind: input, shape index: {}]   ;;  %s255_s0 = inlined_call_operand.vmem [shape: bf16[8,144], index: 0, kind: input, shape index: {}]   ;;  %s256_s2 = inlined_call_operand.vmem [shape: f32[1,32], index: 2, kind: input, shape index: {}]   ;;  %s257_s3 = inlined_call_operand.vmem [shape: bf16[8,32], index: 3, kind: output, shape index: {}]  }
   0x1   :  { %105 = vmatprep.subr.bf16.mxu0 %v194_v0  ;;  %v183_v1 = vld [vmem:[%s254_s1] sm:$0xff]   ;;  %20 = vst.msk [vmem:[#allocation2] sm:$0xff] %vm19_vm0, %v195_v2  ;;  %v184_v3 = vld [vmem:[%s254_s1 + $0x8] sm:$0xff]   ;;  %v185_v4 = vld [vmem:[%s254_s1 + $0x10] sm:$0xff]   ;;  %vm162_vm2 = vcmask 257024  }
   0x2   :  { %106 = vmatpush1.bf16.msra.mxu0 %v183_v1  ;;  %v22_v5 = vld [vmem:[%s255_s0] sm:$0xff]  ;;  %v186_v6 = vld [vmem:[%s254_s1 + $0x18] sm:$0xff]   ;;  %v188_v9 = vld [vmem:[%s254_s1 + $0x28] sm:$0xff]  }
   0x3   :  { %107 = vmatprep.subr.bf16.mxu0 %v194_v0  ;;  %v169_v7 = vcombine.high %v22_v5, %v22_v5  ;;  %v187_v8 = vld [vmem:[%s254_s1 + $0x20] sm:$0xff]   ;;  %v189_v10 = vld [vmem:[%s254_s1 + $0x30] sm:$0xff]   ;;  %v190_v11 = vld [vmem:[%s254_s1 + $0x38] sm:$0xff]   ;;  %v168_v13 = vcombine.low %v22_v5, %v22_v5 }
   0x4   :  { %v191_v12 = vld [vmem:[%s254_s1 + $0x40] sm:$0xff]  }
   0x5   :  { %179 = vmatprep.mubr.msk.bf16.mxu0 %vm101_vm1, %v169_v7  ;;  %v180_v20 = vld [vmem:[%s256_s2] ss:$0 sm:$0xff] }
   0x6   :  { %108 = vmatpush1.bf16.msra.mxu0 %v184_v3 }
   0x7   :  { %109 = vmatprep.subr.bf16.mxu0 %v194_v0 }
   0x8   :  { %v21_v14 = vld [vmem:[#allocation2] sm:$0xff] }
   0xa   :  { %110 = vmatpush1.bf16.msra.mxu0 %v185_v4 }
   0xb   :  { %111 = vmatprep.subr.bf16.mxu0 %v194_v0 }
   0xe   :  { %112 = vmatpush1.bf16.msra.mxu0 %v186_v6 }
   0xf   :  { %113 = vmatprep.subr.bf16.mxu0 %v194_v0 }
  0x12   :  { %114 = vmatpush1.bf16.msra.mxu0 %v187_v8 }
  0x13   :  { %115 = vmatprep.subr.bf16.mxu0 %v194_v0 }
  0x16   :  { %116 = vmatpush1.bf16.msra.mxu0 %v188_v9 }
  0x17   :  { %117 = vmatprep.subr.bf16.mxu0 %v194_v0 }
  0x1a   :  { %118 = vmatpush1.bf16.msra.mxu0 %v189_v10 }
  0x1b   :  { %119 = vmatprep.subr.bf16.mxu0 %v194_v0 }
  0x1e   :  { %120 = vmatpush1.bf16.msra.mxu0 %v190_v11 }
  0x1f   :  { %121 = vmatprep.subr.bf16.mxu0 %v194_v0 }
  0x22   :  { %122 = vmatpush1.bf16.msra.mxu0 %v191_v12 }
  0x25   :  { %138 = vmatmul.mubr.bf16.vlgmr.msra.gmra.mrb[0].mxu0 %v168_v13 }
  0xf8   :  { %v139_v15 = vpop.f32.mrb[0].mxu0 }
  0xf9   :  { %v145_v16 = vadd.f32 %v139_v15, %v21_v14  ;;  %v141_v17 = vpop.f32.mrb[1].mxu0 }
  0xfa   :  { %v142_v18 = vpop.f32.mrb[2].mxu0 }
  0xfb   :  { %147 = vst.msk [vmem:[#allocation2] sm:$0xff] %vm19_vm0, %v145_v16  ;;  %v143_v19 = vpop.f32.mrb[3].mxu0 }
 0x102   :  { %v151_v21 = vld [vmem:[#allocation2] sm:$0xff] }
 0x103   :  { %v159_v22 = vadd.f32 %v180_v20, %v151_v21 }
 0x105   :  { %v160_v23 = vmax.f32 %v159_v22, 0.0 }
 0x107   :  { %v161_v24 = vpack.c.bf16 %v160_v23, %v160_v23 }
 0x109   :  { %163 = vst.msk [vmem:[%s257_s3] sm:$0xf] %vm162_vm2, %v161_v24 }

// kernel: _lambda_.37
= control target key start
LH: loop header
LB: loop body
LE: loop exit
PB: predicated region body
PF: predicated region fallthrough
CT: control target
= control target key end

     0   :  { %s793_s15 = smov 0   ;;  %s795_s16 = smov 0   ;;  %s859_s0 = inlined_call_operand.vmem [shape: bf16[8,512], index: 0, kind: input, shape index: {}]   ;;  %s860_s1 = inlined_call_operand.vmem [shape: bf16[512,32], index: 1, kind: input, shape index: {}]   ;;  %s861_s2 = inlined_call_operand.vmem [shape: f32[1,32], index: 2, kind: input, shape index: {}]   ;;  %s862_s3 = inlined_call_operand.vmem [shape: bf16[8,32], index: 3, kind: input, shape index: {}]   ;;  %s863_s4 = inlined_call_operand.vmem [shape: bf16[8,32], index: 4, kind: output, shape index: {}]  }
   0x1   :  { %s797_s17 = smov 0  }
   0x2 LB: > { %s26_s18 = sadd.s32 1, %s761_s16  ;;  %p649_p0 = scmp.ge.s32.totalorder %s765_s17, 1  ;;  %s765_s17 = sphi %s797_s17, %s14_s17   ;;  %s761_s16 = sphi %s795_s16, %s865_s16   ;;  %s757_s15 = sphi %s793_s15, %s864_s15  }
   0x3   : > { %p27_p1 = scmp.ge.s32.totalorder %s26_s18, 2  ;;  %p228_p2 = scmp.lt.s32.totalorder %s765_s17, 3 }
   0x5   : > { %s867_s18 = smov (%p27_p1, %s26_s18), 0  ;;  %p229_p3 = pnand %p649_p0, %p228_p2 }
   0x6   : > { %s650_s19 = sshll.u32 (!%p229_p3), %s757_s15, 1  ;;  %s652_s20 = sshll.u32 (!%p229_p3), %s757_s15, 5 }
   0x7   : > { %232 = sbr.rel (%p229_p3) target bundleno = 291 (0x123), region = 36  ;;  %p281_p4 = scmp.lt.s32.totalorder (!%p229_p3), %s650_s19, 3 }
   0x8   : > { %p289_p5 = scmp.lt.s32.totalorder (!%p229_p3), %s652_s20, 63  ;;  %p654_p6 = scmp.ne.s32.totalorder (!%p229_p3), %s757_s15, 0 }
   0xe   : > { %s869_s19 = smov (!%p281_p4, %s650_s19), 3  ;;  %s871_s20 = smov (!%p289_p5, %s652_s20), 63 }
   0xf   : > { %s651_s21 = sshll.u32 %s869_s19, 2  ;;  %s653_s25 = sshll.u32 %s871_s20, 2  ;;  %vm319_vm0 = vcmask (!%p654_p6), 261120   ;;  %v767_v0 = vmov (!%p654_p6), 0.0  }
  0x10   : > { %s286_s24 = scalar_lea.vmem %s859_s0, %s651_s21  ;;  %s821_s28 = scalar_lea.vmem %s860_s1, %s653_s25  ;;  %320 = vst.msk [vmem:[#allocation2] sm:$0xff] (!%p654_p6), %vm319_vm0, %v767_v0 }
  0x11   : > { %318 = sbr.rel (%p654_p6) target bundleno = 24 (0x18), region = 40 }
  0x18 PF: > { %v725_v1 = vld [vmem:[%s821_s28 + $0x40] sm:$0xff]   ;;  %v727_v3 = vld [vmem:[%s821_s28 + $0x48] sm:$0xff]   ;;  %v729_v5 = vld [vmem:[%s821_s28 + $0x50] sm:$0xff]   ;;  %vm499_vm1 = vcmask 261120   ;;  %p673_p7 = scmp.ne.s32.totalorder %s757_s15, 1 }
  0x19   : > { %v726_v2 = vld [vmem:[%s821_s28] sm:$0xff]   ;;  %678 = vmatprep.subr.bf16.mxu0 %v725_v1  ;;  %v728_v4 = vld [vmem:[%s821_s28 + $0x8] sm:$0xff]   ;;  %v730_v6 = vld [vmem:[%s821_s28 + $0x10] sm:$0xff]   ;;  %vm519_vm2 = vcmask (!%p673_p7), 257024  }
  0x1a   : > { %679 = vmatpush3.bf16.msra.mxu0 %v726_v2  ;;  %v731_v7 = vld [vmem:[%s821_s28 + $0x58] sm:$0xff]   ;;  %v733_v9 = vld [vmem:[%s821_s28 + $0x60] sm:$0xff]   ;;  %v735_v11 = vld [vmem:[%s821_s28 + $0x68] sm:$0xff]  }
  0x1b   : > { %680 = vmatprep.subr.bf16.mxu0 %v727_v3  ;;  %v732_v8 = vld [vmem:[%s821_s28 + $0x18] sm:$0xff]   ;;  %v734_v10 = vld [vmem:[%s821_s28 + $0x20] sm:$0xff]   ;;  %v736_v14 = vld [vmem:[%s821_s28 + $0x28] sm:$0xff]  }
  0x1c   : > { %v322_v12 = vld [vmem:[%s286_s24] sm:$0xff]  ;;  %v737_v15 = vld [vmem:[%s821_s28 + $0x70] sm:$0xff]   ;;  %v739_v17 = vld [vmem:[%s821_s28 + $0x78] sm:$0xff]  }
  0x1d   : > { %v656_v13 = vcombine.high %v322_v12, %v322_v12  ;;  %v738_v16 = vld [vmem:[%s821_s28 + $0x30] sm:$0xff]   ;;  %v740_v18 = vld [vmem:[%s821_s28 + $0x38] sm:$0xff]   ;;  %v655_v19 = vcombine.low %v322_v12, %v322_v12  ;;  %v321_v21 = vld [vmem:[#allocation2] sm:$0xff] }
  0x1e   : > { %681 = vmatpush3.bf16.msra.mxu0 %v728_v4  ;;  %v674_v28 = vld [vmem:[%s861_s2] ss:$0 sm:$0xff] (!%p673_p7) }
  0x1f   : > { %682 = vmatprep.subr.bf16.mxu0 %v729_v5  ;;  %490 = vmatprep.mubr.bf16.mxu0 %v656_v13  ;;  %v514_v29 = vld [vmem:[%s862_s3] sm:$0xf] (!%p673_p7) }
  0x20   : > { %v515_v31 = vunpack.c.l.bf16 (!%p673_p7), %v514_v29 }
  0x22   : > { %683 = vmatpush3.bf16.msra.mxu0 %v730_v6 }
  0x23   : > { %684 = vmatprep.subr.bf16.mxu0 %v731_v7 }
  0x26   : > { %685 = vmatpush3.bf16.msra.mxu0 %v732_v8 }
  0x27   : > { %686 = vmatprep.subr.bf16.mxu0 %v733_v9 }
  0x2a   : > { %687 = vmatpush3.bf16.msra.mxu0 %v734_v10 }
  0x2b   : > { %688 = vmatprep.subr.bf16.mxu0 %v735_v11 }
  0x2e   : > { %689 = vmatpush3.bf16.msra.mxu0 %v736_v14 }
  0x2f   : > { %690 = vmatprep.subr.bf16.mxu0 %v737_v15 }
  0x32   : > { %691 = vmatpush3.bf16.msra.mxu0 %v738_v16 }
  0x33   : > { %692 = vmatprep.subr.bf16.mxu0 %v739_v17 }
  0x36   : > { %693 = vmatpush3.bf16.msra.mxu0 %v740_v18 }
  0x39   : > { %491 = vmatmul.mubr.bf16.vlgmr.msra.gmra.mrb[0].mxu0 %v655_v19 }
 0x10c   : > { %v694_v20 = vpop.f32.mrb[0].mxu0  ;;  %504 = sbr.rel (%p673_p7) target bundleno = 291 (0x123), region = 44 }
 0x10d   : > { %v695_v22 = vpop.f32.mrb[1].mxu0 }
 0x10e   : > { %v696_v23 = vadd.f32 %v695_v22, %v694_v20  ;;  %v697_v24 = vpop.f32.mrb[2].mxu0 }
 0x10f   : > { %v698_v25 = vpop.f32.mrb[3].mxu0 }
 0x110   : > { %v498_v26 = vadd.f32 %v696_v23, %v321_v21 }
 0x112   : > { %500 = vst.msk [vmem:[#allocation2] sm:$0xff] %vm499_vm1, %v498_v26 }
 0x119   : > { %v505_v27 = vld [vmem:[#allocation2] sm:$0xff] }
 0x11a   : > { %v513_v30 = vadd.f32 %v674_v28, %v505_v27 }
 0x11c   : > { %v516_v32 = vadd.f32 %v515_v31, %v513_v30 }
 0x11e   : > { %v517_v33 = vmax.f32 %v516_v32, 0.0 }
 0x120   : > { %v518_v34 = vpack.c.bf16 %v517_v33, %v517_v33 }
 0x122   : > { %520 = vst.msk [vmem:[%s863_s4] sm:$0xf] %vm519_vm2, %v518_v34 }
 0x123 PF: > { %s14_s17 = sadd.s32 1, %s765_s17   ;;  %s864_s15 = smov %s761_s16 }
 0x124   : > { %p11_p8 = scmp.ge.s32.totalorder %s14_s17, 4   ;;  %s865_s16 = smov %s867_s18 }
 0x126   :  { %13 = sbr.rel (!%p11_p8) target bundleno = 2 (0x2), region = 83 }

// kernel: _lambda_.38
= control target key start
LH: loop header
LB: loop body
LE: loop exit
PB: predicated region body
PF: predicated region fallthrough
CT: control target
= control target key end

     0   :  { %s711_s12 = smov 0   ;;  %s713_s13 = smov 0   ;;  %s774_s0 = inlined_call_operand.vmem [shape: bf16[8,512], index: 0, kind: input, shape index: {}]   ;;  %s775_s1 = inlined_call_operand.vmem [shape: bf16[512,32], index: 1, kind: input, shape index: {}]   ;;  %s776_s2 = inlined_call_operand.vmem [shape: f32[1,32], index: 2, kind: input, shape index: {}]   ;;  %s777_s3 = inlined_call_operand.vmem [shape: bf16[8,32], index: 3, kind: output, shape index: {}]  }
   0x1   :  { %s715_s14 = smov 0  }
   0x2 LB: > { %s25_s15 = sadd.s32 1, %s684_s13  ;;  %p572_p0 = scmp.ge.s32.totalorder %s688_s14, 1  ;;  %s688_s14 = sphi %s715_s14, %s13_s14   ;;  %s684_s13 = sphi %s713_s13, %s779_s13   ;;  %s680_s12 = sphi %s711_s12, %s778_s12  }
   0x3   : > { %p26_p1 = scmp.ge.s32.totalorder %s25_s15, 2  ;;  %p189_p2 = scmp.lt.s32.totalorder %s688_s14, 3 }
   0x5   : > { %s781_s15 = smov (%p26_p1, %s25_s15), 0  ;;  %p190_p3 = pnand %p572_p0, %p189_p2 }
   0x6   : > { %s573_s16 = sshll.u32 (!%p190_p3), %s680_s12, 1  ;;  %s575_s17 = sshll.u32 (!%p190_p3), %s680_s12, 5 }
   0x7   : > { %193 = sbr.rel (%p190_p3) target bundleno = 289 (0x121), region = 32  ;;  %p233_p4 = scmp.lt.s32.totalorder (!%p190_p3), %s573_s16, 3 }
   0x8   : > { %p241_p5 = scmp.lt.s32.totalorder (!%p190_p3), %s575_s17, 63  ;;  %p577_p6 = scmp.ne.s32.totalorder (!%p190_p3), %s680_s12, 0 }
   0xe   : > { %s783_s16 = smov (!%p233_p4, %s573_s16), 3  ;;  %s785_s17 = smov (!%p241_p5, %s575_s17), 63 }
   0xf   : > { %s574_s18 = sshll.u32 %s783_s16, 2  ;;  %s576_s22 = sshll.u32 %s785_s17, 2  ;;  %vm264_vm0 = vcmask (!%p577_p6), 261120   ;;  %v690_v0 = vmov (!%p577_p6), 0.0  }
  0x10   : > { %s238_s21 = scalar_lea.vmem %s774_s0, %s574_s18  ;;  %s739_s25 = scalar_lea.vmem %s775_s1, %s576_s22  ;;  %265 = vst.msk [vmem:[#allocation2] sm:$0xff] (!%p577_p6), %vm264_vm0, %v690_v0 }
  0x11   : > { %263 = sbr.rel (%p577_p6) target bundleno = 24 (0x18), region = 36 }
  0x18 PF: > { %v648_v1 = vld [vmem:[%s739_s25 + $0x40] sm:$0xff]   ;;  %v650_v3 = vld [vmem:[%s739_s25 + $0x48] sm:$0xff]   ;;  %v652_v5 = vld [vmem:[%s739_s25 + $0x50] sm:$0xff]   ;;  %vm444_vm1 = vcmask 261120   ;;  %p596_p7 = scmp.ne.s32.totalorder %s680_s12, 1 }
  0x19   : > { %v649_v2 = vld [vmem:[%s739_s25] sm:$0xff]   ;;  %601 = vmatprep.subr.bf16.mxu0 %v648_v1  ;;  %v651_v4 = vld [vmem:[%s739_s25 + $0x8] sm:$0xff]   ;;  %v653_v6 = vld [vmem:[%s739_s25 + $0x10] sm:$0xff]   ;;  %vm461_vm2 = vcmask (!%p596_p7), 257024  }
  0x1a   : > { %602 = vmatpush3.bf16.msra.mxu0 %v649_v2  ;;  %v654_v7 = vld [vmem:[%s739_s25 + $0x58] sm:$0xff]   ;;  %v656_v9 = vld [vmem:[%s739_s25 + $0x60] sm:$0xff]   ;;  %v658_v11 = vld [vmem:[%s739_s25 + $0x68] sm:$0xff]  }
  0x1b   : > { %603 = vmatprep.subr.bf16.mxu0 %v650_v3  ;;  %v655_v8 = vld [vmem:[%s739_s25 + $0x18] sm:$0xff]   ;;  %v657_v10 = vld [vmem:[%s739_s25 + $0x20] sm:$0xff]   ;;  %v659_v14 = vld [vmem:[%s739_s25 + $0x28] sm:$0xff]  }
  0x1c   : > { %v267_v12 = vld [vmem:[%s238_s21] sm:$0xff]  ;;  %v660_v15 = vld [vmem:[%s739_s25 + $0x70] sm:$0xff]   ;;  %v662_v17 = vld [vmem:[%s739_s25 + $0x78] sm:$0xff]  }
  0x1d   : > { %v579_v13 = vcombine.high %v267_v12, %v267_v12  ;;  %v661_v16 = vld [vmem:[%s739_s25 + $0x30] sm:$0xff]   ;;  %v663_v18 = vld [vmem:[%s739_s25 + $0x38] sm:$0xff]   ;;  %v578_v19 = vcombine.low %v267_v12, %v267_v12  ;;  %v266_v21 = vld [vmem:[#allocation2] sm:$0xff] }
  0x1e   : > { %604 = vmatpush3.bf16.msra.mxu0 %v651_v4  ;;  %v597_v28 = vld [vmem:[%s776_s2] ss:$0 sm:$0xff] (!%p596_p7) }
  0x1f   : > { %605 = vmatprep.subr.bf16.mxu0 %v652_v5  ;;  %435 = vmatprep.mubr.bf16.mxu0 %v579_v13 }
  0x22   : > { %606 = vmatpush3.bf16.msra.mxu0 %v653_v6 }
  0x23   : > { %607 = vmatprep.subr.bf16.mxu0 %v654_v7 }
  0x26   : > { %608 = vmatpush3.bf16.msra.mxu0 %v655_v8 }
  0x27   : > { %609 = vmatprep.subr.bf16.mxu0 %v656_v9 }
  0x2a   : > { %610 = vmatpush3.bf16.msra.mxu0 %v657_v10 }
  0x2b   : > { %611 = vmatprep.subr.bf16.mxu0 %v658_v11 }
  0x2e   : > { %612 = vmatpush3.bf16.msra.mxu0 %v659_v14 }
  0x2f   : > { %613 = vmatprep.subr.bf16.mxu0 %v660_v15 }
  0x32   : > { %614 = vmatpush3.bf16.msra.mxu0 %v661_v16 }
  0x33   : > { %615 = vmatprep.subr.bf16.mxu0 %v662_v17 }
  0x36   : > { %616 = vmatpush3.bf16.msra.mxu0 %v663_v18 }
  0x39   : > { %436 = vmatmul.mubr.bf16.vlgmr.msra.gmra.mrb[0].mxu0 %v578_v19 }
 0x10c   : > { %v617_v20 = vpop.f32.mrb[0].mxu0  ;;  %449 = sbr.rel (%p596_p7) target bundleno = 289 (0x121), region = 40 }
 0x10d   : > { %v618_v22 = vpop.f32.mrb[1].mxu0 }
 0x10e   : > { %v619_v23 = vadd.f32 %v618_v22, %v617_v20  ;;  %v620_v24 = vpop.f32.mrb[2].mxu0 }
 0x10f   : > { %v621_v25 = vpop.f32.mrb[3].mxu0 }
 0x110   : > { %v443_v26 = vadd.f32 %v619_v23, %v266_v21 }
 0x112   : > { %445 = vst.msk [vmem:[#allocation2] sm:$0xff] %vm444_vm1, %v443_v26 }
 0x119   : > { %v450_v27 = vld [vmem:[#allocation2] sm:$0xff] }
 0x11a   : > { %v458_v29 = vadd.f32 %v597_v28, %v450_v27 }
 0x11c   : > { %v459_v30 = vmax.f32 %v458_v29, 0.0 }
 0x11e   : > { %v460_v31 = vpack.c.bf16 %v459_v30, %v459_v30 }
 0x120   : > { %462 = vst.msk [vmem:[%s777_s3] sm:$0xf] %vm461_vm2, %v460_v31 }
 0x121 PF: > { %s13_s14 = sadd.s32 1, %s688_s14   ;;  %s778_s12 = smov %s684_s13 }
 0x122   : > { %p10_p8 = scmp.ge.s32.totalorder %s13_s14, 4   ;;  %s779_s13 = smov %s781_s15 }
 0x124   :  { %12 = sbr.rel (!%p10_p8) target bundleno = 2 (0x2), region = 76 }

// kernel: _lambda_.40
= control target key start
LH: loop header
LB: loop body
LE: loop exit
PB: predicated region body
PF: predicated region fallthrough
CT: control target
= control target key end

     0   :  { %s711_s12 = smov 0   ;;  %s713_s13 = smov 0   ;;  %s774_s0 = inlined_call_operand.vmem [shape: bf16[8,512], index: 0, kind: input, shape index: {}]   ;;  %s775_s1 = inlined_call_operand.vmem [shape: bf16[512,64], index: 1, kind: input, shape index: {}]   ;;  %s776_s2 = inlined_call_operand.vmem [shape: f32[1,64], index: 2, kind: input, shape index: {}]   ;;  %s777_s3 = inlined_call_operand.vmem [shape: bf16[8,64], index: 3, kind: output, shape index: {}]  }
   0x1   :  { %s715_s14 = smov 0  }
   0x2 LB: > { %s25_s15 = sadd.s32 1, %s684_s13  ;;  %p572_p0 = scmp.ge.s32.totalorder %s688_s14, 1  ;;  %s688_s14 = sphi %s715_s14, %s13_s14   ;;  %s684_s13 = sphi %s713_s13, %s779_s13   ;;  %s680_s12 = sphi %s711_s12, %s778_s12  }
   0x3   : > { %p26_p1 = scmp.ge.s32.totalorder %s25_s15, 2  ;;  %p189_p2 = scmp.lt.s32.totalorder %s688_s14, 3 }
   0x5   : > { %s781_s15 = smov (%p26_p1, %s25_s15), 0  ;;  %p190_p3 = pnand %p572_p0, %p189_p2 }
   0x6   : > { %s573_s16 = sshll.u32 (!%p190_p3), %s680_s12, 1  ;;  %s575_s17 = sshll.u32 (!%p190_p3), %s680_s12, 5 }
   0x7   : > { %193 = sbr.rel (%p190_p3) target bundleno = 289 (0x121), region = 32  ;;  %p233_p4 = scmp.lt.s32.totalorder (!%p190_p3), %s573_s16, 3 }
   0x8   : > { %p241_p5 = scmp.lt.s32.totalorder (!%p190_p3), %s575_s17, 63  ;;  %p577_p6 = scmp.ne.s32.totalorder (!%p190_p3), %s680_s12, 0 }
   0xe   : > { %s783_s16 = smov (!%p233_p4, %s573_s16), 3  ;;  %s785_s17 = smov (!%p241_p5, %s575_s17), 63 }
   0xf   : > { %s574_s18 = sshll.u32 %s783_s16, 2  ;;  %s576_s22 = sshll.u32 %s785_s17, 2  ;;  %vm264_vm0 = vcmask (!%p577_p6), 523264   ;;  %v690_v0 = vmov (!%p577_p6), 0.0  }
  0x10   : > { %s238_s21 = scalar_lea.vmem %s774_s0, %s574_s18  ;;  %s739_s25 = scalar_lea.vmem %s775_s1, %s576_s22  ;;  %265 = vst.msk [vmem:[#allocation2] sm:$0xff] (!%p577_p6), %vm264_vm0, %v690_v0 }
  0x11   : > { %263 = sbr.rel (%p577_p6) target bundleno = 24 (0x18), region = 36 }
  0x18 PF: > { %v648_v1 = vld [vmem:[%s739_s25 + $0x40] sm:$0xff]   ;;  %v650_v3 = vld [vmem:[%s739_s25 + $0x48] sm:$0xff]   ;;  %v652_v5 = vld [vmem:[%s739_s25 + $0x50] sm:$0xff]   ;;  %vm444_vm1 = vcmask 523264   ;;  %p596_p7 = scmp.ne.s32.totalorder %s680_s12, 1 }
  0x19   : > { %v649_v2 = vld [vmem:[%s739_s25] sm:$0xff]   ;;  %601 = vmatprep.subr.bf16.mxu0 %v648_v1  ;;  %v651_v4 = vld [vmem:[%s739_s25 + $0x8] sm:$0xff]   ;;  %v653_v6 = vld [vmem:[%s739_s25 + $0x10] sm:$0xff]   ;;  %vm461_vm2 = vcmask (!%p596_p7), 519168  }
  0x1a   : > { %602 = vmatpush3.bf16.msra.mxu0 %v649_v2  ;;  %v654_v7 = vld [vmem:[%s739_s25 + $0x58] sm:$0xff]   ;;  %v656_v9 = vld [vmem:[%s739_s25 + $0x60] sm:$0xff]   ;;  %v658_v11 = vld [vmem:[%s739_s25 + $0x68] sm:$0xff]  }
  0x1b   : > { %603 = vmatprep.subr.bf16.mxu0 %v650_v3  ;;  %v655_v8 = vld [vmem:[%s739_s25 + $0x18] sm:$0xff]   ;;  %v657_v10 = vld [vmem:[%s739_s25 + $0x20] sm:$0xff]   ;;  %v659_v14 = vld [vmem:[%s739_s25 + $0x28] sm:$0xff]  }
  0x1c   : > { %v267_v12 = vld [vmem:[%s238_s21] sm:$0xff]  ;;  %v660_v15 = vld [vmem:[%s739_s25 + $0x70] sm:$0xff]   ;;  %v662_v17 = vld [vmem:[%s739_s25 + $0x78] sm:$0xff]  }
  0x1d   : > { %v579_v13 = vcombine.high %v267_v12, %v267_v12  ;;  %v661_v16 = vld [vmem:[%s739_s25 + $0x30] sm:$0xff]   ;;  %v663_v18 = vld [vmem:[%s739_s25 + $0x38] sm:$0xff]   ;;  %v578_v19 = vcombine.low %v267_v12, %v267_v12  ;;  %v266_v21 = vld [vmem:[#allocation2] sm:$0xff] }
  0x1e   : > { %604 = vmatpush3.bf16.msra.mxu0 %v651_v4  ;;  %v597_v28 = vld [vmem:[%s776_s2] ss:$0 sm:$0xff] (!%p596_p7) }
  0x1f   : > { %605 = vmatprep.subr.bf16.mxu0 %v652_v5  ;;  %435 = vmatprep.mubr.bf16.mxu0 %v579_v13 }
  0x22   : > { %606 = vmatpush3.bf16.msra.mxu0 %v653_v6 }
  0x23   : > { %607 = vmatprep.subr.bf16.mxu0 %v654_v7 }
  0x26   : > { %608 = vmatpush3.bf16.msra.mxu0 %v655_v8 }
  0x27   : > { %609 = vmatprep.subr.bf16.mxu0 %v656_v9 }
  0x2a   : > { %610 = vmatpush3.bf16.msra.mxu0 %v657_v10 }
  0x2b   : > { %611 = vmatprep.subr.bf16.mxu0 %v658_v11 }
  0x2e   : > { %612 = vmatpush3.bf16.msra.mxu0 %v659_v14 }
  0x2f   : > { %613 = vmatprep.subr.bf16.mxu0 %v660_v15 }
  0x32   : > { %614 = vmatpush3.bf16.msra.mxu0 %v661_v16 }
  0x33   : > { %615 = vmatprep.subr.bf16.mxu0 %v662_v17 }
  0x36   : > { %616 = vmatpush3.bf16.msra.mxu0 %v663_v18 }
  0x39   : > { %436 = vmatmul.mubr.bf16.vlgmr.msra.gmra.mrb[0].mxu0 %v578_v19 }
 0x10c   : > { %v617_v20 = vpop.f32.mrb[0].mxu0  ;;  %449 = sbr.rel (%p596_p7) target bundleno = 289 (0x121), region = 40 }
 0x10d   : > { %v618_v22 = vpop.f32.mrb[1].mxu0 }
 0x10e   : > { %v619_v23 = vadd.f32 %v618_v22, %v617_v20  ;;  %v620_v24 = vpop.f32.mrb[2].mxu0 }
 0x10f   : > { %v621_v25 = vpop.f32.mrb[3].mxu0 }
 0x110   : > { %v443_v26 = vadd.f32 %v619_v23, %v266_v21 }
 0x112   : > { %445 = vst.msk [vmem:[#allocation2] sm:$0xff] %vm444_vm1, %v443_v26 }
 0x119   : > { %v450_v27 = vld [vmem:[#allocation2] sm:$0xff] }
 0x11a   : > { %v458_v29 = vadd.f32 %v597_v28, %v450_v27 }
 0x11c   : > { %v459_v30 = vmax.f32 %v458_v29, 0.0 }
 0x11e   : > { %v460_v31 = vpack.c.bf16 %v459_v30, %v459_v30 }
 0x120   : > { %462 = vst.msk [vmem:[%s777_s3] sm:$0xf] %vm461_vm2, %v460_v31 }
 0x121 PF: > { %s13_s14 = sadd.s32 1, %s688_s14   ;;  %s778_s12 = smov %s684_s13 }
 0x122   : > { %p10_p8 = scmp.ge.s32.totalorder %s13_s14, 4   ;;  %s779_s13 = smov %s781_s15 }
 0x124   :  { %12 = sbr.rel (!%p10_p8) target bundleno = 2 (0x2), region = 76 }

// kernel: _lambda_.41
= control target key start
LH: loop header
LB: loop body
LE: loop exit
PB: predicated region body
PF: predicated region fallthrough
CT: control target
= control target key end

     0   :  { %vm19_vm0 = vcmask 523264   ;;  %v124_v0 = vmov 0.0   ;;  %vm125_vm1 = vmmov 0   ;;  %vm39_vm2 = vcmask 261120   ;;  %s163_s1 = inlined_call_operand.vmem [shape: bf16[32,64], index: 1, kind: input, shape index: {}]   ;;  %s164_s0 = inlined_call_operand.vmem [shape: bf16[8,32], index: 0, kind: input, shape index: {}]   ;;  %s165_s2 = inlined_call_operand.vmem [shape: f32[1,64], index: 2, kind: input, shape index: {}]   ;;  %s166_s3 = inlined_call_operand.vmem [shape: bf16[8,64], index: 3, kind: output, shape index: {}]  }
   0x1   :  { %20 = vst.msk [vmem:[#allocation2] sm:$0xff] %vm19_vm0, %v124_v0  ;;  %112 = vmatprep.subr.bf16.mxu0 %v124_v0  ;;  %v122_v1 = vld [vmem:[%s163_s1] sm:$0xff]   ;;  %116 = vmatprep.mubr.msk.bf16.mxu0 %vm125_vm1, %v124_v0  ;;  %v123_v2 = vld [vmem:[%s163_s1 + $0x8] sm:$0xff]   ;;  %vm99_vm3 = vcmask 519168  }
   0x2   :  { %113 = vmatpush3.bf16.msra.mxu0 %v122_v1  ;;  %v22_v3 = vld [vmem:[%s164_s0] sm:$0xf] }
   0x3   :  { %114 = vmatprep.subr.bf16.mxu0 %v124_v0  ;;  %v108_v10 = vld [vmem:[%s165_s2] ss:$0 sm:$0xff] }
   0x6   :  { %115 = vmatpush3.bf16.msra.mxu0 %v123_v2 }
   0x8   :  { %v21_v4 = vld [vmem:[#allocation2] sm:$0xff] }
   0x9   :  { %117 = vmatmul.mubr.msk.bf16.vlgmr.msra.gmra.mrb[0].mxu0 %vm39_vm2, %v22_v3 }
  0xdc   :  { %v77_v5 = vpop.f32.mrb[0].mxu0 }
  0xdd   :  { %v83_v6 = vadd.f32 %v77_v5, %v21_v4  ;;  %v118_v7 = vpop.f32.mrb[1].mxu0 }
  0xde   :  { %v80_v8 = vpop.f32.mrb[2].mxu0 }
  0xdf   :  { %85 = vst.msk [vmem:[#allocation2] sm:$0xff] %vm19_vm0, %v83_v6  ;;  %v119_v9 = vpop.f32.mrb[3].mxu0 }
  0xe6   :  { %v89_v11 = vld [vmem:[#allocation2] sm:$0xff] }
  0xe7   :  { %v97_v12 = vadd.f32 %v108_v10, %v89_v11 }
  0xe9   :  { %v98_v13 = vpack.c.bf16 %v97_v12, %v97_v12 }
  0xeb   :  { %100 = vst.msk [vmem:[%s166_s3] sm:$0xf] %vm99_vm3, %v98_v13 }

// kernel: _lambda_.45
= control target key start
LH: loop header
LB: loop body
LE: loop exit
PB: predicated region body
PF: predicated region fallthrough
CT: control target
= control target key end

     0   :  { %10 = vsyncpa [#allocation3], 0  ;;  %v26_v3 = vlaneseq  ;;  %v252_v4 = vmov 0.0|0.0   ;;  %vm253_vm0 = vmmov 0   ;;  %v254_v7 = vmov 0.0   ;;  %s339_s0 = inlined_call_operand.vmem [shape: bf16[2,1,64], index: 0, kind: input, shape index: {}]   ;;  %s340_s1 = inlined_call_operand.vmem [shape: f32[64,10], index: 1, kind: input, shape index: {}]   ;;  %s341_s2 = inlined_call_operand.vmem [shape: f32[1,10], index: 2, kind: input, shape index: {}]   ;;  %s342_s3 = inlined_call_operand.hbm [shape: f32[2,64], index: 3, kind: output, shape index: {0}]   ;;  %s343_s4 = inlined_call_operand.hbm [shape: f32[2,10], index: 4, kind: output, shape index: {1}]  }
   0x1   :  { %v39_v0 = vld [vmem:[%s340_s1] sm:$0xff]  ;;  %v40_v1 = vld [vmem:[%s340_s1 + $0x8] sm:$0xff]  ;;  %v41_v2 = vld [vmem:[%s340_s1 + $0x10] sm:$0xff]  ;;  %187 = vmatprep.subr.bf16.mxu0 %v252_v4  ;;  %184 = vmatprep.mubr.msk.f32.mxu0 %vm253_vm0, %v254_v7 }
   0x2   :  { %v188_v5 = vpack.c.bf16 %v40_v1, %v39_v0  ;;  %v42_v6 = vld [vmem:[%s340_s1 + $0x18] sm:$0xff]  ;;  %v43_v9 = vld [vmem:[%s340_s1 + $0x20] sm:$0xff]  ;;  %v27_v10 = vshrl.u32 %v26_v3, 7 }
   0x3   :  { %v191_v8 = vpack.c.bf16 %v42_v6, %v41_v2 }
   0x4   :  { %189 = vmatpush3.bf16.msra.mxu0 %v188_v5 }
   0x5   :  { %11 = vsyncpa [#allocation5], 0  ;;  %190 = vmatprep.subr.bf16.mxu0 %v252_v4  ;;  %v44_v11 = vld [vmem:[%s340_s1 + $0x28] sm:$0xff]  ;;  %v18_v12 = vld [vmem:[%s339_s0] sm:$0x1]  ;;  %v28_v17 = vsub.s32 0, %v27_v10 }
   0x6   :  { %v19_v13 = vld [vmem:[%s339_s0 + $0x1] sm:$0x1]  ;;  %v194_v14 = vpack.c.bf16 %v44_v11, %v43_v9  ;;  %v20_v15 = vunpack.c.l.bf16 %v18_v12  ;;  %v45_v18 = vld [vmem:[%s340_s1 + $0x30] sm:$0xff]  ;;  %v46_v19 = vld [vmem:[%s340_s1 + $0x38] sm:$0xff]  ;;  %vm34_vm1 = vcmask 1041409   ;;  %vm54_vm2 = vcmask 523264  }
   0x7   :  { %v21_v16 = vunpack.c.l.bf16 %v19_v13  ;;  %v197_v20 = vpack.c.bf16 %v46_v19, %v45_v18  ;;  %vm37_vm3 = vcmask 517120   ;;  %s255_s0 = smov [#allocation2]  }
   0x8   :  { %192 = vmatpush3.bf16.msra.mxu0 %v191_v8  ;;  %v29_v21 = vrot.slane %v20_v15, %v28_v17  ;;  %s135_s9 = sshll.u32 %s255_s0, 4  ;;  %s136_s9 = int_to_ptr.vmem [resolvable:$true] %s135_s9 }
   0x9   :  { %193 = vmatprep.subr.bf16.mxu0 %v252_v4  ;;  %v33_v22 = vrot.slane %v21_v16, %v28_v17  ;;  %s204_s10 = scalar_lea.vmem %s136_s9, 32  ;;  %p209_p1 = scmp.lt.s32.totalorder %s136_s9, %s136_s9 }
   0xa   :  { %p205_p0 = scmp.ne.s32.totalorder %s136_s9, %s204_s10  ;;  %p210_p2 = scmp.lt.s32.totalorder %s204_s10, %s204_s10 }
   0xb   :  { %v35_v23 = vsel %vm34_vm1, %v33_v22, %v29_v21 }
   0xc   :  { %195 = vmatpush3.bf16.msra.mxu0 %v194_v14  ;;  %38 = vst.msk [vmem:[#allocation2] sm:$0x3] %vm37_vm3, %v35_v23  ;;  %p211_p3 = por %p210_p2, %p209_p1 }
   0xd   :  { %196 = vmatprep.subr.bf16.mxu0 %v252_v4 }
   0xe   :  { %p212_p4 = pnand %p211_p3, %p205_p0 }
  0x10   :  { %198 = vmatpush3.bf16.msra.mxu0 %v197_v20 }
  0x13   :  { %185 = vmatmul.mubr.msk.f32.vlgmr.msra.gmra.mrb[0].mxu0 %vm54_vm2, %v35_v23 }
  0x14   :  { %215 = shalt.err (!%p212_p4)
}
  0x15   :  { %s216_s12 = scalar_lea.hbm %s342_s3, 32 }
  0x16   :  { %p217_p5 = scmp.ne.s32.totalorder %s342_s3, %s216_s12  ;;  %p220_p6 = scmp.lt.u32.totalorder %s216_s12, %s342_s3 }
  0x18   :  { %p222_p7 = pnand %p220_p6, %p217_p5 }
  0x1a   :  { %225 = shalt.err (!%p222_p7)
}
  0x1b   :  { %138 = dma.vmem_to_hbm [thread:$0]  %s136_s9, 32, %s342_s3, [#allocation3]   ;;  %v157_v24 = vld [vmem:[%s341_s2] ss:$0 sm:$0xff]  ;;  %vm127_vm4 = vcmask 74752  }
  0x1c   :  { %s256_s21 = smov [#allocation4]  }
  0x1d   :  { %s145_s22 = sshll.u32 %s256_s21, 4  ;;  %s146_s22 = int_to_ptr.vmem [resolvable:$true] %s145_s22 }
  0x1e   :  { %s226_s23 = scalar_lea.vmem %s146_s22, 32  ;;  %p231_p9 = scmp.lt.s32.totalorder %s146_s22, %s146_s22 }
  0x1f   :  { %p227_p8 = scmp.ne.s32.totalorder %s146_s22, %s226_s23  ;;  %p232_p10 = scmp.lt.s32.totalorder %s226_s23, %s226_s23 }
  0x21   :  { %p233_p11 = por %p232_p10, %p231_p9 }
  0x23   :  { %p234_p12 = pnand %p233_p11, %p227_p8 }
  0xe6   :  { %v123_v25 = vpop.f32.mrb[0].mxu0 }
  0xe7   :  { %v124_v26 = vadd.f32 %v157_v24, %v123_v25  ;;  %v186_v27 = vpop.f32.mrb[1].mxu0 }
  0xe9   :  { %128 = vst.msk [vmem:[#allocation4] sm:$0x3] %vm127_vm4, %v124_v26 }
  0xea   :  { %237 = shalt.err (!%p234_p12)
}
  0xeb   :  { %s238_s25 = scalar_lea.hbm %s343_s4, 32 }
  0xec   :  { %p239_p13 = scmp.ne.s32.totalorder %s343_s4, %s238_s25  ;;  %p242_p0 = scmp.lt.u32.totalorder %s238_s25, %s343_s4 }
  0xee   :  { %p244_p1 = pnand %p242_p0, %p239_p13 }
  0xf0   :  { %247 = shalt.err (!%p244_p1)
}
  0xf1   :  { %148 = dma.vmem_to_hbm [thread:$0]  %s146_s22, 32, %s343_s4, [#allocation5]  }
  0xf2   :  { %248 = dma.done.wait [#allocation3], 32  }
  0xf3   :  { %249 = vsyncadd [#allocation3], 4294967264 }
  0xf4   :  { %250 = dma.done.wait [#allocation5], 32  }
  0xf5   :  { %251 = vsyncadd [#allocation5], 4294967264 }
  0xf6   :  { %155 = vsyncpa [#allocation3], 1 }
  0xf7   :  { %156 = vsyncpa [#allocation5], 1 }

// kernel: _lambda_.43
= control target key start
LH: loop header
LB: loop body
LE: loop exit
PB: predicated region body
PF: predicated region fallthrough
CT: control target
= control target key end

     0   :  { %s711_s12 = smov 0   ;;  %s713_s13 = smov 0   ;;  %s774_s0 = inlined_call_operand.vmem [shape: bf16[8,768], index: 0, kind: input, shape index: {}]   ;;  %s775_s1 = inlined_call_operand.vmem [shape: bf16[768,64], index: 1, kind: input, shape index: {}]   ;;  %s776_s2 = inlined_call_operand.vmem [shape: f32[1,64], index: 2, kind: input, shape index: {}]   ;;  %s777_s3 = inlined_call_operand.vmem [shape: bf16[8,64], index: 3, kind: output, shape index: {}]  }
   0x1   :  { %s715_s14 = smov 0  }
   0x2 LB: > { %s25_s15 = sadd.s32 1, %s684_s13  ;;  %p572_p0 = scmp.ge.s32.totalorder %s688_s14, 1  ;;  %s688_s14 = sphi %s715_s14, %s13_s14   ;;  %s684_s13 = sphi %s713_s13, %s779_s13   ;;  %s680_s12 = sphi %s711_s12, %s778_s12  }
   0x3   : > { %p26_p1 = scmp.ge.s32.totalorder %s25_s15, 3  ;;  %p189_p2 = scmp.lt.s32.totalorder %s688_s14, 4 }
   0x5   : > { %s781_s15 = smov (%p26_p1, %s25_s15), 0  ;;  %p190_p3 = pnand %p572_p0, %p189_p2 }
   0x6   : > { %s573_s16 = sshll.u32 (!%p190_p3), %s680_s12, 1  ;;  %s575_s17 = sshll.u32 (!%p190_p3), %s680_s12, 5 }
   0x7   : > { %193 = sbr.rel (%p190_p3) target bundleno = 289 (0x121), region = 32  ;;  %p233_p4 = scmp.lt.s32.totalorder (!%p190_p3), %s573_s16, 5 }
   0x8   : > { %p241_p5 = scmp.lt.s32.totalorder (!%p190_p3), %s575_s17, 95  ;;  %p577_p6 = scmp.ne.s32.totalorder (!%p190_p3), %s680_s12, 0 }
   0xe   : > { %s783_s16 = smov (!%p233_p4, %s573_s16), 5  ;;  %s785_s17 = smov (!%p241_p5, %s575_s17), 95 }
   0xf   : > { %s574_s18 = sshll.u32 %s783_s16, 2  ;;  %s576_s22 = sshll.u32 %s785_s17, 2  ;;  %vm264_vm0 = vcmask (!%p577_p6), 523264   ;;  %v690_v0 = vmov (!%p577_p6), 0.0  }
  0x10   : > { %s238_s21 = scalar_lea.vmem %s774_s0, %s574_s18  ;;  %s739_s25 = scalar_lea.vmem %s775_s1, %s576_s22  ;;  %265 = vst.msk [vmem:[#allocation2] sm:$0xff] (!%p577_p6), %vm264_vm0, %v690_v0 }
  0x11   : > { %263 = sbr.rel (%p577_p6) target bundleno = 24 (0x18), region = 36 }
  0x18 PF: > { %v648_v1 = vld [vmem:[%s739_s25 + $0x40] sm:$0xff]   ;;  %v650_v3 = vld [vmem:[%s739_s25 + $0x48] sm:$0xff]   ;;  %v652_v5 = vld [vmem:[%s739_s25 + $0x50] sm:$0xff]   ;;  %vm444_vm1 = vcmask 523264   ;;  %p596_p7 = scmp.ne.s32.totalorder %s680_s12, 2 }
  0x19   : > { %v649_v2 = vld [vmem:[%s739_s25] sm:$0xff]   ;;  %601 = vmatprep.subr.bf16.mxu0 %v648_v1  ;;  %v651_v4 = vld [vmem:[%s739_s25 + $0x8] sm:$0xff]   ;;  %v653_v6 = vld [vmem:[%s739_s25 + $0x10] sm:$0xff]   ;;  %vm461_vm2 = vcmask (!%p596_p7), 519168  }
  0x1a   : > { %602 = vmatpush3.bf16.msra.mxu0 %v649_v2  ;;  %v654_v7 = vld [vmem:[%s739_s25 + $0x58] sm:$0xff]   ;;  %v656_v9 = vld [vmem:[%s739_s25 + $0x60] sm:$0xff]   ;;  %v658_v11 = vld [vmem:[%s739_s25 + $0x68] sm:$0xff]  }
  0x1b   : > { %603 = vmatprep.subr.bf16.mxu0 %v650_v3  ;;  %v655_v8 = vld [vmem:[%s739_s25 + $0x18] sm:$0xff]   ;;  %v657_v10 = vld [vmem:[%s739_s25 + $0x20] sm:$0xff]   ;;  %v659_v14 = vld [vmem:[%s739_s25 + $0x28] sm:$0xff]  }
  0x1c   : > { %v267_v12 = vld [vmem:[%s238_s21] sm:$0xff]  ;;  %v660_v15 = vld [vmem:[%s739_s25 + $0x70] sm:$0xff]   ;;  %v662_v17 = vld [vmem:[%s739_s25 + $0x78] sm:$0xff]  }
  0x1d   : > { %v579_v13 = vcombine.high %v267_v12, %v267_v12  ;;  %v661_v16 = vld [vmem:[%s739_s25 + $0x30] sm:$0xff]   ;;  %v663_v18 = vld [vmem:[%s739_s25 + $0x38] sm:$0xff]   ;;  %v578_v19 = vcombine.low %v267_v12, %v267_v12  ;;  %v266_v21 = vld [vmem:[#allocation2] sm:$0xff] }
  0x1e   : > { %604 = vmatpush3.bf16.msra.mxu0 %v651_v4  ;;  %v597_v28 = vld [vmem:[%s776_s2] ss:$0 sm:$0xff] (!%p596_p7) }
  0x1f   : > { %605 = vmatprep.subr.bf16.mxu0 %v652_v5  ;;  %435 = vmatprep.mubr.bf16.mxu0 %v579_v13 }
  0x22   : > { %606 = vmatpush3.bf16.msra.mxu0 %v653_v6 }
  0x23   : > { %607 = vmatprep.subr.bf16.mxu0 %v654_v7 }
  0x26   : > { %608 = vmatpush3.bf16.msra.mxu0 %v655_v8 }
  0x27   : > { %609 = vmatprep.subr.bf16.mxu0 %v656_v9 }
  0x2a   : > { %610 = vmatpush3.bf16.msra.mxu0 %v657_v10 }
  0x2b   : > { %611 = vmatprep.subr.bf16.mxu0 %v658_v11 }
  0x2e   : > { %612 = vmatpush3.bf16.msra.mxu0 %v659_v14 }
  0x2f   : > { %613 = vmatprep.subr.bf16.mxu0 %v660_v15 }
  0x32   : > { %614 = vmatpush3.bf16.msra.mxu0 %v661_v16 }
  0x33   : > { %615 = vmatprep.subr.bf16.mxu0 %v662_v17 }
  0x36   : > { %616 = vmatpush3.bf16.msra.mxu0 %v663_v18 }
  0x39   : > { %436 = vmatmul.mubr.bf16.vlgmr.msra.gmra.mrb[0].mxu0 %v578_v19 }
 0x10c   : > { %v617_v20 = vpop.f32.mrb[0].mxu0  ;;  %449 = sbr.rel (%p596_p7) target bundleno = 289 (0x121), region = 40 }
 0x10d   : > { %v618_v22 = vpop.f32.mrb[1].mxu0 }
 0x10e   : > { %v619_v23 = vadd.f32 %v618_v22, %v617_v20  ;;  %v620_v24 = vpop.f32.mrb[2].mxu0 }
 0x10f   : > { %v621_v25 = vpop.f32.mrb[3].mxu0 }
 0x110   : > { %v443_v26 = vadd.f32 %v619_v23, %v266_v21 }
 0x112   : > { %445 = vst.msk [vmem:[#allocation2] sm:$0xff] %vm444_vm1, %v443_v26 }
 0x119   : > { %v450_v27 = vld [vmem:[#allocation2] sm:$0xff] }
 0x11a   : > { %v458_v29 = vadd.f32 %v597_v28, %v450_v27 }
 0x11c   : > { %v459_v30 = vmax.f32 %v458_v29, 0.0 }
 0x11e   : > { %v460_v31 = vpack.c.bf16 %v459_v30, %v459_v30 }
 0x120   : > { %462 = vst.msk [vmem:[%s777_s3] sm:$0xf] %vm461_vm2, %v460_v31 }
 0x121 PF: > { %s13_s14 = sadd.s32 1, %s688_s14   ;;  %s778_s12 = smov %s684_s13 }
 0x122   : > { %p10_p8 = scmp.ge.s32.totalorder %s13_s14, 5   ;;  %s779_s13 = smov %s781_s15 }
 0x124   :  { %12 = sbr.rel (!%p10_p8) target bundleno = 2 (0x2), region = 76 }

// kernel: _lambda_.42
= control target key start
LH: loop header
LB: loop body
LE: loop exit
PB: predicated region body
PF: predicated region fallthrough
CT: control target
= control target key end

     0   :  { %s793_s15 = smov 0   ;;  %s795_s16 = smov 0   ;;  %s859_s0 = inlined_call_operand.vmem [shape: bf16[8,768], index: 0, kind: input, shape index: {}]   ;;  %s860_s1 = inlined_call_operand.vmem [shape: bf16[768,64], index: 1, kind: input, shape index: {}]   ;;  %s861_s2 = inlined_call_operand.vmem [shape: f32[1,64], index: 2, kind: input, shape index: {}]   ;;  %s862_s3 = inlined_call_operand.vmem [shape: bf16[8,64], index: 3, kind: input, shape index: {}]   ;;  %s863_s4 = inlined_call_operand.vmem [shape: bf16[8,64], index: 4, kind: output, shape index: {}]  }
   0x1   :  { %s797_s17 = smov 0  }
   0x2 LB: > { %s26_s18 = sadd.s32 1, %s761_s16  ;;  %p649_p0 = scmp.ge.s32.totalorder %s765_s17, 1  ;;  %s765_s17 = sphi %s797_s17, %s14_s17   ;;  %s761_s16 = sphi %s795_s16, %s865_s16   ;;  %s757_s15 = sphi %s793_s15, %s864_s15  }
   0x3   : > { %p27_p1 = scmp.ge.s32.totalorder %s26_s18, 3  ;;  %p228_p2 = scmp.lt.s32.totalorder %s765_s17, 4 }
   0x5   : > { %s867_s18 = smov (%p27_p1, %s26_s18), 0  ;;  %p229_p3 = pnand %p649_p0, %p228_p2 }
   0x6   : > { %s650_s19 = sshll.u32 (!%p229_p3), %s757_s15, 1  ;;  %s652_s20 = sshll.u32 (!%p229_p3), %s757_s15, 5 }
   0x7   : > { %232 = sbr.rel (%p229_p3) target bundleno = 291 (0x123), region = 36  ;;  %p281_p4 = scmp.lt.s32.totalorder (!%p229_p3), %s650_s19, 5 }
   0x8   : > { %p289_p5 = scmp.lt.s32.totalorder (!%p229_p3), %s652_s20, 95  ;;  %p654_p6 = scmp.ne.s32.totalorder (!%p229_p3), %s757_s15, 0 }
   0xe   : > { %s869_s19 = smov (!%p281_p4, %s650_s19), 5  ;;  %s871_s20 = smov (!%p289_p5, %s652_s20), 95 }
   0xf   : > { %s651_s21 = sshll.u32 %s869_s19, 2  ;;  %s653_s25 = sshll.u32 %s871_s20, 2  ;;  %vm319_vm0 = vcmask (!%p654_p6), 523264   ;;  %v767_v0 = vmov (!%p654_p6), 0.0  }
  0x10   : > { %s286_s24 = scalar_lea.vmem %s859_s0, %s651_s21  ;;  %s821_s28 = scalar_lea.vmem %s860_s1, %s653_s25  ;;  %320 = vst.msk [vmem:[#allocation2] sm:$0xff] (!%p654_p6), %vm319_vm0, %v767_v0 }
  0x11   : > { %318 = sbr.rel (%p654_p6) target bundleno = 24 (0x18), region = 40 }
  0x18 PF: > { %v725_v1 = vld [vmem:[%s821_s28 + $0x40] sm:$0xff]   ;;  %v727_v3 = vld [vmem:[%s821_s28 + $0x48] sm:$0xff]   ;;  %v729_v5 = vld [vmem:[%s821_s28 + $0x50] sm:$0xff]   ;;  %vm499_vm1 = vcmask 523264   ;;  %p673_p7 = scmp.ne.s32.totalorder %s757_s15, 2 }
  0x19   : > { %v726_v2 = vld [vmem:[%s821_s28] sm:$0xff]   ;;  %678 = vmatprep.subr.bf16.mxu0 %v725_v1  ;;  %v728_v4 = vld [vmem:[%s821_s28 + $0x8] sm:$0xff]   ;;  %v730_v6 = vld [vmem:[%s821_s28 + $0x10] sm:$0xff]   ;;  %vm519_vm2 = vcmask (!%p673_p7), 519168  }
  0x1a   : > { %679 = vmatpush3.bf16.msra.mxu0 %v726_v2  ;;  %v731_v7 = vld [vmem:[%s821_s28 + $0x58] sm:$0xff]   ;;  %v733_v9 = vld [vmem:[%s821_s28 + $0x60] sm:$0xff]   ;;  %v735_v11 = vld [vmem:[%s821_s28 + $0x68] sm:$0xff]  }
  0x1b   : > { %680 = vmatprep.subr.bf16.mxu0 %v727_v3  ;;  %v732_v8 = vld [vmem:[%s821_s28 + $0x18] sm:$0xff]   ;;  %v734_v10 = vld [vmem:[%s821_s28 + $0x20] sm:$0xff]   ;;  %v736_v14 = vld [vmem:[%s821_s28 + $0x28] sm:$0xff]  }
  0x1c   : > { %v322_v12 = vld [vmem:[%s286_s24] sm:$0xff]  ;;  %v737_v15 = vld [vmem:[%s821_s28 + $0x70] sm:$0xff]   ;;  %v739_v17 = vld [vmem:[%s821_s28 + $0x78] sm:$0xff]  }
  0x1d   : > { %v656_v13 = vcombine.high %v322_v12, %v322_v12  ;;  %v738_v16 = vld [vmem:[%s821_s28 + $0x30] sm:$0xff]   ;;  %v740_v18 = vld [vmem:[%s821_s28 + $0x38] sm:$0xff]   ;;  %v655_v19 = vcombine.low %v322_v12, %v322_v12  ;;  %v321_v21 = vld [vmem:[#allocation2] sm:$0xff] }
  0x1e   : > { %681 = vmatpush3.bf16.msra.mxu0 %v728_v4  ;;  %v674_v28 = vld [vmem:[%s861_s2] ss:$0 sm:$0xff] (!%p673_p7) }
  0x1f   : > { %682 = vmatprep.subr.bf16.mxu0 %v729_v5  ;;  %490 = vmatprep.mubr.bf16.mxu0 %v656_v13  ;;  %v514_v29 = vld [vmem:[%s862_s3] sm:$0xf] (!%p673_p7) }
  0x20   : > { %v515_v31 = vunpack.c.l.bf16 (!%p673_p7), %v514_v29 }
  0x22   : > { %683 = vmatpush3.bf16.msra.mxu0 %v730_v6 }
  0x23   : > { %684 = vmatprep.subr.bf16.mxu0 %v731_v7 }
  0x26   : > { %685 = vmatpush3.bf16.msra.mxu0 %v732_v8 }
  0x27   : > { %686 = vmatprep.subr.bf16.mxu0 %v733_v9 }
  0x2a   : > { %687 = vmatpush3.bf16.msra.mxu0 %v734_v10 }
  0x2b   : > { %688 = vmatprep.subr.bf16.mxu0 %v735_v11 }
  0x2e   : > { %689 = vmatpush3.bf16.msra.mxu0 %v736_v14 }
  0x2f   : > { %690 = vmatprep.subr.bf16.mxu0 %v737_v15 }
  0x32   : > { %691 = vmatpush3.bf16.msra.mxu0 %v738_v16 }
  0x33   : > { %692 = vmatprep.subr.bf16.mxu0 %v739_v17 }
  0x36   : > { %693 = vmatpush3.bf16.msra.mxu0 %v740_v18 }
  0x39   : > { %491 = vmatmul.mubr.bf16.vlgmr.msra.gmra.mrb[0].mxu0 %v655_v19 }
 0x10c   : > { %v694_v20 = vpop.f32.mrb[0].mxu0  ;;  %504 = sbr.rel (%p673_p7) target bundleno = 291 (0x123), region = 44 }
 0x10d   : > { %v695_v22 = vpop.f32.mrb[1].mxu0 }
 0x10e   : > { %v696_v23 = vadd.f32 %v695_v22, %v694_v20  ;;  %v697_v24 = vpop.f32.mrb[2].mxu0 }
 0x10f   : > { %v698_v25 = vpop.f32.mrb[3].mxu0 }
 0x110   : > { %v498_v26 = vadd.f32 %v696_v23, %v321_v21 }
 0x112   : > { %500 = vst.msk [vmem:[#allocation2] sm:$0xff] %vm499_vm1, %v498_v26 }
 0x119   : > { %v505_v27 = vld [vmem:[#allocation2] sm:$0xff] }
 0x11a   : > { %v513_v30 = vadd.f32 %v674_v28, %v505_v27 }
 0x11c   : > { %v516_v32 = vadd.f32 %v515_v31, %v513_v30 }
 0x11e   : > { %v517_v33 = vmax.f32 %v516_v32, 0.0 }
 0x120   : > { %v518_v34 = vpack.c.bf16 %v517_v33, %v517_v33 }
 0x122   : > { %520 = vst.msk [vmem:[%s863_s4] sm:$0xf] %vm519_vm2, %v518_v34 }
 0x123 PF: > { %s14_s17 = sadd.s32 1, %s765_s17   ;;  %s864_s15 = smov %s761_s16 }
 0x124   : > { %p11_p8 = scmp.ge.s32.totalorder %s14_s17, 5   ;;  %s865_s16 = smov %s867_s18 }
 0x126   :  { %13 = sbr.rel (!%p11_p8) target bundleno = 2 (0x2), region = 83 }

</bundles_post_ra>
